<compile_context>
chip_gen: v7x
topology: tpu7x:2x2x1
jax: 0.10.0
libtpu: 0.0.40
codegen_flags: <defaults>
</compile_context>

<pallas_src>
import functools

import jax
import jax.numpy as jnp
from jax.experimental import pallas as pl
from jax.experimental.pallas import tpu as pltpu

BN_EPS = 1e-5                       # PyTorch BatchNorm2d default eps
_FUSED_VMEM_BUDGET = 24 * (1 << 20)  # conservative: fits v5e/v6e/v7x scoped VMEM
_DEFAULT_TM = 512                   # M tile for the scalable path


def _round_up(x, m):
    return (x + m - 1) // m * m


def _default_tn():
    """256-wide N tiles for v6e/v7x MXU (2x256^2); 128 for v5e (4x128^2)."""
    try:
        kind = jax.devices()[0].device_kind.lower()
    except Exception:
        return 128
    if "v5 lite" in kind or "v5e" in kind or "v4" in kind or "v3" in kind or "v2" in kind:
        return 128
    return 256


def _compiler_params(sem, needed_bytes):
    # Explicit scoped-VMEM budget (v7x only has 64 MiB total per TC).
    limit = int(min(max(needed_bytes * 5 // 4 + (2 << 20), 16 << 20), 64 << 20))
    return pltpu.CompilerParams(dimension_semantics=sem, vmem_limit_bytes=limit)


# --------------------------------------------------------------------------
# Kernel 1a (fused path): Conv(im2col matmul, bf16) + bias + ReLU + BN.
# Grid tiles only the output-channel axis; every block sees all M rows, so the
# per-channel batch statistics are computed in a single pass inside the block.
# --------------------------------------------------------------------------
def _conv_relu_bn_fused_kernel(a_ref, w_ref, b_ref, g_ref, beta_ref, o_ref,
                               *, m_true, m_pad):
    acc = jnp.dot(a_ref[...], w_ref[...], preferred_element_type=jnp.float32)
    act = jnp.maximum(acc + b_ref[...], 0.0)                 # Conv + bias + ReLU (f32)
    if m_pad > m_true:                                       # mask padded rows out of stats
        row = jax.lax.broadcasted_iota(jnp.int32, (m_pad, 1), 0)
        act_m = jnp.where(row < m_true, act, 0.0)
    else:
        act_m = act
    inv_n = jnp.float32(1.0 / m_true)
    s1 = jnp.sum(act_m, axis=0, keepdims=True)               # single-pass stats
    s2 = jnp.sum(act_m * act, axis=0, keepdims=True)
    mean = s1 * inv_n
    var = jnp.maximum(s2 * inv_n - mean * mean, 0.0)         # biased var, like PyTorch
    scale = g_ref[...] * jax.lax.rsqrt(var + BN_EPS)
    o_ref[...] = (act - mean) * scale + beta_ref[...]


# --------------------------------------------------------------------------
# Kernel 1b/1c (M-tiled path for large M): matmul + bias + ReLU, accumulating
# per-channel sum / sum-of-squares across M tiles; then a normalize kernel.
# --------------------------------------------------------------------------
def _conv_stats_kernel(a_ref, w_ref, b_ref, act_ref, s1_ref, s2_ref, *, m_true, tm):
    i = pl.program_id(1)                                     # M axis (arbitrary, last)

    @pl.when(i == 0)
    def _():
        s1_ref[...] = jnp.zeros_like(s1_ref)
        s2_ref[...] = jnp.zeros_like(s2_ref)

    acc = jnp.dot(a_ref[...], w_ref[...], preferred_element_type=jnp.float32)
    act = jnp.maximum(acc + b_ref[...], 0.0)
    row = jax.lax.broadcasted_iota(jnp.int32, (tm, 1), 0) + i * tm
    act_m = jnp.where(row < m_true, act, 0.0)                # padded rows excluded
    s1_ref[...] += jnp.sum(act_m, axis=0, keepdims=True)
    s2_ref[...] += jnp.sum(act_m * act, axis=0, keepdims=True)
    act_ref[...] = act


def _bn_apply_kernel(act_ref, s1_ref, s2_ref, g_ref, beta_ref, o_ref, *, m_true):
    inv_n = jnp.float32(1.0 / m_true)
    mean = s1_ref[...] * inv_n
    var = jnp.maximum(s2_ref[...] * inv_n - mean * mean, 0.0)
    scale = g_ref[...] * jax.lax.rsqrt(var + BN_EPS)
    o_ref[...] = (act_ref[...] - mean) * scale + beta_ref[...]


def conv_relu_bn(patches, w_mat, bias, gamma, beta, *, tn=None,
                 force_tiled=False, tile_m=None):
    """patches: [M, K]; w_mat: [K, Cout]; bias/gamma/beta: [Cout]. Returns [M, Cout] f32."""
    M, K = patches.shape
    Cout = w_mat.shape[1]

    if tn is None:
        tn = _default_tn()
    if Cout % 128 == 0:
        tn = min(tn, max(128, Cout // 2))   # keep >= 2 channel tiles (v7x megacore)
        while Cout % tn:
            tn //= 2
    else:
        tn = Cout                            # full-extent channel block

    Kp = _round_up(K, 128)
    w = w_mat.astype(jnp.bfloat16)
    if Kp != K:
        w = jnp.pad(w, ((0, Kp - K), (0, 0)))
    b = bias.reshape(1, Cout).astype(jnp.float32)
    g = gamma.reshape(1, Cout).astype(jnp.float32)
    bt = beta.reshape(1, Cout).astype(jnp.float32)
    a = patches.astype(jnp.bfloat16)

    # ---------------- fused single-kernel path (A fully resident) -------------
    Mp_fused = _round_up(M, 8)
    fused_bytes = (2 * Mp_fused * Kp * 2      # A (bf16)
                   + 2 * Kp * tn * 2          # W tile, double-buffered
                   + 3 * Mp_fused * tn * 4    # out tile (x2 buffers) + act temp
                   + 8 * tn * 4)
    if (not force_tiled) and fused_bytes <= _FUSED_VMEM_BUDGET:
        if Mp_fused != M or Kp != K:
            a = jnp.pad(a, ((0, Mp_fused - M), (0, Kp - K)))
        kern = functools.partial(_conv_relu_bn_fused_kernel, m_true=M, m_pad=Mp_fused)
        out = pl.pallas_call(
            kern,
            out_shape=jax.ShapeDtypeStruct((Mp_fused, Cout), jnp.float32),
            grid=(Cout // tn,),
            in_specs=[
                pl.BlockSpec((Mp_fused, Kp), lambda j: (0, 0)),   # full patch matrix
                pl.BlockSpec((Kp, tn), lambda j: (0, j)),         # weight channel slice
                pl.BlockSpec((1, tn), lambda j: (0, j)),          # conv bias
                pl.BlockSpec((1, tn), lambda j: (0, j)),          # BN gamma
                pl.BlockSpec((1, tn), lambda j: (0, j)),          # BN beta
            ],
            out_specs=pl.BlockSpec((Mp_fused, tn), lambda j: (0, j)),
            compiler_params=_compiler_params(("parallel",), fused_bytes),
        )(a, w, b, g, bt)
        return out[:M]

    # ---------------- M-tiled two-pass-BN path (scales to large M) ------------
    tm = tile_m if tile_m is not None else _DEFAULT_TM
    tm = max(8, _round_up(min(tm, _round_up(M, 8)), 8))
    Mp = _round_up(M, tm)
    if Mp != M or Kp != K:
        a = jnp.pad(a, ((0, Mp - M), (0, Kp - K)))

    stats_bytes = (2 * tm * Kp * 2 + 2 * Kp * tn * 2 + 2 * tm * tn * 4
                   + tm * tn * 4 + 8 * tn * 4)
    kern_a = functools.partial(_conv_stats_kernel, m_true=M, tm=tm)
    act, s1, s2 = pl.pallas_call(
        kern_a,
        out_shape=(jax.ShapeDtypeStruct((Mp, Cout), jnp.float32),
                   jax.ShapeDtypeStruct((1, Cout), jnp.float32),
                   jax.ShapeDtypeStruct((1, Cout), jnp.float32)),
        grid=(Cout // tn, Mp // tm),
        in_specs=[
            pl.BlockSpec((tm, Kp), lambda j, i: (i, 0)),
            pl.BlockSpec((Kp, tn), lambda j, i: (0, j)),
            pl.BlockSpec((1, tn), lambda j, i: (0, j)),
        ],
        out_specs=(
            pl.BlockSpec((tm, tn), lambda j, i: (i, j)),
            pl.BlockSpec((1, tn), lambda j, i: (0, j)),   # resident accumulators
            pl.BlockSpec((1, tn), lambda j, i: (0, j)),   # across the M axis
        ),
        compiler_params=_compiler_params(("parallel", "arbitrary"), stats_bytes),
    )(a, w, b)

    bn_bytes = 2 * (2 * tm * tn * 4) + 16 * tn * 4
    kern_b = functools.partial(_bn_apply_kernel, m_true=M)
    out = pl.pallas_call(
        kern_b,
        out_shape=jax.ShapeDtypeStruct((Mp, Cout), jnp.float32),
        grid=(Cout // tn, Mp // tm),
        in_specs=[
            pl.BlockSpec((tm, tn), lambda j, i: (i, j)),
            pl.BlockSpec((1, tn), lambda j, i: (0, j)),
            pl.BlockSpec((1, tn), lambda j, i: (0, j)),
            pl.BlockSpec((1, tn), lambda j, i: (0, j)),
            pl.BlockSpec((1, tn), lambda j, i: (0, j)),
        ],
        out_specs=pl.BlockSpec((tm, tn), lambda j, i: (i, j)),
        compiler_params=_compiler_params(("parallel", "parallel"), bn_bytes),
    )(act, s1, s2, g, bt)
    return out[:M]


# --------------------------------------------------------------------------
# Kernel 2: fused AdaptiveAvgPool2d((1,1)) + Flatten + Linear (output padded
# to 128 lanes for unmasked stores; sliced back to num_class outside).
# --------------------------------------------------------------------------
def _pool_linear_kernel(x_ref, w_ref, b_ref, o_ref):
    pooled = jnp.mean(x_ref[...], axis=1)                    # global average pool (f32)
    o_ref[...] = jnp.dot(pooled.astype(jnp.bfloat16), w_ref[...],
                         preferred_element_type=jnp.float32) + b_ref[...]


def pool_linear(x_nsc, fc_w, fc_b):
    """x_nsc: [N, S, C] f32; fc_w: [num_class, C] (PyTorch layout); fc_b: [num_class]."""
    N, S, C = x_nsc.shape
    num_class = fc_w.shape[0]
    ncp = _round_up(num_class, 128)
    w = jnp.zeros((C, ncp), jnp.bfloat16).at[:, :num_class].set(
        jnp.transpose(fc_w).astype(jnp.bfloat16))
    b = jnp.zeros((1, ncp), jnp.float32).at[:, :num_class].set(
        fc_b.astype(jnp.float32)[None, :])
    out = pl.pallas_call(
        _pool_linear_kernel,
        out_shape=jax.ShapeDtypeStruct((N, ncp), jnp.float32),
        grid=(1,),
        in_specs=[
            pl.BlockSpec((N, S, C), lambda i: (0, 0, 0)),
            pl.BlockSpec((C, ncp), lambda i: (0, 0)),
            pl.BlockSpec((1, ncp), lambda i: (0, 0)),
        ],
        out_specs=pl.BlockSpec((N, ncp), lambda i: (0, 0)),
        compiler_params=pltpu.CompilerParams(dimension_semantics=("arbitrary",)),
    )(x_nsc, w, b)
    return out[:, :num_class]


# --------------------------------------------------------------------------
# Glue (plain JAX): im2col patch extraction and weight reshaping
# --------------------------------------------------------------------------
def im2col(x_nhwc, kh, kw, stride):
    N, H, W, C = x_nhwc.shape
    Ho = (H - kh) // stride + 1
    Wo = (W - kw) // stride + 1
    cols = []
    for i in range(kh):
        for j in range(kw):
            cols.append(x_nhwc[:, i:i + stride * Ho:stride,
                               j:j + stride * Wo:stride, :])          # [N, Ho, Wo, C]
    patches = jnp.stack(cols, axis=3)                                 # [N, Ho, Wo, kh*kw, C]
    return patches.reshape(N * Ho * Wo, kh * kw * C), Ho, Wo


def conv_w_to_mat(w_oihw):
    # PyTorch [Cout, Cin, kh, kw] -> [kh*kw*Cin, Cout]; matches im2col (i, j, cin) order
    return jnp.transpose(w_oihw, (2, 3, 1, 0)).reshape(-1, w_oihw.shape[0])


def init_params(key, num_class=100):
    ks = jax.random.split(key, 8)

    def nrm(k, shape, scale):
        return scale * jax.random.normal(k, shape, dtype=jnp.float32)

    p = {}
    p["c1_w"] = nrm(ks[0], (256, 3, 4, 4), 0.08)          # Conv2d(3, 256, k=4, s=2)
    p["c1_b"] = nrm(ks[1], (256,), 0.02)
    p["c2_w"] = nrm(ks[2], (512, 256, 3, 3), 0.02)        # Conv2d(256, 512, k=3, s=1)
    p["c2_b"] = nrm(ks[3], (512,), 0.02)
    p["c3_w"] = nrm(ks[4], (1024, 512, 3, 3), 0.015)      # Conv2d(512, 1024, k=3, s=1)
    p["c3_b"] = nrm(ks[5], (1024,), 0.02)
    for i, c in zip((1, 2, 3), (256, 512, 1024)):         # BatchNorm2d default init
        p[f"bn{i}_g"] = jnp.ones((c,), jnp.float32)
        p[f"bn{i}_b"] = jnp.zeros((c,), jnp.float32)
    p["fc_w"] = nrm(ks[6], (num_class, 1024), 0.03)       # Linear(1024, num_class)
    p["fc_b"] = nrm(ks[7], (num_class,), 0.02)
    return p


@functools.partial(jax.jit, static_argnames=("force_tiled", "tile_m"))
def cnn_bn_forward(x_nchw, params, *, force_tiled=False, tile_m=None):
    # BatchNorm is evaluated in training mode (module default right after
    # construction): batch statistics, biased variance, eps=1e-5.
    x = jnp.transpose(x_nchw, (0, 2, 3, 1)).astype(jnp.float32)       # NCHW -> NHWC
    N = x.shape[0]

    for conv_name, bn_name, k, s in (("c1", "bn1", 4, 2),
                                     ("c2", "bn2", 3, 1),
                                     ("c3", "bn3", 3, 1)):
        # im2col matrix built in bf16 (half the duplicated HBM bytes); further
        # improvement (deferred): in-kernel shifted matmuls over NHWC to avoid
        # the kh*kw duplication entirely.
        patches, Ho, Wo = im2col(x.astype(jnp.bfloat16), k, k, s)
        w_mat = conv_w_to_mat(params[f"{conv_name}_w"])
        y = conv_relu_bn(patches, w_mat,
                         params[f"{conv_name}_b"],
                         params[f"{bn_name}_g"],
                         params[f"{bn_name}_b"],
                         force_tiled=force_tiled, tile_m=tile_m)
        x = y.reshape(N, Ho, Wo, w_mat.shape[1])

    x_nsc = x.reshape(N, x.shape[1] * x.shape[2], x.shape[3])         # [N, Ho*Wo, 1024]
    return pool_linear(x_nsc, params["fc_w"], params["fc_b"])


if __name__ == "__main__":
    key = jax.random.PRNGKey(0)
    k_x, k_p = jax.random.split(key)
    # Small CIFAR-like input, NCHW like the PyTorch module expects.
    x = jax.random.normal(k_x, (2, 3, 16, 16), dtype=jnp.float32)
    params = init_params(k_p, num_class=100)

    out = jax.block_until_ready(cnn_bn_forward(x, params))
    assert out.shape == (2, 100), out.shape
    assert bool(jnp.all(jnp.isfinite(out)))

    # Also exercise the scalable M-tiled two-pass-BN path (small tile_m forces
    # several M tiles) and check it agrees with the fused path.
    out_tiled = jax.block_until_ready(
        cnn_bn_forward(x, params, force_tiled=True, tile_m=16))
    assert out_tiled.shape == (2, 100), out_tiled.shape
    assert bool(jnp.all(jnp.isfinite(out_tiled)))
    max_diff = float(jnp.max(jnp.abs(out_tiled - out)))
    assert max_diff < 1e-2, max_diff

    print("KERNEL_OK")
</pallas_src>

<mosaic_0001>
module attributes {stable_mosaic.version = 11 : i64} {
  func.func @_conv_relu_bn_fused_kernel(%arg0: i32, %arg1: memref<104x128xbf16, #tpu.memory_space<vmem>>, %arg2: memref<128x128xbf16, #tpu.memory_space<vmem>>, %arg3: memref<1x128xf32, #tpu.memory_space<vmem>>, %arg4: memref<1x128xf32, #tpu.memory_space<vmem>>, %arg5: memref<1x128xf32, #tpu.memory_space<vmem>>, %arg6: memref<104x128xf32, #tpu.memory_space<vmem>>) attributes {dimension_semantics = [#tpu.dimension_semantics<parallel>], iteration_bounds = array<i64: 2>, scalar_prefetch = 0 : i64, scratch_operands = 0 : i64, tpu.core_type = #tpu.core_type<tc>, window_params = [{pipeline_mode = #tpu.pipeline_mode<synchronous>, transform_indices = @transform_0, window_bounds = array<i64: 104, 128>}, {transform_indices = @transform_1, window_bounds = array<i64: 128, 128>}, {transform_indices = @transform_2, window_bounds = array<i64: 1, 128>}, {transform_indices = @transform_3, window_bounds = array<i64: 1, 128>}, {transform_indices = @transform_4, window_bounds = array<i64: 1, 128>}, {transform_indices = @transform_5, window_bounds = array<i64: 104, 128>}]} {
    %c0 = arith.constant 0 : index
    %c0_0 = arith.constant 0 : index
    %0 = vector.load %arg1[%c0, %c0_0] : memref<104x128xbf16, #tpu.memory_space<vmem>>, vector<104x128xbf16>
    %c0_1 = arith.constant 0 : index
    %c0_2 = arith.constant 0 : index
    %1 = vector.load %arg2[%c0_1, %c0_2] : memref<128x128xbf16, #tpu.memory_space<vmem>>, vector<128x128xbf16>
    %cst = arith.constant dense<0.000000e+00> : vector<104x128xf32>
    %2 = tpu.matmul %0, %1, %cst {dimension_numbers = #tpu.dot_dimension_numbers<[1], [0], [0], [1], [0, 0, 1, 1], [], []>} : vector<104x128xbf16>, vector<128x128xbf16>, vector<104x128xf32> -> vector<104x128xf32>
    %c0_3 = arith.constant 0 : index
    %c0_4 = arith.constant 0 : index
    %3 = vector.load %arg3[%c0_3, %c0_4] : memref<1x128xf32, #tpu.memory_space<vmem>>, vector<1x128xf32>
    %4 = vector.broadcast %3 : vector<1x128xf32> to vector<104x128xf32>
    %5 = arith.addf %2, %4 : vector<104x128xf32>
    %cst_5 = arith.constant 0.000000e+00 : f32
    %6 = vector.broadcast %cst_5 : f32 to vector<104x128xf32>
    %7 = arith.maximumf %5, %6 : vector<104x128xf32>
    %8 = tpu.iota {dimensions = array<i32: 0>} : vector<104x1xi32>
    %c98_i32 = arith.constant 98 : i32
    %9 = vector.broadcast %c98_i32 : i32 to vector<104x1xi32>
    %10 = arith.cmpi slt, %8, %9 : vector<104x1xi32>
    %cst_6 = arith.constant 0.000000e+00 : f32
    %11 = vector.shape_cast %10 : vector<104x1xi1> to vector<104x1xi1>
    %12 = vector.broadcast %11 : vector<104x1xi1> to vector<104x128xi1>
    %13 = vector.broadcast %cst_6 : f32 to vector<104x128xf32>
    %14 = arith.select %12, %7, %13 : vector<104x128xi1>, vector<104x128xf32>
    %cst_7 = arith.constant dense<0.000000e+00> : vector<128xf32>
    %15 = vector.multi_reduction <add>, %14, %cst_7 [0] : vector<104x128xf32> to vector<128xf32>
    %16 = vector.shape_cast %15 : vector<128xf32> to vector<1x128xf32>
    %17 = arith.mulf %14, %7 : vector<104x128xf32>
    %cst_8 = arith.constant dense<0.000000e+00> : vector<128xf32>
    %18 = vector.multi_reduction <add>, %17, %cst_8 [0] : vector<104x128xf32> to vector<128xf32>
    %19 = vector.shape_cast %18 : vector<128xf32> to vector<1x128xf32>
    %cst_9 = arith.constant 0.0102040814 : f32
    %20 = vector.broadcast %cst_9 : f32 to vector<1x128xf32>
    %21 = arith.mulf %16, %20 : vector<1x128xf32>
    %cst_10 = arith.constant 0.0102040814 : f32
    %22 = vector.broadcast %cst_10 : f32 to vector<1x128xf32>
    %23 = arith.mulf %19, %22 : vector<1x128xf32>
    %24 = arith.mulf %21, %21 : vector<1x128xf32>
    %25 = arith.subf %23, %24 : vector<1x128xf32>
    %cst_11 = arith.constant 0.000000e+00 : f32
    %26 = vector.broadcast %cst_11 : f32 to vector<1x128xf32>
    %27 = arith.maximumf %25, %26 : vector<1x128xf32>
    %c0_12 = arith.constant 0 : index
    %c0_13 = arith.constant 0 : index
    %28 = vector.load %arg4[%c0_12, %c0_13] : memref<1x128xf32, #tpu.memory_space<vmem>>, vector<1x128xf32>
    %cst_14 = arith.constant 9.99999974E-6 : f32
    %29 = vector.broadcast %cst_14 : f32 to vector<1x128xf32>
    %30 = arith.addf %27, %29 : vector<1x128xf32>
    %31 = math.rsqrt %30 : vector<1x128xf32>
    %32 = arith.mulf %28, %31 : vector<1x128xf32>
    %33 = vector.broadcast %21 : vector<1x128xf32> to vector<104x128xf32>
    %34 = arith.subf %7, %33 : vector<104x128xf32>
    %35 = vector.broadcast %32 : vector<1x128xf32> to vector<104x128xf32>
    %36 = arith.mulf %34, %35 : vector<104x128xf32>
    %c0_15 = arith.constant 0 : index
    %c0_16 = arith.constant 0 : index
    %37 = vector.load %arg5[%c0_15, %c0_16] : memref<1x128xf32, #tpu.memory_space<vmem>>, vector<1x128xf32>
    %38 = vector.broadcast %37 : vector<1x128xf32> to vector<104x128xf32>
    %39 = arith.addf %36, %38 : vector<104x128xf32>
    %c0_17 = arith.constant 0 : index
    %c0_18 = arith.constant 0 : index
    %40 = vector.load %arg6[%c0_17, %c0_18] : memref<104x128xf32, #tpu.memory_space<vmem>>, vector<104x128xf32>
    tpu.vector_store %arg6[%c0_17, %c0_18], %39 {strides = array<i32>} : memref<104x128xf32, #tpu.memory_space<vmem>>, vector<104x128xf32>,
    return
  }
  func.func @transform_0(%arg0: i32) -> (i32, i32) {
    %c0_i32 = arith.constant 0 : i32
    %c0_i32_0 = arith.constant 0 : i32
    %c0_i32_1 = arith.constant 0 : i32
    return %c0_i32, %c0_i32_0 : i32, i32
  }
  func.func @transform_1(%arg0: i32) -> (i32, i32) {
    %c0_i32 = arith.constant 0 : i32
    %c0_i32_0 = arith.constant 0 : i32
    return %c0_i32, %arg0 : i32, i32
  }
  func.func @transform_2(%arg0: i32) -> (i32, i32) {
    %c0_i32 = arith.constant 0 : i32
    %c0_i32_0 = arith.constant 0 : i32
    return %c0_i32, %arg0 : i32, i32
  }
  func.func @transform_3(%arg0: i32) -> (i32, i32) {
    %c0_i32 = arith.constant 0 : i32
    %c0_i32_0 = arith.constant 0 : i32
    return %c0_i32, %arg0 : i32, i32
  }
  func.func @transform_4(%arg0: i32) -> (i32, i32) {
    %c0_i32 = arith.constant 0 : i32
    %c0_i32_0 = arith.constant 0 : i32
    return %c0_i32, %arg0 : i32, i32
  }
  func.func @transform_5(%arg0: i32) -> (i32, i32) {
    %c0_i32 = arith.constant 0 : i32
    %c0_i32_0 = arith.constant 0 : i32
    return %c0_i32, %arg0 : i32, i32
  }
}

module attributes {stable_mosaic.version = 11 : i64} {
  func.func @_conv_relu_bn_fused_kernel(%arg0: i32, %arg1: memref<56x2304xbf16, #tpu.memory_space<vmem>>, %arg2: memref<2304x256xbf16, #tpu.memory_space<vmem>>, %arg3: memref<1x256xf32, #tpu.memory_space<vmem>>, %arg4: memref<1x256xf32, #tpu.memory_space<vmem>>, %arg5: memref<1x256xf32, #tpu.memory_space<vmem>>, %arg6: memref<56x256xf32, #tpu.memory_space<vmem>>) attributes {dimension_semantics = [#tpu.dimension_semantics<parallel>], iteration_bounds = array<i64: 2>, scalar_prefetch = 0 : i64, scratch_operands = 0 : i64, tpu.core_type = #tpu.core_type<tc>, window_params = [{pipeline_mode = #tpu.pipeline_mode<synchronous>, transform_indices = @transform_0, window_bounds = array<i64: 56, 2304>}, {transform_indices = @transform_1, window_bounds = array<i64: 2304, 256>}, {transform_indices = @transform_2, window_bounds = array<i64: 1, 256>}, {transform_indices = @transform_3, window_bounds = array<i64: 1, 256>}, {transform_indices = @transform_4, window_bounds = array<i64: 1, 256>}, {transform_indices = @transform_5, window_bounds = array<i64: 56, 256>}]} {
    %c0 = arith.constant 0 : index
    %c0_0 = arith.constant 0 : index
    %0 = vector.load %arg1[%c0, %c0_0] : memref<56x2304xbf16, #tpu.memory_space<vmem>>, vector<56x2304xbf16>
    %c0_1 = arith.constant 0 : index
    %c0_2 = arith.constant 0 : index
    %1 = vector.load %arg2[%c0_1, %c0_2] : memref<2304x256xbf16, #tpu.memory_space<vmem>>, vector<2304x256xbf16>
    %cst = arith.constant dense<0.000000e+00> : vector<56x256xf32>
    %2 = tpu.matmul %0, %1, %cst {dimension_numbers = #tpu.dot_dimension_numbers<[1], [0], [0], [1], [0, 0, 1, 1], [], []>} : vector<56x2304xbf16>, vector<2304x256xbf16>, vector<56x256xf32> -> vector<56x256xf32>
    %c0_3 = arith.constant 0 : index
    %c0_4 = arith.constant 0 : index
    %3 = vector.load %arg3[%c0_3, %c0_4] : memref<1x256xf32, #tpu.memory_space<vmem>>, vector<1x256xf32>
    %4 = vector.broadcast %3 : vector<1x256xf32> to vector<56x256xf32>
    %5 = arith.addf %2, %4 : vector<56x256xf32>
    %cst_5 = arith.constant 0.000000e+00 : f32
    %6 = vector.broadcast %cst_5 : f32 to vector<56x256xf32>
    %7 = arith.maximumf %5, %6 : vector<56x256xf32>
    %8 = tpu.iota {dimensions = array<i32: 0>} : vector<56x1xi32>
    %c50_i32 = arith.constant 50 : i32
    %9 = vector.broadcast %c50_i32 : i32 to vector<56x1xi32>
    %10 = arith.cmpi slt, %8, %9 : vector<56x1xi32>
    %cst_6 = arith.constant 0.000000e+00 : f32
    %11 = vector.shape_cast %10 : vector<56x1xi1> to vector<56x1xi1>
    %12 = vector.broadcast %11 : vector<56x1xi1> to vector<56x256xi1>
    %13 = vector.broadcast %cst_6 : f32 to vector<56x256xf32>
    %14 = arith.select %12, %7, %13 : vector<56x256xi1>, vector<56x256xf32>
    %cst_7 = arith.constant dense<0.000000e+00> : vector<256xf32>
    %15 = vector.multi_reduction <add>, %14, %cst_7 [0] : vector<56x256xf32> to vector<256xf32>
    %16 = vector.shape_cast %15 : vector<256xf32> to vector<1x256xf32>
    %17 = arith.mulf %14, %7 : vector<56x256xf32>
    %cst_8 = arith.constant dense<0.000000e+00> : vector<256xf32>
    %18 = vector.multi_reduction <add>, %17, %cst_8 [0] : vector<56x256xf32> to vector<256xf32>
    %19 = vector.shape_cast %18 : vector<256xf32> to vector<1x256xf32>
    %cst_9 = arith.constant 2.000000e-02 : f32
    %20 = vector.broadcast %cst_9 : f32 to vector<1x256xf32>
    %21 = arith.mulf %16, %20 : vector<1x256xf32>
    %cst_10 = arith.constant 2.000000e-02 : f32
    %22 = vector.broadcast %cst_10 : f32 to vector<1x256xf32>
    %23 = arith.mulf %19, %22 : vector<1x256xf32>
    %24 = arith.mulf %21, %21 : vector<1x256xf32>
    %25 = arith.subf %23, %24 : vector<1x256xf32>
    %cst_11 = arith.constant 0.000000e+00 : f32
    %26 = vector.broadcast %cst_11 : f32 to vector<1x256xf32>
    %27 = arith.maximumf %25, %26 : vector<1x256xf32>
    %c0_12 = arith.constant 0 : index
    %c0_13 = arith.constant 0 : index
    %28 = vector.load %arg4[%c0_12, %c0_13] : memref<1x256xf32, #tpu.memory_space<vmem>>, vector<1x256xf32>
    %cst_14 = arith.constant 9.99999974E-6 : f32
    %29 = vector.broadcast %cst_14 : f32 to vector<1x256xf32>
    %30 = arith.addf %27, %29 : vector<1x256xf32>
    %31 = math.rsqrt %30 : vector<1x256xf32>
    %32 = arith.mulf %28, %31 : vector<1x256xf32>
    %33 = vector.broadcast %21 : vector<1x256xf32> to vector<56x256xf32>
    %34 = arith.subf %7, %33 : vector<56x256xf32>
    %35 = vector.broadcast %32 : vector<1x256xf32> to vector<56x256xf32>
    %36 = arith.mulf %34, %35 : vector<56x256xf32>
    %c0_15 = arith.constant 0 : index
    %c0_16 = arith.constant 0 : index
    %37 = vector.load %arg5[%c0_15, %c0_16] : memref<1x256xf32, #tpu.memory_space<vmem>>, vector<1x256xf32>
    %38 = vector.broadcast %37 : vector<1x256xf32> to vector<56x256xf32>
    %39 = arith.addf %36, %38 : vector<56x256xf32>
    %c0_17 = arith.constant 0 : index
    %c0_18 = arith.constant 0 : index
    %40 = vector.load %arg6[%c0_17, %c0_18] : memref<56x256xf32, #tpu.memory_space<vmem>>, vector<56x256xf32>
    tpu.vector_store %arg6[%c0_17, %c0_18], %39 {strides = array<i32>} : memref<56x256xf32, #tpu.memory_space<vmem>>, vector<56x256xf32>,
    return
  }
  func.func @transform_0(%arg0: i32) -> (i32, i32) {
    %c0_i32 = arith.constant 0 : i32
    %c0_i32_0 = arith.constant 0 : i32
    %c0_i32_1 = arith.constant 0 : i32
    return %c0_i32, %c0_i32_0 : i32, i32
  }
  func.func @transform_1(%arg0: i32) -> (i32, i32) {
    %c0_i32 = arith.constant 0 : i32
    %c0_i32_0 = arith.constant 0 : i32
    return %c0_i32, %arg0 : i32, i32
  }
  func.func @transform_2(%arg0: i32) -> (i32, i32) {
    %c0_i32 = arith.constant 0 : i32
    %c0_i32_0 = arith.constant 0 : i32
    return %c0_i32, %arg0 : i32, i32
  }
  func.func @transform_3(%arg0: i32) -> (i32, i32) {
    %c0_i32 = arith.constant 0 : i32
    %c0_i32_0 = arith.constant 0 : i32
    return %c0_i32, %arg0 : i32, i32
  }
  func.func @transform_4(%arg0: i32) -> (i32, i32) {
    %c0_i32 = arith.constant 0 : i32
    %c0_i32_0 = arith.constant 0 : i32
    return %c0_i32, %arg0 : i32, i32
  }
  func.func @transform_5(%arg0: i32) -> (i32, i32) {
    %c0_i32 = arith.constant 0 : i32
    %c0_i32_0 = arith.constant 0 : i32
    return %c0_i32, %arg0 : i32, i32
  }
}

module attributes {stable_mosaic.version = 11 : i64} {
  func.func @_conv_relu_bn_fused_kernel(%arg0: i32, %arg1: memref<24x4608xbf16, #tpu.memory_space<vmem>>, %arg2: memref<4608x256xbf16, #tpu.memory_space<vmem>>, %arg3: memref<1x256xf32, #tpu.memory_space<vmem>>, %arg4: memref<1x256xf32, #tpu.memory_space<vmem>>, %arg5: memref<1x256xf32, #tpu.memory_space<vmem>>, %arg6: memref<24x256xf32, #tpu.memory_space<vmem>>) attributes {dimension_semantics = [#tpu.dimension_semantics<parallel>], iteration_bounds = array<i64: 4>, scalar_prefetch = 0 : i64, scratch_operands = 0 : i64, tpu.core_type = #tpu.core_type<tc>, window_params = [{pipeline_mode = #tpu.pipeline_mode<synchronous>, transform_indices = @transform_0, window_bounds = array<i64: 24, 4608>}, {transform_indices = @transform_1, window_bounds = array<i64: 4608, 256>}, {transform_indices = @transform_2, window_bounds = array<i64: 1, 256>}, {transform_indices = @transform_3, window_bounds = array<i64: 1, 256>}, {transform_indices = @transform_4, window_bounds = array<i64: 1, 256>}, {transform_indices = @transform_5, window_bounds = array<i64: 24, 256>}]} {
    %c0 = arith.constant 0 : index
    %c0_0 = arith.constant 0 : index
    %0 = vector.load %arg1[%c0, %c0_0] : memref<24x4608xbf16, #tpu.memory_space<vmem>>, vector<24x4608xbf16>
    %c0_1 = arith.constant 0 : index
    %c0_2 = arith.constant 0 : index
    %1 = vector.load %arg2[%c0_1, %c0_2] : memref<4608x256xbf16, #tpu.memory_space<vmem>>, vector<4608x256xbf16>
    %cst = arith.constant dense<0.000000e+00> : vector<24x256xf32>
    %2 = tpu.matmul %0, %1, %cst {dimension_numbers = #tpu.dot_dimension_numbers<[1], [0], [0], [1], [0, 0, 1, 1], [], []>} : vector<24x4608xbf16>, vector<4608x256xbf16>, vector<24x256xf32> -> vector<24x256xf32>
    %c0_3 = arith.constant 0 : index
    %c0_4 = arith.constant 0 : index
    %3 = vector.load %arg3[%c0_3, %c0_4] : memref<1x256xf32, #tpu.memory_space<vmem>>, vector<1x256xf32>
    %4 = vector.broadcast %3 : vector<1x256xf32> to vector<24x256xf32>
    %5 = arith.addf %2, %4 : vector<24x256xf32>
    %cst_5 = arith.constant 0.000000e+00 : f32
    %6 = vector.broadcast %cst_5 : f32 to vector<24x256xf32>
    %7 = arith.maximumf %5, %6 : vector<24x256xf32>
    %8 = tpu.iota {dimensions = array<i32: 0>} : vector<24x1xi32>
    %c18_i32 = arith.constant 18 : i32
    %9 = vector.broadcast %c18_i32 : i32 to vector<24x1xi32>
    %10 = arith.cmpi slt, %8, %9 : vector<24x1xi32>
    %cst_6 = arith.constant 0.000000e+00 : f32
    %11 = vector.shape_cast %10 : vector<24x1xi1> to vector<24x1xi1>
    %12 = vector.broadcast %11 : vector<24x1xi1> to vector<24x256xi1>
    %13 = vector.broadcast %cst_6 : f32 to vector<24x256xf32>
    %14 = arith.select %12, %7, %13 : vector<24x256xi1>, vector<24x256xf32>
    %cst_7 = arith.constant dense<0.000000e+00> : vector<256xf32>
    %15 = vector.multi_reduction <add>, %14, %cst_7 [0] : vector<24x256xf32> to vector<256xf32>
    %16 = vector.shape_cast %15 : vector<256xf32> to vector<1x256xf32>
    %17 = arith.mulf %14, %7 : vector<24x256xf32>
    %cst_8 = arith.constant dense<0.000000e+00> : vector<256xf32>
    %18 = vector.multi_reduction <add>, %17, %cst_8 [0] : vector<24x256xf32> to vector<256xf32>
    %19 = vector.shape_cast %18 : vector<256xf32> to vector<1x256xf32>
    %cst_9 = arith.constant 0.055555556 : f32
    %20 = vector.broadcast %cst_9 : f32 to vector<1x256xf32>
    %21 = arith.mulf %16, %20 : vector<1x256xf32>
    %cst_10 = arith.constant 0.055555556 : f32
    %22 = vector.broadcast %cst_10 : f32 to vector<1x256xf32>
    %23 = arith.mulf %19, %22 : vector<1x256xf32>
    %24 = arith.mulf %21, %21 : vector<1x256xf32>
    %25 = arith.subf %23, %24 : vector<1x256xf32>
    %cst_11 = arith.constant 0.000000e+00 : f32
    %26 = vector.broadcast %cst_11 : f32 to vector<1x256xf32>
    %27 = arith.maximumf %25, %26 : vector<1x256xf32>
    %c0_12 = arith.constant 0 : index
    %c0_13 = arith.constant 0 : index
    %28 = vector.load %arg4[%c0_12, %c0_13] : memref<1x256xf32, #tpu.memory_space<vmem>>, vector<1x256xf32>
    %cst_14 = arith.constant 9.99999974E-6 : f32
    %29 = vector.broadcast %cst_14 : f32 to vector<1x256xf32>
    %30 = arith.addf %27, %29 : vector<1x256xf32>
    %31 = math.rsqrt %30 : vector<1x256xf32>
    %32 = arith.mulf %28, %31 : vector<1x256xf32>
    %33 = vector.broadcast %21 : vector<1x256xf32> to vector<24x256xf32>
    %34 = arith.subf %7, %33 : vector<24x256xf32>
    %35 = vector.broadcast %32 : vector<1x256xf32> to vector<24x256xf32>
    %36 = arith.mulf %34, %35 : vector<24x256xf32>
    %c0_15 = arith.constant 0 : index
    %c0_16 = arith.constant 0 : index
    %37 = vector.load %arg5[%c0_15, %c0_16] : memref<1x256xf32, #tpu.memory_space<vmem>>, vector<1x256xf32>
    %38 = vector.broadcast %37 : vector<1x256xf32> to vector<24x256xf32>
    %39 = arith.addf %36, %38 : vector<24x256xf32>
    %c0_17 = arith.constant 0 : index
    %c0_18 = arith.constant 0 : index
    %40 = vector.load %arg6[%c0_17, %c0_18] : memref<24x256xf32, #tpu.memory_space<vmem>>, vector<24x256xf32>
    tpu.vector_store %arg6[%c0_17, %c0_18], %39 {strides = array<i32>} : memref<24x256xf32, #tpu.memory_space<vmem>>, vector<24x256xf32>,
    return
  }
  func.func @transform_0(%arg0: i32) -> (i32, i32) {
    %c0_i32 = arith.constant 0 : i32
    %c0_i32_0 = arith.constant 0 : i32
    %c0_i32_1 = arith.constant 0 : i32
    return %c0_i32, %c0_i32_0 : i32, i32
  }
  func.func @transform_1(%arg0: i32) -> (i32, i32) {
    %c0_i32 = arith.constant 0 : i32
    %c0_i32_0 = arith.constant 0 : i32
    return %c0_i32, %arg0 : i32, i32
  }
  func.func @transform_2(%arg0: i32) -> (i32, i32) {
    %c0_i32 = arith.constant 0 : i32
    %c0_i32_0 = arith.constant 0 : i32
    return %c0_i32, %arg0 : i32, i32
  }
  func.func @transform_3(%arg0: i32) -> (i32, i32) {
    %c0_i32 = arith.constant 0 : i32
    %c0_i32_0 = arith.constant 0 : i32
    return %c0_i32, %arg0 : i32, i32
  }
  func.func @transform_4(%arg0: i32) -> (i32, i32) {
    %c0_i32 = arith.constant 0 : i32
    %c0_i32_0 = arith.constant 0 : i32
    return %c0_i32, %arg0 : i32, i32
  }
  func.func @transform_5(%arg0: i32) -> (i32, i32) {
    %c0_i32 = arith.constant 0 : i32
    %c0_i32_0 = arith.constant 0 : i32
    return %c0_i32, %arg0 : i32, i32
  }
}

module attributes {stable_mosaic.version = 11 : i64} {
  func.func @_pool_linear_kernel(%arg0: i32, %arg1: memref<2x9x1024xf32, #tpu.memory_space<vmem>>, %arg2: memref<1024x128xbf16, #tpu.memory_space<vmem>>, %arg3: memref<1x128xf32, #tpu.memory_space<vmem>>, %arg4: memref<2x128xf32, #tpu.memory_space<vmem>>) attributes {dimension_semantics = [#tpu.dimension_semantics<arbitrary>], iteration_bounds = array<i64: 1>, scalar_prefetch = 0 : i64, scratch_operands = 0 : i64, tpu.core_type = #tpu.core_type<tc>, window_params = [{pipeline_mode = #tpu.pipeline_mode<synchronous>, transform_indices = @transform_0, window_bounds = array<i64: 2, 9, 1024>}, {pipeline_mode = #tpu.pipeline_mode<synchronous>, transform_indices = @transform_1, window_bounds = array<i64: 1024, 128>}, {pipeline_mode = #tpu.pipeline_mode<synchronous>, transform_indices = @transform_2, window_bounds = array<i64: 1, 128>}, {pipeline_mode = #tpu.pipeline_mode<synchronous>, transform_indices = @transform_3, window_bounds = array<i64: 2, 128>}]} {
    %c0 = arith.constant 0 : index
    %c0_0 = arith.constant 0 : index
    %c0_1 = arith.constant 0 : index
    %0 = vector.load %arg1[%c0, %c0_0, %c0_1] : memref<2x9x1024xf32, #tpu.memory_space<vmem>>, vector<2x9x1024xf32>
    %cst = arith.constant dense<0.000000e+00> : vector<2x1024xf32>
    %1 = vector.multi_reduction <add>, %0, %cst [1] : vector<2x9x1024xf32> to vector<2x1024xf32>
    %cst_2 = arith.constant 9.000000e+00 : f32
    %2 = vector.broadcast %cst_2 : f32 to vector<2x1024xf32>
    %3 = arith.divf %1, %2 : vector<2x1024xf32>
    %4 = arith.truncf %3 : vector<2x1024xf32> to vector<2x1024xbf16>
    %c0_3 = arith.constant 0 : index
    %c0_4 = arith.constant 0 : index
    %5 = vector.load %arg2[%c0_3, %c0_4] : memref<1024x128xbf16, #tpu.memory_space<vmem>>, vector<1024x128xbf16>
    %cst_5 = arith.constant dense<0.000000e+00> : vector<2x128xf32>
    %6 = tpu.matmul %4, %5, %cst_5 {dimension_numbers = #tpu.dot_dimension_numbers<[1], [0], [0], [1], [0, 0, 1, 1], [], []>} : vector<2x1024xbf16>, vector<1024x128xbf16>, vector<2x128xf32> -> vector<2x128xf32>
    %c0_6 = arith.constant 0 : index
    %c0_7 = arith.constant 0 : index
    %7 = vector.load %arg3[%c0_6, %c0_7] : memref<1x128xf32, #tpu.memory_space<vmem>>, vector<1x128xf32>
    %8 = vector.broadcast %7 : vector<1x128xf32> to vector<2x128xf32>
    %9 = arith.addf %6, %8 : vector<2x128xf32>
    %c0_8 = arith.constant 0 : index
    %c0_9 = arith.constant 0 : index
    %10 = vector.load %arg4[%c0_8, %c0_9] : memref<2x128xf32, #tpu.memory_space<vmem>>, vector<2x128xf32>
    tpu.vector_store %arg4[%c0_8, %c0_9], %9 {strides = array<i32>} : memref<2x128xf32, #tpu.memory_space<vmem>>, vector<2x128xf32>,
    return
  }
  func.func @transform_0(%arg0: i32) -> (i32, i32, i32) {
    %c0_i32 = arith.constant 0 : i32
    %c0_i32_0 = arith.constant 0 : i32
    %c0_i32_1 = arith.constant 0 : i32
    %c0_i32_2 = arith.constant 0 : i32
    return %c0_i32, %c0_i32_0, %c0_i32_1 : i32, i32, i32
  }
  func.func @transform_1(%arg0: i32) -> (i32, i32) {
    %c0_i32 = arith.constant 0 : i32
    %c0_i32_0 = arith.constant 0 : i32
    %c0_i32_1 = arith.constant 0 : i32
    return %c0_i32, %c0_i32_0 : i32, i32
  }
  func.func @transform_2(%arg0: i32) -> (i32, i32) {
    %c0_i32 = arith.constant 0 : i32
    %c0_i32_0 = arith.constant 0 : i32
    %c0_i32_1 = arith.constant 0 : i32
    return %c0_i32, %c0_i32_0 : i32, i32
  }
  func.func @transform_3(%arg0: i32) -> (i32, i32) {
    %c0_i32 = arith.constant 0 : i32
    %c0_i32_0 = arith.constant 0 : i32
    %c0_i32_1 = arith.constant 0 : i32
    return %c0_i32, %c0_i32_0 : i32, i32
  }
}

</mosaic_0001>

<bundles_post_ra>
// kernel: cnn_bn_forward.4
= control target key start
LH: loop header
LB: loop body
LE: loop exit
PB: predicated region body
PF: predicated region fallthrough
CT: control target
= control target key end

     0   :  { %10 = vsyncpa [#allocation4], 0  ;;  %s1722_s0 = inlined_call_operand.vmem [shape: bf16[104,128], index: 0, kind: input, shape index: {}]   ;;  %s1723_s1 = inlined_call_operand.vmem [shape: bf16[128,256], index: 1, kind: input, shape index: {}]   ;;  %s1724_s2 = inlined_call_operand.hbm [shape: f32[1,256], index: 2, kind: input, shape index: {}]   ;;  %s1725_s3 = inlined_call_operand.hbm [shape: f32[1,256], index: 3, kind: input, shape index: {}]   ;;  %s1726_s4 = inlined_call_operand.hbm [shape: f32[1,256], index: 4, kind: input, shape index: {}]   ;;  %s1727_s5 = inlined_call_operand.vmem [shape: f32[104,256], index: 5, kind: output, shape index: {}]  }
   0x1   :  { %12 = vsyncpa [#allocation4 + $0x1], 0 }
   0x2   :  { %13 = vsyncpa [#allocation6], 0 }
   0x3   :  { %15 = vsyncpa [#allocation6 + $0x1], 0  ;;  %s1359_s18 = smov 0   ;;  %s1361_s19 = smov 0  }
   0x4   :  { %s1363_s20 = smov 0   ;;  %s1365_s21 = smov 0  }
   0x5 LB: > { %s1378_s22 = sadd.s32 4294967295, %s1322_s21   ;;  %s1381_s23 = sadd.s32 1, %s1322_s21   ;;  %s1322_s21 = sphi %s1365_s21, %s1737_s21   ;;  %s1318_s20 = sphi %s1363_s20, %s1736_s20   ;;  %s1314_s19 = sphi %s1361_s19, %s1735_s19   ;;  %s1310_s18 = sphi %s1359_s18, %s1734_s18  }
   0x6   : > { %s46_s24 = ssub.s32 %s1322_s21, %s1381_s23  ;;  %s49_s25 = sadd.s32 1, %s1318_s20 }
   0x7   : > { %p47_p0 = scmp.eq.s32.totalorder %s46_s24, 0  ;;  %p56_p1 = scmp.ne.s32.totalorder %s1318_s20, %s1314_s19 }
   0x8   : > { %p57_p2 = scmp.eq.s32.totalorder %s1322_s21, 0  ;;  %p88_p3 = scmp.ne.s32.totalorder %s1314_s19, %s1310_s18 }
   0x9   : > { %s1391_s26 = scalar_select %p47_p0, %s1318_s20, %s49_s25  }
   0xa   : > { %p1393_p4 = por %p57_p2, %p56_p1  ;;  %p89_p5 = scmp.eq.s32.totalorder %s1378_s22, 0 }
   0xb   : > { %p164_p6 = scmp.eq.s32.totalorder %s1378_s22, 1  ;;  %p1039_p9 = scmp.ge.s32.totalorder %s1322_s21, 2 }
   0xc   : > { %p1399_p7 = por %p89_p5, %p88_p3 }
   0xd   : > { %p1403_p8 = por %p164_p6, %p56_p1  ;;  %189 = sbr.rel (%p1039_p9) target bundleno = 106 (0x6a), region = 20 }
   0xe   : > { %s1730_s28 = scalar_select %p1399_p7, 1, 0 }
   0xf   : > { %s1731_s29 = scalar_select %p1403_p8, 1, 0 }
  0x14   : > { %192 = sbr.rel (!%p1393_p4) target bundleno = 34 (0x22), region = 24  ;;  %s194_s30 = sand.u32 (%p1393_p4), 1, %s1318_s20  }
  0x15   : > { %s1041_s6 = sshll.u32 (%p1393_p4), %s1322_s21, 2  ;;  %s1040_s7 = sshll.u32 (%p1393_p4), %s194_s30, 6 }
  0x16   : > { %s1415_s10 = scalar_lea.vmem (%p1393_p4), %s1723_s1, %s1041_s6  ;;  %s196_s11 = scalar_lea.vmem (%p1393_p4), [#allocation2], %s1040_s7 }
  0x17   : > { %v214_v0 = vld [vmem:[%s1415_s10] sm:$0xf] (%p1393_p4)  ;;  %v216_v1 = vld [vmem:[%s1415_s10 + $0x8] sm:$0xf] (%p1393_p4)  ;;  %v218_v2 = vld [vmem:[%s1415_s10 + $0x10] sm:$0xf] (%p1393_p4) }
  0x18   : > { %215 = vst [vmem:[%s196_s11] sm:$0xf] (%p1393_p4), %v214_v0  ;;  %217 = vst [vmem:[%s196_s11 + $0x4] sm:$0xf] (%p1393_p4), %v216_v1  ;;  %v220_v3 = vld [vmem:[%s1415_s10 + $0x18] sm:$0xf] (%p1393_p4) }
  0x19   : > { %v222_v4 = vld [vmem:[%s1415_s10 + $0x20] sm:$0xf] (%p1393_p4)  ;;  %219 = vst [vmem:[%s196_s11 + $0x8] sm:$0xf] (%p1393_p4), %v218_v2  ;;  %221 = vst [vmem:[%s196_s11 + $0xc] sm:$0xf] (%p1393_p4), %v220_v3 }
  0x1a   : > { %223 = vst [vmem:[%s196_s11 + $0x10] sm:$0xf] (%p1393_p4), %v222_v4  ;;  %v224_v5 = vld [vmem:[%s1415_s10 + $0x28] sm:$0xf] (%p1393_p4)  ;;  %v226_v6 = vld [vmem:[%s1415_s10 + $0x30] sm:$0xf] (%p1393_p4) }
  0x1b   : > { %v228_v7 = vld [vmem:[%s1415_s10 + $0x38] sm:$0xf]  ;;  %225 = vst [vmem:[%s196_s11 + $0x14] sm:$0xf] %v224_v5  ;;  %227 = vst [vmem:[%s196_s11 + $0x18] sm:$0xf] %v226_v6 }
  0x1c   : > { %229 = vst [vmem:[%s196_s11 + $0x1c] sm:$0xf] %v228_v7  ;;  %v230_v8 = vld [vmem:[%s1415_s10 + $0x40] sm:$0xf]  ;;  %v232_v9 = vld [vmem:[%s1415_s10 + $0x48] sm:$0xf] }
  0x1d   : > { %v234_v10 = vld [vmem:[%s1415_s10 + $0x50] sm:$0xf]  ;;  %231 = vst [vmem:[%s196_s11 + $0x20] sm:$0xf] %v230_v8  ;;  %233 = vst [vmem:[%s196_s11 + $0x24] sm:$0xf] %v232_v9 }
  0x1e   : > { %235 = vst [vmem:[%s196_s11 + $0x28] sm:$0xf] %v234_v10  ;;  %v236_v11 = vld [vmem:[%s1415_s10 + $0x58] sm:$0xf]  ;;  %v238_v12 = vld [vmem:[%s1415_s10 + $0x60] sm:$0xf] }
  0x1f   : > { %v240_v13 = vld [vmem:[%s1415_s10 + $0x68] sm:$0xf]  ;;  %237 = vst [vmem:[%s196_s11 + $0x2c] sm:$0xf] %v236_v11  ;;  %239 = vst [vmem:[%s196_s11 + $0x30] sm:$0xf] %v238_v12 }
  0x20   : > { %241 = vst [vmem:[%s196_s11 + $0x34] sm:$0xf] %v240_v13  ;;  %v242_v14 = vld [vmem:[%s1415_s10 + $0x70] sm:$0xf]  ;;  %v244_v15 = vld [vmem:[%s1415_s10 + $0x78] sm:$0xf] }
  0x21   : > { %243 = vst [vmem:[%s196_s11 + $0x38] sm:$0xf] %v242_v14  ;;  %245 = vst [vmem:[%s196_s11 + $0x3c] sm:$0xf] %v244_v15 }
  0x22 PF: > { %s1434_s12 = sand.u32 1, %s1318_s20   ;;  %s1437_s13 = sshll.u32 %s1322_s21, 4 }
  0x23   : > { %s318_s14 = sand.u32 1, %s1322_s21   ;;  %s1444_s17 = scalar_lea.hbm %s1725_s3, %s1437_s13 }
  0x24   : > { %s321_s18 = scalar_lea.vmem [#allocation5], %s1434_s12  ;;  %s1447_s25 = scalar_lea.sflag [#allocation6], %s318_s14 }
  0x25   : > { %s328_s24 = sshll.u32 %s321_s18, 4  ;;  %s1200_s30 = scalar_lea.hbm %s1444_s17, 16  ;;  %s329_s24 = int_to_ptr.vmem [resolvable:$true] %s328_s24 }
  0x26   : > { %p1201_p10 = scmp.ne.s32.totalorder %s1444_s17, %s1200_s30  ;;  %s1204_s8 = scalar_lea.hbm %s1725_s3, 32 }
  0x27   : > { %p1205_p13 = scmp.lt.u32.totalorder %s1444_s17, %s1725_s3  ;;  %p1206_p0 = scmp.lt.u32.totalorder %s1204_s8, %s1200_s30 }
  0x28   : > { %p1202_p11 = pnand %p1201_p10, %p1393_p4  ;;  %p1208_p2 = scmp.lt.u32.totalorder %s1200_s30, %s1444_s17 }
  0x29   : > { %p1207_p1 = por %p1206_p0, %p1205_p13 }
  0x2a   : > { %p1203_p12 = pneg %p1202_p11 }
  0x2b   : > { %p1209_p3 = por %p1208_p2, %p1207_p1 }
  0x2d   : > { %p1210_p5 = pnand %p1209_p3, %p1203_p12 }
  0x2f   : > { %1213 = shalt.err (!%p1210_p5)
}
  0x30   : > { %s1214_s11 = scalar_lea.vmem %s329_s24, 16  ;;  %s1324_s14 = smov [#allocation5]  }
  0x31   : > { %p1215_p6 = scmp.ne.s32.totalorder %s329_s24, %s1214_s11  ;;  %s1218_s15 = sshll.u32 %s1324_s14, 4  ;;  %s1219_s15 = int_to_ptr.vmem [resolvable:$false] %s1218_s15 }
  0x32   : > { %s1220_s16 = scalar_lea.vmem %s1219_s15, 32  ;;  %p1221_p11 = scmp.lt.s32.totalorder %s329_s24, %s1219_s15 }
  0x33   : > { %p1216_p9 = pnand %p1215_p6, %p1393_p4  ;;  %p1222_p8 = scmp.lt.s32.totalorder %s1220_s16, %s1214_s11 }
  0x35   : > { %p1217_p10 = pneg %p1216_p9  ;;  %p1223_p7 = por %p1222_p8, %p1221_p11 }
  0x37   : > { %p1224_p0 = pnand %p1223_p7, %p1217_p10 }
  0x39   : > { %1227 = shalt.err (!%p1224_p0)
}
  0x3a   : > { %1144 = dma.hbm_to_vmem [thread:$0]  (%p1393_p4), %s1444_s17, 16, %s329_s24, %s1447_s25  }
  0x3b   : > { %s1471_s6 = scalar_lea.hbm %s1724_s2, %s1437_s13  ;;  %s304_s7 = scalar_lea.vmem [#allocation3], %s1434_s12 }
  0x3c   : > { %s311_s8 = sshll.u32 %s304_s7, 4  ;;  %s302_s9 = scalar_lea.sflag [#allocation4], %s1434_s12  ;;  %s312_s8 = int_to_ptr.vmem [resolvable:$true] %s311_s8 }
  0x3d   : > { %s1228_s10 = scalar_lea.hbm %s1471_s6, 16  ;;  %s1232_s24 = scalar_lea.hbm %s1724_s2, 32 }
  0x3e   : > { %p1229_p7 = scmp.ne.s32.totalorder %s1471_s6, %s1228_s10  ;;  %p1233_p13 = scmp.lt.u32.totalorder %s1471_s6, %s1724_s2 }
  0x3f   : > { %p1234_p1 = scmp.lt.u32.totalorder %s1232_s24, %s1228_s10  ;;  %p1236_p3 = scmp.lt.u32.totalorder %s1228_s10, %s1471_s6 }
  0x40   : > { %p1230_p8 = pnand %p1229_p7, %p1393_p4 }
  0x41   : > { %p1235_p2 = por %p1234_p1, %p1233_p13 }
  0x42   : > { %p1231_p12 = pneg %p1230_p8 }
  0x43   : > { %p1237_p5 = por %p1236_p3, %p1235_p2 }
  0x45   : > { %p1238_p6 = pnand %p1237_p5, %p1231_p12 }
  0x47   : > { %1241 = shalt.err (!%p1238_p6)
}
  0x48   : > { %s1242_s16 = scalar_lea.vmem %s312_s8, 16  ;;  %s1325_s18 = smov [#allocation3]  }
  0x49   : > { %p1243_p9 = scmp.ne.s32.totalorder %s312_s8, %s1242_s16  ;;  %s1246_s30 = sshll.u32 %s1325_s18, 4  ;;  %s1247_s30 = int_to_ptr.vmem [resolvable:$false] %s1246_s30 }
  0x4a   : > { %s1248_s7 = scalar_lea.vmem %s1247_s30, 32  ;;  %p1249_p0 = scmp.lt.s32.totalorder %s312_s8, %s1247_s30 }
  0x4b   : > { %p1244_p10 = pnand %p1243_p9, %p1393_p4  ;;  %p1250_p7 = scmp.lt.s32.totalorder %s1248_s7, %s1242_s16 }
  0x4d   : > { %p1245_p11 = pneg %p1244_p10  ;;  %p1251_p8 = por %p1250_p7, %p1249_p0 }
  0x4f   : > { %p1252_p1 = pnand %p1251_p8, %p1245_p11 }
  0x51   : > { %1255 = shalt.err (!%p1252_p1)
}
  0x52   : > { %1143 = dma.hbm_to_vmem [thread:$0]  (%p1393_p4), %s1471_s6, 16, %s312_s8, %s302_s9  }
  0x53   : > { %s1496_s17 = scalar_lea.hbm %s1726_s4, %s1437_s13  ;;  %s338_s24 = scalar_lea.vmem [#allocation7], %s1434_s12 }
  0x54   : > { %s345_s14 = sshll.u32 %s338_s24, 4  ;;  %s1256_s15 = scalar_lea.hbm %s1496_s17, 16  ;;  %s346_s14 = int_to_ptr.vmem [resolvable:$true] %s345_s14 }
  0x55   : > { %p1257_p12 = scmp.ne.s32.totalorder %s1496_s17, %s1256_s15  ;;  %s1260_s6 = scalar_lea.hbm %s1726_s4, 32 }
  0x56   : > { %p1261_p3 = scmp.lt.u32.totalorder %s1496_s17, %s1726_s4  ;;  %p1262_p5 = scmp.lt.u32.totalorder %s1260_s6, %s1256_s15 }
  0x57   : > { %p1258_p13 = pnand %p1257_p12, %p1393_p4  ;;  %p1264_p9 = scmp.lt.u32.totalorder %s1256_s15, %s1496_s17 }
  0x58   : > { %p1263_p6 = por %p1262_p5, %p1261_p3 }
  0x59   : > { %p1259_p2 = pneg %p1258_p13 }
  0x5a   : > { %p1265_p10 = por %p1264_p9, %p1263_p6 }
  0x5c   : > { %p1266_p11 = pnand %p1265_p10, %p1259_p2 }
  0x5e   : > { %1269 = shalt.err (!%p1266_p11)
}
  0x5f   : > { %s1270_s12 = scalar_lea.vmem %s346_s14, 16  ;;  %s1326_s13 = smov [#allocation7]  }
  0x60   : > { %p1271_p0 = scmp.ne.s32.totalorder %s346_s14, %s1270_s12  ;;  %s1274_s30 = sshll.u32 %s1326_s13, 4  ;;  %s1275_s30 = int_to_ptr.vmem [resolvable:$false] %s1274_s30 }
  0x61   : > { %s1276_s7 = scalar_lea.vmem %s1275_s30, 32  ;;  %p1277_p1 = scmp.lt.s32.totalorder %s346_s14, %s1275_s30 }
  0x62   : > { %p1272_p7 = pnand %p1271_p0, %p1393_p4  ;;  %p1278_p12 = scmp.lt.s32.totalorder %s1276_s7, %s1270_s12 }
  0x64   : > { %p1273_p8 = pneg %p1272_p7  ;;  %p1279_p13 = por %p1278_p12, %p1277_p1 }
  0x66   : > { %p1280_p3 = pnand %p1279_p13, %p1273_p8 }
  0x68   : > { %1283 = shalt.err (!%p1280_p3)
}
  0x69   : > { %1145 = dma.hbm_to_vmem [thread:$0]  (%p1393_p4), %s1496_s17, 16, %s346_s14, %s1447_s25  }
  0x6a PF: > { %p1045_p2 = scmp.ge.s32.totalorder %s1322_s21, 1  ;;  %p350_p5 = scmp.lt.s32.totalorder %s1322_s21, 3 }
  0x6c   : > { %p351_p6 = pnand %p1045_p2, %p350_p5 }
  0x6d   : > { %s1520_s10 = sand.u32 (!%p351_p6), 1, %s1314_s19   ;;  %p1732_p4 = scmp.ne.s32.totalorder (!%p351_p6), %s1730_s28, 0 }
  0x6e   : > { %354 = sbr.rel (%p351_p6) target bundleno = 466 (0x1d2), region = 77  ;;  %s1046_s11 = sshll.u32 (!%p351_p6), %s1520_s10, 6 }
  0x6f   : > { %s1523_s24 = scalar_lea.vmem (!%p351_p6), [#allocation2], %s1046_s11  ;;  %s364_s27 = scalar_lea.sflag (!%p351_p6), [#allocation4], %s1520_s10 }
  0x70   : > { %s366_s15 = scalar_lea.vmem (!%p351_p6), [#allocation3], %s1520_s10 }
  0x75   : > { %1301 = dma.done.wait (%p1732_p4), %s364_s27, 16  }
  0x76   : > { %1303 = vsyncadd (%p1732_p4), %s364_s27, 4294967280  ;;  %s371_s21 = sand.u32 1, %s1378_s22   ;;  %s374_s17 = scalar_lea.vmem [#allocation5], %s1520_s10 }
  0x77   : > { %s372_s25 = scalar_lea.sflag [#allocation6], %s371_s21 }
  0x78   : > { %1305 = dma.done.wait (%p1732_p4), %s372_s25, 32  }
  0x79   : > { %1307 = vsyncadd (%p1732_p4), %s372_s25, 4294967264  ;;  %v1327_v16 = vmov 0.0   ;;  %vm1328_vm0 = vmmov 0   ;;  %v1183_v17 = vld [vmem:[%s1523_s24] sm:$0xff]   ;;  %v1184_v18 = vld [vmem:[%s1523_s24 + $0x8] sm:$0xff]   ;;  %v645_v14 = vlaneseq  ;;  %s382_s21 = scalar_lea.vmem [#allocation7], %s1520_s10 }
  0x7a   : > { %1082 = vmatprep.subr.bf16.mxu0 %v1327_v16  ;;  %1126 = vmatprep.subr.bf16.mxu1 %v1327_v16  ;;  %v1185_v19 = vld [vmem:[%s1523_s24 + $0x10] sm:$0xff]   ;;  %v1186_v20 = vld [vmem:[%s1523_s24 + $0x18] sm:$0xff]   ;;  %v1187_v21 = vld [vmem:[%s1523_s24 + $0x20] sm:$0xff]   ;;  %p1733_p9 = scmp.ne.s32.totalorder %s1731_s29, 0 }
  0x7b   : > { %1098 = vmatprep.mubr.msk.bf16.mxu0 %vm1328_vm0, %v1327_v16  ;;  %1114 = vmatprep.mubr.msk.bf16.mxu1 %vm1328_vm0, %v1327_v16  ;;  %v1188_v22 = vld [vmem:[%s1523_s24 + $0x28] sm:$0xff]   ;;  %v1189_v23 = vld [vmem:[%s1523_s24 + $0x30] sm:$0xff]   ;;  %v1190_v24 = vld [vmem:[%s1523_s24 + $0x38] sm:$0xff]   ;;  %s1064_s25 = sshll.u32 (%p1733_p9), %s1378_s22, 3 }
  0x7c   : > { %1083 = vmatpush3.bf16.msra.mxu0 %v1183_v17  ;;  %1134 = vmatpush3.bf16.msra.mxu1 %v1183_v17  ;;  %v1191_v25 = vld [vmem:[%s1722_s0] sm:$0xff]   ;;  %v1192_v27 = vld [vmem:[%s1722_s0 + $0x8] sm:$0xff]   ;;  %v1193_v29 = vld [vmem:[%s1722_s0 + $0x10] sm:$0xff]   ;;  %s842_s14 = scalar_lea.vmem (%p1733_p9), %s1727_s5, %s1064_s25 }
  0x7d   : > { %1084 = vmatprep.subr.bf16.mxu0 %v1327_v16  ;;  %1127 = vmatprep.subr.bf16.mxu1 %v1327_v16  ;;  %v1194_v26 = vld [vmem:[%s1722_s0 + $0x20] sm:$0xff]   ;;  %v1196_v28 = vld [vmem:[%s1722_s0 + $0x28] sm:$0xff]   ;;  %v1197_v30 = vld [vmem:[%s1722_s0 + $0x30] ss:$0 sps:$4 sm:$0xff]  }
  0x7e   : > { %v1195_v31 = vld [vmem:[%s1722_s0 + $0x18] sm:$0xff]   ;;  %v1575_v32 = vld [vmem:[%s366_s15] ss:$0 sm:$0xff]  ;;  %s1142_s15 = smul.u32 104, %s1520_s10 }
  0x80   : > { %1085 = vmatpush3.bf16.msra.mxu0 %v1184_v18  ;;  %1135 = vmatpush3.bf16.msra.mxu1 %v1184_v18  ;;  %s1675_s10 = scalar_lea.vmem [#allocation8], %s1142_s15 }
  0x81   : > { %1086 = vmatprep.subr.bf16.mxu0 %v1327_v16  ;;  %1128 = vmatprep.subr.bf16.mxu1 %v1327_v16 }
  0x84   : > { %1087 = vmatpush3.bf16.msra.mxu0 %v1185_v19  ;;  %1136 = vmatpush3.bf16.msra.mxu1 %v1185_v19 }
  0x85   : > { %1088 = vmatprep.subr.bf16.mxu0 %v1327_v16  ;;  %1129 = vmatprep.subr.bf16.mxu1 %v1327_v16 }
  0x88   : > { %1089 = vmatpush3.bf16.msra.mxu0 %v1186_v20  ;;  %1137 = vmatpush3.bf16.msra.mxu1 %v1186_v20 }
  0x89   : > { %1090 = vmatprep.subr.bf16.mxu0 %v1327_v16  ;;  %1130 = vmatprep.subr.bf16.mxu1 %v1327_v16 }
  0x8c   : > { %1091 = vmatpush3.bf16.msra.mxu0 %v1187_v21  ;;  %1138 = vmatpush3.bf16.msra.mxu1 %v1187_v21 }
  0x8d   : > { %1092 = vmatprep.subr.bf16.mxu0 %v1327_v16  ;;  %1131 = vmatprep.subr.bf16.mxu1 %v1327_v16 }
  0x90   : > { %1093 = vmatpush3.bf16.msra.mxu0 %v1188_v22  ;;  %1139 = vmatpush3.bf16.msra.mxu1 %v1188_v22 }
  0x91   : > { %1094 = vmatprep.subr.bf16.mxu0 %v1327_v16  ;;  %1132 = vmatprep.subr.bf16.mxu1 %v1327_v16 }
  0x94   : > { %1095 = vmatpush3.bf16.msra.mxu0 %v1189_v23  ;;  %1140 = vmatpush3.bf16.msra.mxu1 %v1189_v23  ;;  %v1614_v23 = vshrl.u32 %v645_v14, 7 }
  0x95   : > { %1096 = vmatprep.subr.bf16.mxu0 %v1327_v16  ;;  %1133 = vmatprep.subr.bf16.mxu1 %v1327_v16 }
  0x98   : > { %1097 = vmatpush3.bf16.msra.mxu0 %v1190_v24  ;;  %1141 = vmatpush3.bf16.msra.mxu1 %v1190_v24 }
  0x9b   : > { %1099 = vmatmul.mubr.bf16.vlgmr.msra.gmra.mrb[0].mxu0 %v1191_v25  ;;  %1115 = vmatmul.mubr.bf16.vlgmr.msra.gmra.mrb[0].mxu1 %v1194_v26 }
  0x9c   : > { %1102 = vmatprep.mubr.msk.bf16.mxu0 %vm1328_vm0, %v1327_v16  ;;  %1118 = vmatprep.mubr.msk.bf16.mxu1 %vm1328_vm0, %v1327_v16 }
  0xa3   : > { %1103 = vmatmul.mubr.bf16.gmra.mrb[4].mxu0 %v1192_v27  ;;  %1119 = vmatmul.mubr.bf16.gmra.mrb[4].mxu1 %v1196_v28 }
  0xa4   : > { %1106 = vmatprep.mubr.msk.bf16.mxu0 %vm1328_vm0, %v1327_v16  ;;  %1122 = vmatprep.mubr.msk.bf16.mxu1 %vm1328_vm0, %v1327_v16 }
  0xab   : > { %1107 = vmatmul.mubr.bf16.gmra.mrb[8].mxu0 %v1193_v29  ;;  %1123 = vmatmul.mubr.bf16.gmra.mrb[8].mxu1 %v1197_v30 }
  0xac   : > { %1110 = vmatprep.mubr.msk.bf16.mxu0 %vm1328_vm0, %v1327_v16 }
  0xb3   : > { %1111 = vmatmul.mubr.bf16.gmra.mrb[12].mxu0 %v1195_v31 }
 0x16e   : > { %v578_v33 = vpop.f32.mrb[0].mxu0  ;;  %v610_v34 = vpop.f32.mrb[0].mxu1 }
 0x16f   : > { %v579_v35 = vadd.f32 %v1575_v32, %v578_v33  ;;  %v1100_v36 = vpop.f32.mrb[1].mxu0  ;;  %v1116_v37 = vpop.f32.mrb[1].mxu1  ;;  %v611_v21 = vadd.f32 %v1575_v32, %v610_v34  ;;  %v658_v34 = vadd.s32 96, %v1614_v23 }
 0x170   : > { %v581_v38 = vpop.f32.mrb[2].mxu0  ;;  %v613_v39 = vpop.f32.mrb[2].mxu1 }
 0x171   : > { %v1578_v40 = vmax.f32 %v579_v35, 0.0  ;;  %v582_v41 = vadd.f32 %v1575_v32, %v581_v38  ;;  %v1101_v42 = vpop.f32.mrb[3].mxu0  ;;  %v1117_v43 = vpop.f32.mrb[3].mxu1  ;;  %v614_v27 = vadd.f32 %v1575_v32, %v613_v39  ;;  %v1621_v33 = vmax.f32 %v611_v21, 0.0 }
 0x172   : > { %vm671_vm1 = vcmp.lt.s32.totalorder %v658_v34, 98 }
 0x173   : > { %v1581_v44 = vmax.f32 %v582_v41, 0.0  ;;  %v729_v45 = vmul.f32 %v1578_v40, %v1578_v40  ;;  %v1631_v41 = vmax.f32 %v614_v27, 0.0 }
 0x175   : > { %v711_v46 = vadd.f32 %v1581_v44, %v1578_v40  ;;  %v730_v47 = vmul.f32 %v1581_v44, %v1581_v44 }
 0x176   : > { %v586_v48 = vpop.f32.mrb[4].mxu0  ;;  %v618_v49 = vpop.f32.mrb[4].mxu1 }
 0x177   : > { %v742_v50 = vadd.f32 %v730_v47, %v729_v45  ;;  %v587_v51 = vadd.f32 %v1575_v32, %v586_v48  ;;  %v1104_v52 = vpop.f32.mrb[5].mxu0  ;;  %v1120_v53 = vpop.f32.mrb[5].mxu1  ;;  %v619_v38 = vadd.f32 %v1575_v32, %v618_v49  ;;  %v737_v48 = vmul.f32 %v1621_v33, %v1621_v33 }
 0x178   : > { %v589_v54 = vpop.f32.mrb[6].mxu0  ;;  %v621_v55 = vpop.f32.mrb[6].mxu1  ;;  %v738_v52 = vmul.f32 %v1631_v41, %v1631_v41 }
 0x179   : > { %v1590_v56 = vmax.f32 %v587_v51, 0.0  ;;  %v590_v57 = vadd.f32 %v1575_v32, %v589_v54  ;;  %v1105_v58 = vpop.f32.mrb[7].mxu0  ;;  %v1121_v59 = vpop.f32.mrb[7].mxu1 }
 0x17b   : > { %v712_v60 = vadd.f32 %v711_v46, %v1590_v56  ;;  %v731_v61 = vmul.f32 %v1590_v56, %v1590_v56  ;;  %v1596_v62 = vmax.f32 %v590_v57, 0.0  ;;  %v622_v46 = vadd.f32 %v1575_v32, %v621_v55 }
 0x17d   : > { %v743_v63 = vadd.f32 %v742_v50, %v731_v61  ;;  %v713_v0 = vadd.f32 %v712_v60, %v1596_v62  ;;  %v732_v1 = vmul.f32 %v1596_v62, %v1596_v62  ;;  %v1641_v50 = vmax.f32 %v619_v38, 0.0 }
 0x17e   : > { %v594_v2 = vpop.f32.mrb[8].mxu0  ;;  %v626_v3 = vpop.f32.mrb[8].mxu1  ;;  %v1646_v54 = vmax.f32 %v622_v46, 0.0 }
 0x17f   : > { %v744_v4 = vadd.f32 %v743_v63, %v732_v1  ;;  %v595_v5 = vadd.f32 %v1575_v32, %v594_v2  ;;  %v1108_v6 = vpop.f32.mrb[9].mxu0  ;;  %v1124_v7 = vpop.f32.mrb[9].mxu1  ;;  %v627_v35 = vadd.f32 %v1575_v32, %v626_v3  ;;  %v739_v55 = vmul.f32 %v1641_v50, %v1641_v50 }
 0x180   : > { %v597_v8 = vpop.f32.mrb[10].mxu0  ;;  %v629_v9 = vpop.f32.mrb[10].mxu1  ;;  %v740_v61 = vmul.f32 %v1646_v54, %v1646_v54 }
 0x181   : > { %v1602_v10 = vmax.f32 %v595_v5, 0.0  ;;  %v598_v11 = vadd.f32 %v1575_v32, %v597_v8  ;;  %v1109_v12 = vpop.f32.mrb[11].mxu0  ;;  %v1125_v13 = vpop.f32.mrb[11].mxu1  ;;  %v1637_v47 = vmax.f32 %v627_v35, 0.0 }
 0x183   : > { %v714_v15 = vadd.f32 %v713_v0, %v1602_v10  ;;  %v733_v16 = vmul.f32 %v1602_v10, %v1602_v10  ;;  %v1608_v17 = vmax.f32 %v598_v11, 0.0 }
 0x185   : > { %v745_v18 = vadd.f32 %v744_v4, %v733_v16  ;;  %v715_v19 = vadd.f32 %v714_v15, %v1608_v17  ;;  %v734_v20 = vmul.f32 %v1608_v17, %v1608_v17 }
 0x186   : > { %v602_v22 = vpop.f32.mrb[12].mxu0 }
 0x187   : > { %v746_v24 = vadd.f32 %v745_v18, %v734_v20  ;;  %v603_v25 = vadd.f32 %v1575_v32, %v602_v22  ;;  %v1112_v26 = vpop.f32.mrb[13].mxu0 }
 0x188   : > { %v605_v28 = vpop.f32.mrb[14].mxu0 }
 0x189   : > { %v1618_v29 = vmax.f32 %v603_v25, 0.0  ;;  %v606_v30 = vadd.f32 %v1575_v32, %v605_v28  ;;  %v1113_v31 = vpop.f32.mrb[15].mxu0  ;;  %v710_v32 = vsel %vm671_vm1, %v1637_v47, 0.0 }
 0x18a   : > { %v741_v0 = vmul.f32 %v710_v32, %v1637_v47 }
 0x18b   : > { %v716_v36 = vadd.f32 %v715_v19, %v1618_v29  ;;  %v735_v37 = vmul.f32 %v1618_v29, %v1618_v29  ;;  %v1629_v39 = vmax.f32 %v606_v30, 0.0 }
 0x18d   : > { %v747_v42 = vadd.f32 %v746_v24, %v735_v37  ;;  %v717_v43 = vadd.f32 %v716_v36, %v1629_v39  ;;  %v736_v45 = vmul.f32 %v1629_v39, %v1629_v39 }
 0x18f   : > { %v718_v49 = vadd.f32 %v717_v43, %v1621_v33  ;;  %v748_v51 = vadd.f32 %v747_v42, %v736_v45  ;;  %v1063_v43 = vld [vmem:[%s382_s21] ss:$0 sm:$0xff] }
 0x191   : > { %v749_v53 = vadd.f32 %v748_v51, %v737_v48  ;;  %v719_v57 = vadd.f32 %v718_v49, %v1631_v41 }
 0x193   : > { %v720_v58 = vadd.f32 %v719_v57, %v1641_v50  ;;  %v750_v59 = vadd.f32 %v749_v53, %v738_v52 }
 0x195   : > { %v721_v60 = vadd.f32 %v720_v58, %v1646_v54  ;;  %v751_v63 = vadd.f32 %v750_v59, %v739_v55 }
 0x197   : > { %v752_v1 = vadd.f32 %v751_v63, %v740_v61  ;;  %v722_v2 = vadd.f32 %v721_v60, %v710_v32 }
 0x199   : > { %v723_v3 = vrot.slane %v722_v2, 4  ;;  %v753_v4 = vadd.f32 %v752_v1, %v741_v0 }
 0x19b   : > { %v724_v5 = vadd.f32 %v723_v3, %v722_v2  ;;  %v754_v6 = vrot.slane %v753_v4, 4 }
 0x19d   : > { %v725_v7 = vrot.slane %v724_v5, 2  ;;  %v755_v8 = vadd.f32 %v754_v6, %v753_v4 }
 0x19f   : > { %v726_v9 = vadd.f32 %v725_v7, %v724_v5  ;;  %v756_v11 = vrot.slane %v755_v8, 2 }
 0x1a1   : > { %v727_v12 = vrot.slane %v726_v9, 1  ;;  %v757_v13 = vadd.f32 %v756_v11, %v755_v8 }
 0x1a3   : > { %v728_v14 = vadd.f32 %v727_v12, %v726_v9  ;;  %v758_v15 = vrot.slane %v757_v13, 1 }
 0x1a5   : > { %v759_v16 = vadd.f32 %v758_v15, %v757_v13  ;;  %v760_v18 = vmul.f32 0.010204081, %v728_v14 }
 0x1a7   : > { %v761_v19 = vmul.f32 0.010204081, %v759_v16  ;;  %v762_v20 = vmul.f32 %v760_v18, %v760_v18  ;;  %v769_v21 = vsub.f32 %v1578_v40, %v760_v18  ;;  %v770_v22 = vsub.f32 %v1581_v44, %v760_v18 }
 0x1a8   : > { %v771_v24 = vsub.f32 %v1590_v56, %v760_v18  ;;  %v772_v25 = vsub.f32 %v1596_v62, %v760_v18  ;;  %v773_v26 = vsub.f32 %v1602_v10, %v760_v18  ;;  %v774_v27 = vsub.f32 %v1608_v17, %v760_v18  ;;  %v765_v17 = vld [vmem:[%s374_s17] sm:$0x1] }
 0x1a9   : > { %v763_v28 = vsub.f32 %v761_v19, %v762_v20  ;;  %v775_v30 = vsub.f32 %v1618_v29, %v760_v18  ;;  %v776_v31 = vsub.f32 %v1629_v39, %v760_v18  ;;  %v777_v35 = vsub.f32 %v1621_v33, %v760_v18 }
 0x1aa   : > { %v778_v40 = vsub.f32 %v1631_v41, %v760_v18  ;;  %v779_v44 = vsub.f32 %v1641_v50, %v760_v18  ;;  %v780_v56 = vsub.f32 %v1646_v54, %v760_v18  ;;  %v781_v62 = vsub.f32 %v1637_v47, %v760_v18 }
 0x1ab   : > { %v764_v10 = vmax.f32 %v763_v28, 0.0  ;;  %v785_v29 = vsub.s32 0, %v1614_v23 }
 0x1ad   : > { %v766_v34 = vadd.f32 1e-05, %v764_v10 }
 0x1af   : > { %1198 = vrsqrt.f32 %v766_v34 }
 0x1b9   : > { %v1199_v36 = vpop.eup %1198 }
 0x1ba   : > { %v768_v37 = vmul.f32 %v1199_v36, %v765_v17 }
 0x1bc   : > { %v786_v33 = vrot.slane %v768_v37, %v785_v29 }
 0x1be   : > { %v788_v38 = vmul.f32 %v786_v33, %v769_v21  ;;  %v789_v39 = vmul.f32 %v786_v33, %v770_v22  ;;  %v790_v41 = vmul.f32 %v786_v33, %v771_v24  ;;  %v791_v42 = vmul.f32 %v786_v33, %v772_v25 }
 0x1bf   : > { %v792_v45 = vmul.f32 %v786_v33, %v773_v26  ;;  %v793_v46 = vmul.f32 %v786_v33, %v774_v27  ;;  %v794_v47 = vmul.f32 %v786_v33, %v775_v30  ;;  %v795_v48 = vmul.f32 %v786_v33, %v776_v31 }
 0x1c0   : > { %v796_v50 = vmul.f32 %v786_v33, %v777_v35  ;;  %v797_v49 = vmul.f32 %v786_v33, %v778_v40  ;;  %v798_v51 = vmul.f32 %v786_v33, %v779_v44  ;;  %v799_v52 = vmul.f32 %v786_v33, %v780_v56 }
 0x1c1   : > { %v800_v53 = vmul.f32 %v786_v33, %v781_v62  ;;  %v808_v23 = vadd.f32 %v1063_v43, %v788_v38  ;;  %v809_v54 = vadd.f32 %v1063_v43, %v789_v39  ;;  %v810_v57 = vadd.f32 %v1063_v43, %v790_v41 }
 0x1c2   : > { %v811_v32 = vadd.f32 %v1063_v43, %v791_v42  ;;  %v812_v55 = vadd.f32 %v1063_v43, %v792_v45  ;;  %v813_v58 = vadd.f32 %v1063_v43, %v793_v46  ;;  %v814_v59 = vadd.f32 %v1063_v43, %v794_v47 }
 0x1c3   : > { %v815_v60 = vadd.f32 %v1063_v43, %v795_v48  ;;  %v816_v61 = vadd.f32 %v1063_v43, %v796_v50  ;;  %v817_v63 = vadd.f32 %v1063_v43, %v797_v49  ;;  %v818_v0 = vadd.f32 %v1063_v43, %v798_v51  ;;  %821 = vst [vmem:[%s1675_s10] sm:$0xff] %v808_v23  ;;  %840 = sbr.rel (!%p1733_p9) target bundleno = 466 (0x1d2), region = 97 }
 0x1c4   : > { %822 = vst [vmem:[%s1675_s10 + $0x8] sm:$0xff] %v809_v54  ;;  %823 = vst [vmem:[%s1675_s10 + $0x10] sm:$0xff] %v810_v57  ;;  %v819_v1 = vadd.f32 %v1063_v43, %v799_v52  ;;  %v820_v2 = vadd.f32 %v1063_v43, %v800_v53 }
 0x1c5   : > { %824 = vst [vmem:[%s1675_s10 + $0x18] sm:$0xff] %v811_v32  ;;  %825 = vst [vmem:[%s1675_s10 + $0x20] sm:$0xff] %v812_v55 }
 0x1c6   : > { %826 = vst [vmem:[%s1675_s10 + $0x28] sm:$0xff] %v813_v58  ;;  %827 = vst [vmem:[%s1675_s10 + $0x30] sm:$0xff] %v814_v59 }
 0x1c7   : > { %828 = vst [vmem:[%s1675_s10 + $0x38] sm:$0xff] %v815_v60  ;;  %829 = vst [vmem:[%s1675_s10 + $0x40] sm:$0xff] %v816_v61 }
 0x1c8   : > { %830 = vst [vmem:[%s1675_s10 + $0x48] sm:$0xff] %v817_v63  ;;  %831 = vst [vmem:[%s1675_s10 + $0x50] sm:$0xff] %v818_v0 }
 0x1c9   : > { %832 = vst [vmem:[%s1675_s10 + $0x58] sm:$0xff] %v819_v1  ;;  %833 = vst [vmem:[%s1675_s10 + $0x60] sm:$0xff] %v820_v2 }
 0x1ca   : > { %v894_v3 = vld [vmem:[%s1675_s10] sm:$0xff] }
 0x1cb   : > { %v896_v4 = vld [vmem:[%s1675_s10 + $0x8] sm:$0xff]  ;;  %v898_v5 = vld [vmem:[%s1675_s10 + $0x10] sm:$0xff]  ;;  %895 = vst [vmem:[%s842_s14] sm:$0xff] %v894_v3 }
 0x1cc   : > { %v900_v6 = vld [vmem:[%s1675_s10 + $0x18] sm:$0xff]  ;;  %v902_v7 = vld [vmem:[%s1675_s10 + $0x20] sm:$0xff]  ;;  %897 = vst [vmem:[%s842_s14 + $0x10] sm:$0xff] %v896_v4  ;;  %899 = vst [vmem:[%s842_s14 + $0x20] sm:$0xff] %v898_v5 }
 0x1cd   : > { %v904_v8 = vld [vmem:[%s1675_s10 + $0x28] sm:$0xff]  ;;  %901 = vst [vmem:[%s842_s14 + $0x30] sm:$0xff] %v900_v6  ;;  %903 = vst [vmem:[%s842_s14 + $0x40] sm:$0xff] %v902_v7  ;;  %v906_v9 = vld [vmem:[%s1675_s10 + $0x30] sm:$0xff] }
 0x1ce   : > { %905 = vst [vmem:[%s842_s14 + $0x50] sm:$0xff] %v904_v8  ;;  %v908_v11 = vld [vmem:[%s1675_s10 + $0x38] sm:$0xff]  ;;  %v910_v12 = vld [vmem:[%s1675_s10 + $0x40] sm:$0xff]  ;;  %907 = vst [vmem:[%s842_s14 + $0x60] sm:$0xff] %v906_v9 }
 0x1cf   : > { %909 = vst [vmem:[%s842_s14 + $0x70] sm:$0xff] %v908_v11  ;;  %911 = vst [vmem:[%s842_s14 + $0x80] sm:$0xff] %v910_v12  ;;  %v912_v13 = vld [vmem:[%s1675_s10 + $0x48] sm:$0xff]  ;;  %v914_v14 = vld [vmem:[%s1675_s10 + $0x50] sm:$0xff] }
 0x1d0   : > { %v916_v15 = vld [vmem:[%s1675_s10 + $0x58] sm:$0xff]  ;;  %913 = vst [vmem:[%s842_s14 + $0x90] sm:$0xff] %v912_v13  ;;  %915 = vst [vmem:[%s842_s14 + $0xa0] sm:$0xff] %v914_v14  ;;  %v918_v16 = vld [vmem:[%s1675_s10 + $0x60] sm:$0xff] }
 0x1d1   : > { %917 = vst [vmem:[%s842_s14 + $0xb0] sm:$0xff] %v916_v15  ;;  %919 = vst [vmem:[%s842_s14 + $0xc0] sm:$0xff] %v918_v16 }
 0x1d2 PF: > { %p18_p10 = scmp.ge.s32.totalorder %s1381_s23, 4   ;;  %s1734_s18 = smov %s1314_s19 }
 0x1d3   : > { %s1735_s19 = smov %s1318_s20  ;;  %s1736_s20 = smov %s1391_s26 }
 0x1d4   : > { %s1737_s21 = smov %s1381_s23  ;;  %20 = sbr.rel (!%p18_p10) target bundleno = 5 (0x5), region = 191 }
 0x1db   :  { %935 = vsyncpa [#allocation4], 1 }
 0x1dc   :  { %937 = vsyncpa [#allocation4 + $0x1], 1 }
 0x1dd   :  { %938 = vsyncpa [#allocation6], 1 }
 0x1de   :  { %940 = vsyncpa [#allocation6 + $0x1], 1 }

// kernel: cnn_bn_forward.5
= control target key start
LH: loop header
LB: loop body
LE: loop exit
PB: predicated region body
PF: predicated region fallthrough
CT: control target
= control target key end

     0   :  { %s5768_s18 = smov 0   ;;  %s5770_s19 = smov 0   ;;  %s7081_s0 = inlined_call_operand.vmem [shape: bf16[56,2304], index: 0, kind: input, shape index: {}]   ;;  %s7082_s1 = inlined_call_operand.vmem [shape: bf16[2304,512], index: 1, kind: input, shape index: {}]   ;;  %s7083_s2 = inlined_call_operand.vmem [shape: f32[1,512], index: 2, kind: input, shape index: {}]   ;;  %s7084_s3 = inlined_call_operand.vmem [shape: f32[1,512], index: 3, kind: input, shape index: {}]   ;;  %s7085_s4 = inlined_call_operand.vmem [shape: f32[1,512], index: 4, kind: input, shape index: {}]   ;;  %s7086_s5 = inlined_call_operand.vmem [shape: f32[56,512], index: 5, kind: output, shape index: {}]  }
   0x1   :  { %s5772_s20 = smov 0  }
   0x2 LB: > { %s5784_s21 = sadd.s32 4294967295, %s5735_s20   ;;  %s5787_s22 = sadd.s32 1, %s5735_s20   ;;  %s5735_s20 = sphi %s5772_s20, %s7090_s20   ;;  %s5731_s19 = sphi %s5770_s19, %s7089_s19   ;;  %s5727_s18 = sphi %s5768_s18, %s7088_s18  }
   0x3   : > { %s40_s23 = ssub.s32 %s5735_s20, %s5787_s22  ;;  %s43_s24 = sadd.s32 1, %s5731_s19 }
   0x4   : > { %p41_p0 = scmp.eq.s32.totalorder %s40_s23, 0  ;;  %p50_p1 = scmp.ne.s32.totalorder %s5731_s19, %s5727_s18 }
   0x5   : > { %p51_p2 = scmp.eq.s32.totalorder %s5735_s20, 0  ;;  %p158_p3 = scmp.eq.s32.totalorder %s5784_s21, 1 }
   0x6   : > { %s5797_s25 = scalar_select %p41_p0, %s5731_s19, %s43_s24  }
   0x7   : > { %p52_p4 = por %p51_p2, %p50_p1  ;;  %p5799_p5 = por %p158_p3, %p50_p1 }
   0x8   : > { %p4607_p6 = scmp.ge.s32.totalorder %s5735_s20, 2 }
   0xa   : > { %183 = sbr.rel (%p4607_p6) target bundleno = 165 (0xa5), region = 20 }
  0x11   : > { %186 = sbr.rel (!%p52_p4) target bundleno = 165 (0xa5), region = 24  ;;  %s188_s27 = sand.u32 (%p52_p4), 1, %s5731_s19  }
  0x12   : > { %s4978_s28 = sshll.u32 (%p52_p4), %s5735_s20, 3  ;;  %s5150_s29 = smul.u32 (%p52_p4), 2304, %s188_s27 }
  0x13   : > { %s5809_s7 = scalar_lea.vmem (%p52_p4), %s7082_s1, %s4978_s28 }
  0x14   : > { %v795_v0 = vld [vmem:[%s5809_s7] sm:$0xff] (%p52_p4)  ;;  %v797_v1 = vld [vmem:[%s5809_s7 + $0x10] sm:$0xff] (%p52_p4)  ;;  %s5817_s8 = scalar_lea.vmem (%p52_p4), [#allocation2], %s5150_s29 }
  0x15   : > { %v799_v2 = vld [vmem:[%s5809_s7 + $0x20] sm:$0xff] (%p52_p4)  ;;  %v801_v3 = vld [vmem:[%s5809_s7 + $0x30] sm:$0xff] (%p52_p4)  ;;  %796 = vst [vmem:[%s5817_s8] sm:$0xff] (%p52_p4), %v795_v0  ;;  %798 = vst [vmem:[%s5817_s8 + $0x8] sm:$0xff] (%p52_p4), %v797_v1 }
  0x16   : > { %v803_v4 = vld [vmem:[%s5809_s7 + $0x40] sm:$0xff] (%p52_p4)  ;;  %v805_v5 = vld [vmem:[%s5809_s7 + $0x50] sm:$0xff] (%p52_p4)  ;;  %800 = vst [vmem:[%s5817_s8 + $0x10] sm:$0xff] (%p52_p4), %v799_v2  ;;  %802 = vst [vmem:[%s5817_s8 + $0x18] sm:$0xff] (%p52_p4), %v801_v3 }
  0x17   : > { %804 = vst [vmem:[%s5817_s8 + $0x20] sm:$0xff] (%p52_p4), %v803_v4  ;;  %806 = vst [vmem:[%s5817_s8 + $0x28] sm:$0xff] (%p52_p4), %v805_v5  ;;  %v807_v6 = vld [vmem:[%s5809_s7 + $0x60] sm:$0xff] (%p52_p4)  ;;  %v809_v7 = vld [vmem:[%s5809_s7 + $0x70] sm:$0xff] (%p52_p4) }
  0x18   : > { %v811_v8 = vld [vmem:[%s5809_s7 + $0x80] sm:$0xff]  ;;  %808 = vst [vmem:[%s5817_s8 + $0x30] sm:$0xff] %v807_v6  ;;  %810 = vst [vmem:[%s5817_s8 + $0x38] sm:$0xff] %v809_v7  ;;  %v813_v9 = vld [vmem:[%s5809_s7 + $0x90] sm:$0xff] }
  0x19   : > { %812 = vst [vmem:[%s5817_s8 + $0x40] sm:$0xff] %v811_v8  ;;  %v815_v10 = vld [vmem:[%s5809_s7 + $0xa0] sm:$0xff]  ;;  %v817_v11 = vld [vmem:[%s5809_s7 + $0xb0] sm:$0xff]  ;;  %814 = vst [vmem:[%s5817_s8 + $0x48] sm:$0xff] %v813_v9 }
  0x1a   : > { %816 = vst [vmem:[%s5817_s8 + $0x50] sm:$0xff] %v815_v10  ;;  %818 = vst [vmem:[%s5817_s8 + $0x58] sm:$0xff] %v817_v11  ;;  %v819_v12 = vld [vmem:[%s5809_s7 + $0xc0] sm:$0xff]  ;;  %v821_v13 = vld [vmem:[%s5809_s7 + $0xd0] sm:$0xff] }
  0x1b   : > { %v823_v14 = vld [vmem:[%s5809_s7 + $0xe0] sm:$0xff]  ;;  %820 = vst [vmem:[%s5817_s8 + $0x60] sm:$0xff] %v819_v12  ;;  %822 = vst [vmem:[%s5817_s8 + $0x68] sm:$0xff] %v821_v13  ;;  %v825_v15 = vld [vmem:[%s5809_s7 + $0xf0] sm:$0xff] }
  0x1c   : > { %824 = vst [vmem:[%s5817_s8 + $0x70] sm:$0xff] %v823_v14  ;;  %v827_v16 = vld [vmem:[%s5809_s7 + $0x100] sm:$0xff]  ;;  %v829_v17 = vld [vmem:[%s5809_s7 + $0x110] sm:$0xff]  ;;  %826 = vst [vmem:[%s5817_s8 + $0x78] sm:$0xff] %v825_v15 }
  0x1d   : > { %828 = vst [vmem:[%s5817_s8 + $0x80] sm:$0xff] %v827_v16  ;;  %830 = vst [vmem:[%s5817_s8 + $0x88] sm:$0xff] %v829_v17  ;;  %v831_v18 = vld [vmem:[%s5809_s7 + $0x120] sm:$0xff]  ;;  %v833_v19 = vld [vmem:[%s5809_s7 + $0x130] sm:$0xff] }
  0x1e   : > { %v835_v20 = vld [vmem:[%s5809_s7 + $0x140] sm:$0xff]  ;;  %832 = vst [vmem:[%s5817_s8 + $0x90] sm:$0xff] %v831_v18  ;;  %834 = vst [vmem:[%s5817_s8 + $0x98] sm:$0xff] %v833_v19  ;;  %v837_v21 = vld [vmem:[%s5809_s7 + $0x150] sm:$0xff] }
  0x1f   : > { %836 = vst [vmem:[%s5817_s8 + $0xa0] sm:$0xff] %v835_v20  ;;  %v839_v22 = vld [vmem:[%s5809_s7 + $0x160] sm:$0xff]  ;;  %v841_v23 = vld [vmem:[%s5809_s7 + $0x170] sm:$0xff]  ;;  %838 = vst [vmem:[%s5817_s8 + $0xa8] sm:$0xff] %v837_v21 }
  0x20   : > { %840 = vst [vmem:[%s5817_s8 + $0xb0] sm:$0xff] %v839_v22  ;;  %842 = vst [vmem:[%s5817_s8 + $0xb8] sm:$0xff] %v841_v23  ;;  %v843_v24 = vld [vmem:[%s5809_s7 + $0x180] sm:$0xff]  ;;  %v845_v25 = vld [vmem:[%s5809_s7 + $0x190] sm:$0xff] }
  0x21   : > { %v847_v26 = vld [vmem:[%s5809_s7 + $0x1a0] sm:$0xff]  ;;  %844 = vst [vmem:[%s5817_s8 + $0xc0] sm:$0xff] %v843_v24  ;;  %846 = vst [vmem:[%s5817_s8 + $0xc8] sm:$0xff] %v845_v25  ;;  %v849_v27 = vld [vmem:[%s5809_s7 + $0x1b0] sm:$0xff] }
  0x22   : > { %848 = vst [vmem:[%s5817_s8 + $0xd0] sm:$0xff] %v847_v26  ;;  %v851_v28 = vld [vmem:[%s5809_s7 + $0x1c0] sm:$0xff]  ;;  %v853_v29 = vld [vmem:[%s5809_s7 + $0x1d0] sm:$0xff]  ;;  %850 = vst [vmem:[%s5817_s8 + $0xd8] sm:$0xff] %v849_v27 }
  0x23   : > { %852 = vst [vmem:[%s5817_s8 + $0xe0] sm:$0xff] %v851_v28  ;;  %854 = vst [vmem:[%s5817_s8 + $0xe8] sm:$0xff] %v853_v29  ;;  %v855_v30 = vld [vmem:[%s5809_s7 + $0x1e0] sm:$0xff]  ;;  %v857_v31 = vld [vmem:[%s5809_s7 + $0x1f0] sm:$0xff] }
  0x24   : > { %v859_v32 = vld [vmem:[%s5809_s7 + $0x200] sm:$0xff]  ;;  %856 = vst [vmem:[%s5817_s8 + $0xf0] sm:$0xff] %v855_v30  ;;  %858 = vst [vmem:[%s5817_s8 + $0xf8] sm:$0xff] %v857_v31  ;;  %v861_v33 = vld [vmem:[%s5809_s7 + $0x210] sm:$0xff] }
  0x25   : > { %860 = vst [vmem:[%s5817_s8 + $0x100] sm:$0xff] %v859_v32  ;;  %v863_v34 = vld [vmem:[%s5809_s7 + $0x220] sm:$0xff]  ;;  %v865_v35 = vld [vmem:[%s5809_s7 + $0x230] sm:$0xff]  ;;  %862 = vst [vmem:[%s5817_s8 + $0x108] sm:$0xff] %v861_v33 }
  0x26   : > { %864 = vst [vmem:[%s5817_s8 + $0x110] sm:$0xff] %v863_v34  ;;  %866 = vst [vmem:[%s5817_s8 + $0x118] sm:$0xff] %v865_v35  ;;  %v867_v36 = vld [vmem:[%s5809_s7 + $0x240] sm:$0xff]  ;;  %v869_v37 = vld [vmem:[%s5809_s7 + $0x250] sm:$0xff] }
  0x27   : > { %v871_v38 = vld [vmem:[%s5809_s7 + $0x260] sm:$0xff]  ;;  %868 = vst [vmem:[%s5817_s8 + $0x120] sm:$0xff] %v867_v36  ;;  %870 = vst [vmem:[%s5817_s8 + $0x128] sm:$0xff] %v869_v37  ;;  %v873_v39 = vld [vmem:[%s5809_s7 + $0x270] sm:$0xff] }
  0x28   : > { %872 = vst [vmem:[%s5817_s8 + $0x130] sm:$0xff] %v871_v38  ;;  %v875_v40 = vld [vmem:[%s5809_s7 + $0x280] sm:$0xff]  ;;  %v877_v41 = vld [vmem:[%s5809_s7 + $0x290] sm:$0xff]  ;;  %874 = vst [vmem:[%s5817_s8 + $0x138] sm:$0xff] %v873_v39 }
  0x29   : > { %876 = vst [vmem:[%s5817_s8 + $0x140] sm:$0xff] %v875_v40  ;;  %878 = vst [vmem:[%s5817_s8 + $0x148] sm:$0xff] %v877_v41  ;;  %v879_v42 = vld [vmem:[%s5809_s7 + $0x2a0] sm:$0xff]  ;;  %v881_v43 = vld [vmem:[%s5809_s7 + $0x2b0] sm:$0xff] }
  0x2a   : > { %v883_v44 = vld [vmem:[%s5809_s7 + $0x2c0] sm:$0xff]  ;;  %880 = vst [vmem:[%s5817_s8 + $0x150] sm:$0xff] %v879_v42  ;;  %882 = vst [vmem:[%s5817_s8 + $0x158] sm:$0xff] %v881_v43  ;;  %v885_v45 = vld [vmem:[%s5809_s7 + $0x2d0] sm:$0xff] }
  0x2b   : > { %884 = vst [vmem:[%s5817_s8 + $0x160] sm:$0xff] %v883_v44  ;;  %v887_v46 = vld [vmem:[%s5809_s7 + $0x2e0] sm:$0xff]  ;;  %v889_v47 = vld [vmem:[%s5809_s7 + $0x2f0] sm:$0xff]  ;;  %886 = vst [vmem:[%s5817_s8 + $0x168] sm:$0xff] %v885_v45 }
  0x2c   : > { %888 = vst [vmem:[%s5817_s8 + $0x170] sm:$0xff] %v887_v46  ;;  %890 = vst [vmem:[%s5817_s8 + $0x178] sm:$0xff] %v889_v47  ;;  %v891_v48 = vld [vmem:[%s5809_s7 + $0x300] sm:$0xff]  ;;  %v893_v49 = vld [vmem:[%s5809_s7 + $0x310] sm:$0xff] }
  0x2d   : > { %v895_v50 = vld [vmem:[%s5809_s7 + $0x320] sm:$0xff]  ;;  %892 = vst [vmem:[%s5817_s8 + $0x180] sm:$0xff] %v891_v48  ;;  %894 = vst [vmem:[%s5817_s8 + $0x188] sm:$0xff] %v893_v49  ;;  %v897_v51 = vld [vmem:[%s5809_s7 + $0x330] sm:$0xff] }
  0x2e   : > { %896 = vst [vmem:[%s5817_s8 + $0x190] sm:$0xff] %v895_v50  ;;  %v899_v52 = vld [vmem:[%s5809_s7 + $0x340] sm:$0xff]  ;;  %v901_v53 = vld [vmem:[%s5809_s7 + $0x350] sm:$0xff]  ;;  %898 = vst [vmem:[%s5817_s8 + $0x198] sm:$0xff] %v897_v51 }
  0x2f   : > { %900 = vst [vmem:[%s5817_s8 + $0x1a0] sm:$0xff] %v899_v52  ;;  %902 = vst [vmem:[%s5817_s8 + $0x1a8] sm:$0xff] %v901_v53  ;;  %v903_v54 = vld [vmem:[%s5809_s7 + $0x360] sm:$0xff]  ;;  %v905_v55 = vld [vmem:[%s5809_s7 + $0x370] sm:$0xff] }
  0x30   : > { %v907_v56 = vld [vmem:[%s5809_s7 + $0x380] sm:$0xff]  ;;  %904 = vst [vmem:[%s5817_s8 + $0x1b0] sm:$0xff] %v903_v54  ;;  %906 = vst [vmem:[%s5817_s8 + $0x1b8] sm:$0xff] %v905_v55  ;;  %v909_v57 = vld [vmem:[%s5809_s7 + $0x390] sm:$0xff] }
  0x31   : > { %908 = vst [vmem:[%s5817_s8 + $0x1c0] sm:$0xff] %v907_v56  ;;  %v911_v58 = vld [vmem:[%s5809_s7 + $0x3a0] sm:$0xff]  ;;  %v913_v59 = vld [vmem:[%s5809_s7 + $0x3b0] sm:$0xff]  ;;  %910 = vst [vmem:[%s5817_s8 + $0x1c8] sm:$0xff] %v909_v57 }
  0x32   : > { %912 = vst [vmem:[%s5817_s8 + $0x1d0] sm:$0xff] %v911_v58  ;;  %914 = vst [vmem:[%s5817_s8 + $0x1d8] sm:$0xff] %v913_v59  ;;  %v915_v60 = vld [vmem:[%s5809_s7 + $0x3c0] sm:$0xff]  ;;  %v917_v61 = vld [vmem:[%s5809_s7 + $0x3d0] sm:$0xff] }
  0x33   : > { %v919_v62 = vld [vmem:[%s5809_s7 + $0x3e0] sm:$0xff]  ;;  %916 = vst [vmem:[%s5817_s8 + $0x1e0] sm:$0xff] %v915_v60  ;;  %918 = vst [vmem:[%s5817_s8 + $0x1e8] sm:$0xff] %v917_v61  ;;  %v921_v63 = vld [vmem:[%s5809_s7 + $0x3f0] sm:$0xff] }
  0x34   : > { %920 = vst [vmem:[%s5817_s8 + $0x1f0] sm:$0xff] %v919_v62  ;;  %v923_v0 = vld [vmem:[%s5809_s7 + $0x400] sm:$0xff]  ;;  %v925_v1 = vld [vmem:[%s5809_s7 + $0x410] sm:$0xff]  ;;  %922 = vst [vmem:[%s5817_s8 + $0x1f8] sm:$0xff] %v921_v63 }
  0x35   : > { %924 = vst [vmem:[%s5817_s8 + $0x200] sm:$0xff] %v923_v0  ;;  %926 = vst [vmem:[%s5817_s8 + $0x208] sm:$0xff] %v925_v1  ;;  %v927_v2 = vld [vmem:[%s5809_s7 + $0x420] sm:$0xff]  ;;  %v929_v3 = vld [vmem:[%s5809_s7 + $0x430] sm:$0xff] }
  0x36   : > { %v931_v4 = vld [vmem:[%s5809_s7 + $0x440] sm:$0xff]  ;;  %928 = vst [vmem:[%s5817_s8 + $0x210] sm:$0xff] %v927_v2  ;;  %930 = vst [vmem:[%s5817_s8 + $0x218] sm:$0xff] %v929_v3  ;;  %v933_v5 = vld [vmem:[%s5809_s7 + $0x450] sm:$0xff] }
  0x37   : > { %932 = vst [vmem:[%s5817_s8 + $0x220] sm:$0xff] %v931_v4  ;;  %v935_v6 = vld [vmem:[%s5809_s7 + $0x460] sm:$0xff]  ;;  %v937_v7 = vld [vmem:[%s5809_s7 + $0x470] sm:$0xff]  ;;  %934 = vst [vmem:[%s5817_s8 + $0x228] sm:$0xff] %v933_v5 }
  0x38   : > { %936 = vst [vmem:[%s5817_s8 + $0x230] sm:$0xff] %v935_v6  ;;  %938 = vst [vmem:[%s5817_s8 + $0x238] sm:$0xff] %v937_v7  ;;  %v939_v8 = vld [vmem:[%s5809_s7 + $0x480] sm:$0xff]  ;;  %v941_v9 = vld [vmem:[%s5809_s7 + $0x490] sm:$0xff] }
  0x39   : > { %v943_v10 = vld [vmem:[%s5809_s7 + $0x4a0] sm:$0xff]  ;;  %940 = vst [vmem:[%s5817_s8 + $0x240] sm:$0xff] %v939_v8  ;;  %942 = vst [vmem:[%s5817_s8 + $0x248] sm:$0xff] %v941_v9  ;;  %v945_v11 = vld [vmem:[%s5809_s7 + $0x4b0] sm:$0xff] }
  0x3a   : > { %944 = vst [vmem:[%s5817_s8 + $0x250] sm:$0xff] %v943_v10  ;;  %v947_v12 = vld [vmem:[%s5809_s7 + $0x4c0] sm:$0xff]  ;;  %v949_v13 = vld [vmem:[%s5809_s7 + $0x4d0] sm:$0xff]  ;;  %946 = vst [vmem:[%s5817_s8 + $0x258] sm:$0xff] %v945_v11 }
  0x3b   : > { %948 = vst [vmem:[%s5817_s8 + $0x260] sm:$0xff] %v947_v12  ;;  %950 = vst [vmem:[%s5817_s8 + $0x268] sm:$0xff] %v949_v13  ;;  %v951_v14 = vld [vmem:[%s5809_s7 + $0x4e0] sm:$0xff]  ;;  %v953_v15 = vld [vmem:[%s5809_s7 + $0x4f0] sm:$0xff] }
  0x3c   : > { %v955_v16 = vld [vmem:[%s5809_s7 + $0x500] sm:$0xff]  ;;  %952 = vst [vmem:[%s5817_s8 + $0x270] sm:$0xff] %v951_v14  ;;  %954 = vst [vmem:[%s5817_s8 + $0x278] sm:$0xff] %v953_v15  ;;  %v957_v17 = vld [vmem:[%s5809_s7 + $0x510] sm:$0xff] }
  0x3d   : > { %956 = vst [vmem:[%s5817_s8 + $0x280] sm:$0xff] %v955_v16  ;;  %v959_v18 = vld [vmem:[%s5809_s7 + $0x520] sm:$0xff]  ;;  %v961_v19 = vld [vmem:[%s5809_s7 + $0x530] sm:$0xff]  ;;  %958 = vst [vmem:[%s5817_s8 + $0x288] sm:$0xff] %v957_v17 }
  0x3e   : > { %960 = vst [vmem:[%s5817_s8 + $0x290] sm:$0xff] %v959_v18  ;;  %962 = vst [vmem:[%s5817_s8 + $0x298] sm:$0xff] %v961_v19  ;;  %v963_v20 = vld [vmem:[%s5809_s7 + $0x540] sm:$0xff]  ;;  %v965_v21 = vld [vmem:[%s5809_s7 + $0x550] sm:$0xff] }
  0x3f   : > { %v967_v22 = vld [vmem:[%s5809_s7 + $0x560] sm:$0xff]  ;;  %964 = vst [vmem:[%s5817_s8 + $0x2a0] sm:$0xff] %v963_v20  ;;  %966 = vst [vmem:[%s5817_s8 + $0x2a8] sm:$0xff] %v965_v21  ;;  %v969_v23 = vld [vmem:[%s5809_s7 + $0x570] sm:$0xff] }
  0x40   : > { %968 = vst [vmem:[%s5817_s8 + $0x2b0] sm:$0xff] %v967_v22  ;;  %v971_v24 = vld [vmem:[%s5809_s7 + $0x580] sm:$0xff]  ;;  %v973_v25 = vld [vmem:[%s5809_s7 + $0x590] sm:$0xff]  ;;  %970 = vst [vmem:[%s5817_s8 + $0x2b8] sm:$0xff] %v969_v23 }
  0x41   : > { %972 = vst [vmem:[%s5817_s8 + $0x2c0] sm:$0xff] %v971_v24  ;;  %974 = vst [vmem:[%s5817_s8 + $0x2c8] sm:$0xff] %v973_v25  ;;  %v975_v26 = vld [vmem:[%s5809_s7 + $0x5a0] sm:$0xff]  ;;  %v977_v27 = vld [vmem:[%s5809_s7 + $0x5b0] sm:$0xff] }
  0x42   : > { %v979_v28 = vld [vmem:[%s5809_s7 + $0x5c0] sm:$0xff]  ;;  %976 = vst [vmem:[%s5817_s8 + $0x2d0] sm:$0xff] %v975_v26  ;;  %978 = vst [vmem:[%s5817_s8 + $0x2d8] sm:$0xff] %v977_v27  ;;  %v981_v29 = vld [vmem:[%s5809_s7 + $0x5d0] sm:$0xff] }
  0x43   : > { %980 = vst [vmem:[%s5817_s8 + $0x2e0] sm:$0xff] %v979_v28  ;;  %v983_v30 = vld [vmem:[%s5809_s7 + $0x5e0] sm:$0xff]  ;;  %v985_v31 = vld [vmem:[%s5809_s7 + $0x5f0] sm:$0xff]  ;;  %982 = vst [vmem:[%s5817_s8 + $0x2e8] sm:$0xff] %v981_v29 }
  0x44   : > { %984 = vst [vmem:[%s5817_s8 + $0x2f0] sm:$0xff] %v983_v30  ;;  %986 = vst [vmem:[%s5817_s8 + $0x2f8] sm:$0xff] %v985_v31  ;;  %v987_v32 = vld [vmem:[%s5809_s7 + $0x600] sm:$0xff]  ;;  %v989_v33 = vld [vmem:[%s5809_s7 + $0x610] sm:$0xff] }
  0x45   : > { %v991_v34 = vld [vmem:[%s5809_s7 + $0x620] sm:$0xff]  ;;  %988 = vst [vmem:[%s5817_s8 + $0x300] sm:$0xff] %v987_v32  ;;  %990 = vst [vmem:[%s5817_s8 + $0x308] sm:$0xff] %v989_v33  ;;  %v993_v35 = vld [vmem:[%s5809_s7 + $0x630] sm:$0xff] }
  0x46   : > { %992 = vst [vmem:[%s5817_s8 + $0x310] sm:$0xff] %v991_v34  ;;  %v995_v36 = vld [vmem:[%s5809_s7 + $0x640] sm:$0xff]  ;;  %v997_v37 = vld [vmem:[%s5809_s7 + $0x650] sm:$0xff]  ;;  %994 = vst [vmem:[%s5817_s8 + $0x318] sm:$0xff] %v993_v35 }
  0x47   : > { %996 = vst [vmem:[%s5817_s8 + $0x320] sm:$0xff] %v995_v36  ;;  %998 = vst [vmem:[%s5817_s8 + $0x328] sm:$0xff] %v997_v37  ;;  %v999_v38 = vld [vmem:[%s5809_s7 + $0x660] sm:$0xff]  ;;  %v1001_v39 = vld [vmem:[%s5809_s7 + $0x670] sm:$0xff] }
  0x48   : > { %v1003_v40 = vld [vmem:[%s5809_s7 + $0x680] sm:$0xff]  ;;  %1000 = vst [vmem:[%s5817_s8 + $0x330] sm:$0xff] %v999_v38  ;;  %1002 = vst [vmem:[%s5817_s8 + $0x338] sm:$0xff] %v1001_v39  ;;  %v1005_v41 = vld [vmem:[%s5809_s7 + $0x690] sm:$0xff] }
  0x49   : > { %1004 = vst [vmem:[%s5817_s8 + $0x340] sm:$0xff] %v1003_v40  ;;  %v1007_v42 = vld [vmem:[%s5809_s7 + $0x6a0] sm:$0xff]  ;;  %v1009_v43 = vld [vmem:[%s5809_s7 + $0x6b0] sm:$0xff]  ;;  %1006 = vst [vmem:[%s5817_s8 + $0x348] sm:$0xff] %v1005_v41 }
  0x4a   : > { %1008 = vst [vmem:[%s5817_s8 + $0x350] sm:$0xff] %v1007_v42  ;;  %1010 = vst [vmem:[%s5817_s8 + $0x358] sm:$0xff] %v1009_v43  ;;  %v1011_v44 = vld [vmem:[%s5809_s7 + $0x6c0] sm:$0xff]  ;;  %v1013_v45 = vld [vmem:[%s5809_s7 + $0x6d0] sm:$0xff] }
  0x4b   : > { %v1015_v46 = vld [vmem:[%s5809_s7 + $0x6e0] sm:$0xff]  ;;  %1012 = vst [vmem:[%s5817_s8 + $0x360] sm:$0xff] %v1011_v44  ;;  %1014 = vst [vmem:[%s5817_s8 + $0x368] sm:$0xff] %v1013_v45  ;;  %v1017_v47 = vld [vmem:[%s5809_s7 + $0x6f0] sm:$0xff] }
  0x4c   : > { %1016 = vst [vmem:[%s5817_s8 + $0x370] sm:$0xff] %v1015_v46  ;;  %v1019_v48 = vld [vmem:[%s5809_s7 + $0x700] sm:$0xff]  ;;  %v1021_v49 = vld [vmem:[%s5809_s7 + $0x710] sm:$0xff]  ;;  %1018 = vst [vmem:[%s5817_s8 + $0x378] sm:$0xff] %v1017_v47 }
  0x4d   : > { %1020 = vst [vmem:[%s5817_s8 + $0x380] sm:$0xff] %v1019_v48  ;;  %1022 = vst [vmem:[%s5817_s8 + $0x388] sm:$0xff] %v1021_v49  ;;  %v1023_v50 = vld [vmem:[%s5809_s7 + $0x720] sm:$0xff]  ;;  %v1025_v51 = vld [vmem:[%s5809_s7 + $0x730] sm:$0xff] }
  0x4e   : > { %v1027_v52 = vld [vmem:[%s5809_s7 + $0x740] sm:$0xff]  ;;  %1024 = vst [vmem:[%s5817_s8 + $0x390] sm:$0xff] %v1023_v50  ;;  %1026 = vst [vmem:[%s5817_s8 + $0x398] sm:$0xff] %v1025_v51  ;;  %v1029_v53 = vld [vmem:[%s5809_s7 + $0x750] sm:$0xff] }
  0x4f   : > { %1028 = vst [vmem:[%s5817_s8 + $0x3a0] sm:$0xff] %v1027_v52  ;;  %v1031_v54 = vld [vmem:[%s5809_s7 + $0x760] sm:$0xff]  ;;  %v1033_v55 = vld [vmem:[%s5809_s7 + $0x770] sm:$0xff]  ;;  %1030 = vst [vmem:[%s5817_s8 + $0x3a8] sm:$0xff] %v1029_v53 }
  0x50   : > { %1032 = vst [vmem:[%s5817_s8 + $0x3b0] sm:$0xff] %v1031_v54  ;;  %1034 = vst [vmem:[%s5817_s8 + $0x3b8] sm:$0xff] %v1033_v55  ;;  %v1035_v56 = vld [vmem:[%s5809_s7 + $0x780] sm:$0xff]  ;;  %v1037_v57 = vld [vmem:[%s5809_s7 + $0x790] sm:$0xff] }
  0x51   : > { %v1039_v58 = vld [vmem:[%s5809_s7 + $0x7a0] sm:$0xff]  ;;  %1036 = vst [vmem:[%s5817_s8 + $0x3c0] sm:$0xff] %v1035_v56  ;;  %1038 = vst [vmem:[%s5817_s8 + $0x3c8] sm:$0xff] %v1037_v57  ;;  %v1041_v59 = vld [vmem:[%s5809_s7 + $0x7b0] sm:$0xff] }
  0x52   : > { %1040 = vst [vmem:[%s5817_s8 + $0x3d0] sm:$0xff] %v1039_v58  ;;  %v1043_v60 = vld [vmem:[%s5809_s7 + $0x7c0] sm:$0xff]  ;;  %v1045_v61 = vld [vmem:[%s5809_s7 + $0x7d0] sm:$0xff]  ;;  %1042 = vst [vmem:[%s5817_s8 + $0x3d8] sm:$0xff] %v1041_v59 }
  0x53   : > { %1044 = vst [vmem:[%s5817_s8 + $0x3e0] sm:$0xff] %v1043_v60  ;;  %1046 = vst [vmem:[%s5817_s8 + $0x3e8] sm:$0xff] %v1045_v61  ;;  %v1047_v62 = vld [vmem:[%s5809_s7 + $0x7e0] sm:$0xff]  ;;  %v1049_v63 = vld [vmem:[%s5809_s7 + $0x7f0] sm:$0xff] }
  0x54   : > { %v1051_v0 = vld [vmem:[%s5809_s7 + $0x800] sm:$0xff]  ;;  %1048 = vst [vmem:[%s5817_s8 + $0x3f0] sm:$0xff] %v1047_v62  ;;  %1050 = vst [vmem:[%s5817_s8 + $0x3f8] sm:$0xff] %v1049_v63  ;;  %v1053_v1 = vld [vmem:[%s5809_s7 + $0x810] sm:$0xff] }
  0x55   : > { %1052 = vst [vmem:[%s5817_s8 + $0x400] sm:$0xff] %v1051_v0  ;;  %v1055_v2 = vld [vmem:[%s5809_s7 + $0x820] sm:$0xff]  ;;  %v1057_v3 = vld [vmem:[%s5809_s7 + $0x830] sm:$0xff]  ;;  %1054 = vst [vmem:[%s5817_s8 + $0x408] sm:$0xff] %v1053_v1 }
  0x56   : > { %1056 = vst [vmem:[%s5817_s8 + $0x410] sm:$0xff] %v1055_v2  ;;  %1058 = vst [vmem:[%s5817_s8 + $0x418] sm:$0xff] %v1057_v3  ;;  %v1059_v4 = vld [vmem:[%s5809_s7 + $0x840] sm:$0xff]  ;;  %v1061_v5 = vld [vmem:[%s5809_s7 + $0x850] sm:$0xff] }
  0x57   : > { %v1063_v6 = vld [vmem:[%s5809_s7 + $0x860] sm:$0xff]  ;;  %1060 = vst [vmem:[%s5817_s8 + $0x420] sm:$0xff] %v1059_v4  ;;  %1062 = vst [vmem:[%s5817_s8 + $0x428] sm:$0xff] %v1061_v5  ;;  %v1065_v7 = vld [vmem:[%s5809_s7 + $0x870] sm:$0xff] }
  0x58   : > { %1064 = vst [vmem:[%s5817_s8 + $0x430] sm:$0xff] %v1063_v6  ;;  %v1067_v8 = vld [vmem:[%s5809_s7 + $0x880] sm:$0xff]  ;;  %v1069_v9 = vld [vmem:[%s5809_s7 + $0x890] sm:$0xff]  ;;  %1066 = vst [vmem:[%s5817_s8 + $0x438] sm:$0xff] %v1065_v7 }
  0x59   : > { %1068 = vst [vmem:[%s5817_s8 + $0x440] sm:$0xff] %v1067_v8  ;;  %1070 = vst [vmem:[%s5817_s8 + $0x448] sm:$0xff] %v1069_v9  ;;  %v1071_v10 = vld [vmem:[%s5809_s7 + $0x8a0] sm:$0xff]  ;;  %v1073_v11 = vld [vmem:[%s5809_s7 + $0x8b0] sm:$0xff] }
  0x5a   : > { %v1075_v12 = vld [vmem:[%s5809_s7 + $0x8c0] sm:$0xff]  ;;  %1072 = vst [vmem:[%s5817_s8 + $0x450] sm:$0xff] %v1071_v10  ;;  %1074 = vst [vmem:[%s5817_s8 + $0x458] sm:$0xff] %v1073_v11  ;;  %v1077_v13 = vld [vmem:[%s5809_s7 + $0x8d0] sm:$0xff] }
  0x5b   : > { %1076 = vst [vmem:[%s5817_s8 + $0x460] sm:$0xff] %v1075_v12  ;;  %v1079_v14 = vld [vmem:[%s5809_s7 + $0x8e0] sm:$0xff]  ;;  %v1081_v15 = vld [vmem:[%s5809_s7 + $0x8f0] sm:$0xff]  ;;  %1078 = vst [vmem:[%s5817_s8 + $0x468] sm:$0xff] %v1077_v13 }
  0x5c   : > { %1080 = vst [vmem:[%s5817_s8 + $0x470] sm:$0xff] %v1079_v14  ;;  %1082 = vst [vmem:[%s5817_s8 + $0x478] sm:$0xff] %v1081_v15  ;;  %v1083_v16 = vld [vmem:[%s5809_s7 + $0x900] sm:$0xff]  ;;  %v1085_v17 = vld [vmem:[%s5809_s7 + $0x910] sm:$0xff] }
  0x5d   : > { %v1087_v18 = vld [vmem:[%s5809_s7 + $0x920] sm:$0xff]  ;;  %1084 = vst [vmem:[%s5817_s8 + $0x480] sm:$0xff] %v1083_v16  ;;  %1086 = vst [vmem:[%s5817_s8 + $0x488] sm:$0xff] %v1085_v17  ;;  %v1089_v19 = vld [vmem:[%s5809_s7 + $0x930] sm:$0xff] }
  0x5e   : > { %1088 = vst [vmem:[%s5817_s8 + $0x490] sm:$0xff] %v1087_v18  ;;  %v1091_v20 = vld [vmem:[%s5809_s7 + $0x940] sm:$0xff]  ;;  %v1093_v21 = vld [vmem:[%s5809_s7 + $0x950] sm:$0xff]  ;;  %1090 = vst [vmem:[%s5817_s8 + $0x498] sm:$0xff] %v1089_v19 }
  0x5f   : > { %1092 = vst [vmem:[%s5817_s8 + $0x4a0] sm:$0xff] %v1091_v20  ;;  %1094 = vst [vmem:[%s5817_s8 + $0x4a8] sm:$0xff] %v1093_v21  ;;  %v1095_v22 = vld [vmem:[%s5809_s7 + $0x960] sm:$0xff]  ;;  %v1097_v23 = vld [vmem:[%s5809_s7 + $0x970] sm:$0xff] }
  0x60   : > { %v1099_v24 = vld [vmem:[%s5809_s7 + $0x980] sm:$0xff]  ;;  %1096 = vst [vmem:[%s5817_s8 + $0x4b0] sm:$0xff] %v1095_v22  ;;  %1098 = vst [vmem:[%s5817_s8 + $0x4b8] sm:$0xff] %v1097_v23  ;;  %v1101_v25 = vld [vmem:[%s5809_s7 + $0x990] sm:$0xff] }
  0x61   : > { %1100 = vst [vmem:[%s5817_s8 + $0x4c0] sm:$0xff] %v1099_v24  ;;  %v1103_v26 = vld [vmem:[%s5809_s7 + $0x9a0] sm:$0xff]  ;;  %v1105_v27 = vld [vmem:[%s5809_s7 + $0x9b0] sm:$0xff]  ;;  %1102 = vst [vmem:[%s5817_s8 + $0x4c8] sm:$0xff] %v1101_v25 }
  0x62   : > { %1104 = vst [vmem:[%s5817_s8 + $0x4d0] sm:$0xff] %v1103_v26  ;;  %1106 = vst [vmem:[%s5817_s8 + $0x4d8] sm:$0xff] %v1105_v27  ;;  %v1107_v28 = vld [vmem:[%s5809_s7 + $0x9c0] sm:$0xff]  ;;  %v1109_v29 = vld [vmem:[%s5809_s7 + $0x9d0] sm:$0xff] }
  0x63   : > { %v1111_v30 = vld [vmem:[%s5809_s7 + $0x9e0] sm:$0xff]  ;;  %1108 = vst [vmem:[%s5817_s8 + $0x4e0] sm:$0xff] %v1107_v28  ;;  %1110 = vst [vmem:[%s5817_s8 + $0x4e8] sm:$0xff] %v1109_v29  ;;  %v1113_v31 = vld [vmem:[%s5809_s7 + $0x9f0] sm:$0xff] }
  0x64   : > { %1112 = vst [vmem:[%s5817_s8 + $0x4f0] sm:$0xff] %v1111_v30  ;;  %v1115_v32 = vld [vmem:[%s5809_s7 + $0xa00] sm:$0xff]  ;;  %v1117_v33 = vld [vmem:[%s5809_s7 + $0xa10] sm:$0xff]  ;;  %1114 = vst [vmem:[%s5817_s8 + $0x4f8] sm:$0xff] %v1113_v31 }
  0x65   : > { %1116 = vst [vmem:[%s5817_s8 + $0x500] sm:$0xff] %v1115_v32  ;;  %1118 = vst [vmem:[%s5817_s8 + $0x508] sm:$0xff] %v1117_v33  ;;  %v1119_v34 = vld [vmem:[%s5809_s7 + $0xa20] sm:$0xff]  ;;  %v1121_v35 = vld [vmem:[%s5809_s7 + $0xa30] sm:$0xff] }
  0x66   : > { %v1123_v36 = vld [vmem:[%s5809_s7 + $0xa40] sm:$0xff]  ;;  %1120 = vst [vmem:[%s5817_s8 + $0x510] sm:$0xff] %v1119_v34  ;;  %1122 = vst [vmem:[%s5817_s8 + $0x518] sm:$0xff] %v1121_v35  ;;  %v1125_v37 = vld [vmem:[%s5809_s7 + $0xa50] sm:$0xff] }
  0x67   : > { %1124 = vst [vmem:[%s5817_s8 + $0x520] sm:$0xff] %v1123_v36  ;;  %v1127_v38 = vld [vmem:[%s5809_s7 + $0xa60] sm:$0xff]  ;;  %v1129_v39 = vld [vmem:[%s5809_s7 + $0xa70] sm:$0xff]  ;;  %1126 = vst [vmem:[%s5817_s8 + $0x528] sm:$0xff] %v1125_v37 }
  0x68   : > { %1128 = vst [vmem:[%s5817_s8 + $0x530] sm:$0xff] %v1127_v38  ;;  %1130 = vst [vmem:[%s5817_s8 + $0x538] sm:$0xff] %v1129_v39  ;;  %v1131_v40 = vld [vmem:[%s5809_s7 + $0xa80] sm:$0xff]  ;;  %v1133_v41 = vld [vmem:[%s5809_s7 + $0xa90] sm:$0xff] }
  0x69   : > { %v1135_v42 = vld [vmem:[%s5809_s7 + $0xaa0] sm:$0xff]  ;;  %1132 = vst [vmem:[%s5817_s8 + $0x540] sm:$0xff] %v1131_v40  ;;  %1134 = vst [vmem:[%s5817_s8 + $0x548] sm:$0xff] %v1133_v41  ;;  %v1137_v43 = vld [vmem:[%s5809_s7 + $0xab0] sm:$0xff] }
  0x6a   : > { %1136 = vst [vmem:[%s5817_s8 + $0x550] sm:$0xff] %v1135_v42  ;;  %v1139_v44 = vld [vmem:[%s5809_s7 + $0xac0] sm:$0xff]  ;;  %v1141_v45 = vld [vmem:[%s5809_s7 + $0xad0] sm:$0xff]  ;;  %1138 = vst [vmem:[%s5817_s8 + $0x558] sm:$0xff] %v1137_v43 }
  0x6b   : > { %1140 = vst [vmem:[%s5817_s8 + $0x560] sm:$0xff] %v1139_v44  ;;  %1142 = vst [vmem:[%s5817_s8 + $0x568] sm:$0xff] %v1141_v45  ;;  %v1143_v46 = vld [vmem:[%s5809_s7 + $0xae0] sm:$0xff]  ;;  %v1145_v47 = vld [vmem:[%s5809_s7 + $0xaf0] sm:$0xff] }
  0x6c   : > { %v1147_v48 = vld [vmem:[%s5809_s7 + $0xb00] sm:$0xff]  ;;  %1144 = vst [vmem:[%s5817_s8 + $0x570] sm:$0xff] %v1143_v46  ;;  %1146 = vst [vmem:[%s5817_s8 + $0x578] sm:$0xff] %v1145_v47  ;;  %v1149_v49 = vld [vmem:[%s5809_s7 + $0xb10] sm:$0xff] }
  0x6d   : > { %1148 = vst [vmem:[%s5817_s8 + $0x580] sm:$0xff] %v1147_v48  ;;  %v1151_v50 = vld [vmem:[%s5809_s7 + $0xb20] sm:$0xff]  ;;  %v1153_v51 = vld [vmem:[%s5809_s7 + $0xb30] sm:$0xff]  ;;  %1150 = vst [vmem:[%s5817_s8 + $0x588] sm:$0xff] %v1149_v49 }
  0x6e   : > { %1152 = vst [vmem:[%s5817_s8 + $0x590] sm:$0xff] %v1151_v50  ;;  %1154 = vst [vmem:[%s5817_s8 + $0x598] sm:$0xff] %v1153_v51  ;;  %v1155_v52 = vld [vmem:[%s5809_s7 + $0xb40] sm:$0xff]  ;;  %v1157_v53 = vld [vmem:[%s5809_s7 + $0xb50] sm:$0xff] }
  0x6f   : > { %v1159_v54 = vld [vmem:[%s5809_s7 + $0xb60] sm:$0xff]  ;;  %1156 = vst [vmem:[%s5817_s8 + $0x5a0] sm:$0xff] %v1155_v52  ;;  %1158 = vst [vmem:[%s5817_s8 + $0x5a8] sm:$0xff] %v1157_v53  ;;  %v1161_v55 = vld [vmem:[%s5809_s7 + $0xb70] sm:$0xff] }
  0x70   : > { %1160 = vst [vmem:[%s5817_s8 + $0x5b0] sm:$0xff] %v1159_v54  ;;  %v1163_v56 = vld [vmem:[%s5809_s7 + $0xb80] sm:$0xff]  ;;  %v1165_v57 = vld [vmem:[%s5809_s7 + $0xb90] sm:$0xff]  ;;  %1162 = vst [vmem:[%s5817_s8 + $0x5b8] sm:$0xff] %v1161_v55 }
  0x71   : > { %1164 = vst [vmem:[%s5817_s8 + $0x5c0] sm:$0xff] %v1163_v56  ;;  %1166 = vst [vmem:[%s5817_s8 + $0x5c8] sm:$0xff] %v1165_v57  ;;  %v1167_v58 = vld [vmem:[%s5809_s7 + $0xba0] sm:$0xff]  ;;  %v1169_v59 = vld [vmem:[%s5809_s7 + $0xbb0] sm:$0xff] }
  0x72   : > { %v1171_v60 = vld [vmem:[%s5809_s7 + $0xbc0] sm:$0xff]  ;;  %1168 = vst [vmem:[%s5817_s8 + $0x5d0] sm:$0xff] %v1167_v58  ;;  %1170 = vst [vmem:[%s5817_s8 + $0x5d8] sm:$0xff] %v1169_v59  ;;  %v1173_v61 = vld [vmem:[%s5809_s7 + $0xbd0] sm:$0xff] }
  0x73   : > { %1172 = vst [vmem:[%s5817_s8 + $0x5e0] sm:$0xff] %v1171_v60  ;;  %v1175_v62 = vld [vmem:[%s5809_s7 + $0xbe0] sm:$0xff]  ;;  %v1177_v63 = vld [vmem:[%s5809_s7 + $0xbf0] sm:$0xff]  ;;  %1174 = vst [vmem:[%s5817_s8 + $0x5e8] sm:$0xff] %v1173_v61 }
  0x74   : > { %1176 = vst [vmem:[%s5817_s8 + $0x5f0] sm:$0xff] %v1175_v62  ;;  %1178 = vst [vmem:[%s5817_s8 + $0x5f8] sm:$0xff] %v1177_v63  ;;  %v1179_v0 = vld [vmem:[%s5809_s7 + $0xc00] sm:$0xff]  ;;  %v1181_v1 = vld [vmem:[%s5809_s7 + $0xc10] sm:$0xff] }
  0x75   : > { %v1183_v2 = vld [vmem:[%s5809_s7 + $0xc20] sm:$0xff]  ;;  %1180 = vst [vmem:[%s5817_s8 + $0x600] sm:$0xff] %v1179_v0  ;;  %1182 = vst [vmem:[%s5817_s8 + $0x608] sm:$0xff] %v1181_v1  ;;  %v1185_v3 = vld [vmem:[%s5809_s7 + $0xc30] sm:$0xff] }
  0x76   : > { %1184 = vst [vmem:[%s5817_s8 + $0x610] sm:$0xff] %v1183_v2  ;;  %v1187_v4 = vld [vmem:[%s5809_s7 + $0xc40] sm:$0xff]  ;;  %v1189_v5 = vld [vmem:[%s5809_s7 + $0xc50] sm:$0xff]  ;;  %1186 = vst [vmem:[%s5817_s8 + $0x618] sm:$0xff] %v1185_v3 }
  0x77   : > { %1188 = vst [vmem:[%s5817_s8 + $0x620] sm:$0xff] %v1187_v4  ;;  %1190 = vst [vmem:[%s5817_s8 + $0x628] sm:$0xff] %v1189_v5  ;;  %v1191_v6 = vld [vmem:[%s5809_s7 + $0xc60] sm:$0xff]  ;;  %v1193_v7 = vld [vmem:[%s5809_s7 + $0xc70] sm:$0xff] }
  0x78   : > { %v1195_v8 = vld [vmem:[%s5809_s7 + $0xc80] sm:$0xff]  ;;  %1192 = vst [vmem:[%s5817_s8 + $0x630] sm:$0xff] %v1191_v6  ;;  %1194 = vst [vmem:[%s5817_s8 + $0x638] sm:$0xff] %v1193_v7  ;;  %v1197_v9 = vld [vmem:[%s5809_s7 + $0xc90] sm:$0xff] }
  0x79   : > { %1196 = vst [vmem:[%s5817_s8 + $0x640] sm:$0xff] %v1195_v8  ;;  %v1199_v10 = vld [vmem:[%s5809_s7 + $0xca0] sm:$0xff]  ;;  %v1201_v11 = vld [vmem:[%s5809_s7 + $0xcb0] sm:$0xff]  ;;  %1198 = vst [vmem:[%s5817_s8 + $0x648] sm:$0xff] %v1197_v9 }
  0x7a   : > { %1200 = vst [vmem:[%s5817_s8 + $0x650] sm:$0xff] %v1199_v10  ;;  %1202 = vst [vmem:[%s5817_s8 + $0x658] sm:$0xff] %v1201_v11  ;;  %v1203_v12 = vld [vmem:[%s5809_s7 + $0xcc0] sm:$0xff]  ;;  %v1205_v13 = vld [vmem:[%s5809_s7 + $0xcd0] sm:$0xff] }
  0x7b   : > { %v1207_v14 = vld [vmem:[%s5809_s7 + $0xce0] sm:$0xff]  ;;  %1204 = vst [vmem:[%s5817_s8 + $0x660] sm:$0xff] %v1203_v12  ;;  %1206 = vst [vmem:[%s5817_s8 + $0x668] sm:$0xff] %v1205_v13  ;;  %v1209_v15 = vld [vmem:[%s5809_s7 + $0xcf0] sm:$0xff] }
  0x7c   : > { %1208 = vst [vmem:[%s5817_s8 + $0x670] sm:$0xff] %v1207_v14  ;;  %v1211_v16 = vld [vmem:[%s5809_s7 + $0xd00] sm:$0xff]  ;;  %v1213_v17 = vld [vmem:[%s5809_s7 + $0xd10] sm:$0xff]  ;;  %1210 = vst [vmem:[%s5817_s8 + $0x678] sm:$0xff] %v1209_v15 }
  0x7d   : > { %1212 = vst [vmem:[%s5817_s8 + $0x680] sm:$0xff] %v1211_v16  ;;  %1214 = vst [vmem:[%s5817_s8 + $0x688] sm:$0xff] %v1213_v17  ;;  %v1215_v18 = vld [vmem:[%s5809_s7 + $0xd20] sm:$0xff]  ;;  %v1217_v19 = vld [vmem:[%s5809_s7 + $0xd30] sm:$0xff] }
  0x7e   : > { %v1219_v20 = vld [vmem:[%s5809_s7 + $0xd40] sm:$0xff]  ;;  %1216 = vst [vmem:[%s5817_s8 + $0x690] sm:$0xff] %v1215_v18  ;;  %1218 = vst [vmem:[%s5817_s8 + $0x698] sm:$0xff] %v1217_v19  ;;  %v1221_v21 = vld [vmem:[%s5809_s7 + $0xd50] sm:$0xff] }
  0x7f   : > { %1220 = vst [vmem:[%s5817_s8 + $0x6a0] sm:$0xff] %v1219_v20  ;;  %v1223_v22 = vld [vmem:[%s5809_s7 + $0xd60] sm:$0xff]  ;;  %v1225_v23 = vld [vmem:[%s5809_s7 + $0xd70] sm:$0xff]  ;;  %1222 = vst [vmem:[%s5817_s8 + $0x6a8] sm:$0xff] %v1221_v21 }
  0x80   : > { %1224 = vst [vmem:[%s5817_s8 + $0x6b0] sm:$0xff] %v1223_v22  ;;  %1226 = vst [vmem:[%s5817_s8 + $0x6b8] sm:$0xff] %v1225_v23  ;;  %v1227_v24 = vld [vmem:[%s5809_s7 + $0xd80] sm:$0xff]  ;;  %v1229_v25 = vld [vmem:[%s5809_s7 + $0xd90] sm:$0xff] }
  0x81   : > { %v1231_v26 = vld [vmem:[%s5809_s7 + $0xda0] sm:$0xff]  ;;  %1228 = vst [vmem:[%s5817_s8 + $0x6c0] sm:$0xff] %v1227_v24  ;;  %1230 = vst [vmem:[%s5817_s8 + $0x6c8] sm:$0xff] %v1229_v25  ;;  %v1233_v27 = vld [vmem:[%s5809_s7 + $0xdb0] sm:$0xff] }
  0x82   : > { %1232 = vst [vmem:[%s5817_s8 + $0x6d0] sm:$0xff] %v1231_v26  ;;  %v1235_v28 = vld [vmem:[%s5809_s7 + $0xdc0] sm:$0xff]  ;;  %v1237_v29 = vld [vmem:[%s5809_s7 + $0xdd0] sm:$0xff]  ;;  %1234 = vst [vmem:[%s5817_s8 + $0x6d8] sm:$0xff] %v1233_v27 }
  0x83   : > { %1236 = vst [vmem:[%s5817_s8 + $0x6e0] sm:$0xff] %v1235_v28  ;;  %1238 = vst [vmem:[%s5817_s8 + $0x6e8] sm:$0xff] %v1237_v29  ;;  %v1239_v30 = vld [vmem:[%s5809_s7 + $0xde0] sm:$0xff]  ;;  %v1241_v31 = vld [vmem:[%s5809_s7 + $0xdf0] sm:$0xff] }
  0x84   : > { %v1243_v32 = vld [vmem:[%s5809_s7 + $0xe00] sm:$0xff]  ;;  %1240 = vst [vmem:[%s5817_s8 + $0x6f0] sm:$0xff] %v1239_v30  ;;  %1242 = vst [vmem:[%s5817_s8 + $0x6f8] sm:$0xff] %v1241_v31  ;;  %v1245_v33 = vld [vmem:[%s5809_s7 + $0xe10] sm:$0xff] }
  0x85   : > { %1244 = vst [vmem:[%s5817_s8 + $0x700] sm:$0xff] %v1243_v32  ;;  %v1247_v34 = vld [vmem:[%s5809_s7 + $0xe20] sm:$0xff]  ;;  %v1249_v35 = vld [vmem:[%s5809_s7 + $0xe30] sm:$0xff]  ;;  %1246 = vst [vmem:[%s5817_s8 + $0x708] sm:$0xff] %v1245_v33 }
  0x86   : > { %1248 = vst [vmem:[%s5817_s8 + $0x710] sm:$0xff] %v1247_v34  ;;  %1250 = vst [vmem:[%s5817_s8 + $0x718] sm:$0xff] %v1249_v35  ;;  %v1251_v36 = vld [vmem:[%s5809_s7 + $0xe40] sm:$0xff]  ;;  %v1253_v37 = vld [vmem:[%s5809_s7 + $0xe50] sm:$0xff] }
  0x87   : > { %v1255_v38 = vld [vmem:[%s5809_s7 + $0xe60] sm:$0xff]  ;;  %1252 = vst [vmem:[%s5817_s8 + $0x720] sm:$0xff] %v1251_v36  ;;  %1254 = vst [vmem:[%s5817_s8 + $0x728] sm:$0xff] %v1253_v37  ;;  %v1257_v39 = vld [vmem:[%s5809_s7 + $0xe70] sm:$0xff] }
  0x88   : > { %1256 = vst [vmem:[%s5817_s8 + $0x730] sm:$0xff] %v1255_v38  ;;  %v1259_v40 = vld [vmem:[%s5809_s7 + $0xe80] sm:$0xff]  ;;  %v1261_v41 = vld [vmem:[%s5809_s7 + $0xe90] sm:$0xff]  ;;  %1258 = vst [vmem:[%s5817_s8 + $0x738] sm:$0xff] %v1257_v39 }
  0x89   : > { %1260 = vst [vmem:[%s5817_s8 + $0x740] sm:$0xff] %v1259_v40  ;;  %1262 = vst [vmem:[%s5817_s8 + $0x748] sm:$0xff] %v1261_v41  ;;  %v1263_v42 = vld [vmem:[%s5809_s7 + $0xea0] sm:$0xff]  ;;  %v1265_v43 = vld [vmem:[%s5809_s7 + $0xeb0] sm:$0xff] }
  0x8a   : > { %v1267_v44 = vld [vmem:[%s5809_s7 + $0xec0] sm:$0xff]  ;;  %1264 = vst [vmem:[%s5817_s8 + $0x750] sm:$0xff] %v1263_v42  ;;  %1266 = vst [vmem:[%s5817_s8 + $0x758] sm:$0xff] %v1265_v43  ;;  %v1269_v45 = vld [vmem:[%s5809_s7 + $0xed0] sm:$0xff] }
  0x8b   : > { %1268 = vst [vmem:[%s5817_s8 + $0x760] sm:$0xff] %v1267_v44  ;;  %v1271_v46 = vld [vmem:[%s5809_s7 + $0xee0] sm:$0xff]  ;;  %v1273_v47 = vld [vmem:[%s5809_s7 + $0xef0] sm:$0xff]  ;;  %1270 = vst [vmem:[%s5817_s8 + $0x768] sm:$0xff] %v1269_v45 }
  0x8c   : > { %1272 = vst [vmem:[%s5817_s8 + $0x770] sm:$0xff] %v1271_v46  ;;  %1274 = vst [vmem:[%s5817_s8 + $0x778] sm:$0xff] %v1273_v47  ;;  %v1275_v48 = vld [vmem:[%s5809_s7 + $0xf00] sm:$0xff]  ;;  %v1277_v49 = vld [vmem:[%s5809_s7 + $0xf10] sm:$0xff] }
  0x8d   : > { %v1279_v50 = vld [vmem:[%s5809_s7 + $0xf20] sm:$0xff]  ;;  %1276 = vst [vmem:[%s5817_s8 + $0x780] sm:$0xff] %v1275_v48  ;;  %1278 = vst [vmem:[%s5817_s8 + $0x788] sm:$0xff] %v1277_v49  ;;  %v1281_v51 = vld [vmem:[%s5809_s7 + $0xf30] sm:$0xff] }
  0x8e   : > { %1280 = vst [vmem:[%s5817_s8 + $0x790] sm:$0xff] %v1279_v50  ;;  %v1283_v52 = vld [vmem:[%s5809_s7 + $0xf40] sm:$0xff]  ;;  %v1285_v53 = vld [vmem:[%s5809_s7 + $0xf50] sm:$0xff]  ;;  %1282 = vst [vmem:[%s5817_s8 + $0x798] sm:$0xff] %v1281_v51 }
  0x8f   : > { %1284 = vst [vmem:[%s5817_s8 + $0x7a0] sm:$0xff] %v1283_v52  ;;  %1286 = vst [vmem:[%s5817_s8 + $0x7a8] sm:$0xff] %v1285_v53  ;;  %v1287_v54 = vld [vmem:[%s5809_s7 + $0xf60] sm:$0xff]  ;;  %v1289_v55 = vld [vmem:[%s5809_s7 + $0xf70] sm:$0xff] }
  0x90   : > { %v1291_v56 = vld [vmem:[%s5809_s7 + $0xf80] sm:$0xff]  ;;  %1288 = vst [vmem:[%s5817_s8 + $0x7b0] sm:$0xff] %v1287_v54  ;;  %1290 = vst [vmem:[%s5817_s8 + $0x7b8] sm:$0xff] %v1289_v55  ;;  %v1293_v57 = vld [vmem:[%s5809_s7 + $0xf90] sm:$0xff] }
  0x91   : > { %1292 = vst [vmem:[%s5817_s8 + $0x7c0] sm:$0xff] %v1291_v56  ;;  %v1295_v58 = vld [vmem:[%s5809_s7 + $0xfa0] sm:$0xff]  ;;  %v1297_v59 = vld [vmem:[%s5809_s7 + $0xfb0] sm:$0xff]  ;;  %1294 = vst [vmem:[%s5817_s8 + $0x7c8] sm:$0xff] %v1293_v57 }
  0x92   : > { %1296 = vst [vmem:[%s5817_s8 + $0x7d0] sm:$0xff] %v1295_v58  ;;  %1298 = vst [vmem:[%s5817_s8 + $0x7d8] sm:$0xff] %v1297_v59  ;;  %v1299_v60 = vld [vmem:[%s5809_s7 + $0xfc0] sm:$0xff]  ;;  %v1301_v61 = vld [vmem:[%s5809_s7 + $0xfd0] sm:$0xff] }
  0x93   : > { %v1303_v62 = vld [vmem:[%s5809_s7 + $0xfe0] sm:$0xff]  ;;  %1300 = vst [vmem:[%s5817_s8 + $0x7e0] sm:$0xff] %v1299_v60  ;;  %1302 = vst [vmem:[%s5817_s8 + $0x7e8] sm:$0xff] %v1301_v61  ;;  %v1305_v63 = vld [vmem:[%s5809_s7 + $0xff0] sm:$0xff] }
  0x94   : > { %1304 = vst [vmem:[%s5817_s8 + $0x7f0] sm:$0xff] %v1303_v62  ;;  %v1307_v0 = vld [vmem:[%s5809_s7 + $0x1000] sm:$0xff]  ;;  %v1309_v1 = vld [vmem:[%s5809_s7 + $0x1010] sm:$0xff]  ;;  %1306 = vst [vmem:[%s5817_s8 + $0x7f8] sm:$0xff] %v1305_v63 }
  0x95   : > { %1308 = vst [vmem:[%s5817_s8 + $0x800] sm:$0xff] %v1307_v0  ;;  %1310 = vst [vmem:[%s5817_s8 + $0x808] sm:$0xff] %v1309_v1  ;;  %v1311_v2 = vld [vmem:[%s5809_s7 + $0x1020] sm:$0xff]  ;;  %v1313_v3 = vld [vmem:[%s5809_s7 + $0x1030] sm:$0xff] }
  0x96   : > { %v1315_v4 = vld [vmem:[%s5809_s7 + $0x1040] sm:$0xff]  ;;  %1312 = vst [vmem:[%s5817_s8 + $0x810] sm:$0xff] %v1311_v2  ;;  %1314 = vst [vmem:[%s5817_s8 + $0x818] sm:$0xff] %v1313_v3  ;;  %v1317_v5 = vld [vmem:[%s5809_s7 + $0x1050] sm:$0xff] }
  0x97   : > { %1316 = vst [vmem:[%s5817_s8 + $0x820] sm:$0xff] %v1315_v4  ;;  %v1319_v6 = vld [vmem:[%s5809_s7 + $0x1060] sm:$0xff]  ;;  %v1321_v7 = vld [vmem:[%s5809_s7 + $0x1070] sm:$0xff]  ;;  %1318 = vst [vmem:[%s5817_s8 + $0x828] sm:$0xff] %v1317_v5 }
  0x98   : > { %1320 = vst [vmem:[%s5817_s8 + $0x830] sm:$0xff] %v1319_v6  ;;  %1322 = vst [vmem:[%s5817_s8 + $0x838] sm:$0xff] %v1321_v7  ;;  %v1323_v8 = vld [vmem:[%s5809_s7 + $0x1080] sm:$0xff]  ;;  %v1325_v9 = vld [vmem:[%s5809_s7 + $0x1090] sm:$0xff] }
  0x99   : > { %v1327_v10 = vld [vmem:[%s5809_s7 + $0x10a0] sm:$0xff]  ;;  %1324 = vst [vmem:[%s5817_s8 + $0x840] sm:$0xff] %v1323_v8  ;;  %1326 = vst [vmem:[%s5817_s8 + $0x848] sm:$0xff] %v1325_v9  ;;  %v1329_v11 = vld [vmem:[%s5809_s7 + $0x10b0] sm:$0xff] }
  0x9a   : > { %1328 = vst [vmem:[%s5817_s8 + $0x850] sm:$0xff] %v1327_v10  ;;  %v1331_v12 = vld [vmem:[%s5809_s7 + $0x10c0] sm:$0xff]  ;;  %v1333_v13 = vld [vmem:[%s5809_s7 + $0x10d0] sm:$0xff]  ;;  %1330 = vst [vmem:[%s5817_s8 + $0x858] sm:$0xff] %v1329_v11 }
  0x9b   : > { %1332 = vst [vmem:[%s5817_s8 + $0x860] sm:$0xff] %v1331_v12  ;;  %1334 = vst [vmem:[%s5817_s8 + $0x868] sm:$0xff] %v1333_v13  ;;  %v1335_v14 = vld [vmem:[%s5809_s7 + $0x10e0] sm:$0xff]  ;;  %v1337_v15 = vld [vmem:[%s5809_s7 + $0x10f0] sm:$0xff] }
  0x9c   : > { %v1339_v16 = vld [vmem:[%s5809_s7 + $0x1100] sm:$0xff]  ;;  %1336 = vst [vmem:[%s5817_s8 + $0x870] sm:$0xff] %v1335_v14  ;;  %1338 = vst [vmem:[%s5817_s8 + $0x878] sm:$0xff] %v1337_v15  ;;  %v1341_v17 = vld [vmem:[%s5809_s7 + $0x1110] sm:$0xff] }
  0x9d   : > { %1340 = vst [vmem:[%s5817_s8 + $0x880] sm:$0xff] %v1339_v16  ;;  %v1343_v18 = vld [vmem:[%s5809_s7 + $0x1120] sm:$0xff]  ;;  %v1345_v19 = vld [vmem:[%s5809_s7 + $0x1130] sm:$0xff]  ;;  %1342 = vst [vmem:[%s5817_s8 + $0x888] sm:$0xff] %v1341_v17 }
  0x9e   : > { %1344 = vst [vmem:[%s5817_s8 + $0x890] sm:$0xff] %v1343_v18  ;;  %1346 = vst [vmem:[%s5817_s8 + $0x898] sm:$0xff] %v1345_v19  ;;  %v1347_v20 = vld [vmem:[%s5809_s7 + $0x1140] sm:$0xff]  ;;  %v1349_v21 = vld [vmem:[%s5809_s7 + $0x1150] sm:$0xff] }
  0x9f   : > { %v1351_v22 = vld [vmem:[%s5809_s7 + $0x1160] sm:$0xff]  ;;  %1348 = vst [vmem:[%s5817_s8 + $0x8a0] sm:$0xff] %v1347_v20  ;;  %1350 = vst [vmem:[%s5817_s8 + $0x8a8] sm:$0xff] %v1349_v21  ;;  %v1353_v23 = vld [vmem:[%s5809_s7 + $0x1170] sm:$0xff] }
  0xa0   : > { %1352 = vst [vmem:[%s5817_s8 + $0x8b0] sm:$0xff] %v1351_v22  ;;  %v1355_v24 = vld [vmem:[%s5809_s7 + $0x1180] sm:$0xff]  ;;  %v1357_v25 = vld [vmem:[%s5809_s7 + $0x1190] sm:$0xff]  ;;  %1354 = vst [vmem:[%s5817_s8 + $0x8b8] sm:$0xff] %v1353_v23 }
  0xa1   : > { %1356 = vst [vmem:[%s5817_s8 + $0x8c0] sm:$0xff] %v1355_v24  ;;  %1358 = vst [vmem:[%s5817_s8 + $0x8c8] sm:$0xff] %v1357_v25  ;;  %v1359_v26 = vld [vmem:[%s5809_s7 + $0x11a0] sm:$0xff]  ;;  %v1361_v27 = vld [vmem:[%s5809_s7 + $0x11b0] sm:$0xff] }
  0xa2   : > { %v1363_v28 = vld [vmem:[%s5809_s7 + $0x11c0] sm:$0xff]  ;;  %1360 = vst [vmem:[%s5817_s8 + $0x8d0] sm:$0xff] %v1359_v26  ;;  %1362 = vst [vmem:[%s5817_s8 + $0x8d8] sm:$0xff] %v1361_v27  ;;  %v1365_v29 = vld [vmem:[%s5809_s7 + $0x11d0] sm:$0xff] }
  0xa3   : > { %1364 = vst [vmem:[%s5817_s8 + $0x8e0] sm:$0xff] %v1363_v28  ;;  %v1367_v30 = vld [vmem:[%s5809_s7 + $0x11e0] sm:$0xff]  ;;  %v1369_v31 = vld [vmem:[%s5809_s7 + $0x11f0] sm:$0xff]  ;;  %1366 = vst [vmem:[%s5817_s8 + $0x8e8] sm:$0xff] %v1365_v29 }
  0xa4   : > { %1368 = vst [vmem:[%s5817_s8 + $0x8f0] sm:$0xff] %v1367_v30  ;;  %1370 = vst [vmem:[%s5817_s8 + $0x8f8] sm:$0xff] %v1369_v31 }
  0xa5 PF: > { %p4610_p7 = scmp.ge.s32.totalorder %s5735_s20, 1  ;;  %p1399_p8 = scmp.lt.s32.totalorder %s5735_s20, 3 }
  0xa7   : > { %p1400_p9 = pnand %p4610_p7, %p1399_p8 }
  0xa8   : > { %s1406_s9 = sand.u32 (!%p1400_p9), 1, %s5727_s18   ;;  %v5276_v32 = vld [vmem:[%s7081_s0 + $0x4] ss:$72 sps:$4 sm:$0xff] (!%p1400_p9)   ;;  %s4611_s20 = sshll.u32 (!%p1400_p9), %s5784_s21, 1 }
  0xa9   : > { %1403 = sbr.rel (%p1400_p9) target bundleno = 795 (0x31b), region = 74  ;;  %v5282_v33 = vld [vmem:[%s7081_s0 + $0x24] ss:$72 sps:$4 sm:$0xff] (!%p1400_p9)   ;;  %3629 = vmatprep.mubr.bf16.mxu1 (!%p1400_p9), %v5276_v32  ;;  %p1446_p10 = scmp.lt.s32.totalorder (!%p1400_p9), %s4611_s20, 3 }
  0xaa   : > { %s5151_s10 = smul.u32 (!%p1400_p9), 2304, %s1406_s9  ;;  %3913 = vmatprep.mubr.bf16.mxu0 (!%p1400_p9), %v5282_v33 }
  0xac   : > { %s6400_s15 = scalar_lea.vmem (!%p1400_p9), [#allocation2], %s5151_s10  ;;  %s5152_s10 = smul.u32 (!%p1400_p9), 112, %s1406_s9 }
  0xad   : > { %v5178_v34 = vld [vmem:[%s6400_s15 + $0x4] ss:$8 sps:$4 sm:$0xff] (!%p1400_p9)   ;;  %v5182_v36 = vld [vmem:[%s6400_s15] ss:$8 sps:$4 sm:$0xff] (!%p1400_p9)   ;;  %v5184_v38 = vld [vmem:[%s6400_s15 + $0x14] ss:$8 sps:$4 sm:$0xff] (!%p1400_p9)  }
  0xae   : > { %v5180_v35 = vld [vmem:[%s6400_s15 + $0x404] ss:$8 sps:$4 sm:$0xff] (!%p1400_p9)   ;;  %3597 = vmatprep.subr.bf16.mxu1 (!%p1400_p9), %v5178_v34  ;;  %v5183_v37 = vld [vmem:[%s6400_s15 + $0x400] ss:$8 sps:$4 sm:$0xff] (!%p1400_p9)   ;;  %v5186_v39 = vld [vmem:[%s6400_s15 + $0x414] ss:$8 sps:$4 sm:$0xff] (!%p1400_p9)  }
  0xaf   : > { %3881 = vmatprep.subr.bf16.mxu0 (!%p1400_p9), %v5180_v35  ;;  %3598 = vmatpush1.bf16.msra.mxu1 (!%p1400_p9), %v5182_v36  ;;  %v5188_v40 = vld [vmem:[%s6400_s15 + $0x10] ss:$8 sps:$4 sm:$0xff] (!%p1400_p9)   ;;  %v5190_v42 = vld [vmem:[%s6400_s15 + $0x24] ss:$8 sps:$4 sm:$0xff] (!%p1400_p9)   ;;  %v5194_v44 = vld [vmem:[%s6400_s15 + $0x20] ss:$8 sps:$4 sm:$0xff] (!%p1400_p9)  }
  0xb0   : > { %3882 = vmatpush1.bf16.msra.mxu0 %v5183_v37  ;;  %3599 = vmatprep.subr.bf16.mxu1 %v5184_v38  ;;  %v5189_v41 = vld [vmem:[%s6400_s15 + $0x410] ss:$8 sps:$4 sm:$0xff]   ;;  %v5192_v43 = vld [vmem:[%s6400_s15 + $0x424] ss:$8 sps:$4 sm:$0xff]   ;;  %v5195_v45 = vld [vmem:[%s6400_s15 + $0x420] ss:$8 sps:$4 sm:$0xff]  }
  0xb1   : > { %3883 = vmatprep.subr.bf16.mxu0 %v5186_v39  ;;  %v5196_v46 = vld [vmem:[%s6400_s15 + $0x34] ss:$8 sps:$4 sm:$0xff]   ;;  %v5200_v48 = vld [vmem:[%s6400_s15 + $0x30] ss:$8 sps:$4 sm:$0xff]   ;;  %v5202_v50 = vld [vmem:[%s6400_s15 + $0x44] ss:$8 sps:$4 sm:$0xff]  }
  0xb2   : > { %v5198_v47 = vld [vmem:[%s6400_s15 + $0x434] ss:$8 sps:$4 sm:$0xff]   ;;  %v5201_v49 = vld [vmem:[%s6400_s15 + $0x430] ss:$8 sps:$4 sm:$0xff]   ;;  %v5204_v51 = vld [vmem:[%s6400_s15 + $0x444] ss:$8 sps:$4 sm:$0xff]  }
  0xb3   : > { %3600 = vmatpush1.bf16.msra.mxu1 %v5188_v40  ;;  %v5206_v52 = vld [vmem:[%s6400_s15 + $0x40] ss:$8 sps:$4 sm:$0xff]   ;;  %v5208_v54 = vld [vmem:[%s6400_s15 + $0x54] ss:$8 sps:$4 sm:$0xff]   ;;  %v5212_v56 = vld [vmem:[%s6400_s15 + $0x50] ss:$8 sps:$4 sm:$0xff]  }
  0xb4   : > { %3884 = vmatpush1.bf16.msra.mxu0 %v5189_v41  ;;  %3601 = vmatprep.subr.bf16.mxu1 %v5190_v42  ;;  %v5207_v53 = vld [vmem:[%s6400_s15 + $0x440] ss:$8 sps:$4 sm:$0xff]   ;;  %v5210_v55 = vld [vmem:[%s6400_s15 + $0x454] ss:$8 sps:$4 sm:$0xff]   ;;  %v5213_v57 = vld [vmem:[%s6400_s15 + $0x450] ss:$8 sps:$4 sm:$0xff]  }
  0xb5   : > { %3885 = vmatprep.subr.bf16.mxu0 %v5192_v43  ;;  %v5214_v58 = vld [vmem:[%s6400_s15 + $0x64] ss:$8 sps:$4 sm:$0xff]   ;;  %v5218_v60 = vld [vmem:[%s6400_s15 + $0x60] ss:$8 sps:$4 sm:$0xff]   ;;  %v5220_v62 = vld [vmem:[%s6400_s15 + $0x74] ss:$8 sps:$4 sm:$0xff]  }
  0xb6   : > { %v5216_v59 = vld [vmem:[%s6400_s15 + $0x464] ss:$8 sps:$4 sm:$0xff]   ;;  %v5219_v61 = vld [vmem:[%s6400_s15 + $0x460] ss:$8 sps:$4 sm:$0xff]   ;;  %v5222_v63 = vld [vmem:[%s6400_s15 + $0x474] ss:$8 sps:$4 sm:$0xff]  }
  0xb7   : > { %3602 = vmatpush1.bf16.msra.mxu1 %v5194_v44  ;;  %v5224_v0 = vld [vmem:[%s6400_s15 + $0x70] ss:$8 sps:$4 sm:$0xff]   ;;  %v5226_v2 = vld [vmem:[%s6400_s15 + $0x84] ss:$8 sps:$4 sm:$0xff]   ;;  %v5230_v4 = vld [vmem:[%s6400_s15 + $0x80] ss:$8 sps:$4 sm:$0xff]  }
  0xb8   : > { %3886 = vmatpush1.bf16.msra.mxu0 %v5195_v45  ;;  %3603 = vmatprep.subr.bf16.mxu1 %v5196_v46  ;;  %v5225_v1 = vld [vmem:[%s6400_s15 + $0x470] ss:$8 sps:$4 sm:$0xff]   ;;  %v5228_v3 = vld [vmem:[%s6400_s15 + $0x484] ss:$8 sps:$4 sm:$0xff]   ;;  %v5231_v5 = vld [vmem:[%s6400_s15 + $0x480] ss:$8 sps:$4 sm:$0xff]  }
  0xb9   : > { %3887 = vmatprep.subr.bf16.mxu0 %v5198_v47  ;;  %v5232_v6 = vld [vmem:[%s6400_s15 + $0x94] ss:$8 sps:$4 sm:$0xff]   ;;  %v5236_v8 = vld [vmem:[%s6400_s15 + $0x90] ss:$8 sps:$4 sm:$0xff]   ;;  %v5238_v10 = vld [vmem:[%s6400_s15 + $0xa4] ss:$8 sps:$4 sm:$0xff]  }
  0xba   : > { %v5234_v7 = vld [vmem:[%s6400_s15 + $0x494] ss:$8 sps:$4 sm:$0xff]   ;;  %v5237_v9 = vld [vmem:[%s6400_s15 + $0x490] ss:$8 sps:$4 sm:$0xff]   ;;  %v5240_v11 = vld [vmem:[%s6400_s15 + $0x4a4] ss:$8 sps:$4 sm:$0xff]  }
  0xbb   : > { %3604 = vmatpush1.bf16.msra.mxu1 %v5200_v48  ;;  %v5242_v12 = vld [vmem:[%s6400_s15 + $0xa0] ss:$8 sps:$4 sm:$0xff]   ;;  %v5244_v14 = vld [vmem:[%s6400_s15 + $0xb4] ss:$8 sps:$4 sm:$0xff]   ;;  %v5248_v16 = vld [vmem:[%s6400_s15 + $0xb0] ss:$8 sps:$4 sm:$0xff]  }
  0xbc   : > { %3888 = vmatpush1.bf16.msra.mxu0 %v5201_v49  ;;  %3605 = vmatprep.subr.bf16.mxu1 %v5202_v50  ;;  %v5243_v13 = vld [vmem:[%s6400_s15 + $0x4a0] ss:$8 sps:$4 sm:$0xff]   ;;  %v5246_v15 = vld [vmem:[%s6400_s15 + $0x4b4] ss:$8 sps:$4 sm:$0xff]   ;;  %v5249_v17 = vld [vmem:[%s6400_s15 + $0x4b0] ss:$8 sps:$4 sm:$0xff]  }
  0xbd   : > { %3889 = vmatprep.subr.bf16.mxu0 %v5204_v51  ;;  %v5250_v18 = vld [vmem:[%s6400_s15 + $0xc4] ss:$8 sps:$4 sm:$0xff]   ;;  %v5254_v20 = vld [vmem:[%s6400_s15 + $0xc0] ss:$8 sps:$4 sm:$0xff]   ;;  %v5256_v22 = vld [vmem:[%s6400_s15 + $0xd4] ss:$8 sps:$4 sm:$0xff]  }
  0xbe   : > { %v5252_v19 = vld [vmem:[%s6400_s15 + $0x4c4] ss:$8 sps:$4 sm:$0xff]   ;;  %v5255_v21 = vld [vmem:[%s6400_s15 + $0x4c0] ss:$8 sps:$4 sm:$0xff]   ;;  %v5258_v23 = vld [vmem:[%s6400_s15 + $0x4d4] ss:$8 sps:$4 sm:$0xff]  }
  0xbf   : > { %3606 = vmatpush1.bf16.msra.mxu1 %v5206_v52  ;;  %v5260_v24 = vld [vmem:[%s6400_s15 + $0xd0] ss:$8 sps:$4 sm:$0xff]   ;;  %v5262_v26 = vld [vmem:[%s6400_s15 + $0xe4] ss:$8 sps:$4 sm:$0xff]   ;;  %v5266_v28 = vld [vmem:[%s6400_s15 + $0xe0] ss:$8 sps:$4 sm:$0xff]  }
  0xc0   : > { %3890 = vmatpush1.bf16.msra.mxu0 %v5207_v53  ;;  %3607 = vmatprep.subr.bf16.mxu1 %v5208_v54  ;;  %v5261_v25 = vld [vmem:[%s6400_s15 + $0x4d0] ss:$8 sps:$4 sm:$0xff]   ;;  %v5264_v27 = vld [vmem:[%s6400_s15 + $0x4e4] ss:$8 sps:$4 sm:$0xff]   ;;  %v5267_v29 = vld [vmem:[%s6400_s15 + $0x4e0] ss:$8 sps:$4 sm:$0xff]  }
  0xc1   : > { %3891 = vmatprep.subr.bf16.mxu0 %v5210_v55  ;;  %v5268_v30 = vld [vmem:[%s6400_s15 + $0xf4] ss:$8 sps:$4 sm:$0xff]   ;;  %v5272_v32 = vld [vmem:[%s6400_s15 + $0xf0] ss:$8 sps:$4 sm:$0xff]   ;;  %v5279_v34 = vld [vmem:[%s6400_s15 + $0x104] ss:$8 sps:$4 sm:$0xff]  }
  0xc2   : > { %v5270_v31 = vld [vmem:[%s6400_s15 + $0x4f4] ss:$8 sps:$4 sm:$0xff]   ;;  %v5273_v33 = vld [vmem:[%s6400_s15 + $0x4f0] ss:$8 sps:$4 sm:$0xff]   ;;  %v5285_v35 = vld [vmem:[%s6400_s15 + $0x504] ss:$8 sps:$4 sm:$0xff]  }
  0xc3   : > { %3608 = vmatpush1.bf16.msra.mxu1 %v5212_v56  ;;  %v5274_v36 = vld [vmem:[%s7081_s0] ss:$72 sps:$4 sm:$0xff]   ;;  %v5288_v40 = vld [vmem:[%s6400_s15 + $0x114] ss:$8 sps:$4 sm:$0xff]   ;;  %v5286_v43 = vld [vmem:[%s6400_s15 + $0x110] ss:$8 sps:$4 sm:$0xff]  }
  0xc4   : > { %3892 = vmatpush1.bf16.msra.mxu0 %v5213_v57  ;;  %3609 = vmatprep.subr.bf16.mxu1 %v5214_v58  ;;  %v5280_v37 = vld [vmem:[%s7081_s0 + $0x20] ss:$72 sps:$4 sm:$0xff]   ;;  %v5291_v41 = vld [vmem:[%s6400_s15 + $0x514] ss:$8 sps:$4 sm:$0xff]   ;;  %v5289_v44 = vld [vmem:[%s6400_s15 + $0x510] ss:$8 sps:$4 sm:$0xff]  }
  0xc5   : > { %3893 = vmatprep.subr.bf16.mxu0 %v5216_v59  ;;  %v5277_v38 = vld [vmem:[%s6400_s15 + $0x100] ss:$8 sps:$4 sm:$0xff]   ;;  %v5340_v42 = vld [vmem:[%s7081_s0 + $0x94] ss:$72 sps:$4 sm:$0xff]   ;;  %v5294_v45 = vld [vmem:[%s6400_s15 + $0x124] ss:$8 sps:$4 sm:$0xff]  }
  0xc6   : > { %v5283_v39 = vld [vmem:[%s6400_s15 + $0x500] ss:$8 sps:$4 sm:$0xff]   ;;  %v5297_v46 = vld [vmem:[%s6400_s15 + $0x524] ss:$8 sps:$4 sm:$0xff]   ;;  %v5345_v49 = vld [vmem:[%s7081_s0 + $0xb4] ss:$72 sps:$4 sm:$0xff]  }
  0xc7   : > { %3610 = vmatpush1.bf16.msra.mxu1 %v5218_v60  ;;  %v5292_v47 = vld [vmem:[%s6400_s15 + $0x120] ss:$8 sps:$4 sm:$0xff]   ;;  %v5300_v50 = vld [vmem:[%s6400_s15 + $0x134] ss:$8 sps:$4 sm:$0xff]   ;;  %v5350_v52 = vld [vmem:[%s7081_s0 + $0x90] ss:$72 sps:$4 sm:$0xff]  }
  0xc8   : > { %3894 = vmatpush1.bf16.msra.mxu0 %v5219_v61  ;;  %3611 = vmatprep.subr.bf16.mxu1 %v5220_v62  ;;  %v5295_v48 = vld [vmem:[%s6400_s15 + $0x520] ss:$8 sps:$4 sm:$0xff]   ;;  %v5303_v51 = vld [vmem:[%s6400_s15 + $0x534] ss:$8 sps:$4 sm:$0xff]   ;;  %v5351_v53 = vld [vmem:[%s7081_s0 + $0xb0] ss:$72 sps:$4 sm:$0xff]  }
  0xc9   : > { %3895 = vmatprep.subr.bf16.mxu0 %v5222_v63  ;;  %v5298_v54 = vld [vmem:[%s6400_s15 + $0x130] ss:$8 sps:$4 sm:$0xff]   ;;  %v5306_v56 = vld [vmem:[%s6400_s15 + $0x144] ss:$8 sps:$4 sm:$0xff]   ;;  %v5304_v59 = vld [vmem:[%s6400_s15 + $0x140] ss:$8 sps:$4 sm:$0xff]  }
  0xca   : > { %v5301_v55 = vld [vmem:[%s6400_s15 + $0x530] ss:$8 sps:$4 sm:$0xff]   ;;  %v5358_v57 = vld [vmem:[%s7081_s0 + $0x124] ss:$72 sps:$4 sm:$0xff]   ;;  %v5307_v60 = vld [vmem:[%s6400_s15 + $0x540] ss:$8 sps:$4 sm:$0xff]  }
  0xcb   : > { %3612 = vmatpush1.bf16.msra.mxu1 %v5224_v0  ;;  %v5309_v58 = vld [vmem:[%s6400_s15 + $0x544] ss:$8 sps:$4 sm:$0xff]   ;;  %v5312_v62 = vld [vmem:[%s6400_s15 + $0x154] ss:$8 sps:$4 sm:$0xff]   ;;  %v5368_v0 = vld [vmem:[%s7081_s0 + $0x120] ss:$72 sps:$4 sm:$0xff]  }
  0xcc   : > { %3896 = vmatpush1.bf16.msra.mxu0 %v5225_v1  ;;  %3613 = vmatprep.subr.bf16.mxu1 %v5226_v2  ;;  %v5363_v61 = vld [vmem:[%s7081_s0 + $0x144] ss:$72 sps:$4 sm:$0xff]   ;;  %v5315_v63 = vld [vmem:[%s6400_s15 + $0x554] ss:$8 sps:$4 sm:$0xff]   ;;  %v5369_v1 = vld [vmem:[%s7081_s0 + $0x140] ss:$72 sps:$4 sm:$0xff]  }
  0xcd   : > { %3897 = vmatprep.subr.bf16.mxu0 %v5228_v3  ;;  %v5310_v2 = vld [vmem:[%s6400_s15 + $0x150] ss:$8 sps:$4 sm:$0xff]   ;;  %s7092_s20 = smov (!%p1446_p10, %s4611_s20), 3  ;;  %s7031_s18 = scalar_lea.vmem [#allocation3], %s5152_s10 }
  0xce   : > { %v5313_v3 = vld [vmem:[%s6400_s15 + $0x550] ss:$8 sps:$4 sm:$0xff]   ;;  %s1458_s27 = scalar_lea.vmem %s7085_s4, %s7092_s20  ;;  %s1448_s30 = scalar_lea.vmem %s7083_s2, %s7092_s20 }
  0xcf   : > { %3614 = vmatpush1.bf16.msra.mxu1 %v5230_v4  ;;  %v1515_v4 = vld [vmem:[%s7081_s0 + $0x1b0] sm:$0xff]  ;;  %s1453_s8 = scalar_lea.vmem %s7084_s3, %s7092_s20  ;;  %s4979_s9 = sshll.u32 (%p5799_p5), %s5784_s21, 4 }
  0xd0   : > { %3898 = vmatpush1.bf16.msra.mxu0 %v5231_v5  ;;  %3615 = vmatprep.subr.bf16.mxu1 %v5232_v6  ;;  %v5318_v5 = vld [vmem:[%s6400_s15 + $0x164] ss:$8 sps:$4 sm:$0xff]   ;;  %s4477_s13 = scalar_lea.vmem (%p5799_p5), %s7086_s5, %s4979_s9 }
  0xd1   : > { %3899 = vmatprep.subr.bf16.mxu0 %v5234_v7  ;;  %v5321_v6 = vld [vmem:[%s6400_s15 + $0x564] ss:$8 sps:$4 sm:$0xff]   ;;  %v4669_v7 = vcombine.high %v1515_v4, %v1515_v4 }
  0xd3   : > { %3616 = vmatpush1.bf16.msra.mxu1 %v5236_v8  ;;  %v1519_v8 = vld [vmem:[%s7081_s0 + $0x1d0] sm:$0xff] }
  0xd4   : > { %3900 = vmatpush1.bf16.msra.mxu0 %v5237_v9  ;;  %3617 = vmatprep.subr.bf16.mxu1 %v5238_v10  ;;  %v4677_v9 = vcombine.high %v1519_v8, %v1519_v8  ;;  %v4668_v10 = vcombine.low %v1515_v4, %v1515_v4  ;;  %v5469_v4 = vld [vmem:[%s7081_s0 + $0xb8] ss:$72 sps:$4 sm:$0xff]  }
  0xd5   : > { %3901 = vmatprep.subr.bf16.mxu0 %v5240_v11  ;;  %v4676_v11 = vcombine.low %v1519_v8, %v1519_v8  ;;  %v5476_v8 = vld [vmem:[%s7081_s0 + $0x12c] ss:$72 sps:$4 sm:$0xff]  }
  0xd7   : > { %3618 = vmatpush1.bf16.msra.mxu1 %v5242_v12  ;;  %v5316_v12 = vld [vmem:[%s6400_s15 + $0x160] ss:$8 sps:$4 sm:$0xff]  }
  0xd8   : > { %3902 = vmatpush1.bf16.msra.mxu0 %v5243_v13  ;;  %3619 = vmatprep.subr.bf16.mxu1 %v5244_v14  ;;  %v5319_v13 = vld [vmem:[%s6400_s15 + $0x560] ss:$8 sps:$4 sm:$0xff]   ;;  %v5324_v14 = vld [vmem:[%s6400_s15 + $0x174] ss:$8 sps:$4 sm:$0xff]  }
  0xd9   : > { %3903 = vmatprep.subr.bf16.mxu0 %v5246_v15  ;;  %v5327_v15 = vld [vmem:[%s6400_s15 + $0x574] ss:$8 sps:$4 sm:$0xff]  }
  0xdb   : > { %3620 = vmatpush1.bf16.msra.mxu1 %v5248_v16  ;;  %v5322_v16 = vld [vmem:[%s6400_s15 + $0x170] ss:$8 sps:$4 sm:$0xff]  }
  0xdc   : > { %3904 = vmatpush1.bf16.msra.mxu0 %v5249_v17  ;;  %3621 = vmatprep.subr.bf16.mxu1 %v5250_v18  ;;  %v5394_v17 = vld [vmem:[%s7081_s0 + $0xc] ss:$72 sps:$4 sm:$0xff]   ;;  %v5325_v18 = vld [vmem:[%s6400_s15 + $0x570] ss:$8 sps:$4 sm:$0xff]  }
  0xdd   : > { %3905 = vmatprep.subr.bf16.mxu0 %v5252_v19  ;;  %v5330_v19 = vld [vmem:[%s6400_s15 + $0x184] ss:$8 sps:$4 sm:$0xff]  }
  0xdf   : > { %3622 = vmatpush1.bf16.msra.mxu1 %v5254_v20  ;;  %v5333_v20 = vld [vmem:[%s6400_s15 + $0x584] ss:$8 sps:$4 sm:$0xff]  }
  0xe0   : > { %3906 = vmatpush1.bf16.msra.mxu0 %v5255_v21  ;;  %3623 = vmatprep.subr.bf16.mxu1 %v5256_v22  ;;  %v5400_v21 = vld [vmem:[%s7081_s0 + $0x2c] ss:$72 sps:$4 sm:$0xff]   ;;  %v5328_v22 = vld [vmem:[%s6400_s15 + $0x180] ss:$8 sps:$4 sm:$0xff]  }
  0xe1   : > { %3907 = vmatprep.subr.bf16.mxu0 %v5258_v23  ;;  %v5331_v23 = vld [vmem:[%s6400_s15 + $0x580] ss:$8 sps:$4 sm:$0xff]  }
  0xe3   : > { %3624 = vmatpush1.bf16.msra.mxu1 %v5260_v24  ;;  %v5336_v24 = vld [vmem:[%s6400_s15 + $0x194] ss:$8 sps:$4 sm:$0xff]  }
  0xe4   : > { %3908 = vmatpush1.bf16.msra.mxu0 %v5261_v25  ;;  %3625 = vmatprep.subr.bf16.mxu1 %v5262_v26  ;;  %v5339_v25 = vld [vmem:[%s6400_s15 + $0x594] ss:$8 sps:$4 sm:$0xff]   ;;  %v5334_v26 = vld [vmem:[%s6400_s15 + $0x190] ss:$8 sps:$4 sm:$0xff]  }
  0xe5   : > { %3909 = vmatprep.subr.bf16.mxu0 %v5264_v27  ;;  %v5337_v27 = vld [vmem:[%s6400_s15 + $0x590] ss:$8 sps:$4 sm:$0xff]  }
  0xe7   : > { %3626 = vmatpush1.bf16.msra.mxu1 %v5266_v28  ;;  %v5344_v28 = vld [vmem:[%s6400_s15 + $0x1a4] ss:$8 sps:$4 sm:$0xff]  }
  0xe8   : > { %3910 = vmatpush1.bf16.msra.mxu0 %v5267_v29  ;;  %3627 = vmatprep.subr.bf16.mxu1 %v5268_v30  ;;  %v5349_v29 = vld [vmem:[%s6400_s15 + $0x5a4] ss:$8 sps:$4 sm:$0xff]   ;;  %v5342_v30 = vld [vmem:[%s6400_s15 + $0x1a0] ss:$8 sps:$4 sm:$0xff]  }
  0xe9   : > { %3911 = vmatprep.subr.bf16.mxu0 %v5270_v31  ;;  %v5347_v31 = vld [vmem:[%s6400_s15 + $0x5a0] ss:$8 sps:$4 sm:$0xff]  }
  0xeb   : > { %3628 = vmatpush1.bf16.msra.mxu1 %v5272_v32  ;;  %v5354_v32 = vld [vmem:[%s6400_s15 + $0x1b4] ss:$8 sps:$4 sm:$0xff]  }
  0xec   : > { %3912 = vmatpush1.bf16.msra.mxu0 %v5273_v33  ;;  %3668 = vmatprep.subr.bf16.mxu1 %v5279_v34  ;;  %v5357_v33 = vld [vmem:[%s6400_s15 + $0x5b4] ss:$8 sps:$4 sm:$0xff]   ;;  %v5352_v34 = vld [vmem:[%s6400_s15 + $0x1b0] ss:$8 sps:$4 sm:$0xff]  }
  0xed   : > { %3952 = vmatprep.subr.bf16.mxu0 %v5285_v35  ;;  %v5355_v35 = vld [vmem:[%s6400_s15 + $0x5b0] ss:$8 sps:$4 sm:$0xff]  }
  0xee   : > { %3630 = vmatmul.mubr.bf16.vlgmr.msra.gmra.mrb[0].mxu1 %v5274_v36  ;;  %v5362_v36 = vld [vmem:[%s6400_s15 + $0x1c4] ss:$8 sps:$4 sm:$0xff]  }
  0xef   : > { %3914 = vmatmul.mubr.bf16.vlgmr.msra.gmra.mrb[0].mxu0 %v5280_v37  ;;  %3669 = vmatpush1.bf16.msra.mxu1 %v5277_v38  ;;  %v5367_v37 = vld [vmem:[%s6400_s15 + $0x5c4] ss:$8 sps:$4 sm:$0xff]   ;;  %v5360_v38 = vld [vmem:[%s6400_s15 + $0x1c0] ss:$8 sps:$4 sm:$0xff]  }
  0xf0   : > { %3953 = vmatpush1.bf16.msra.mxu0 %v5283_v39  ;;  %3670 = vmatprep.subr.bf16.mxu1 %v5288_v40  ;;  %v5365_v39 = vld [vmem:[%s6400_s15 + $0x5c0] ss:$8 sps:$4 sm:$0xff]   ;;  %v5372_v40 = vld [vmem:[%s6400_s15 + $0x1d4] ss:$8 sps:$4 sm:$0xff]  }
  0xf1   : > { %3954 = vmatprep.subr.bf16.mxu0 %v5291_v41  ;;  %3639 = vmatprep.mubr.bf16.mxu1 %v5340_v42  ;;  %v5375_v41 = vld [vmem:[%s6400_s15 + $0x5d4] ss:$8 sps:$4 sm:$0xff]   ;;  %v5370_v42 = vld [vmem:[%s6400_s15 + $0x1d0] ss:$8 sps:$4 sm:$0xff]  }
  0xf2   : > { %3923 = vmatprep.mubr.bf16.mxu0 %v5345_v49  ;;  %v5391_v49 = vld [vmem:[%s6400_s15 + $0x5f4] ss:$8 sps:$4 sm:$0xff]  }
  0xf3   : > { %3671 = vmatpush1.bf16.msra.mxu1 %v5286_v43  ;;  %v5373_v43 = vld [vmem:[%s6400_s15 + $0x5d0] ss:$8 sps:$4 sm:$0xff]  }
  0xf4   : > { %3955 = vmatpush1.bf16.msra.mxu0 %v5289_v44  ;;  %3672 = vmatprep.subr.bf16.mxu1 %v5294_v45  ;;  %v5379_v44 = vld [vmem:[%s6400_s15 + $0x1e4] ss:$8 sps:$4 sm:$0xff]  }
  0xf5   : > { %3956 = vmatprep.subr.bf16.mxu0 %v5297_v46  ;;  %v5383_v45 = vld [vmem:[%s6400_s15 + $0x5e4] ss:$8 sps:$4 sm:$0xff]   ;;  %v5377_v46 = vld [vmem:[%s6400_s15 + $0x1e0] ss:$8 sps:$4 sm:$0xff]  }
  0xf6   : > { %3640 = vmatmul.mubr.bf16.gmra.mrb[4].mxu1 %v5350_v52  ;;  %v5392_v52 = vld [vmem:[%s7081_s0 + $0x8] ss:$72 sps:$4 sm:$0xff]  }
  0xf7   : > { %3924 = vmatmul.mubr.bf16.gmra.mrb[4].mxu0 %v5351_v53  ;;  %3673 = vmatpush1.bf16.msra.mxu1 %v5292_v47  ;;  %v5381_v47 = vld [vmem:[%s6400_s15 + $0x5e0] ss:$8 sps:$4 sm:$0xff]   ;;  %v5397_v53 = vld [vmem:[%s6400_s15 + $0x204] ss:$8 sps:$4 sm:$0xff]  }
  0xf8   : > { %3957 = vmatpush1.bf16.msra.mxu0 %v5295_v48  ;;  %3674 = vmatprep.subr.bf16.mxu1 %v5300_v50  ;;  %v5388_v48 = vld [vmem:[%s6400_s15 + $0x1f4] ss:$8 sps:$4 sm:$0xff]   ;;  %v5386_v50 = vld [vmem:[%s6400_s15 + $0x1f0] ss:$8 sps:$4 sm:$0xff]  }
  0xf9   : > { %3958 = vmatprep.subr.bf16.mxu0 %v5303_v51  ;;  %3649 = vmatprep.mubr.bf16.mxu1 %v5358_v57  ;;  %v5389_v51 = vld [vmem:[%s6400_s15 + $0x5f0] ss:$8 sps:$4 sm:$0xff]   ;;  %v5401_v57 = vld [vmem:[%s6400_s15 + $0x600] ss:$8 sps:$4 sm:$0xff]  }
  0xfa   : > { %3933 = vmatprep.mubr.bf16.mxu0 %v5363_v61  ;;  %v5463_v61 = vld [vmem:[%s7081_s0 + $0xbc] ss:$72 sps:$4 sm:$0xff]  }
  0xfb   : > { %3675 = vmatpush1.bf16.msra.mxu1 %v5298_v54  ;;  %v5403_v54 = vld [vmem:[%s6400_s15 + $0x604] ss:$8 sps:$4 sm:$0xff]  }
  0xfc   : > { %3959 = vmatpush1.bf16.msra.mxu0 %v5301_v55  ;;  %3676 = vmatprep.subr.bf16.mxu1 %v5306_v56  ;;  %v5395_v55 = vld [vmem:[%s6400_s15 + $0x200] ss:$8 sps:$4 sm:$0xff]  }
  0xfd   : > { %3960 = vmatprep.subr.bf16.mxu0 %v5309_v58  ;;  %v5398_v56 = vld [vmem:[%s7081_s0 + $0x28] ss:$72 sps:$4 sm:$0xff]   ;;  %v5406_v58 = vld [vmem:[%s6400_s15 + $0x214] ss:$8 sps:$4 sm:$0xff]  }
  0xfe   : > { %3650 = vmatmul.mubr.bf16.gmra.mrb[8].mxu1 %v5368_v0  ;;  %v5412_v0 = vld [vmem:[%s6400_s15 + $0x224] ss:$8 sps:$4 sm:$0xff]  }
  0xff   : > { %3934 = vmatmul.mubr.bf16.gmra.mrb[8].mxu0 %v5369_v1  ;;  %3677 = vmatpush1.bf16.msra.mxu1 %v5304_v59  ;;  %v5409_v59 = vld [vmem:[%s6400_s15 + $0x614] ss:$8 sps:$4 sm:$0xff]   ;;  %v5415_v1 = vld [vmem:[%s6400_s15 + $0x624] ss:$8 sps:$4 sm:$0xff]  }
 0x100   : > { %3961 = vmatpush1.bf16.msra.mxu0 %v5307_v60  ;;  %3678 = vmatprep.subr.bf16.mxu1 %v5312_v62  ;;  %v5458_v60 = vld [vmem:[%s7081_s0 + $0x9c] ss:$72 sps:$4 sm:$0xff]   ;;  %v5404_v62 = vld [vmem:[%s6400_s15 + $0x210] ss:$8 sps:$4 sm:$0xff]  }
 0x101   : > { %3962 = vmatprep.subr.bf16.mxu0 %v5315_v63  ;;  %3659 = vmatprep.mubr.bf16.mxu1 %v4669_v7  ;;  %v5407_v63 = vld [vmem:[%s6400_s15 + $0x610] ss:$8 sps:$4 sm:$0xff]   ;;  %v5421_v7 = vld [vmem:[%s6400_s15 + $0x634] ss:$8 sps:$4 sm:$0xff]  }
 0x102   : > { %3943 = vmatprep.mubr.bf16.mxu0 %v4677_v9  ;;  %v5481_v9 = vld [vmem:[%s7081_s0 + $0x14c] ss:$72 sps:$4 sm:$0xff]  }
 0x103   : > { %3679 = vmatpush1.bf16.msra.mxu1 %v5310_v2  ;;  %v5410_v2 = vld [vmem:[%s6400_s15 + $0x220] ss:$8 sps:$4 sm:$0xff]  }
 0x104   : > { %3963 = vmatpush1.bf16.msra.mxu0 %v5313_v3  ;;  %3680 = vmatprep.subr.bf16.mxu1 %v5318_v5  ;;  %v5468_v3 = vld [vmem:[%s7081_s0 + $0x98] ss:$72 sps:$4 sm:$0xff]  }
 0x105   : > { %3964 = vmatprep.subr.bf16.mxu0 %v5321_v6  ;;  %v5413_v5 = vld [vmem:[%s6400_s15 + $0x620] ss:$8 sps:$4 sm:$0xff]   ;;  %v5418_v6 = vld [vmem:[%s6400_s15 + $0x234] ss:$8 sps:$4 sm:$0xff]  }
 0x106   : > { %3660 = vmatmul.mubr.bf16.gmra.mrb[12].mxu1 %v4668_v10  ;;  %v5416_v10 = vld [vmem:[%s6400_s15 + $0x230] ss:$8 sps:$4 sm:$0xff]  }
 0x107   : > { %3944 = vmatmul.mubr.bf16.gmra.mrb[12].mxu0 %v4676_v11  ;;  %3681 = vmatpush1.bf16.msra.mxu1 %v5316_v12  ;;  %v5419_v11 = vld [vmem:[%s6400_s15 + $0x630] ss:$8 sps:$4 sm:$0xff]   ;;  %v5424_v12 = vld [vmem:[%s6400_s15 + $0x244] ss:$8 sps:$4 sm:$0xff]  }
 0x108   : > { %3965 = vmatpush1.bf16.msra.mxu0 %v5319_v13  ;;  %3682 = vmatprep.subr.bf16.mxu1 %v5324_v14  ;;  %v5427_v13 = vld [vmem:[%s6400_s15 + $0x644] ss:$8 sps:$4 sm:$0xff]   ;;  %v5422_v14 = vld [vmem:[%s6400_s15 + $0x240] ss:$8 sps:$4 sm:$0xff]  }
 0x109   : > { %3966 = vmatprep.subr.bf16.mxu0 %v5327_v15  ;;  %3700 = vmatprep.mubr.bf16.mxu1 %v5394_v17  ;;  %v5425_v15 = vld [vmem:[%s6400_s15 + $0x640] ss:$8 sps:$4 sm:$0xff]  }
 0x10a   : > { %3984 = vmatprep.mubr.bf16.mxu0 %v5400_v21  ;;  %v5487_v17 = vld [vmem:[%s7081_s0 + $0x148] ss:$72 sps:$4 sm:$0xff]   ;;  %v5433_v21 = vld [vmem:[%s6400_s15 + $0x654] ss:$8 sps:$4 sm:$0xff]  }
 0x10b   : > { %3683 = vmatpush1.bf16.msra.mxu1 %v5322_v16  ;;  %v5486_v16 = vld [vmem:[%s7081_s0 + $0x128] ss:$72 sps:$4 sm:$0xff]  }
 0x10c   : > { %3967 = vmatpush1.bf16.msra.mxu0 %v5325_v18  ;;  %3684 = vmatprep.subr.bf16.mxu1 %v5330_v19  ;;  %v1516_v18 = vld [vmem:[%s7081_s0 + $0x1b8] sm:$0xff] }
 0x10d   : > { %3968 = vmatprep.subr.bf16.mxu0 %v5333_v20  ;;  %v1520_v19 = vld [vmem:[%s7081_s0 + $0x1d8] sm:$0xff] }
 0x10e   : > { %v5430_v20 = vld [vmem:[%s6400_s15 + $0x254] ss:$8 sps:$4 sm:$0xff]  }
 0x10f   : > { %3685 = vmatpush1.bf16.msra.mxu1 %v5328_v22  ;;  %v4671_v22 = vcombine.high %v1516_v18, %v1516_v18 }
 0x110   : > { %3969 = vmatpush1.bf16.msra.mxu0 %v5331_v23  ;;  %3686 = vmatprep.subr.bf16.mxu1 %v5336_v24  ;;  %v4679_v23 = vcombine.high %v1520_v19, %v1520_v19  ;;  %v5428_v24 = vld [vmem:[%s6400_s15 + $0x250] ss:$8 sps:$4 sm:$0xff]  }
 0x111   : > { %3970 = vmatprep.subr.bf16.mxu0 %v5339_v25  ;;  %v5431_v25 = vld [vmem:[%s6400_s15 + $0x650] ss:$8 sps:$4 sm:$0xff]  }
 0x113   : > { %3687 = vmatpush1.bf16.msra.mxu1 %v5334_v26  ;;  %v5436_v26 = vld [vmem:[%s6400_s15 + $0x264] ss:$8 sps:$4 sm:$0xff]  }
 0x114   : > { %3971 = vmatpush1.bf16.msra.mxu0 %v5337_v27  ;;  %3688 = vmatprep.subr.bf16.mxu1 %v5344_v28  ;;  %v5439_v27 = vld [vmem:[%s6400_s15 + $0x664] ss:$8 sps:$4 sm:$0xff]   ;;  %v5434_v28 = vld [vmem:[%s6400_s15 + $0x260] ss:$8 sps:$4 sm:$0xff]  }
 0x115   : > { %3972 = vmatprep.subr.bf16.mxu0 %v5349_v29  ;;  %v5437_v29 = vld [vmem:[%s6400_s15 + $0x660] ss:$8 sps:$4 sm:$0xff]  }
 0x117   : > { %3689 = vmatpush1.bf16.msra.mxu1 %v5342_v30  ;;  %v4670_v30 = vcombine.low %v1516_v18, %v1516_v18  ;;  %v5530_v18 = vld [vmem:[%s6400_s15 + $0x324] ss:$8 sps:$4 sm:$0xff]  }
 0x118   : > { %3973 = vmatpush1.bf16.msra.mxu0 %v5347_v31  ;;  %3690 = vmatprep.subr.bf16.mxu1 %v5354_v32  ;;  %v4678_v31 = vcombine.low %v1520_v19, %v1520_v19  ;;  %v5442_v32 = vld [vmem:[%s6400_s15 + $0x274] ss:$8 sps:$4 sm:$0xff]   ;;  %v5533_v19 = vld [vmem:[%s6400_s15 + $0x724] ss:$8 sps:$4 sm:$0xff]  }
 0x119   : > { %3974 = vmatprep.subr.bf16.mxu0 %v5357_v33  ;;  %v5445_v33 = vld [vmem:[%s6400_s15 + $0x674] ss:$8 sps:$4 sm:$0xff]  }
 0x11b   : > { %3691 = vmatpush1.bf16.msra.mxu1 %v5352_v34  ;;  %v5512_v34 = vld [vmem:[%s7081_s0 + $0x14] ss:$72 sps:$4 sm:$0xff]  }
 0x11c   : > { %3975 = vmatpush1.bf16.msra.mxu0 %v5355_v35  ;;  %3692 = vmatprep.subr.bf16.mxu1 %v5362_v36  ;;  %v5518_v35 = vld [vmem:[%s7081_s0 + $0x34] ss:$72 sps:$4 sm:$0xff]   ;;  %v5440_v36 = vld [vmem:[%s6400_s15 + $0x270] ss:$8 sps:$4 sm:$0xff]  }
 0x11d   : > { %3976 = vmatprep.subr.bf16.mxu0 %v5367_v37  ;;  %v5443_v37 = vld [vmem:[%s6400_s15 + $0x670] ss:$8 sps:$4 sm:$0xff]  }
 0x11f   : > { %3693 = vmatpush1.bf16.msra.mxu1 %v5360_v38  ;;  %v5448_v38 = vld [vmem:[%s6400_s15 + $0x284] ss:$8 sps:$4 sm:$0xff]  }
 0x120   : > { %3977 = vmatpush1.bf16.msra.mxu0 %v5365_v39  ;;  %3694 = vmatprep.subr.bf16.mxu1 %v5372_v40  ;;  %v5451_v39 = vld [vmem:[%s6400_s15 + $0x684] ss:$8 sps:$4 sm:$0xff]   ;;  %v5446_v40 = vld [vmem:[%s6400_s15 + $0x280] ss:$8 sps:$4 sm:$0xff]  }
 0x121   : > { %3978 = vmatprep.subr.bf16.mxu0 %v5375_v41  ;;  %v5449_v41 = vld [vmem:[%s6400_s15 + $0x680] ss:$8 sps:$4 sm:$0xff]  }
 0x123   : > { %3695 = vmatpush1.bf16.msra.mxu1 %v5370_v42  ;;  %v5454_v42 = vld [vmem:[%s6400_s15 + $0x294] ss:$8 sps:$4 sm:$0xff]  }
 0x124   : > { %3979 = vmatpush1.bf16.msra.mxu0 %v5373_v43  ;;  %3696 = vmatprep.subr.bf16.mxu1 %v5379_v44  ;;  %v5457_v43 = vld [vmem:[%s6400_s15 + $0x694] ss:$8 sps:$4 sm:$0xff]   ;;  %v5452_v44 = vld [vmem:[%s6400_s15 + $0x290] ss:$8 sps:$4 sm:$0xff]  }
 0x125   : > { %3980 = vmatprep.subr.bf16.mxu0 %v5383_v45  ;;  %v5455_v45 = vld [vmem:[%s6400_s15 + $0x690] ss:$8 sps:$4 sm:$0xff]  }
 0x127   : > { %3697 = vmatpush1.bf16.msra.mxu1 %v5377_v46  ;;  %v5462_v46 = vld [vmem:[%s6400_s15 + $0x2a4] ss:$8 sps:$4 sm:$0xff]  }
 0x128   : > { %3981 = vmatpush1.bf16.msra.mxu0 %v5381_v47  ;;  %3698 = vmatprep.subr.bf16.mxu1 %v5388_v48  ;;  %v5467_v47 = vld [vmem:[%s6400_s15 + $0x6a4] ss:$8 sps:$4 sm:$0xff]   ;;  %v5460_v48 = vld [vmem:[%s6400_s15 + $0x2a0] ss:$8 sps:$4 sm:$0xff]  }
 0x129   : > { %3982 = vmatprep.subr.bf16.mxu0 %v5391_v49  ;;  %v5465_v49 = vld [vmem:[%s6400_s15 + $0x6a0] ss:$8 sps:$4 sm:$0xff]  }
 0x12b   : > { %3699 = vmatpush1.bf16.msra.mxu1 %v5386_v50  ;;  %v5472_v50 = vld [vmem:[%s6400_s15 + $0x2b4] ss:$8 sps:$4 sm:$0xff]  }
 0x12c   : > { %3983 = vmatpush1.bf16.msra.mxu0 %v5389_v51  ;;  %3739 = vmatprep.subr.bf16.mxu1 %v5397_v53  ;;  %v5475_v51 = vld [vmem:[%s6400_s15 + $0x6b4] ss:$8 sps:$4 sm:$0xff]   ;;  %v5473_v53 = vld [vmem:[%s6400_s15 + $0x6b0] ss:$8 sps:$4 sm:$0xff]  }
 0x12d   : > { %4023 = vmatprep.subr.bf16.mxu0 %v5403_v54  ;;  %v5480_v54 = vld [vmem:[%s6400_s15 + $0x2c4] ss:$8 sps:$4 sm:$0xff]  }
 0x12e   : > { %3701 = vmatmul.mubr.bf16.vlgmr.msra.gmra.mrb[0].mxu1 %v5392_v52  ;;  %v5470_v52 = vld [vmem:[%s6400_s15 + $0x2b0] ss:$8 sps:$4 sm:$0xff]  }
 0x12f   : > { %3985 = vmatmul.mubr.bf16.vlgmr.msra.gmra.mrb[0].mxu0 %v5398_v56  ;;  %3740 = vmatpush1.bf16.msra.mxu1 %v5395_v55  ;;  %v5485_v55 = vld [vmem:[%s6400_s15 + $0x6c4] ss:$8 sps:$4 sm:$0xff]   ;;  %v5478_v56 = vld [vmem:[%s6400_s15 + $0x2c0] ss:$8 sps:$4 sm:$0xff]  }
 0x130   : > { %4024 = vmatpush1.bf16.msra.mxu0 %v5401_v57  ;;  %3741 = vmatprep.subr.bf16.mxu1 %v5406_v58  ;;  %v5483_v57 = vld [vmem:[%s6400_s15 + $0x6c0] ss:$8 sps:$4 sm:$0xff]   ;;  %v5490_v58 = vld [vmem:[%s6400_s15 + $0x2d4] ss:$8 sps:$4 sm:$0xff]  }
 0x131   : > { %4025 = vmatprep.subr.bf16.mxu0 %v5409_v59  ;;  %3710 = vmatprep.mubr.bf16.mxu1 %v5458_v60  ;;  %v5493_v59 = vld [vmem:[%s6400_s15 + $0x6d4] ss:$8 sps:$4 sm:$0xff]   ;;  %v5488_v60 = vld [vmem:[%s6400_s15 + $0x2d0] ss:$8 sps:$4 sm:$0xff]  }
 0x132   : > { %3994 = vmatprep.mubr.bf16.mxu0 %v5463_v61  ;;  %v5491_v61 = vld [vmem:[%s6400_s15 + $0x6d0] ss:$8 sps:$4 sm:$0xff]  }
 0x133   : > { %3742 = vmatpush1.bf16.msra.mxu1 %v5404_v62  ;;  %v5497_v62 = vld [vmem:[%s6400_s15 + $0x2e4] ss:$8 sps:$4 sm:$0xff]  }
 0x134   : > { %4026 = vmatpush1.bf16.msra.mxu0 %v5407_v63  ;;  %3743 = vmatprep.subr.bf16.mxu1 %v5412_v0  ;;  %v5501_v63 = vld [vmem:[%s6400_s15 + $0x6e4] ss:$8 sps:$4 sm:$0xff]   ;;  %v5495_v0 = vld [vmem:[%s6400_s15 + $0x2e0] ss:$8 sps:$4 sm:$0xff]  }
 0x135   : > { %4027 = vmatprep.subr.bf16.mxu0 %v5415_v1  ;;  %v5499_v1 = vld [vmem:[%s6400_s15 + $0x6e0] ss:$8 sps:$4 sm:$0xff]  }
 0x136   : > { %3711 = vmatmul.mubr.bf16.gmra.mrb[4].mxu1 %v5468_v3  ;;  %v5509_v3 = vld [vmem:[%s6400_s15 + $0x6f4] ss:$8 sps:$4 sm:$0xff]  }
 0x137   : > { %3995 = vmatmul.mubr.bf16.gmra.mrb[4].mxu0 %v5469_v4  ;;  %3744 = vmatpush1.bf16.msra.mxu1 %v5410_v2  ;;  %v5506_v2 = vld [vmem:[%s6400_s15 + $0x2f4] ss:$8 sps:$4 sm:$0xff]   ;;  %v5504_v4 = vld [vmem:[%s6400_s15 + $0x2f0] ss:$8 sps:$4 sm:$0xff]  }
 0x138   : > { %4028 = vmatpush1.bf16.msra.mxu0 %v5413_v5  ;;  %3745 = vmatprep.subr.bf16.mxu1 %v5418_v6  ;;  %v5507_v5 = vld [vmem:[%s6400_s15 + $0x6f0] ss:$8 sps:$4 sm:$0xff]  }
 0x139   : > { %4029 = vmatprep.subr.bf16.mxu0 %v5421_v7  ;;  %3720 = vmatprep.mubr.bf16.mxu1 %v5476_v8  ;;  %v5510_v6 = vld [vmem:[%s7081_s0 + $0x10] ss:$72 sps:$4 sm:$0xff]   ;;  %v5515_v7 = vld [vmem:[%s6400_s15 + $0x304] ss:$8 sps:$4 sm:$0xff]  }
 0x13a   : > { %4004 = vmatprep.mubr.bf16.mxu0 %v5481_v9  ;;  %v5521_v8 = vld [vmem:[%s6400_s15 + $0x704] ss:$8 sps:$4 sm:$0xff]   ;;  %v5513_v9 = vld [vmem:[%s6400_s15 + $0x300] ss:$8 sps:$4 sm:$0xff]  }
 0x13b   : > { %3746 = vmatpush1.bf16.msra.mxu1 %v5416_v10  ;;  %v5516_v10 = vld [vmem:[%s7081_s0 + $0x30] ss:$72 sps:$4 sm:$0xff]  }
 0x13c   : > { %4030 = vmatpush1.bf16.msra.mxu0 %v5419_v11  ;;  %3747 = vmatprep.subr.bf16.mxu1 %v5424_v12  ;;  %v5519_v11 = vld [vmem:[%s6400_s15 + $0x700] ss:$8 sps:$4 sm:$0xff]   ;;  %v5524_v12 = vld [vmem:[%s6400_s15 + $0x314] ss:$8 sps:$4 sm:$0xff]  }
 0x13d   : > { %4031 = vmatprep.subr.bf16.mxu0 %v5427_v13  ;;  %v5527_v13 = vld [vmem:[%s6400_s15 + $0x714] ss:$8 sps:$4 sm:$0xff]  }
 0x13e   : > { %3721 = vmatmul.mubr.bf16.gmra.mrb[8].mxu1 %v5486_v16  ;;  %v5522_v16 = vld [vmem:[%s6400_s15 + $0x310] ss:$8 sps:$4 sm:$0xff]  }
 0x13f   : > { %4005 = vmatmul.mubr.bf16.gmra.mrb[8].mxu0 %v5487_v17  ;;  %3748 = vmatpush1.bf16.msra.mxu1 %v5422_v14  ;;  %v5576_v14 = vld [vmem:[%s7081_s0 + $0xa4] ss:$72 sps:$4 sm:$0xff]   ;;  %v5525_v17 = vld [vmem:[%s6400_s15 + $0x710] ss:$8 sps:$4 sm:$0xff]  }
 0x140   : > { %4032 = vmatpush1.bf16.msra.mxu0 %v5425_v15  ;;  %3749 = vmatprep.subr.bf16.mxu1 %v5430_v20  ;;  %v5578_v15 = vld [vmem:[%s7081_s0 + $0xc4] ss:$72 sps:$4 sm:$0xff]   ;;  %v5528_v20 = vld [vmem:[%s6400_s15 + $0x320] ss:$8 sps:$4 sm:$0xff]  }
 0x141   : > { %4033 = vmatprep.subr.bf16.mxu0 %v5433_v21  ;;  %3730 = vmatprep.mubr.bf16.mxu1 %v4671_v22  ;;  %v5580_v21 = vld [vmem:[%s7081_s0 + $0xa0] ss:$72 sps:$4 sm:$0xff]  }
 0x142   : > { %4014 = vmatprep.mubr.bf16.mxu0 %v4679_v23  ;;  %v5584_v22 = vld [vmem:[%s7081_s0 + $0xc0] ss:$72 sps:$4 sm:$0xff]  }
 0x143   : > { %3750 = vmatpush1.bf16.msra.mxu1 %v5428_v24  ;;  %v5531_v23 = vld [vmem:[%s6400_s15 + $0x720] ss:$8 sps:$4 sm:$0xff]   ;;  %v5536_v24 = vld [vmem:[%s6400_s15 + $0x334] ss:$8 sps:$4 sm:$0xff]  }
 0x144   : > { %4034 = vmatpush1.bf16.msra.mxu0 %v5431_v25  ;;  %3751 = vmatprep.subr.bf16.mxu1 %v5436_v26  ;;  %v5539_v25 = vld [vmem:[%s6400_s15 + $0x734] ss:$8 sps:$4 sm:$0xff]  }
 0x145   : > { %4035 = vmatprep.subr.bf16.mxu0 %v5439_v27  ;;  %v5594_v26 = vld [vmem:[%s7081_s0 + $0x134] ss:$72 sps:$4 sm:$0xff]   ;;  %v5534_v27 = vld [vmem:[%s6400_s15 + $0x330] ss:$8 sps:$4 sm:$0xff]  }
 0x146   : > { %3731 = vmatmul.mubr.bf16.gmra.mrb[12].mxu1 %v4670_v30  ;;  %v5542_v30 = vld [vmem:[%s6400_s15 + $0x344] ss:$8 sps:$4 sm:$0xff]  }
 0x147   : > { %4015 = vmatmul.mubr.bf16.gmra.mrb[12].mxu0 %v4678_v31  ;;  %3752 = vmatpush1.bf16.msra.mxu1 %v5434_v28  ;;  %v5596_v28 = vld [vmem:[%s7081_s0 + $0x154] ss:$72 sps:$4 sm:$0xff]   ;;  %v5545_v31 = vld [vmem:[%s6400_s15 + $0x744] ss:$8 sps:$4 sm:$0xff]  }
 0x148   : > { %4036 = vmatpush1.bf16.msra.mxu0 %v5437_v29  ;;  %3753 = vmatprep.subr.bf16.mxu1 %v5442_v32  ;;  %v5537_v29 = vld [vmem:[%s6400_s15 + $0x730] ss:$8 sps:$4 sm:$0xff]  }
 0x149   : > { %4037 = vmatprep.subr.bf16.mxu0 %v5445_v33  ;;  %3771 = vmatprep.mubr.bf16.mxu1 %v5512_v34  ;;  %v5598_v32 = vld [vmem:[%s7081_s0 + $0x130] ss:$72 sps:$4 sm:$0xff]   ;;  %v1517_v34 = vld [vmem:[%s7081_s0 + $0x1c0] sm:$0xff] }
 0x14a   : > { %4055 = vmatprep.mubr.bf16.mxu0 %v5518_v35  ;;  %v5602_v33 = vld [vmem:[%s7081_s0 + $0x150] ss:$72 sps:$4 sm:$0xff]   ;;  %v1521_v35 = vld [vmem:[%s7081_s0 + $0x1e0] sm:$0xff] }
 0x14b   : > { %3754 = vmatpush1.bf16.msra.mxu1 %v5440_v36  ;;  %v5540_v36 = vld [vmem:[%s6400_s15 + $0x340] ss:$8 sps:$4 sm:$0xff]  }
 0x14c   : > { %4038 = vmatpush1.bf16.msra.mxu0 %v5443_v37  ;;  %3755 = vmatprep.subr.bf16.mxu1 %v5448_v38  ;;  %v5543_v37 = vld [vmem:[%s6400_s15 + $0x740] ss:$8 sps:$4 sm:$0xff]   ;;  %v5548_v38 = vld [vmem:[%s6400_s15 + $0x354] ss:$8 sps:$4 sm:$0xff]  }
 0x14d   : > { %4039 = vmatprep.subr.bf16.mxu0 %v5451_v39  ;;  %v5551_v39 = vld [vmem:[%s6400_s15 + $0x754] ss:$8 sps:$4 sm:$0xff]  }
 0x14f   : > { %3756 = vmatpush1.bf16.msra.mxu1 %v5446_v40  ;;  %v4673_v40 = vcombine.high %v1517_v34, %v1517_v34 }
 0x150   : > { %4040 = vmatpush1.bf16.msra.mxu0 %v5449_v41  ;;  %3757 = vmatprep.subr.bf16.mxu1 %v5454_v42  ;;  %v4681_v41 = vcombine.high %v1521_v35, %v1521_v35  ;;  %v5546_v42 = vld [vmem:[%s6400_s15 + $0x350] ss:$8 sps:$4 sm:$0xff]  }
 0x151   : > { %4041 = vmatprep.subr.bf16.mxu0 %v5457_v43  ;;  %v5549_v43 = vld [vmem:[%s6400_s15 + $0x750] ss:$8 sps:$4 sm:$0xff]  }
 0x153   : > { %3758 = vmatpush1.bf16.msra.mxu1 %v5452_v44  ;;  %v5554_v44 = vld [vmem:[%s6400_s15 + $0x364] ss:$8 sps:$4 sm:$0xff]  }
 0x154   : > { %4042 = vmatpush1.bf16.msra.mxu0 %v5455_v45  ;;  %3759 = vmatprep.subr.bf16.mxu1 %v5462_v46  ;;  %v5557_v45 = vld [vmem:[%s6400_s15 + $0x764] ss:$8 sps:$4 sm:$0xff]   ;;  %v5552_v46 = vld [vmem:[%s6400_s15 + $0x360] ss:$8 sps:$4 sm:$0xff]  }
 0x155   : > { %4043 = vmatprep.subr.bf16.mxu0 %v5467_v47  ;;  %v5555_v47 = vld [vmem:[%s6400_s15 + $0x760] ss:$8 sps:$4 sm:$0xff]  }
 0x157   : > { %3760 = vmatpush1.bf16.msra.mxu1 %v5460_v48  ;;  %v4672_v48 = vcombine.low %v1517_v34, %v1517_v34  ;;  %v5645_v34 = vld [vmem:[%s7081_s0 + $0xc8] ss:$72 sps:$4 sm:$0xff]  }
 0x158   : > { %4044 = vmatpush1.bf16.msra.mxu0 %v5465_v49  ;;  %3761 = vmatprep.subr.bf16.mxu1 %v5472_v50  ;;  %v4680_v49 = vcombine.low %v1521_v35, %v1521_v35  ;;  %v5560_v50 = vld [vmem:[%s6400_s15 + $0x374] ss:$8 sps:$4 sm:$0xff]   ;;  %v5646_v35 = vld [vmem:[%s6400_s15 + $0x820] ss:$8 sps:$4 sm:$0xff]  }
 0x159   : > { %4045 = vmatprep.subr.bf16.mxu0 %v5475_v51  ;;  %v5563_v51 = vld [vmem:[%s6400_s15 + $0x774] ss:$8 sps:$4 sm:$0xff]  }
 0x15b   : > { %3762 = vmatpush1.bf16.msra.mxu1 %v5470_v52  ;;  %v5630_v52 = vld [vmem:[%s7081_s0 + $0x1c] ss:$72 sps:$4 sm:$0xff]  }
 0x15c   : > { %4046 = vmatpush1.bf16.msra.mxu0 %v5473_v53  ;;  %3763 = vmatprep.subr.bf16.mxu1 %v5480_v54  ;;  %v5633_v53 = vld [vmem:[%s7081_s0 + $0x3c] ss:$72 sps:$4 sm:$0xff]   ;;  %v5558_v54 = vld [vmem:[%s6400_s15 + $0x370] ss:$8 sps:$4 sm:$0xff]  }
 0x15d   : > { %4047 = vmatprep.subr.bf16.mxu0 %v5485_v55  ;;  %v5561_v55 = vld [vmem:[%s6400_s15 + $0x770] ss:$8 sps:$4 sm:$0xff]  }
 0x15f   : > { %3764 = vmatpush1.bf16.msra.mxu1 %v5478_v56  ;;  %v5566_v56 = vld [vmem:[%s6400_s15 + $0x384] ss:$8 sps:$4 sm:$0xff]  }
 0x160   : > { %4048 = vmatpush1.bf16.msra.mxu0 %v5483_v57  ;;  %3765 = vmatprep.subr.bf16.mxu1 %v5490_v58  ;;  %v5569_v57 = vld [vmem:[%s6400_s15 + $0x784] ss:$8 sps:$4 sm:$0xff]   ;;  %v5564_v58 = vld [vmem:[%s6400_s15 + $0x380] ss:$8 sps:$4 sm:$0xff]  }
 0x161   : > { %4049 = vmatprep.subr.bf16.mxu0 %v5493_v59  ;;  %v5567_v59 = vld [vmem:[%s6400_s15 + $0x780] ss:$8 sps:$4 sm:$0xff]  }
 0x163   : > { %3766 = vmatpush1.bf16.msra.mxu1 %v5488_v60  ;;  %v5572_v60 = vld [vmem:[%s6400_s15 + $0x394] ss:$8 sps:$4 sm:$0xff]  }
 0x164   : > { %4050 = vmatpush1.bf16.msra.mxu0 %v5491_v61  ;;  %3767 = vmatprep.subr.bf16.mxu1 %v5497_v62  ;;  %v5575_v61 = vld [vmem:[%s6400_s15 + $0x794] ss:$8 sps:$4 sm:$0xff]   ;;  %v5570_v62 = vld [vmem:[%s6400_s15 + $0x390] ss:$8 sps:$4 sm:$0xff]  }
 0x165   : > { %4051 = vmatprep.subr.bf16.mxu0 %v5501_v63  ;;  %v5573_v63 = vld [vmem:[%s6400_s15 + $0x790] ss:$8 sps:$4 sm:$0xff]  }
 0x167   : > { %3768 = vmatpush1.bf16.msra.mxu1 %v5495_v0  ;;  %v5583_v0 = vld [vmem:[%s6400_s15 + $0x3a4] ss:$8 sps:$4 sm:$0xff]  }
 0x168   : > { %4052 = vmatpush1.bf16.msra.mxu0 %v5499_v1  ;;  %3769 = vmatprep.subr.bf16.mxu1 %v5506_v2  ;;  %v5587_v1 = vld [vmem:[%s6400_s15 + $0x7a4] ss:$8 sps:$4 sm:$0xff]   ;;  %v5581_v2 = vld [vmem:[%s6400_s15 + $0x3a0] ss:$8 sps:$4 sm:$0xff]  }
 0x169   : > { %4053 = vmatprep.subr.bf16.mxu0 %v5509_v3  ;;  %v5585_v3 = vld [vmem:[%s6400_s15 + $0x7a0] ss:$8 sps:$4 sm:$0xff]  }
 0x16b   : > { %3770 = vmatpush1.bf16.msra.mxu1 %v5504_v4  ;;  %v5590_v4 = vld [vmem:[%s6400_s15 + $0x3b4] ss:$8 sps:$4 sm:$0xff]  }
 0x16c   : > { %4054 = vmatpush1.bf16.msra.mxu0 %v5507_v5  ;;  %3810 = vmatprep.subr.bf16.mxu1 %v5515_v7  ;;  %v5593_v5 = vld [vmem:[%s6400_s15 + $0x7b4] ss:$8 sps:$4 sm:$0xff]   ;;  %v5591_v7 = vld [vmem:[%s6400_s15 + $0x7b0] ss:$8 sps:$4 sm:$0xff]  }
 0x16d   : > { %4094 = vmatprep.subr.bf16.mxu0 %v5521_v8  ;;  %v5601_v8 = vld [vmem:[%s6400_s15 + $0x3c4] ss:$8 sps:$4 sm:$0xff]  }
 0x16e   : > { %3772 = vmatmul.mubr.bf16.vlgmr.msra.gmra.mrb[0].mxu1 %v5510_v6  ;;  %v5588_v6 = vld [vmem:[%s6400_s15 + $0x3b0] ss:$8 sps:$4 sm:$0xff]  }
 0x16f   : > { %4056 = vmatmul.mubr.bf16.vlgmr.msra.gmra.mrb[0].mxu0 %v5516_v10  ;;  %3811 = vmatpush1.bf16.msra.mxu1 %v5513_v9  ;;  %v5605_v9 = vld [vmem:[%s6400_s15 + $0x7c4] ss:$8 sps:$4 sm:$0xff]   ;;  %v5599_v10 = vld [vmem:[%s6400_s15 + $0x3c0] ss:$8 sps:$4 sm:$0xff]  }
 0x170   : > { %4095 = vmatpush1.bf16.msra.mxu0 %v5519_v11  ;;  %3812 = vmatprep.subr.bf16.mxu1 %v5524_v12  ;;  %v5603_v11 = vld [vmem:[%s6400_s15 + $0x7c0] ss:$8 sps:$4 sm:$0xff]   ;;  %v5608_v12 = vld [vmem:[%s6400_s15 + $0x3d4] ss:$8 sps:$4 sm:$0xff]  }
 0x171   : > { %4096 = vmatprep.subr.bf16.mxu0 %v5527_v13  ;;  %3781 = vmatprep.mubr.bf16.mxu1 %v5576_v14  ;;  %v5611_v13 = vld [vmem:[%s6400_s15 + $0x7d4] ss:$8 sps:$4 sm:$0xff]   ;;  %v5606_v14 = vld [vmem:[%s6400_s15 + $0x3d0] ss:$8 sps:$4 sm:$0xff]  }
 0x172   : > { %4065 = vmatprep.mubr.bf16.mxu0 %v5578_v15  ;;  %v5609_v15 = vld [vmem:[%s6400_s15 + $0x7d0] ss:$8 sps:$4 sm:$0xff]  }
 0x173   : > { %3813 = vmatpush1.bf16.msra.mxu1 %v5522_v16  ;;  %v5617_v16 = vld [vmem:[%s6400_s15 + $0x3e4] ss:$8 sps:$4 sm:$0xff]  }
 0x174   : > { %4097 = vmatpush1.bf16.msra.mxu0 %v5525_v17  ;;  %3814 = vmatprep.subr.bf16.mxu1 %v5530_v18  ;;  %v5621_v17 = vld [vmem:[%s6400_s15 + $0x7e4] ss:$8 sps:$4 sm:$0xff]   ;;  %v5615_v18 = vld [vmem:[%s6400_s15 + $0x3e0] ss:$8 sps:$4 sm:$0xff]  }
 0x175   : > { %4098 = vmatprep.subr.bf16.mxu0 %v5533_v19  ;;  %v5619_v19 = vld [vmem:[%s6400_s15 + $0x7e0] ss:$8 sps:$4 sm:$0xff]  }
 0x176   : > { %3782 = vmatmul.mubr.bf16.gmra.mrb[4].mxu1 %v5580_v21  ;;  %v5627_v21 = vld [vmem:[%s6400_s15 + $0x7f4] ss:$8 sps:$4 sm:$0xff]  }
 0x177   : > { %4066 = vmatmul.mubr.bf16.gmra.mrb[4].mxu0 %v5584_v22  ;;  %3815 = vmatpush1.bf16.msra.mxu1 %v5528_v20  ;;  %v5624_v20 = vld [vmem:[%s6400_s15 + $0x3f4] ss:$8 sps:$4 sm:$0xff]   ;;  %v5622_v22 = vld [vmem:[%s6400_s15 + $0x3f0] ss:$8 sps:$4 sm:$0xff]  }
 0x178   : > { %4099 = vmatpush1.bf16.msra.mxu0 %v5531_v23  ;;  %3816 = vmatprep.subr.bf16.mxu1 %v5536_v24  ;;  %v5625_v23 = vld [vmem:[%s6400_s15 + $0x7f0] ss:$8 sps:$4 sm:$0xff]   ;;  %v5636_v24 = vld [vmem:[%s6400_s15 + $0x804] ss:$8 sps:$4 sm:$0xff]  }
 0x179   : > { %4100 = vmatprep.subr.bf16.mxu0 %v5539_v25  ;;  %3791 = vmatprep.mubr.bf16.mxu1 %v5594_v26  ;;  %v5628_v25 = vld [vmem:[%s7081_s0 + $0x18] ss:$72 sps:$4 sm:$0xff]  }
 0x17a   : > { %4075 = vmatprep.mubr.bf16.mxu0 %v5596_v28  ;;  %v5631_v26 = vld [vmem:[%s7081_s0 + $0x38] ss:$72 sps:$4 sm:$0xff]   ;;  %v5639_v28 = vld [vmem:[%s6400_s15 + $0x814] ss:$8 sps:$4 sm:$0xff]  }
 0x17b   : > { %3817 = vmatpush1.bf16.msra.mxu1 %v5534_v27  ;;  %v5634_v27 = vld [vmem:[%s6400_s15 + $0x800] ss:$8 sps:$4 sm:$0xff]  }
 0x17c   : > { %4101 = vmatpush1.bf16.msra.mxu0 %v5537_v29  ;;  %3818 = vmatprep.subr.bf16.mxu1 %v5542_v30  ;;  %v5640_v29 = vld [vmem:[%s7081_s0 + $0xac] ss:$72 sps:$4 sm:$0xff]  }
 0x17d   : > { %4102 = vmatprep.subr.bf16.mxu0 %v5545_v31  ;;  %v5642_v30 = vld [vmem:[%s7081_s0 + $0xcc] ss:$72 sps:$4 sm:$0xff]   ;;  %v5637_v31 = vld [vmem:[%s6400_s15 + $0x810] ss:$8 sps:$4 sm:$0xff]  }
 0x17e   : > { %3792 = vmatmul.mubr.bf16.gmra.mrb[8].mxu1 %v5598_v32  ;;  %v5648_v32 = vld [vmem:[%s6400_s15 + $0x824] ss:$8 sps:$4 sm:$0xff]  }
 0x17f   : > { %4076 = vmatmul.mubr.bf16.gmra.mrb[8].mxu0 %v5602_v33  ;;  %3819 = vmatpush1.bf16.msra.mxu1 %v5540_v36  ;;  %v5644_v33 = vld [vmem:[%s7081_s0 + $0xa8] ss:$72 sps:$4 sm:$0xff]   ;;  %v5651_v36 = vld [vmem:[%s6400_s15 + $0x834] ss:$8 sps:$4 sm:$0xff]  }
 0x180   : > { %4103 = vmatpush1.bf16.msra.mxu0 %v5543_v37  ;;  %3820 = vmatprep.subr.bf16.mxu1 %v5548_v38  ;;  %v5652_v37 = vld [vmem:[%s7081_s0 + $0x13c] ss:$72 sps:$4 sm:$0xff]  }
 0x181   : > { %4104 = vmatprep.subr.bf16.mxu0 %v5551_v39  ;;  %3801 = vmatprep.mubr.bf16.mxu1 %v4673_v40  ;;  %v5654_v38 = vld [vmem:[%s7081_s0 + $0x15c] ss:$72 sps:$4 sm:$0xff]   ;;  %v5649_v39 = vld [vmem:[%s6400_s15 + $0x830] ss:$8 sps:$4 sm:$0xff]  }
 0x182   : > { %4085 = vmatprep.mubr.bf16.mxu0 %v4681_v41  ;;  %v5660_v40 = vld [vmem:[%s6400_s15 + $0x844] ss:$8 sps:$4 sm:$0xff]   ;;  %v5656_v41 = vld [vmem:[%s7081_s0 + $0x138] ss:$72 sps:$4 sm:$0xff]  }
 0x183   : > { %3821 = vmatpush1.bf16.msra.mxu1 %v5546_v42  ;;  %v5657_v42 = vld [vmem:[%s7081_s0 + $0x158] ss:$72 sps:$4 sm:$0xff]  }
 0x184   : > { %4105 = vmatpush1.bf16.msra.mxu0 %v5549_v43  ;;  %3822 = vmatprep.subr.bf16.mxu1 %v5554_v44  ;;  %v1518_v43 = vld [vmem:[%s7081_s0 + $0x1c8] sm:$0xff] }
 0x185   : > { %4106 = vmatprep.subr.bf16.mxu0 %v5557_v45  ;;  %v1522_v44 = vld [vmem:[%s7081_s0 + $0x1e8] sm:$0xff] }
 0x186   : > { %3802 = vmatmul.mubr.bf16.gmra.mrb[12].mxu1 %v4672_v48  ;;  %v5658_v45 = vld [vmem:[%s6400_s15 + $0x840] ss:$8 sps:$4 sm:$0xff]   ;;  %v4683_v48 = vcombine.high %v1522_v44, %v1522_v44 }
 0x187   : > { %4086 = vmatmul.mubr.bf16.gmra.mrb[12].mxu0 %v4680_v49  ;;  %3823 = vmatpush1.bf16.msra.mxu1 %v5552_v46  ;;  %v5663_v46 = vld [vmem:[%s6400_s15 + $0x854] ss:$8 sps:$4 sm:$0xff]   ;;  %v5661_v49 = vld [vmem:[%s6400_s15 + $0x850] ss:$8 sps:$4 sm:$0xff]  }
 0x188   : > { %4107 = vmatpush1.bf16.msra.mxu0 %v5555_v47  ;;  %3824 = vmatprep.subr.bf16.mxu1 %v5560_v50  ;;  %v4675_v47 = vcombine.high %v1518_v43, %v1518_v43  ;;  %v5670_v50 = vld [vmem:[%s6400_s15 + $0x864] ss:$8 sps:$4 sm:$0xff]  }
 0x189   : > { %4108 = vmatprep.subr.bf16.mxu0 %v5563_v51  ;;  %3842 = vmatprep.mubr.bf16.mxu1 %v5630_v52  ;;  %v4674_v51 = vcombine.low %v1518_v43, %v1518_v43  ;;  %v4682_v52 = vcombine.low %v1522_v44, %v1522_v44 }
 0x18a   : > { %4126 = vmatprep.mubr.bf16.mxu0 %v5633_v53  ;;  %v5668_v53 = vld [vmem:[%s6400_s15 + $0x860] ss:$8 sps:$4 sm:$0xff]  }
 0x18b   : > { %3825 = vmatpush1.bf16.msra.mxu1 %v5558_v54  ;;  %v5673_v54 = vld [vmem:[%s6400_s15 + $0x874] ss:$8 sps:$4 sm:$0xff]  }
 0x18c   : > { %4109 = vmatpush1.bf16.msra.mxu0 %v5561_v55  ;;  %3826 = vmatprep.subr.bf16.mxu1 %v5566_v56  ;;  %v5700_v55 = vld [vmem:[%s7081_s0 + $0x44] ss:$72 sps:$4 sm:$0xff]  }
 0x18d   : > { %4110 = vmatprep.subr.bf16.mxu0 %v5569_v57  ;;  %v5703_v56 = vld [vmem:[%s7081_s0 + $0x164] ss:$72 sps:$4 sm:$0xff]   ;;  %v5671_v57 = vld [vmem:[%s6400_s15 + $0x870] ss:$8 sps:$4 sm:$0xff]  }
 0x18f   : > { %3827 = vmatpush1.bf16.msra.mxu1 %v5564_v58  ;;  %v5676_v58 = vld [vmem:[%s6400_s15 + $0x884] ss:$8 sps:$4 sm:$0xff]  }
 0x190   : > { %4111 = vmatpush1.bf16.msra.mxu0 %v5567_v59  ;;  %3828 = vmatprep.subr.bf16.mxu1 %v5572_v60  ;;  %v5674_v59 = vld [vmem:[%s6400_s15 + $0x880] ss:$8 sps:$4 sm:$0xff]   ;;  %v5679_v60 = vld [vmem:[%s6400_s15 + $0x894] ss:$8 sps:$4 sm:$0xff]  }
 0x191   : > { %4112 = vmatprep.subr.bf16.mxu0 %v5575_v61  ;;  %v5677_v61 = vld [vmem:[%s6400_s15 + $0x890] ss:$8 sps:$4 sm:$0xff]  }
 0x193   : > { %3829 = vmatpush1.bf16.msra.mxu1 %v5570_v62  ;;  %v5682_v62 = vld [vmem:[%s6400_s15 + $0x8a4] ss:$8 sps:$4 sm:$0xff]  }
 0x194   : > { %4113 = vmatpush1.bf16.msra.mxu0 %v5573_v63  ;;  %3830 = vmatprep.subr.bf16.mxu1 %v5583_v0  ;;  %v5680_v63 = vld [vmem:[%s6400_s15 + $0x8a0] ss:$8 sps:$4 sm:$0xff]   ;;  %v5685_v0 = vld [vmem:[%s6400_s15 + $0x8b4] ss:$8 sps:$4 sm:$0xff]  }
 0x195   : > { %4114 = vmatprep.subr.bf16.mxu0 %v5587_v1  ;;  %v5683_v1 = vld [vmem:[%s6400_s15 + $0x8b0] ss:$8 sps:$4 sm:$0xff]  }
 0x197   : > { %3831 = vmatpush1.bf16.msra.mxu1 %v5581_v2  ;;  %v5688_v2 = vld [vmem:[%s6400_s15 + $0x8c4] ss:$8 sps:$4 sm:$0xff]  }
 0x198   : > { %4115 = vmatpush1.bf16.msra.mxu0 %v5585_v3  ;;  %3832 = vmatprep.subr.bf16.mxu1 %v5590_v4  ;;  %v5686_v3 = vld [vmem:[%s6400_s15 + $0x8c0] ss:$8 sps:$4 sm:$0xff]   ;;  %v5691_v4 = vld [vmem:[%s6400_s15 + $0x8d4] ss:$8 sps:$4 sm:$0xff]  }
 0x199   : > { %4116 = vmatprep.subr.bf16.mxu0 %v5593_v5  ;;  %v5689_v5 = vld [vmem:[%s6400_s15 + $0x8d0] ss:$8 sps:$4 sm:$0xff]  }
 0x19b   : > { %3833 = vmatpush1.bf16.msra.mxu1 %v5588_v6  ;;  %v5694_v6 = vld [vmem:[%s6400_s15 + $0x8e4] ss:$8 sps:$4 sm:$0xff]  }
 0x19c   : > { %4117 = vmatpush1.bf16.msra.mxu0 %v5591_v7  ;;  %3834 = vmatprep.subr.bf16.mxu1 %v5601_v8  ;;  %v5692_v7 = vld [vmem:[%s6400_s15 + $0x8e0] ss:$8 sps:$4 sm:$0xff]   ;;  %v5697_v8 = vld [vmem:[%s6400_s15 + $0x8f4] ss:$8 sps:$4 sm:$0xff]  }
 0x19d   : > { %4118 = vmatprep.subr.bf16.mxu0 %v5605_v9  ;;  %v5695_v9 = vld [vmem:[%s6400_s15 + $0x8f0] ss:$8 sps:$4 sm:$0xff]  }
 0x19f   : > { %3835 = vmatpush1.bf16.msra.mxu1 %v5599_v10  ;;  %v1523_v10 = vld [vmem:[%s7081_s0 + $0x1f0] sm:$0xff] }
 0x1a0   : > { %4119 = vmatpush1.bf16.msra.mxu0 %v5603_v11  ;;  %3836 = vmatprep.subr.bf16.mxu1 %v5608_v12  ;;  %v5698_v11 = vld [vmem:[%s7081_s0 + $0x40] ss:$72 sps:$4 sm:$0xff]  }
 0x1a1   : > { %4120 = vmatprep.subr.bf16.mxu0 %v5611_v13  ;;  %v5701_v12 = vld [vmem:[%s7081_s0 + $0x160] ss:$72 sps:$4 sm:$0xff]   ;;  %v5704_v13 = vld [vmem:[%s7081_s0 + $0xd4] ss:$72 sps:$4 sm:$0xff]  }
 0x1a3   : > { %3837 = vmatpush1.bf16.msra.mxu1 %v5606_v14  ;;  %v4685_v14 = vcombine.high %v1523_v10, %v1523_v10 }
 0x1a4   : > { %4121 = vmatpush1.bf16.msra.mxu0 %v5609_v15  ;;  %3838 = vmatprep.subr.bf16.mxu1 %v5617_v16  ;;  %v5707_v15 = vld [vmem:[%s7081_s0 + $0xd0] ss:$72 sps:$4 sm:$0xff]   ;;  %v4684_v16 = vcombine.low %v1523_v10, %v1523_v10 }
 0x1a5   : > { %4122 = vmatprep.subr.bf16.mxu0 %v5621_v17  ;;  %v1814_v17 = vlaneseq }
 0x1a7   : > { %3839 = vmatpush1.bf16.msra.mxu1 %v5615_v18  ;;  %v6876_v18 = vshrl.u32 %v1814_v17, 7 }
 0x1a8   : > { %4123 = vmatpush1.bf16.msra.mxu0 %v5619_v19  ;;  %3840 = vmatprep.subr.bf16.mxu1 %v5624_v20  ;;  %v4428_v20 = vld [vmem:[%s1458_s27] sm:$0x3] }
 0x1a9   : > { %4124 = vmatprep.subr.bf16.mxu0 %v5627_v21  ;;  %v6883_v19 = vsub.s32 0, %v6876_v18 }
 0x1ab   : > { %3841 = vmatpush1.bf16.msra.mxu1 %v5622_v22  ;;  %v6886_v21 = vrot.slane %v4428_v20, %v6883_v19 }
 0x1ac   : > { %4125 = vmatpush1.bf16.msra.mxu0 %v5625_v23  ;;  %4980 = vmatprep.subr.bf16.mxu1 %v5636_v24 }
 0x1ad   : > { %4165 = vmatprep.subr.bf16.mxu0 %v5636_v24 }
 0x1ae   : > { %3843 = vmatmul.mubr.bf16.vlgmr.msra.gmra.mrb[0].mxu1 %v5628_v25 }
 0x1af   : > { %4127 = vmatmul.mubr.bf16.vlgmr.msra.gmra.mrb[0].mxu0 %v5631_v26  ;;  %4996 = vmatpush1.bf16.msra.mxu1 %v5634_v27  ;;  %v6889_v26 = vsub.s32 1, %v6876_v18 }
 0x1b0   : > { %4166 = vmatpush1.bf16.msra.mxu0 %v5634_v27  ;;  %4981 = vmatprep.subr.bf16.mxu1 %v5639_v28 }
 0x1b1   : > { %4167 = vmatprep.subr.bf16.mxu0 %v5639_v28  ;;  %3852 = vmatprep.mubr.bf16.mxu1 %v5640_v29  ;;  %v6898_v29 = vrot.slane %v4428_v20, %v6889_v26 }
 0x1b2   : > { %4136 = vmatprep.mubr.bf16.mxu0 %v5642_v30 }
 0x1b3   : > { %4997 = vmatpush1.bf16.msra.mxu1 %v5637_v31 }
 0x1b4   : > { %4168 = vmatpush1.bf16.msra.mxu0 %v5637_v31  ;;  %4982 = vmatprep.subr.bf16.mxu1 %v5648_v32 }
 0x1b5   : > { %4169 = vmatprep.subr.bf16.mxu0 %v5648_v32  ;;  %v1812_v32 = vld [vmem:[%s1448_s30] sm:$0x3] }
 0x1b6   : > { %3853 = vmatmul.mubr.bf16.gmra.mrb[4].mxu1 %v5644_v33  ;;  %v6905_v33 = vrot.slane %v1812_v32, %v6883_v19 }
 0x1b7   : > { %4137 = vmatmul.mubr.bf16.gmra.mrb[4].mxu0 %v5645_v34  ;;  %4998 = vmatpush1.bf16.msra.mxu1 %v5646_v35  ;;  %v6908_v34 = vrot.slane %v1812_v32, %v6889_v26 }
 0x1b8   : > { %4170 = vmatpush1.bf16.msra.mxu0 %v5646_v35  ;;  %4983 = vmatprep.subr.bf16.mxu1 %v5651_v36 }
 0x1b9   : > { %4171 = vmatprep.subr.bf16.mxu0 %v5651_v36  ;;  %3862 = vmatprep.mubr.bf16.mxu1 %v5652_v37 }
 0x1ba   : > { %4146 = vmatprep.mubr.bf16.mxu0 %v5654_v38 }
 0x1bb   : > { %4999 = vmatpush1.bf16.msra.mxu1 %v5649_v39 }
 0x1bc   : > { %4172 = vmatpush1.bf16.msra.mxu0 %v5649_v39  ;;  %4984 = vmatprep.subr.bf16.mxu1 %v5660_v40 }
 0x1bd   : > { %4173 = vmatprep.subr.bf16.mxu0 %v5660_v40 }
 0x1be   : > { %3863 = vmatmul.mubr.bf16.gmra.mrb[8].mxu1 %v5656_v41 }
 0x1bf   : > { %4147 = vmatmul.mubr.bf16.gmra.mrb[8].mxu0 %v5657_v42  ;;  %5000 = vmatpush1.bf16.msra.mxu1 %v5658_v45 }
 0x1c0   : > { %4174 = vmatpush1.bf16.msra.mxu0 %v5658_v45  ;;  %4985 = vmatprep.subr.bf16.mxu1 %v5663_v46 }
 0x1c1   : > { %4175 = vmatprep.subr.bf16.mxu0 %v5663_v46  ;;  %3872 = vmatprep.mubr.bf16.mxu1 %v4675_v47 }
 0x1c2   : > { %4156 = vmatprep.mubr.bf16.mxu0 %v4683_v48 }
 0x1c3   : > { %5001 = vmatpush1.bf16.msra.mxu1 %v5661_v49 }
 0x1c4   : > { %4176 = vmatpush1.bf16.msra.mxu0 %v5661_v49  ;;  %4986 = vmatprep.subr.bf16.mxu1 %v5670_v50 }
 0x1c5   : > { %4177 = vmatprep.subr.bf16.mxu0 %v5670_v50 }
 0x1c6   : > { %3873 = vmatmul.mubr.bf16.gmra.mrb[12].mxu1 %v4674_v51 }
 0x1c7   : > { %4157 = vmatmul.mubr.bf16.gmra.mrb[12].mxu0 %v4682_v52  ;;  %5002 = vmatpush1.bf16.msra.mxu1 %v5668_v53 }
 0x1c8   : > { %4178 = vmatpush1.bf16.msra.mxu0 %v5668_v53  ;;  %4987 = vmatprep.subr.bf16.mxu1 %v5673_v54 }
 0x1c9   : > { %4179 = vmatprep.subr.bf16.mxu0 %v5673_v54  ;;  %4197 = vmatprep.mubr.bf16.mxu0 %v5700_v55 }
 0x1ca   : > { %4217 = vmatprep.mubr.bf16.mxu1 %v5703_v56 }
 0x1cb   : > { %5003 = vmatpush1.bf16.msra.mxu1 %v5671_v57 }
 0x1cc   : > { %4180 = vmatpush1.bf16.msra.mxu0 %v5671_v57  ;;  %4988 = vmatprep.subr.bf16.mxu1 %v5676_v58 }
 0x1cd   : > { %4181 = vmatprep.subr.bf16.mxu0 %v5676_v58 }
 0x1cf   : > { %5004 = vmatpush1.bf16.msra.mxu1 %v5674_v59 }
 0x1d0   : > { %4182 = vmatpush1.bf16.msra.mxu0 %v5674_v59  ;;  %4989 = vmatprep.subr.bf16.mxu1 %v5679_v60 }
 0x1d1   : > { %4183 = vmatprep.subr.bf16.mxu0 %v5679_v60 }
 0x1d3   : > { %5005 = vmatpush1.bf16.msra.mxu1 %v5677_v61 }
 0x1d4   : > { %4184 = vmatpush1.bf16.msra.mxu0 %v5677_v61  ;;  %4990 = vmatprep.subr.bf16.mxu1 %v5682_v62 }
 0x1d5   : > { %4185 = vmatprep.subr.bf16.mxu0 %v5682_v62 }
 0x1d7   : > { %5006 = vmatpush1.bf16.msra.mxu1 %v5680_v63 }
 0x1d8   : > { %4186 = vmatpush1.bf16.msra.mxu0 %v5680_v63  ;;  %4991 = vmatprep.subr.bf16.mxu1 %v5685_v0 }
 0x1d9   : > { %4187 = vmatprep.subr.bf16.mxu0 %v5685_v0 }
 0x1db   : > { %5007 = vmatpush1.bf16.msra.mxu1 %v5683_v1 }
 0x1dc   : > { %4188 = vmatpush1.bf16.msra.mxu0 %v5683_v1  ;;  %4992 = vmatprep.subr.bf16.mxu1 %v5688_v2 }
 0x1dd   : > { %4189 = vmatprep.subr.bf16.mxu0 %v5688_v2 }
 0x1df   : > { %5008 = vmatpush1.bf16.msra.mxu1 %v5686_v3 }
 0x1e0   : > { %4190 = vmatpush1.bf16.msra.mxu0 %v5686_v3  ;;  %4993 = vmatprep.subr.bf16.mxu1 %v5691_v4 }
 0x1e1   : > { %4191 = vmatprep.subr.bf16.mxu0 %v5691_v4 }
 0x1e3   : > { %5009 = vmatpush1.bf16.msra.mxu1 %v5689_v5 }
 0x1e4   : > { %4192 = vmatpush1.bf16.msra.mxu0 %v5689_v5  ;;  %4994 = vmatprep.subr.bf16.mxu1 %v5694_v6 }
 0x1e5   : > { %4193 = vmatprep.subr.bf16.mxu0 %v5694_v6 }
 0x1e7   : > { %5010 = vmatpush1.bf16.msra.mxu1 %v5692_v7 }
 0x1e8   : > { %4194 = vmatpush1.bf16.msra.mxu0 %v5692_v7  ;;  %4995 = vmatprep.subr.bf16.mxu1 %v5697_v8 }
 0x1e9   : > { %4195 = vmatprep.subr.bf16.mxu0 %v5697_v8 }
 0x1eb   : > { %5011 = vmatpush1.bf16.msra.mxu1 %v5695_v9 }
 0x1ec   : > { %4196 = vmatpush1.bf16.msra.mxu0 %v5695_v9 }
 0x1ee   : > { %4218 = vmatmul.mubr.bf16.vlgmr.msra.gmra.mrb[16].mxu1 %v5701_v12 }
 0x1ef   : > { %4198 = vmatmul.mubr.bf16.vlgmr.msra.gmra.mrb[0].mxu0 %v5698_v11  ;;  %4227 = vmatprep.mubr.bf16.mxu1 %v4685_v14 }
 0x1f0   : > { %4207 = vmatprep.mubr.bf16.mxu0 %v5704_v13 }
 0x1f6   : > { %4228 = vmatmul.mubr.bf16.gmra.mrb[20].mxu1 %v4684_v16 }
 0x1f7   : > { %4208 = vmatmul.mubr.bf16.gmra.mrb[4].mxu0 %v5707_v15 }
 0x281   : > { %v3844_v22 = vpop.f32.mrb[0].mxu1 }
 0x282   : > { %v3846_v23 = vpop.f32.mrb[1].mxu1  ;;  %v5012_v63 = vadd.f32 %v3844_v22, %v6905_v33 }
 0x283   : > { %v3848_v24 = vpop.f32.mrb[2].mxu1  ;;  %v5014_v0 = vadd.f32 %v3846_v23, %v6908_v34 }
 0x284   : > { %v3850_v25 = vpop.f32.mrb[3].mxu1  ;;  %v5016_v3 = vadd.f32 %v3848_v24, %v6905_v33 }
 0x285   : > { %v5018_v8 = vadd.f32 %v3850_v25, %v6908_v34  ;;  %v4257_v25 = vadd.s32 48, %v6876_v18 }
 0x287   : > { %vm4264_vm0 = vcmp.lt.s32.totalorder %v4257_v25, 50 }
 0x289   : > { %v3854_v27 = vpop.f32.mrb[4].mxu1 }
 0x28a   : > { %v6895_v28 = vpop.f32.mrb[5].mxu1 }
 0x28b   : > { %v6900_v30 = vpop.f32.mrb[6].mxu1 }
 0x28c   : > { %v6902_v31 = vpop.f32.mrb[7].mxu1 }
 0x291   : > { %v3864_v35 = vpop.f32.mrb[8].mxu1 }
 0x292   : > { %v4148_v36 = vpop.f32.mrb[8].mxu0  ;;  %v5028_v37 = vadd.f32 %v3864_v35, %v6905_v33  ;;  %v3866_v38 = vpop.f32.mrb[9].mxu1  ;;  %v5020_v35 = vadd.f32 %v3854_v27, %v6905_v33 }
 0x293   : > { %v4150_v39 = vpop.f32.mrb[9].mxu0  ;;  %v5031_v40 = vadd.f32 %v3866_v38, %v6908_v34  ;;  %v3868_v41 = vpop.f32.mrb[10].mxu1 }
 0x294   : > { %v4152_v42 = vpop.f32.mrb[10].mxu0  ;;  %v5029_v43 = vadd.f32 %v5028_v37, %v4148_v36  ;;  %v5034_v44 = vadd.f32 %v3868_v41, %v6905_v33  ;;  %v3870_v45 = vpop.f32.mrb[11].mxu1 }
 0x295   : > { %v4154_v46 = vpop.f32.mrb[11].mxu0  ;;  %v5032_v47 = vadd.f32 %v5031_v40, %v4150_v39  ;;  %v5037_v48 = vadd.f32 %v3870_v45, %v6908_v34  ;;  %v5022_v39 = vadd.f32 %v6895_v28, %v6908_v34  ;;  %v5026_v28 = vadd.f32 %v6902_v31, %v6908_v34 }
 0x296   : > { %v5035_v49 = vadd.f32 %v5034_v44, %v4152_v42  ;;  %v5024_v44 = vadd.f32 %v6900_v30, %v6905_v33 }
 0x297   : > { %v5038_v50 = vadd.f32 %v5037_v48, %v4154_v46 }
 0x299   : > { %v3874_v51 = vpop.f32.mrb[12].mxu1 }
 0x29a   : > { %v4158_v52 = vpop.f32.mrb[12].mxu0  ;;  %v5040_v53 = vadd.f32 %v3874_v51, %v6905_v33  ;;  %v3876_v54 = vpop.f32.mrb[13].mxu1 }
 0x29b   : > { %v4160_v55 = vpop.f32.mrb[13].mxu0  ;;  %v5043_v56 = vadd.f32 %v3876_v54, %v6908_v34  ;;  %v3878_v57 = vpop.f32.mrb[14].mxu1 }
 0x29c   : > { %v4162_v58 = vpop.f32.mrb[14].mxu0  ;;  %v5041_v59 = vadd.f32 %v5040_v53, %v4158_v52  ;;  %v3879_v60 = vpop.f32.mrb[15].mxu1 }
 0x29d   : > { %v4163_v61 = vpop.f32.mrb[15].mxu0  ;;  %v5044_v62 = vadd.f32 %v5043_v56, %v4160_v55 }
 0x2c1   : > { %v4219_v2 = vpop.f32.mrb[16].mxu1 }
 0x2c2   : > { %v4199_v1 = vpop.f32.mrb[0].mxu0  ;;  %v5030_v5 = vadd.f32 %v5029_v43, %v4219_v2  ;;  %v4221_v7 = vpop.f32.mrb[17].mxu1 }
 0x2c3   : > { %v5013_v4 = vadd.f32 %v5012_v63, %v4199_v1  ;;  %v4201_v6 = vpop.f32.mrb[1].mxu0  ;;  %v5033_v10 = vadd.f32 %v5032_v47, %v4221_v7  ;;  %v4223_v12 = vpop.f32.mrb[18].mxu1 }
 0x2c4   : > { %v5015_v9 = vadd.f32 %v5014_v0, %v4201_v6  ;;  %v4203_v11 = vpop.f32.mrb[2].mxu0  ;;  %v5036_v15 = vadd.f32 %v5035_v49, %v4223_v12  ;;  %v4225_v17 = vpop.f32.mrb[19].mxu1  ;;  %v6952_v33 = vmax.f32 %v5030_v5, 0.0 }
 0x2c5   : > { %v6920_v13 = vmax.f32 %v5013_v4, 0.0  ;;  %v5017_v14 = vadd.f32 %v5016_v3, %v4203_v11  ;;  %v4205_v16 = vpop.f32.mrb[3].mxu0  ;;  %v5039_v23 = vadd.f32 %v5038_v50, %v4225_v17  ;;  %v6969_v4 = vmax.f32 %v5033_v10, 0.0 }
 0x2c6   : > { %v6922_v20 = vmax.f32 %v5015_v9, 0.0  ;;  %v5019_v22 = vadd.f32 %v5018_v8, %v4205_v16  ;;  %v6964_v0 = vmax.f32 %v5036_v15, 0.0  ;;  %v4325_v7 = vmul.f32 %v6952_v33, %v6952_v33 }
 0x2c7   : > { %v6924_v24 = vmax.f32 %v5017_v14, 0.0  ;;  %v4317_v36 = vmul.f32 %v6920_v13, %v6920_v13  ;;  %v6978_v12 = vmax.f32 %v5039_v23, 0.0 }
 0x2c8   : > { %v6926_v32 = vmax.f32 %v5019_v22, 0.0  ;;  %v4318_v40 = vmul.f32 %v6922_v20, %v6922_v20  ;;  %v4327_v16 = vmul.f32 %v6964_v0, %v6964_v0 }
 0x2c9   : > { %v4293_v37 = vadd.f32 %v6924_v24, %v6920_v13  ;;  %v4319_v38 = vmul.f32 %v6924_v24, %v6924_v24  ;;  %v4229_v43 = vpop.f32.mrb[20].mxu1 }
 0x2ca   : > { %v4305_v41 = vadd.f32 %v6926_v32, %v6922_v20  ;;  %v4320_v27 = vmul.f32 %v6926_v32, %v6926_v32  ;;  %v4209_v42 = vpop.f32.mrb[4].mxu0  ;;  %v5042_v47 = vadd.f32 %v5041_v59, %v4229_v43  ;;  %v4231_v49 = vpop.f32.mrb[21].mxu1 }
 0x2cb   : > { %v4331_v45 = vadd.f32 %v4319_v38, %v4317_v36  ;;  %v5021_v46 = vadd.f32 %v5020_v35, %v4209_v42  ;;  %v4211_v48 = vpop.f32.mrb[5].mxu0  ;;  %v5045_v52 = vadd.f32 %v5044_v62, %v4231_v49  ;;  %v4233_v54 = vpop.f32.mrb[22].mxu1  ;;  %v4326_v35 = vmul.f32 %v6969_v4, %v6969_v4 }
 0x2cc   : > { %v4343_v50 = vadd.f32 %v4320_v27, %v4318_v40  ;;  %v5023_v51 = vadd.f32 %v5022_v39, %v4211_v48  ;;  %v4213_v53 = vpop.f32.mrb[6].mxu0  ;;  %v4234_v58 = vpop.f32.mrb[23].mxu1  ;;  %v6959_v61 = vmax.f32 %v5042_v47, 0.0 }
 0x2cd   : > { %v6948_v55 = vmax.f32 %v5021_v46, 0.0  ;;  %v5025_v56 = vadd.f32 %v5024_v44, %v4213_v53  ;;  %v4215_v57 = vpop.f32.mrb[7].mxu0  ;;  %v6975_v8 = vmax.f32 %v5045_v52, 0.0 }
 0x2ce   : > { %v6950_v60 = vmax.f32 %v5023_v51, 0.0  ;;  %v5027_v30 = vadd.f32 %v5026_v28, %v4215_v57  ;;  %v4291_v14 = vsel %vm4264_vm0, %v6959_v61, 0.0 }
 0x2cf   : > { %v4294_v59 = vadd.f32 %v4293_v37, %v6948_v55  ;;  %v4321_v31 = vmul.f32 %v6948_v55, %v6948_v55  ;;  %v6957_v34 = vmax.f32 %v5025_v56, 0.0  ;;  %v4329_v37 = vmul.f32 %v4291_v14, %v6959_v61 }
 0x2d0   : > { %v4306_v62 = vadd.f32 %v4305_v41, %v6950_v60  ;;  %v4322_v63 = vmul.f32 %v6950_v60, %v6950_v60  ;;  %v6971_v6 = vmax.f32 %v5027_v30, 0.0  ;;  %v4292_v38 = vsel %vm4264_vm0, %v6975_v8, 0.0 }
 0x2d1   : > { %v4332_v1 = vadd.f32 %v4331_v45, %v4321_v31  ;;  %v4295_v2 = vadd.f32 %v4294_v59, %v6957_v34  ;;  %v4323_v3 = vmul.f32 %v6957_v34, %v6957_v34  ;;  %v4328_v41 = vmul.f32 %v6978_v12, %v6978_v12 }
 0x2d2   : > { %v4344_v5 = vadd.f32 %v4343_v50, %v4322_v63  ;;  %v4307_v15 = vadd.f32 %v4306_v62, %v6971_v6  ;;  %v4324_v10 = vmul.f32 %v6971_v6, %v6971_v6  ;;  %v4330_v45 = vmul.f32 %v4292_v38, %v6975_v8 }
 0x2d3   : > { %v4296_v9 = vadd.f32 %v4295_v2, %v6952_v33  ;;  %v4333_v11 = vadd.f32 %v4332_v1, %v4323_v3 }
 0x2d4   : > { %v4308_v23 = vadd.f32 %v4307_v15, %v6969_v4  ;;  %v4345_v36 = vadd.f32 %v4344_v5, %v4324_v10 }
 0x2d5   : > { %v4297_v17 = vadd.f32 %v4296_v9, %v6964_v0  ;;  %v4334_v22 = vadd.f32 %v4333_v11, %v4325_v7 }
 0x2d6   : > { %v4309_v27 = vadd.f32 %v4308_v23, %v6978_v12  ;;  %v4346_v42 = vadd.f32 %v4345_v36, %v4326_v35 }
 0x2d7   : > { %v4298_v39 = vadd.f32 %v4297_v17, %v4291_v14  ;;  %v4335_v40 = vadd.f32 %v4334_v22, %v4327_v16 }
 0x2d8   : > { %v4310_v46 = vadd.f32 %v4309_v27, %v4292_v38  ;;  %v4347_v47 = vadd.f32 %v4346_v42, %v4328_v41 }
 0x2d9   : > { %v4299_v43 = vrot.slane %v4298_v39, 4  ;;  %v4336_v44 = vadd.f32 %v4335_v40, %v4329_v37 }
 0x2da   : > { %v4311_v28 = vrot.slane %v4310_v46, 4  ;;  %v4348_v50 = vadd.f32 %v4347_v47, %v4330_v45 }
 0x2db   : > { %v4300_v48 = vadd.f32 %v4299_v43, %v4298_v39  ;;  %v4337_v49 = vrot.slane %v4336_v44, 4 }
 0x2dc   : > { %v4312_v52 = vadd.f32 %v4311_v28, %v4310_v46  ;;  %v4349_v53 = vrot.slane %v4348_v50, 4 }
 0x2dd   : > { %v4301_v25 = vrot.slane %v4300_v48, 2  ;;  %v4338_v51 = vadd.f32 %v4337_v49, %v4336_v44 }
 0x2de   : > { %v4313_v57 = vrot.slane %v4312_v52, 2  ;;  %v4350_v58 = vadd.f32 %v4349_v53, %v4348_v50 }
 0x2df   : > { %v4302_v54 = vadd.f32 %v4301_v25, %v4300_v48  ;;  %v4339_v56 = vrot.slane %v4338_v51, 2  ;;  %v4365_v48 = vld [vmem:[%s1453_s8] sm:$0x3] }
 0x2e0   : > { %v4314_v31 = vadd.f32 %v4313_v57, %v4312_v52  ;;  %v4351_v62 = vrot.slane %v4350_v58, 2 }
 0x2e1   : > { %v4303_v30 = vrot.slane %v4302_v54, 1  ;;  %v4340_v59 = vadd.f32 %v4339_v56, %v4338_v51 }
 0x2e2   : > { %v4315_v2 = vrot.slane %v4314_v31, 1  ;;  %v4352_v3 = vadd.f32 %v4351_v62, %v4350_v58 }
 0x2e3   : > { %v4304_v63 = vadd.f32 %v4303_v30, %v4302_v54  ;;  %v4341_v1 = vrot.slane %v4340_v59, 1 }
 0x2e4   : > { %v4316_v9 = vadd.f32 %v4315_v2, %v4314_v31  ;;  %v4353_v11 = vrot.slane %v4352_v3, 1 }
 0x2e5   : > { %v4342_v5 = vadd.f32 %v4341_v1, %v4340_v59  ;;  %v4355_v7 = vmul.f32 0.02, %v4304_v63 }
 0x2e6   : > { %v4354_v38 = vadd.f32 %v4353_v11, %v4352_v3  ;;  %v4356_v39 = vmul.f32 0.02, %v4316_v9 }
 0x2e7   : > { %v4357_v14 = vmul.f32 0.02, %v4342_v5  ;;  %v4359_v15 = vmul.f32 %v4355_v7, %v4355_v7  ;;  %v4389_v10 = vsub.f32 %v6920_v13, %v4355_v7  ;;  %v4391_v16 = vsub.f32 %v6924_v24, %v4355_v7 }
 0x2e8   : > { %v4393_v17 = vsub.f32 %v6948_v55, %v4355_v7  ;;  %v4395_v22 = vsub.f32 %v6957_v34, %v4355_v7  ;;  %v4397_v35 = vsub.f32 %v6952_v33, %v4355_v7  ;;  %v4399_v23 = vsub.f32 %v6964_v0, %v4355_v7 }
 0x2e9   : > { %v4361_v36 = vsub.f32 %v4357_v14, %v4359_v15  ;;  %v4401_v37 = vsub.f32 %v6959_v61, %v4355_v7  ;;  %v4358_v41 = vmul.f32 0.02, %v4354_v38  ;;  %v4360_v27 = vmul.f32 %v4356_v39, %v4356_v39 }
 0x2ea   : > { %v4390_v13 = vsub.f32 %v6922_v20, %v4356_v39  ;;  %v4392_v24 = vsub.f32 %v6926_v32, %v4356_v39  ;;  %v4394_v55 = vsub.f32 %v6950_v60, %v4356_v39  ;;  %v4396_v34 = vsub.f32 %v6971_v6, %v4356_v39 }
 0x2eb   : > { %v4363_v40 = vmax.f32 %v4361_v36, 0.0  ;;  %v4398_v33 = vsub.f32 %v6969_v4, %v4356_v39  ;;  %v4362_v42 = vsub.f32 %v4358_v41, %v4360_v27  ;;  %v4400_v61 = vsub.f32 %v6978_v12, %v4356_v39 }
 0x2ec   : > { %v4402_v43 = vsub.f32 %v6975_v8, %v4356_v39  ;;  %v5737_v20 = vmov 1966171168  }
 0x2ed   : > { %v4366_v0 = vadd.f32 1e-05, %v4363_v40  ;;  %v4364_v44 = vmax.f32 %v4362_v42, 0.0  ;;  %v4374_v32 = vunpack.c.l.s4 %v5737_v20 }
 0x2ef   : > { %5709 = vrsqrt.f32 %v4366_v0  ;;  %v4367_v45 = vadd.f32 1e-05, %v4364_v44  ;;  %v4375_v46 = vunpack.c.0.s8 %v4374_v32 }
 0x2f1   : > { %5711 = vrsqrt.f32 %v4367_v45  ;;  %v4378_v6 = vsub.s32 %v4375_v46, %v6876_v18 }
 0x2f9   : > { %v5710_v60 = vpop.eup %5709 }
 0x2fb   : > { %v5712_v47 = vpop.eup %5711 }
 0x2fc   : > { %v4372_v4 = vcombine.low %v5710_v60, %v5712_v47 }
 0x2fe   : > { %v4379_v12 = vrot.slane %v4372_v4, %v4378_v6 }
 0x300   : > { %v4386_v8 = vrot.slane %v4379_v12, %v4378_v6 }
 0x302   : > { %v4388_v49 = vmul.f32 %v4386_v8, %v4365_v48 }
 0x304   : > { %v4407_v28 = vrot.slane %v4388_v49, %v6883_v19  ;;  %v4411_v50 = vrot.slane %v4388_v49, %v6889_v26 }
 0x306   : > { %v4414_v25 = vmul.f32 %v4407_v28, %v4389_v10  ;;  %v4415_v51 = vmul.f32 %v4411_v50, %v4390_v13  ;;  %v4416_v52 = vmul.f32 %v4407_v28, %v4391_v16  ;;  %v4417_v18 = vmul.f32 %v4411_v50, %v4392_v24 }
 0x307   : > { %v4418_v53 = vmul.f32 %v4407_v28, %v4393_v17  ;;  %v4419_v54 = vmul.f32 %v4411_v50, %v4394_v55  ;;  %v4420_v56 = vmul.f32 %v4407_v28, %v4395_v22  ;;  %v4421_v57 = vmul.f32 %v4411_v50, %v4396_v34 }
 0x308   : > { %v4422_v58 = vmul.f32 %v4407_v28, %v4397_v35  ;;  %v4423_v30 = vmul.f32 %v4411_v50, %v4398_v33  ;;  %v4424_v59 = vmul.f32 %v4407_v28, %v4399_v23  ;;  %v4425_v31 = vmul.f32 %v4411_v50, %v4400_v61 }
 0x309   : > { %v4426_v62 = vmul.f32 %v4407_v28, %v4401_v37  ;;  %v4427_v63 = vmul.f32 %v4411_v50, %v4402_v43  ;;  %v4440_v1 = vadd.f32 %v6886_v21, %v4414_v25  ;;  %v4441_v19 = vadd.f32 %v6898_v29, %v4415_v51 }
 0x30a   : > { %v4442_v26 = vadd.f32 %v6886_v21, %v4416_v52  ;;  %v4443_v2 = vadd.f32 %v6898_v29, %v4417_v18  ;;  %v4444_v3 = vadd.f32 %v6886_v21, %v4418_v53  ;;  %v4445_v5 = vadd.f32 %v6898_v29, %v4419_v54 }
 0x30b   : > { %v4446_v7 = vadd.f32 %v6886_v21, %v4420_v56  ;;  %v4447_v9 = vadd.f32 %v6898_v29, %v4421_v57  ;;  %v4448_v11 = vadd.f32 %v6886_v21, %v4422_v58  ;;  %v4449_v14 = vadd.f32 %v6898_v29, %v4423_v30  ;;  %4454 = vst [vmem:[%s7031_s18] sm:$0xff] %v4440_v1 }
 0x30c   : > { %4455 = vst [vmem:[%s7031_s18 + $0x8] sm:$0xff] %v4441_v19  ;;  %v4450_v15 = vadd.f32 %v6886_v21, %v4424_v59  ;;  %v4451_v10 = vadd.f32 %v6898_v29, %v4425_v31  ;;  %v4452_v16 = vadd.f32 %v6886_v21, %v4426_v62  ;;  %v4453_v17 = vadd.f32 %v6898_v29, %v4427_v63  ;;  %4474 = sbr.rel (!%p5799_p5) target bundleno = 795 (0x31b), region = 82 }
 0x30d   : > { %4456 = vst [vmem:[%s7031_s18 + $0x10] sm:$0xff] %v4442_v26  ;;  %4457 = vst [vmem:[%s7031_s18 + $0x18] sm:$0xff] %v4443_v2 }
 0x30e   : > { %4458 = vst [vmem:[%s7031_s18 + $0x20] sm:$0xff] %v4444_v3  ;;  %4459 = vst [vmem:[%s7031_s18 + $0x28] sm:$0xff] %v4445_v5 }
 0x30f   : > { %4460 = vst [vmem:[%s7031_s18 + $0x30] sm:$0xff] %v4446_v7  ;;  %4461 = vst [vmem:[%s7031_s18 + $0x38] sm:$0xff] %v4447_v9 }
 0x310   : > { %4462 = vst [vmem:[%s7031_s18 + $0x40] sm:$0xff] %v4448_v11  ;;  %4463 = vst [vmem:[%s7031_s18 + $0x48] sm:$0xff] %v4449_v14 }
 0x311   : > { %4464 = vst [vmem:[%s7031_s18 + $0x50] sm:$0xff] %v4450_v15  ;;  %4465 = vst [vmem:[%s7031_s18 + $0x58] sm:$0xff] %v4451_v10 }
 0x312   : > { %4466 = vst [vmem:[%s7031_s18 + $0x60] sm:$0xff] %v4452_v16  ;;  %4467 = vst [vmem:[%s7031_s18 + $0x68] sm:$0xff] %v4453_v17  ;;  %v4490_v21 = vld [vmem:[%s7031_s18] sm:$0xff] (%p5799_p5) }
 0x313   : > { %v4492_v29 = vld [vmem:[%s7031_s18 + $0x8] sm:$0xff]  ;;  %4491 = vst [vmem:[%s4477_s13] sm:$0xff] %v4490_v21 }
 0x314   : > { %v4494_v22 = vld [vmem:[%s7031_s18 + $0x10] sm:$0xff]  ;;  %v4496_v35 = vld [vmem:[%s7031_s18 + $0x18] sm:$0xff]  ;;  %4493 = vst [vmem:[%s4477_s13 + $0x8] sm:$0xff] %v4492_v29 }
 0x315   : > { %v4498_v23 = vld [vmem:[%s7031_s18 + $0x20] sm:$0xff]  ;;  %v4500_v36 = vld [vmem:[%s7031_s18 + $0x28] sm:$0xff]  ;;  %4495 = vst [vmem:[%s4477_s13 + $0x20] sm:$0xff] %v4494_v22  ;;  %4497 = vst [vmem:[%s4477_s13 + $0x28] sm:$0xff] %v4496_v35 }
 0x316   : > { %4499 = vst [vmem:[%s4477_s13 + $0x40] sm:$0xff] %v4498_v23  ;;  %4501 = vst [vmem:[%s4477_s13 + $0x48] sm:$0xff] %v4500_v36  ;;  %v4502_v37 = vld [vmem:[%s7031_s18 + $0x30] sm:$0xff]  ;;  %v4504_v38 = vld [vmem:[%s7031_s18 + $0x38] sm:$0xff] }
 0x317   : > { %v4506_v39 = vld [vmem:[%s7031_s18 + $0x40] sm:$0xff]  ;;  %4503 = vst [vmem:[%s4477_s13 + $0x60] sm:$0xff] %v4502_v37  ;;  %4505 = vst [vmem:[%s4477_s13 + $0x68] sm:$0xff] %v4504_v38  ;;  %v4508_v40 = vld [vmem:[%s7031_s18 + $0x48] sm:$0xff] }
 0x318   : > { %4507 = vst [vmem:[%s4477_s13 + $0x80] sm:$0xff] %v4506_v39  ;;  %v4510_v41 = vld [vmem:[%s7031_s18 + $0x50] sm:$0xff]  ;;  %v4512_v27 = vld [vmem:[%s7031_s18 + $0x58] sm:$0xff]  ;;  %4509 = vst [vmem:[%s4477_s13 + $0x88] sm:$0xff] %v4508_v40 }
 0x319   : > { %4511 = vst [vmem:[%s4477_s13 + $0xa0] sm:$0xff] %v4510_v41  ;;  %4513 = vst [vmem:[%s4477_s13 + $0xa8] sm:$0xff] %v4512_v27  ;;  %v4514_v13 = vld [vmem:[%s7031_s18 + $0x60] sm:$0xff]  ;;  %v4516_v24 = vld [vmem:[%s7031_s18 + $0x68] sm:$0xff] }
 0x31a   : > { %4515 = vst [vmem:[%s4477_s13 + $0xc0] sm:$0xff] %v4514_v13  ;;  %4517 = vst [vmem:[%s4477_s13 + $0xc8] sm:$0xff] %v4516_v24 }
 0x31b PF: > { %p12_p11 = scmp.ge.s32.totalorder %s5787_s22, 4   ;;  %s7088_s18 = smov %s5731_s19 }
 0x31c   : > { %s7089_s19 = smov %s5797_s25  ;;  %s7090_s20 = smov %s5787_s22 }
 0x31d   :  { %14 = sbr.rel (!%p12_p11) target bundleno = 2 (0x2), region = 145 }

// kernel: cnn_bn_forward.6
= control target key start
LH: loop header
LB: loop body
LE: loop exit
PB: predicated region body
PF: predicated region fallthrough
CT: control target
= control target key end

     0   :  { %s11820_s18 = smov 0   ;;  %s11822_s19 = smov 0   ;;  %s13845_s0 = inlined_call_operand.vmem [shape: bf16[24,4608], index: 0, kind: input, shape index: {}]   ;;  %s13846_s1 = inlined_call_operand.vmem [shape: bf16[4608,1024], index: 1, kind: input, shape index: {}]   ;;  %s13847_s2 = inlined_call_operand.vmem [shape: f32[1,1024], index: 2, kind: input, shape index: {}]   ;;  %s13848_s3 = inlined_call_operand.vmem [shape: f32[1,1024], index: 3, kind: input, shape index: {}]   ;;  %s13849_s4 = inlined_call_operand.vmem [shape: f32[1,1024], index: 4, kind: input, shape index: {}]   ;;  %s13850_s5 = inlined_call_operand.vmem [shape: f32[24,1024], index: 5, kind: output, shape index: {}]  }
   0x1   :  { %s11824_s20 = smov 0  }
   0x2 LB: > { %s11836_s21 = sadd.s32 4294967295, %s11787_s20   ;;  %s11839_s22 = sadd.s32 1, %s11787_s20   ;;  %s11787_s20 = sphi %s11824_s20, %s13854_s20   ;;  %s11783_s19 = sphi %s11822_s19, %s13853_s19   ;;  %s11779_s18 = sphi %s11820_s18, %s13852_s18  }
   0x3   : > { %s40_s23 = ssub.s32 %s11787_s20, %s11839_s22  ;;  %s43_s24 = sadd.s32 1, %s11783_s19 }
   0x4   : > { %p41_p0 = scmp.eq.s32.totalorder %s40_s23, 0  ;;  %p50_p1 = scmp.ne.s32.totalorder %s11783_s19, %s11779_s18 }
   0x5   : > { %p51_p2 = scmp.eq.s32.totalorder %s11787_s20, 0  ;;  %p158_p3 = scmp.eq.s32.totalorder %s11836_s21, 3 }
   0x6   : > { %s11849_s25 = scalar_select %p41_p0, %s11783_s19, %s43_s24  }
   0x7   : > { %p52_p4 = por %p51_p2, %p50_p1  ;;  %p11851_p5 = por %p158_p3, %p50_p1 }
   0x8   : > { %p9978_p6 = scmp.ge.s32.totalorder %s11787_s20, 4 }
   0xa   : > { %183 = sbr.rel (%p9978_p6) target bundleno = 597 (0x255), region = 20 }
  0x11   : > { %186 = sbr.rel (!%p52_p4) target bundleno = 597 (0x255), region = 24  ;;  %s188_s27 = sand.u32 (%p52_p4), 1, %s11783_s19  }
  0x12   : > { %s10637_s28 = sshll.u32 (%p52_p4), %s11787_s20, 3  ;;  %s10779_s29 = smul.u32 (%p52_p4), 4608, %s188_s27 }
  0x13   : > { %s11861_s7 = scalar_lea.vmem (%p52_p4), %s13846_s1, %s10637_s28 }
  0x14   : > { %v1374_v0 = vld [vmem:[%s11861_s7] sm:$0xff] (%p52_p4)  ;;  %s11869_s8 = scalar_lea.vmem (%p52_p4), [#allocation2], %s10779_s29 }
  0x15   : > { %v1376_v1 = vld [vmem:[%s11861_s7 + $0x20] sm:$0xff] (%p52_p4)  ;;  %1375 = vst [vmem:[%s11869_s8] sm:$0xff] (%p52_p4), %v1374_v0 }
  0x16   : > { %v1378_v2 = vld [vmem:[%s11861_s7 + $0x40] sm:$0xff] (%p52_p4)  ;;  %1377 = vst [vmem:[%s11869_s8 + $0x8] sm:$0xff] (%p52_p4), %v1376_v1 }
  0x17   : > { %v1380_v3 = vld [vmem:[%s11861_s7 + $0x60] sm:$0xff] (%p52_p4)  ;;  %1379 = vst [vmem:[%s11869_s8 + $0x10] sm:$0xff] (%p52_p4), %v1378_v2 }
  0x18   : > { %v1382_v4 = vld [vmem:[%s11861_s7 + $0x80] sm:$0xff]  ;;  %1381 = vst [vmem:[%s11869_s8 + $0x18] sm:$0xff] %v1380_v3 }
  0x19   : > { %v1384_v5 = vld [vmem:[%s11861_s7 + $0xa0] sm:$0xff]  ;;  %1383 = vst [vmem:[%s11869_s8 + $0x20] sm:$0xff] %v1382_v4 }
  0x1a   : > { %1385 = vst [vmem:[%s11869_s8 + $0x28] sm:$0xff] %v1384_v5  ;;  %v1386_v6 = vld [vmem:[%s11861_s7 + $0xc0] sm:$0xff] }
  0x1b   : > { %v1388_v7 = vld [vmem:[%s11861_s7 + $0xe0] sm:$0xff]  ;;  %1387 = vst [vmem:[%s11869_s8 + $0x30] sm:$0xff] %v1386_v6 }
  0x1c   : > { %v1390_v8 = vld [vmem:[%s11861_s7 + $0x100] sm:$0xff]  ;;  %1389 = vst [vmem:[%s11869_s8 + $0x38] sm:$0xff] %v1388_v7 }
  0x1d   : > { %1391 = vst [vmem:[%s11869_s8 + $0x40] sm:$0xff] %v1390_v8  ;;  %v1392_v9 = vld [vmem:[%s11861_s7 + $0x120] sm:$0xff] }
  0x1e   : > { %v1394_v10 = vld [vmem:[%s11861_s7 + $0x140] sm:$0xff]  ;;  %1393 = vst [vmem:[%s11869_s8 + $0x48] sm:$0xff] %v1392_v9 }
  0x1f   : > { %v1396_v11 = vld [vmem:[%s11861_s7 + $0x160] sm:$0xff]  ;;  %1395 = vst [vmem:[%s11869_s8 + $0x50] sm:$0xff] %v1394_v10 }
  0x20   : > { %1397 = vst [vmem:[%s11869_s8 + $0x58] sm:$0xff] %v1396_v11  ;;  %v1398_v12 = vld [vmem:[%s11861_s7 + $0x180] sm:$0xff] }
  0x21   : > { %v1400_v13 = vld [vmem:[%s11861_s7 + $0x1a0] sm:$0xff]  ;;  %1399 = vst [vmem:[%s11869_s8 + $0x60] sm:$0xff] %v1398_v12 }
  0x22   : > { %v1402_v14 = vld [vmem:[%s11861_s7 + $0x1c0] sm:$0xff]  ;;  %1401 = vst [vmem:[%s11869_s8 + $0x68] sm:$0xff] %v1400_v13 }
  0x23   : > { %1403 = vst [vmem:[%s11869_s8 + $0x70] sm:$0xff] %v1402_v14  ;;  %v1404_v15 = vld [vmem:[%s11861_s7 + $0x1e0] sm:$0xff] }
  0x24   : > { %v1406_v16 = vld [vmem:[%s11861_s7 + $0x200] sm:$0xff]  ;;  %1405 = vst [vmem:[%s11869_s8 + $0x78] sm:$0xff] %v1404_v15 }
  0x25   : > { %v1408_v17 = vld [vmem:[%s11861_s7 + $0x220] sm:$0xff]  ;;  %1407 = vst [vmem:[%s11869_s8 + $0x80] sm:$0xff] %v1406_v16 }
  0x26   : > { %1409 = vst [vmem:[%s11869_s8 + $0x88] sm:$0xff] %v1408_v17  ;;  %v1410_v18 = vld [vmem:[%s11861_s7 + $0x240] sm:$0xff] }
  0x27   : > { %v1412_v19 = vld [vmem:[%s11861_s7 + $0x260] sm:$0xff]  ;;  %1411 = vst [vmem:[%s11869_s8 + $0x90] sm:$0xff] %v1410_v18 }
  0x28   : > { %v1414_v20 = vld [vmem:[%s11861_s7 + $0x280] sm:$0xff]  ;;  %1413 = vst [vmem:[%s11869_s8 + $0x98] sm:$0xff] %v1412_v19 }
  0x29   : > { %1415 = vst [vmem:[%s11869_s8 + $0xa0] sm:$0xff] %v1414_v20  ;;  %v1416_v21 = vld [vmem:[%s11861_s7 + $0x2a0] sm:$0xff] }
  0x2a   : > { %v1418_v22 = vld [vmem:[%s11861_s7 + $0x2c0] sm:$0xff]  ;;  %1417 = vst [vmem:[%s11869_s8 + $0xa8] sm:$0xff] %v1416_v21 }
  0x2b   : > { %v1420_v23 = vld [vmem:[%s11861_s7 + $0x2e0] sm:$0xff]  ;;  %1419 = vst [vmem:[%s11869_s8 + $0xb0] sm:$0xff] %v1418_v22 }
  0x2c   : > { %1421 = vst [vmem:[%s11869_s8 + $0xb8] sm:$0xff] %v1420_v23  ;;  %v1422_v24 = vld [vmem:[%s11861_s7 + $0x300] sm:$0xff] }
  0x2d   : > { %v1424_v25 = vld [vmem:[%s11861_s7 + $0x320] sm:$0xff]  ;;  %1423 = vst [vmem:[%s11869_s8 + $0xc0] sm:$0xff] %v1422_v24 }
  0x2e   : > { %v1426_v26 = vld [vmem:[%s11861_s7 + $0x340] sm:$0xff]  ;;  %1425 = vst [vmem:[%s11869_s8 + $0xc8] sm:$0xff] %v1424_v25 }
  0x2f   : > { %1427 = vst [vmem:[%s11869_s8 + $0xd0] sm:$0xff] %v1426_v26  ;;  %v1428_v27 = vld [vmem:[%s11861_s7 + $0x360] sm:$0xff] }
  0x30   : > { %v1430_v28 = vld [vmem:[%s11861_s7 + $0x380] sm:$0xff]  ;;  %1429 = vst [vmem:[%s11869_s8 + $0xd8] sm:$0xff] %v1428_v27 }
  0x31   : > { %v1432_v29 = vld [vmem:[%s11861_s7 + $0x3a0] sm:$0xff]  ;;  %1431 = vst [vmem:[%s11869_s8 + $0xe0] sm:$0xff] %v1430_v28 }
  0x32   : > { %1433 = vst [vmem:[%s11869_s8 + $0xe8] sm:$0xff] %v1432_v29  ;;  %v1434_v30 = vld [vmem:[%s11861_s7 + $0x3c0] sm:$0xff] }
  0x33   : > { %v1436_v31 = vld [vmem:[%s11861_s7 + $0x3e0] sm:$0xff]  ;;  %1435 = vst [vmem:[%s11869_s8 + $0xf0] sm:$0xff] %v1434_v30 }
  0x34   : > { %v1438_v32 = vld [vmem:[%s11861_s7 + $0x400] sm:$0xff]  ;;  %1437 = vst [vmem:[%s11869_s8 + $0xf8] sm:$0xff] %v1436_v31 }
  0x35   : > { %1439 = vst [vmem:[%s11869_s8 + $0x100] sm:$0xff] %v1438_v32  ;;  %v1440_v33 = vld [vmem:[%s11861_s7 + $0x420] sm:$0xff] }
  0x36   : > { %v1442_v34 = vld [vmem:[%s11861_s7 + $0x440] sm:$0xff]  ;;  %1441 = vst [vmem:[%s11869_s8 + $0x108] sm:$0xff] %v1440_v33 }
  0x37   : > { %v1444_v35 = vld [vmem:[%s11861_s7 + $0x460] sm:$0xff]  ;;  %1443 = vst [vmem:[%s11869_s8 + $0x110] sm:$0xff] %v1442_v34 }
  0x38   : > { %1445 = vst [vmem:[%s11869_s8 + $0x118] sm:$0xff] %v1444_v35  ;;  %v1446_v36 = vld [vmem:[%s11861_s7 + $0x480] sm:$0xff] }
  0x39   : > { %v1448_v37 = vld [vmem:[%s11861_s7 + $0x4a0] sm:$0xff]  ;;  %1447 = vst [vmem:[%s11869_s8 + $0x120] sm:$0xff] %v1446_v36 }
  0x3a   : > { %v1450_v38 = vld [vmem:[%s11861_s7 + $0x4c0] sm:$0xff]  ;;  %1449 = vst [vmem:[%s11869_s8 + $0x128] sm:$0xff] %v1448_v37 }
  0x3b   : > { %1451 = vst [vmem:[%s11869_s8 + $0x130] sm:$0xff] %v1450_v38  ;;  %v1452_v39 = vld [vmem:[%s11861_s7 + $0x4e0] sm:$0xff] }
  0x3c   : > { %v1454_v40 = vld [vmem:[%s11861_s7 + $0x500] sm:$0xff]  ;;  %1453 = vst [vmem:[%s11869_s8 + $0x138] sm:$0xff] %v1452_v39 }
  0x3d   : > { %v1456_v41 = vld [vmem:[%s11861_s7 + $0x520] sm:$0xff]  ;;  %1455 = vst [vmem:[%s11869_s8 + $0x140] sm:$0xff] %v1454_v40 }
  0x3e   : > { %1457 = vst [vmem:[%s11869_s8 + $0x148] sm:$0xff] %v1456_v41  ;;  %v1458_v42 = vld [vmem:[%s11861_s7 + $0x540] sm:$0xff] }
  0x3f   : > { %v1460_v43 = vld [vmem:[%s11861_s7 + $0x560] sm:$0xff]  ;;  %1459 = vst [vmem:[%s11869_s8 + $0x150] sm:$0xff] %v1458_v42 }
  0x40   : > { %v1462_v44 = vld [vmem:[%s11861_s7 + $0x580] sm:$0xff]  ;;  %1461 = vst [vmem:[%s11869_s8 + $0x158] sm:$0xff] %v1460_v43 }
  0x41   : > { %1463 = vst [vmem:[%s11869_s8 + $0x160] sm:$0xff] %v1462_v44  ;;  %v1464_v45 = vld [vmem:[%s11861_s7 + $0x5a0] sm:$0xff] }
  0x42   : > { %v1466_v46 = vld [vmem:[%s11861_s7 + $0x5c0] sm:$0xff]  ;;  %1465 = vst [vmem:[%s11869_s8 + $0x168] sm:$0xff] %v1464_v45 }
  0x43   : > { %v1468_v47 = vld [vmem:[%s11861_s7 + $0x5e0] sm:$0xff]  ;;  %1467 = vst [vmem:[%s11869_s8 + $0x170] sm:$0xff] %v1466_v46 }
  0x44   : > { %1469 = vst [vmem:[%s11869_s8 + $0x178] sm:$0xff] %v1468_v47  ;;  %v1470_v48 = vld [vmem:[%s11861_s7 + $0x600] sm:$0xff] }
  0x45   : > { %v1472_v49 = vld [vmem:[%s11861_s7 + $0x620] sm:$0xff]  ;;  %1471 = vst [vmem:[%s11869_s8 + $0x180] sm:$0xff] %v1470_v48 }
  0x46   : > { %v1474_v50 = vld [vmem:[%s11861_s7 + $0x640] sm:$0xff]  ;;  %1473 = vst [vmem:[%s11869_s8 + $0x188] sm:$0xff] %v1472_v49 }
  0x47   : > { %1475 = vst [vmem:[%s11869_s8 + $0x190] sm:$0xff] %v1474_v50  ;;  %v1476_v51 = vld [vmem:[%s11861_s7 + $0x660] sm:$0xff] }
  0x48   : > { %v1478_v52 = vld [vmem:[%s11861_s7 + $0x680] sm:$0xff]  ;;  %1477 = vst [vmem:[%s11869_s8 + $0x198] sm:$0xff] %v1476_v51 }
  0x49   : > { %v1480_v53 = vld [vmem:[%s11861_s7 + $0x6a0] sm:$0xff]  ;;  %1479 = vst [vmem:[%s11869_s8 + $0x1a0] sm:$0xff] %v1478_v52 }
  0x4a   : > { %1481 = vst [vmem:[%s11869_s8 + $0x1a8] sm:$0xff] %v1480_v53  ;;  %v1482_v54 = vld [vmem:[%s11861_s7 + $0x6c0] sm:$0xff] }
  0x4b   : > { %v1484_v55 = vld [vmem:[%s11861_s7 + $0x6e0] sm:$0xff]  ;;  %1483 = vst [vmem:[%s11869_s8 + $0x1b0] sm:$0xff] %v1482_v54 }
  0x4c   : > { %v1486_v56 = vld [vmem:[%s11861_s7 + $0x700] sm:$0xff]  ;;  %1485 = vst [vmem:[%s11869_s8 + $0x1b8] sm:$0xff] %v1484_v55 }
  0x4d   : > { %1487 = vst [vmem:[%s11869_s8 + $0x1c0] sm:$0xff] %v1486_v56  ;;  %v1488_v57 = vld [vmem:[%s11861_s7 + $0x720] sm:$0xff] }
  0x4e   : > { %v1490_v58 = vld [vmem:[%s11861_s7 + $0x740] sm:$0xff]  ;;  %1489 = vst [vmem:[%s11869_s8 + $0x1c8] sm:$0xff] %v1488_v57 }
  0x4f   : > { %v1492_v59 = vld [vmem:[%s11861_s7 + $0x760] sm:$0xff]  ;;  %1491 = vst [vmem:[%s11869_s8 + $0x1d0] sm:$0xff] %v1490_v58 }
  0x50   : > { %1493 = vst [vmem:[%s11869_s8 + $0x1d8] sm:$0xff] %v1492_v59  ;;  %v1494_v60 = vld [vmem:[%s11861_s7 + $0x780] sm:$0xff] }
  0x51   : > { %v1496_v61 = vld [vmem:[%s11861_s7 + $0x7a0] sm:$0xff]  ;;  %1495 = vst [vmem:[%s11869_s8 + $0x1e0] sm:$0xff] %v1494_v60 }
  0x52   : > { %v1498_v62 = vld [vmem:[%s11861_s7 + $0x7c0] sm:$0xff]  ;;  %1497 = vst [vmem:[%s11869_s8 + $0x1e8] sm:$0xff] %v1496_v61 }
  0x53   : > { %1499 = vst [vmem:[%s11869_s8 + $0x1f0] sm:$0xff] %v1498_v62  ;;  %v1500_v63 = vld [vmem:[%s11861_s7 + $0x7e0] sm:$0xff] }
  0x54   : > { %v1502_v0 = vld [vmem:[%s11861_s7 + $0x800] sm:$0xff]  ;;  %1501 = vst [vmem:[%s11869_s8 + $0x1f8] sm:$0xff] %v1500_v63 }
  0x55   : > { %v1504_v1 = vld [vmem:[%s11861_s7 + $0x820] sm:$0xff]  ;;  %1503 = vst [vmem:[%s11869_s8 + $0x200] sm:$0xff] %v1502_v0 }
  0x56   : > { %1505 = vst [vmem:[%s11869_s8 + $0x208] sm:$0xff] %v1504_v1  ;;  %v1506_v2 = vld [vmem:[%s11861_s7 + $0x840] sm:$0xff] }
  0x57   : > { %v1508_v3 = vld [vmem:[%s11861_s7 + $0x860] sm:$0xff]  ;;  %1507 = vst [vmem:[%s11869_s8 + $0x210] sm:$0xff] %v1506_v2 }
  0x58   : > { %v1510_v4 = vld [vmem:[%s11861_s7 + $0x880] sm:$0xff]  ;;  %1509 = vst [vmem:[%s11869_s8 + $0x218] sm:$0xff] %v1508_v3 }
  0x59   : > { %1511 = vst [vmem:[%s11869_s8 + $0x220] sm:$0xff] %v1510_v4  ;;  %v1512_v5 = vld [vmem:[%s11861_s7 + $0x8a0] sm:$0xff] }
  0x5a   : > { %v1514_v6 = vld [vmem:[%s11861_s7 + $0x8c0] sm:$0xff]  ;;  %1513 = vst [vmem:[%s11869_s8 + $0x228] sm:$0xff] %v1512_v5 }
  0x5b   : > { %v1516_v7 = vld [vmem:[%s11861_s7 + $0x8e0] sm:$0xff]  ;;  %1515 = vst [vmem:[%s11869_s8 + $0x230] sm:$0xff] %v1514_v6 }
  0x5c   : > { %1517 = vst [vmem:[%s11869_s8 + $0x238] sm:$0xff] %v1516_v7  ;;  %v1518_v8 = vld [vmem:[%s11861_s7 + $0x900] sm:$0xff] }
  0x5d   : > { %v1520_v9 = vld [vmem:[%s11861_s7 + $0x920] sm:$0xff]  ;;  %1519 = vst [vmem:[%s11869_s8 + $0x240] sm:$0xff] %v1518_v8 }
  0x5e   : > { %v1522_v10 = vld [vmem:[%s11861_s7 + $0x940] sm:$0xff]  ;;  %1521 = vst [vmem:[%s11869_s8 + $0x248] sm:$0xff] %v1520_v9 }
  0x5f   : > { %1523 = vst [vmem:[%s11869_s8 + $0x250] sm:$0xff] %v1522_v10  ;;  %v1524_v11 = vld [vmem:[%s11861_s7 + $0x960] sm:$0xff] }
  0x60   : > { %v1526_v12 = vld [vmem:[%s11861_s7 + $0x980] sm:$0xff]  ;;  %1525 = vst [vmem:[%s11869_s8 + $0x258] sm:$0xff] %v1524_v11 }
  0x61   : > { %v1528_v13 = vld [vmem:[%s11861_s7 + $0x9a0] sm:$0xff]  ;;  %1527 = vst [vmem:[%s11869_s8 + $0x260] sm:$0xff] %v1526_v12 }
  0x62   : > { %1529 = vst [vmem:[%s11869_s8 + $0x268] sm:$0xff] %v1528_v13  ;;  %v1530_v14 = vld [vmem:[%s11861_s7 + $0x9c0] sm:$0xff] }
  0x63   : > { %v1532_v15 = vld [vmem:[%s11861_s7 + $0x9e0] sm:$0xff]  ;;  %1531 = vst [vmem:[%s11869_s8 + $0x270] sm:$0xff] %v1530_v14 }
  0x64   : > { %v1534_v16 = vld [vmem:[%s11861_s7 + $0xa00] sm:$0xff]  ;;  %1533 = vst [vmem:[%s11869_s8 + $0x278] sm:$0xff] %v1532_v15 }
  0x65   : > { %1535 = vst [vmem:[%s11869_s8 + $0x280] sm:$0xff] %v1534_v16  ;;  %v1536_v17 = vld [vmem:[%s11861_s7 + $0xa20] sm:$0xff] }
  0x66   : > { %v1538_v18 = vld [vmem:[%s11861_s7 + $0xa40] sm:$0xff]  ;;  %1537 = vst [vmem:[%s11869_s8 + $0x288] sm:$0xff] %v1536_v17 }
  0x67   : > { %v1540_v19 = vld [vmem:[%s11861_s7 + $0xa60] sm:$0xff]  ;;  %1539 = vst [vmem:[%s11869_s8 + $0x290] sm:$0xff] %v1538_v18 }
  0x68   : > { %1541 = vst [vmem:[%s11869_s8 + $0x298] sm:$0xff] %v1540_v19  ;;  %v1542_v20 = vld [vmem:[%s11861_s7 + $0xa80] sm:$0xff] }
  0x69   : > { %v1544_v21 = vld [vmem:[%s11861_s7 + $0xaa0] sm:$0xff]  ;;  %1543 = vst [vmem:[%s11869_s8 + $0x2a0] sm:$0xff] %v1542_v20 }
  0x6a   : > { %v1546_v22 = vld [vmem:[%s11861_s7 + $0xac0] sm:$0xff]  ;;  %1545 = vst [vmem:[%s11869_s8 + $0x2a8] sm:$0xff] %v1544_v21 }
  0x6b   : > { %1547 = vst [vmem:[%s11869_s8 + $0x2b0] sm:$0xff] %v1546_v22  ;;  %v1548_v23 = vld [vmem:[%s11861_s7 + $0xae0] sm:$0xff] }
  0x6c   : > { %v1550_v24 = vld [vmem:[%s11861_s7 + $0xb00] sm:$0xff]  ;;  %1549 = vst [vmem:[%s11869_s8 + $0x2b8] sm:$0xff] %v1548_v23 }
  0x6d   : > { %v1552_v25 = vld [vmem:[%s11861_s7 + $0xb20] sm:$0xff]  ;;  %1551 = vst [vmem:[%s11869_s8 + $0x2c0] sm:$0xff] %v1550_v24 }
  0x6e   : > { %1553 = vst [vmem:[%s11869_s8 + $0x2c8] sm:$0xff] %v1552_v25  ;;  %v1554_v26 = vld [vmem:[%s11861_s7 + $0xb40] sm:$0xff] }
  0x6f   : > { %v1556_v27 = vld [vmem:[%s11861_s7 + $0xb60] sm:$0xff]  ;;  %1555 = vst [vmem:[%s11869_s8 + $0x2d0] sm:$0xff] %v1554_v26 }
  0x70   : > { %v1558_v28 = vld [vmem:[%s11861_s7 + $0xb80] sm:$0xff]  ;;  %1557 = vst [vmem:[%s11869_s8 + $0x2d8] sm:$0xff] %v1556_v27 }
  0x71   : > { %1559 = vst [vmem:[%s11869_s8 + $0x2e0] sm:$0xff] %v1558_v28  ;;  %v1560_v29 = vld [vmem:[%s11861_s7 + $0xba0] sm:$0xff] }
  0x72   : > { %v1562_v30 = vld [vmem:[%s11861_s7 + $0xbc0] sm:$0xff]  ;;  %1561 = vst [vmem:[%s11869_s8 + $0x2e8] sm:$0xff] %v1560_v29 }
  0x73   : > { %v1564_v31 = vld [vmem:[%s11861_s7 + $0xbe0] sm:$0xff]  ;;  %1563 = vst [vmem:[%s11869_s8 + $0x2f0] sm:$0xff] %v1562_v30 }
  0x74   : > { %1565 = vst [vmem:[%s11869_s8 + $0x2f8] sm:$0xff] %v1564_v31  ;;  %v1566_v32 = vld [vmem:[%s11861_s7 + $0xc00] sm:$0xff] }
  0x75   : > { %v1568_v33 = vld [vmem:[%s11861_s7 + $0xc20] sm:$0xff]  ;;  %1567 = vst [vmem:[%s11869_s8 + $0x300] sm:$0xff] %v1566_v32 }
  0x76   : > { %v1570_v34 = vld [vmem:[%s11861_s7 + $0xc40] sm:$0xff]  ;;  %1569 = vst [vmem:[%s11869_s8 + $0x308] sm:$0xff] %v1568_v33 }
  0x77   : > { %1571 = vst [vmem:[%s11869_s8 + $0x310] sm:$0xff] %v1570_v34  ;;  %v1572_v35 = vld [vmem:[%s11861_s7 + $0xc60] sm:$0xff] }
  0x78   : > { %v1574_v36 = vld [vmem:[%s11861_s7 + $0xc80] sm:$0xff]  ;;  %1573 = vst [vmem:[%s11869_s8 + $0x318] sm:$0xff] %v1572_v35 }
  0x79   : > { %v1576_v37 = vld [vmem:[%s11861_s7 + $0xca0] sm:$0xff]  ;;  %1575 = vst [vmem:[%s11869_s8 + $0x320] sm:$0xff] %v1574_v36 }
  0x7a   : > { %1577 = vst [vmem:[%s11869_s8 + $0x328] sm:$0xff] %v1576_v37  ;;  %v1578_v38 = vld [vmem:[%s11861_s7 + $0xcc0] sm:$0xff] }
  0x7b   : > { %v1580_v39 = vld [vmem:[%s11861_s7 + $0xce0] sm:$0xff]  ;;  %1579 = vst [vmem:[%s11869_s8 + $0x330] sm:$0xff] %v1578_v38 }
  0x7c   : > { %v1582_v40 = vld [vmem:[%s11861_s7 + $0xd00] sm:$0xff]  ;;  %1581 = vst [vmem:[%s11869_s8 + $0x338] sm:$0xff] %v1580_v39 }
  0x7d   : > { %1583 = vst [vmem:[%s11869_s8 + $0x340] sm:$0xff] %v1582_v40  ;;  %v1584_v41 = vld [vmem:[%s11861_s7 + $0xd20] sm:$0xff] }
  0x7e   : > { %v1586_v42 = vld [vmem:[%s11861_s7 + $0xd40] sm:$0xff]  ;;  %1585 = vst [vmem:[%s11869_s8 + $0x348] sm:$0xff] %v1584_v41 }
  0x7f   : > { %v1588_v43 = vld [vmem:[%s11861_s7 + $0xd60] sm:$0xff]  ;;  %1587 = vst [vmem:[%s11869_s8 + $0x350] sm:$0xff] %v1586_v42 }
  0x80   : > { %1589 = vst [vmem:[%s11869_s8 + $0x358] sm:$0xff] %v1588_v43  ;;  %v1590_v44 = vld [vmem:[%s11861_s7 + $0xd80] sm:$0xff] }
  0x81   : > { %v1592_v45 = vld [vmem:[%s11861_s7 + $0xda0] sm:$0xff]  ;;  %1591 = vst [vmem:[%s11869_s8 + $0x360] sm:$0xff] %v1590_v44 }
  0x82   : > { %v1594_v46 = vld [vmem:[%s11861_s7 + $0xdc0] sm:$0xff]  ;;  %1593 = vst [vmem:[%s11869_s8 + $0x368] sm:$0xff] %v1592_v45 }
  0x83   : > { %1595 = vst [vmem:[%s11869_s8 + $0x370] sm:$0xff] %v1594_v46  ;;  %v1596_v47 = vld [vmem:[%s11861_s7 + $0xde0] sm:$0xff] }
  0x84   : > { %v1598_v48 = vld [vmem:[%s11861_s7 + $0xe00] sm:$0xff]  ;;  %1597 = vst [vmem:[%s11869_s8 + $0x378] sm:$0xff] %v1596_v47 }
  0x85   : > { %v1600_v49 = vld [vmem:[%s11861_s7 + $0xe20] sm:$0xff]  ;;  %1599 = vst [vmem:[%s11869_s8 + $0x380] sm:$0xff] %v1598_v48 }
  0x86   : > { %1601 = vst [vmem:[%s11869_s8 + $0x388] sm:$0xff] %v1600_v49  ;;  %v1602_v50 = vld [vmem:[%s11861_s7 + $0xe40] sm:$0xff] }
  0x87   : > { %v1604_v51 = vld [vmem:[%s11861_s7 + $0xe60] sm:$0xff]  ;;  %1603 = vst [vmem:[%s11869_s8 + $0x390] sm:$0xff] %v1602_v50 }
  0x88   : > { %v1606_v52 = vld [vmem:[%s11861_s7 + $0xe80] sm:$0xff]  ;;  %1605 = vst [vmem:[%s11869_s8 + $0x398] sm:$0xff] %v1604_v51 }
  0x89   : > { %1607 = vst [vmem:[%s11869_s8 + $0x3a0] sm:$0xff] %v1606_v52  ;;  %v1608_v53 = vld [vmem:[%s11861_s7 + $0xea0] sm:$0xff] }
  0x8a   : > { %v1610_v54 = vld [vmem:[%s11861_s7 + $0xec0] sm:$0xff]  ;;  %1609 = vst [vmem:[%s11869_s8 + $0x3a8] sm:$0xff] %v1608_v53 }
  0x8b   : > { %v1612_v55 = vld [vmem:[%s11861_s7 + $0xee0] sm:$0xff]  ;;  %1611 = vst [vmem:[%s11869_s8 + $0x3b0] sm:$0xff] %v1610_v54 }
  0x8c   : > { %1613 = vst [vmem:[%s11869_s8 + $0x3b8] sm:$0xff] %v1612_v55  ;;  %v1614_v56 = vld [vmem:[%s11861_s7 + $0xf00] sm:$0xff] }
  0x8d   : > { %v1616_v57 = vld [vmem:[%s11861_s7 + $0xf20] sm:$0xff]  ;;  %1615 = vst [vmem:[%s11869_s8 + $0x3c0] sm:$0xff] %v1614_v56 }
  0x8e   : > { %v1618_v58 = vld [vmem:[%s11861_s7 + $0xf40] sm:$0xff]  ;;  %1617 = vst [vmem:[%s11869_s8 + $0x3c8] sm:$0xff] %v1616_v57 }
  0x8f   : > { %1619 = vst [vmem:[%s11869_s8 + $0x3d0] sm:$0xff] %v1618_v58  ;;  %v1620_v59 = vld [vmem:[%s11861_s7 + $0xf60] sm:$0xff] }
  0x90   : > { %v1622_v60 = vld [vmem:[%s11861_s7 + $0xf80] sm:$0xff]  ;;  %1621 = vst [vmem:[%s11869_s8 + $0x3d8] sm:$0xff] %v1620_v59 }
  0x91   : > { %v1624_v61 = vld [vmem:[%s11861_s7 + $0xfa0] sm:$0xff]  ;;  %1623 = vst [vmem:[%s11869_s8 + $0x3e0] sm:$0xff] %v1622_v60 }
  0x92   : > { %1625 = vst [vmem:[%s11869_s8 + $0x3e8] sm:$0xff] %v1624_v61  ;;  %v1626_v62 = vld [vmem:[%s11861_s7 + $0xfc0] sm:$0xff] }
  0x93   : > { %v1628_v63 = vld [vmem:[%s11861_s7 + $0xfe0] sm:$0xff]  ;;  %1627 = vst [vmem:[%s11869_s8 + $0x3f0] sm:$0xff] %v1626_v62 }
  0x94   : > { %v1630_v0 = vld [vmem:[%s11861_s7 + $0x1000] sm:$0xff]  ;;  %1629 = vst [vmem:[%s11869_s8 + $0x3f8] sm:$0xff] %v1628_v63 }
  0x95   : > { %1631 = vst [vmem:[%s11869_s8 + $0x400] sm:$0xff] %v1630_v0  ;;  %v1632_v1 = vld [vmem:[%s11861_s7 + $0x1020] sm:$0xff] }
  0x96   : > { %v1634_v2 = vld [vmem:[%s11861_s7 + $0x1040] sm:$0xff]  ;;  %1633 = vst [vmem:[%s11869_s8 + $0x408] sm:$0xff] %v1632_v1 }
  0x97   : > { %v1636_v3 = vld [vmem:[%s11861_s7 + $0x1060] sm:$0xff]  ;;  %1635 = vst [vmem:[%s11869_s8 + $0x410] sm:$0xff] %v1634_v2 }
  0x98   : > { %1637 = vst [vmem:[%s11869_s8 + $0x418] sm:$0xff] %v1636_v3  ;;  %v1638_v4 = vld [vmem:[%s11861_s7 + $0x1080] sm:$0xff] }
  0x99   : > { %v1640_v5 = vld [vmem:[%s11861_s7 + $0x10a0] sm:$0xff]  ;;  %1639 = vst [vmem:[%s11869_s8 + $0x420] sm:$0xff] %v1638_v4 }
  0x9a   : > { %v1642_v6 = vld [vmem:[%s11861_s7 + $0x10c0] sm:$0xff]  ;;  %1641 = vst [vmem:[%s11869_s8 + $0x428] sm:$0xff] %v1640_v5 }
  0x9b   : > { %1643 = vst [vmem:[%s11869_s8 + $0x430] sm:$0xff] %v1642_v6  ;;  %v1644_v7 = vld [vmem:[%s11861_s7 + $0x10e0] sm:$0xff] }
  0x9c   : > { %v1646_v8 = vld [vmem:[%s11861_s7 + $0x1100] sm:$0xff]  ;;  %1645 = vst [vmem:[%s11869_s8 + $0x438] sm:$0xff] %v1644_v7 }
  0x9d   : > { %v1648_v9 = vld [vmem:[%s11861_s7 + $0x1120] sm:$0xff]  ;;  %1647 = vst [vmem:[%s11869_s8 + $0x440] sm:$0xff] %v1646_v8 }
  0x9e   : > { %1649 = vst [vmem:[%s11869_s8 + $0x448] sm:$0xff] %v1648_v9  ;;  %v1650_v10 = vld [vmem:[%s11861_s7 + $0x1140] sm:$0xff] }
  0x9f   : > { %v1652_v11 = vld [vmem:[%s11861_s7 + $0x1160] sm:$0xff]  ;;  %1651 = vst [vmem:[%s11869_s8 + $0x450] sm:$0xff] %v1650_v10 }
  0xa0   : > { %v1654_v12 = vld [vmem:[%s11861_s7 + $0x1180] sm:$0xff]  ;;  %1653 = vst [vmem:[%s11869_s8 + $0x458] sm:$0xff] %v1652_v11 }
  0xa1   : > { %1655 = vst [vmem:[%s11869_s8 + $0x460] sm:$0xff] %v1654_v12  ;;  %v1656_v13 = vld [vmem:[%s11861_s7 + $0x11a0] sm:$0xff] }
  0xa2   : > { %v1658_v14 = vld [vmem:[%s11861_s7 + $0x11c0] sm:$0xff]  ;;  %1657 = vst [vmem:[%s11869_s8 + $0x468] sm:$0xff] %v1656_v13 }
  0xa3   : > { %v1660_v15 = vld [vmem:[%s11861_s7 + $0x11e0] sm:$0xff]  ;;  %1659 = vst [vmem:[%s11869_s8 + $0x470] sm:$0xff] %v1658_v14 }
  0xa4   : > { %1661 = vst [vmem:[%s11869_s8 + $0x478] sm:$0xff] %v1660_v15  ;;  %v1662_v16 = vld [vmem:[%s11861_s7 + $0x1200] sm:$0xff] }
  0xa5   : > { %v1664_v17 = vld [vmem:[%s11861_s7 + $0x1220] sm:$0xff]  ;;  %1663 = vst [vmem:[%s11869_s8 + $0x480] sm:$0xff] %v1662_v16 }
  0xa6   : > { %v1666_v18 = vld [vmem:[%s11861_s7 + $0x1240] sm:$0xff]  ;;  %1665 = vst [vmem:[%s11869_s8 + $0x488] sm:$0xff] %v1664_v17 }
  0xa7   : > { %1667 = vst [vmem:[%s11869_s8 + $0x490] sm:$0xff] %v1666_v18  ;;  %v1668_v19 = vld [vmem:[%s11861_s7 + $0x1260] sm:$0xff] }
  0xa8   : > { %v1670_v20 = vld [vmem:[%s11861_s7 + $0x1280] sm:$0xff]  ;;  %1669 = vst [vmem:[%s11869_s8 + $0x498] sm:$0xff] %v1668_v19 }
  0xa9   : > { %v1672_v21 = vld [vmem:[%s11861_s7 + $0x12a0] sm:$0xff]  ;;  %1671 = vst [vmem:[%s11869_s8 + $0x4a0] sm:$0xff] %v1670_v20 }
  0xaa   : > { %1673 = vst [vmem:[%s11869_s8 + $0x4a8] sm:$0xff] %v1672_v21  ;;  %v1674_v22 = vld [vmem:[%s11861_s7 + $0x12c0] sm:$0xff] }
  0xab   : > { %v1676_v23 = vld [vmem:[%s11861_s7 + $0x12e0] sm:$0xff]  ;;  %1675 = vst [vmem:[%s11869_s8 + $0x4b0] sm:$0xff] %v1674_v22 }
  0xac   : > { %v1678_v24 = vld [vmem:[%s11861_s7 + $0x1300] sm:$0xff]  ;;  %1677 = vst [vmem:[%s11869_s8 + $0x4b8] sm:$0xff] %v1676_v23 }
  0xad   : > { %1679 = vst [vmem:[%s11869_s8 + $0x4c0] sm:$0xff] %v1678_v24  ;;  %v1680_v25 = vld [vmem:[%s11861_s7 + $0x1320] sm:$0xff] }
  0xae   : > { %v1682_v26 = vld [vmem:[%s11861_s7 + $0x1340] sm:$0xff]  ;;  %1681 = vst [vmem:[%s11869_s8 + $0x4c8] sm:$0xff] %v1680_v25 }
  0xaf   : > { %v1684_v27 = vld [vmem:[%s11861_s7 + $0x1360] sm:$0xff]  ;;  %1683 = vst [vmem:[%s11869_s8 + $0x4d0] sm:$0xff] %v1682_v26 }
  0xb0   : > { %1685 = vst [vmem:[%s11869_s8 + $0x4d8] sm:$0xff] %v1684_v27  ;;  %v1686_v28 = vld [vmem:[%s11861_s7 + $0x1380] sm:$0xff] }
  0xb1   : > { %v1688_v29 = vld [vmem:[%s11861_s7 + $0x13a0] sm:$0xff]  ;;  %1687 = vst [vmem:[%s11869_s8 + $0x4e0] sm:$0xff] %v1686_v28 }
  0xb2   : > { %v1690_v30 = vld [vmem:[%s11861_s7 + $0x13c0] sm:$0xff]  ;;  %1689 = vst [vmem:[%s11869_s8 + $0x4e8] sm:$0xff] %v1688_v29 }
  0xb3   : > { %1691 = vst [vmem:[%s11869_s8 + $0x4f0] sm:$0xff] %v1690_v30  ;;  %v1692_v31 = vld [vmem:[%s11861_s7 + $0x13e0] sm:$0xff] }
  0xb4   : > { %v1694_v32 = vld [vmem:[%s11861_s7 + $0x1400] sm:$0xff]  ;;  %1693 = vst [vmem:[%s11869_s8 + $0x4f8] sm:$0xff] %v1692_v31 }
  0xb5   : > { %v1696_v33 = vld [vmem:[%s11861_s7 + $0x1420] sm:$0xff]  ;;  %1695 = vst [vmem:[%s11869_s8 + $0x500] sm:$0xff] %v1694_v32 }
  0xb6   : > { %1697 = vst [vmem:[%s11869_s8 + $0x508] sm:$0xff] %v1696_v33  ;;  %v1698_v34 = vld [vmem:[%s11861_s7 + $0x1440] sm:$0xff] }
  0xb7   : > { %v1700_v35 = vld [vmem:[%s11861_s7 + $0x1460] sm:$0xff]  ;;  %1699 = vst [vmem:[%s11869_s8 + $0x510] sm:$0xff] %v1698_v34 }
  0xb8   : > { %v1702_v36 = vld [vmem:[%s11861_s7 + $0x1480] sm:$0xff]  ;;  %1701 = vst [vmem:[%s11869_s8 + $0x518] sm:$0xff] %v1700_v35 }
  0xb9   : > { %1703 = vst [vmem:[%s11869_s8 + $0x520] sm:$0xff] %v1702_v36  ;;  %v1704_v37 = vld [vmem:[%s11861_s7 + $0x14a0] sm:$0xff] }
  0xba   : > { %v1706_v38 = vld [vmem:[%s11861_s7 + $0x14c0] sm:$0xff]  ;;  %1705 = vst [vmem:[%s11869_s8 + $0x528] sm:$0xff] %v1704_v37 }
  0xbb   : > { %v1708_v39 = vld [vmem:[%s11861_s7 + $0x14e0] sm:$0xff]  ;;  %1707 = vst [vmem:[%s11869_s8 + $0x530] sm:$0xff] %v1706_v38 }
  0xbc   : > { %1709 = vst [vmem:[%s11869_s8 + $0x538] sm:$0xff] %v1708_v39  ;;  %v1710_v40 = vld [vmem:[%s11861_s7 + $0x1500] sm:$0xff] }
  0xbd   : > { %v1712_v41 = vld [vmem:[%s11861_s7 + $0x1520] sm:$0xff]  ;;  %1711 = vst [vmem:[%s11869_s8 + $0x540] sm:$0xff] %v1710_v40 }
  0xbe   : > { %v1714_v42 = vld [vmem:[%s11861_s7 + $0x1540] sm:$0xff]  ;;  %1713 = vst [vmem:[%s11869_s8 + $0x548] sm:$0xff] %v1712_v41 }
  0xbf   : > { %1715 = vst [vmem:[%s11869_s8 + $0x550] sm:$0xff] %v1714_v42  ;;  %v1716_v43 = vld [vmem:[%s11861_s7 + $0x1560] sm:$0xff] }
  0xc0   : > { %v1718_v44 = vld [vmem:[%s11861_s7 + $0x1580] sm:$0xff]  ;;  %1717 = vst [vmem:[%s11869_s8 + $0x558] sm:$0xff] %v1716_v43 }
  0xc1   : > { %v1720_v45 = vld [vmem:[%s11861_s7 + $0x15a0] sm:$0xff]  ;;  %1719 = vst [vmem:[%s11869_s8 + $0x560] sm:$0xff] %v1718_v44 }
  0xc2   : > { %1721 = vst [vmem:[%s11869_s8 + $0x568] sm:$0xff] %v1720_v45  ;;  %v1722_v46 = vld [vmem:[%s11861_s7 + $0x15c0] sm:$0xff] }
  0xc3   : > { %v1724_v47 = vld [vmem:[%s11861_s7 + $0x15e0] sm:$0xff]  ;;  %1723 = vst [vmem:[%s11869_s8 + $0x570] sm:$0xff] %v1722_v46 }
  0xc4   : > { %v1726_v48 = vld [vmem:[%s11861_s7 + $0x1600] sm:$0xff]  ;;  %1725 = vst [vmem:[%s11869_s8 + $0x578] sm:$0xff] %v1724_v47 }
  0xc5   : > { %1727 = vst [vmem:[%s11869_s8 + $0x580] sm:$0xff] %v1726_v48  ;;  %v1728_v49 = vld [vmem:[%s11861_s7 + $0x1620] sm:$0xff] }
  0xc6   : > { %v1730_v50 = vld [vmem:[%s11861_s7 + $0x1640] sm:$0xff]  ;;  %1729 = vst [vmem:[%s11869_s8 + $0x588] sm:$0xff] %v1728_v49 }
  0xc7   : > { %v1732_v51 = vld [vmem:[%s11861_s7 + $0x1660] sm:$0xff]  ;;  %1731 = vst [vmem:[%s11869_s8 + $0x590] sm:$0xff] %v1730_v50 }
  0xc8   : > { %1733 = vst [vmem:[%s11869_s8 + $0x598] sm:$0xff] %v1732_v51  ;;  %v1734_v52 = vld [vmem:[%s11861_s7 + $0x1680] sm:$0xff] }
  0xc9   : > { %v1736_v53 = vld [vmem:[%s11861_s7 + $0x16a0] sm:$0xff]  ;;  %1735 = vst [vmem:[%s11869_s8 + $0x5a0] sm:$0xff] %v1734_v52 }
  0xca   : > { %v1738_v54 = vld [vmem:[%s11861_s7 + $0x16c0] sm:$0xff]  ;;  %1737 = vst [vmem:[%s11869_s8 + $0x5a8] sm:$0xff] %v1736_v53 }
  0xcb   : > { %1739 = vst [vmem:[%s11869_s8 + $0x5b0] sm:$0xff] %v1738_v54  ;;  %v1740_v55 = vld [vmem:[%s11861_s7 + $0x16e0] sm:$0xff] }
  0xcc   : > { %v1742_v56 = vld [vmem:[%s11861_s7 + $0x1700] sm:$0xff]  ;;  %1741 = vst [vmem:[%s11869_s8 + $0x5b8] sm:$0xff] %v1740_v55 }
  0xcd   : > { %v1744_v57 = vld [vmem:[%s11861_s7 + $0x1720] sm:$0xff]  ;;  %1743 = vst [vmem:[%s11869_s8 + $0x5c0] sm:$0xff] %v1742_v56 }
  0xce   : > { %1745 = vst [vmem:[%s11869_s8 + $0x5c8] sm:$0xff] %v1744_v57  ;;  %v1746_v58 = vld [vmem:[%s11861_s7 + $0x1740] sm:$0xff] }
  0xcf   : > { %v1748_v59 = vld [vmem:[%s11861_s7 + $0x1760] sm:$0xff]  ;;  %1747 = vst [vmem:[%s11869_s8 + $0x5d0] sm:$0xff] %v1746_v58 }
  0xd0   : > { %v1750_v60 = vld [vmem:[%s11861_s7 + $0x1780] sm:$0xff]  ;;  %1749 = vst [vmem:[%s11869_s8 + $0x5d8] sm:$0xff] %v1748_v59 }
  0xd1   : > { %1751 = vst [vmem:[%s11869_s8 + $0x5e0] sm:$0xff] %v1750_v60  ;;  %v1752_v61 = vld [vmem:[%s11861_s7 + $0x17a0] sm:$0xff] }
  0xd2   : > { %v1754_v62 = vld [vmem:[%s11861_s7 + $0x17c0] sm:$0xff]  ;;  %1753 = vst [vmem:[%s11869_s8 + $0x5e8] sm:$0xff] %v1752_v61 }
  0xd3   : > { %v1756_v63 = vld [vmem:[%s11861_s7 + $0x17e0] sm:$0xff]  ;;  %1755 = vst [vmem:[%s11869_s8 + $0x5f0] sm:$0xff] %v1754_v62 }
  0xd4   : > { %1757 = vst [vmem:[%s11869_s8 + $0x5f8] sm:$0xff] %v1756_v63  ;;  %v1758_v0 = vld [vmem:[%s11861_s7 + $0x1800] sm:$0xff] }
  0xd5   : > { %v1760_v1 = vld [vmem:[%s11861_s7 + $0x1820] sm:$0xff]  ;;  %1759 = vst [vmem:[%s11869_s8 + $0x600] sm:$0xff] %v1758_v0 }
  0xd6   : > { %v1762_v2 = vld [vmem:[%s11861_s7 + $0x1840] sm:$0xff]  ;;  %1761 = vst [vmem:[%s11869_s8 + $0x608] sm:$0xff] %v1760_v1 }
  0xd7   : > { %1763 = vst [vmem:[%s11869_s8 + $0x610] sm:$0xff] %v1762_v2  ;;  %v1764_v3 = vld [vmem:[%s11861_s7 + $0x1860] sm:$0xff] }
  0xd8   : > { %v1766_v4 = vld [vmem:[%s11861_s7 + $0x1880] sm:$0xff]  ;;  %1765 = vst [vmem:[%s11869_s8 + $0x618] sm:$0xff] %v1764_v3 }
  0xd9   : > { %v1768_v5 = vld [vmem:[%s11861_s7 + $0x18a0] sm:$0xff]  ;;  %1767 = vst [vmem:[%s11869_s8 + $0x620] sm:$0xff] %v1766_v4 }
  0xda   : > { %1769 = vst [vmem:[%s11869_s8 + $0x628] sm:$0xff] %v1768_v5  ;;  %v1770_v6 = vld [vmem:[%s11861_s7 + $0x18c0] sm:$0xff] }
  0xdb   : > { %v1772_v7 = vld [vmem:[%s11861_s7 + $0x18e0] sm:$0xff]  ;;  %1771 = vst [vmem:[%s11869_s8 + $0x630] sm:$0xff] %v1770_v6 }
  0xdc   : > { %v1774_v8 = vld [vmem:[%s11861_s7 + $0x1900] sm:$0xff]  ;;  %1773 = vst [vmem:[%s11869_s8 + $0x638] sm:$0xff] %v1772_v7 }
  0xdd   : > { %1775 = vst [vmem:[%s11869_s8 + $0x640] sm:$0xff] %v1774_v8  ;;  %v1776_v9 = vld [vmem:[%s11861_s7 + $0x1920] sm:$0xff] }
  0xde   : > { %v1778_v10 = vld [vmem:[%s11861_s7 + $0x1940] sm:$0xff]  ;;  %1777 = vst [vmem:[%s11869_s8 + $0x648] sm:$0xff] %v1776_v9 }
  0xdf   : > { %v1780_v11 = vld [vmem:[%s11861_s7 + $0x1960] sm:$0xff]  ;;  %1779 = vst [vmem:[%s11869_s8 + $0x650] sm:$0xff] %v1778_v10 }
  0xe0   : > { %1781 = vst [vmem:[%s11869_s8 + $0x658] sm:$0xff] %v1780_v11  ;;  %v1782_v12 = vld [vmem:[%s11861_s7 + $0x1980] sm:$0xff] }
  0xe1   : > { %v1784_v13 = vld [vmem:[%s11861_s7 + $0x19a0] sm:$0xff]  ;;  %1783 = vst [vmem:[%s11869_s8 + $0x660] sm:$0xff] %v1782_v12 }
  0xe2   : > { %v1786_v14 = vld [vmem:[%s11861_s7 + $0x19c0] sm:$0xff]  ;;  %1785 = vst [vmem:[%s11869_s8 + $0x668] sm:$0xff] %v1784_v13 }
  0xe3   : > { %1787 = vst [vmem:[%s11869_s8 + $0x670] sm:$0xff] %v1786_v14  ;;  %v1788_v15 = vld [vmem:[%s11861_s7 + $0x19e0] sm:$0xff] }
  0xe4   : > { %v1790_v16 = vld [vmem:[%s11861_s7 + $0x1a00] sm:$0xff]  ;;  %1789 = vst [vmem:[%s11869_s8 + $0x678] sm:$0xff] %v1788_v15 }
  0xe5   : > { %v1792_v17 = vld [vmem:[%s11861_s7 + $0x1a20] sm:$0xff]  ;;  %1791 = vst [vmem:[%s11869_s8 + $0x680] sm:$0xff] %v1790_v16 }
  0xe6   : > { %1793 = vst [vmem:[%s11869_s8 + $0x688] sm:$0xff] %v1792_v17  ;;  %v1794_v18 = vld [vmem:[%s11861_s7 + $0x1a40] sm:$0xff] }
  0xe7   : > { %v1796_v19 = vld [vmem:[%s11861_s7 + $0x1a60] sm:$0xff]  ;;  %1795 = vst [vmem:[%s11869_s8 + $0x690] sm:$0xff] %v1794_v18 }
  0xe8   : > { %v1798_v20 = vld [vmem:[%s11861_s7 + $0x1a80] sm:$0xff]  ;;  %1797 = vst [vmem:[%s11869_s8 + $0x698] sm:$0xff] %v1796_v19 }
  0xe9   : > { %1799 = vst [vmem:[%s11869_s8 + $0x6a0] sm:$0xff] %v1798_v20  ;;  %v1800_v21 = vld [vmem:[%s11861_s7 + $0x1aa0] sm:$0xff] }
  0xea   : > { %v1802_v22 = vld [vmem:[%s11861_s7 + $0x1ac0] sm:$0xff]  ;;  %1801 = vst [vmem:[%s11869_s8 + $0x6a8] sm:$0xff] %v1800_v21 }
  0xeb   : > { %v1804_v23 = vld [vmem:[%s11861_s7 + $0x1ae0] sm:$0xff]  ;;  %1803 = vst [vmem:[%s11869_s8 + $0x6b0] sm:$0xff] %v1802_v22 }
  0xec   : > { %1805 = vst [vmem:[%s11869_s8 + $0x6b8] sm:$0xff] %v1804_v23  ;;  %v1806_v24 = vld [vmem:[%s11861_s7 + $0x1b00] sm:$0xff] }
  0xed   : > { %v1808_v25 = vld [vmem:[%s11861_s7 + $0x1b20] sm:$0xff]  ;;  %1807 = vst [vmem:[%s11869_s8 + $0x6c0] sm:$0xff] %v1806_v24 }
  0xee   : > { %v1810_v26 = vld [vmem:[%s11861_s7 + $0x1b40] sm:$0xff]  ;;  %1809 = vst [vmem:[%s11869_s8 + $0x6c8] sm:$0xff] %v1808_v25 }
  0xef   : > { %1811 = vst [vmem:[%s11869_s8 + $0x6d0] sm:$0xff] %v1810_v26  ;;  %v1812_v27 = vld [vmem:[%s11861_s7 + $0x1b60] sm:$0xff] }
  0xf0   : > { %v1814_v28 = vld [vmem:[%s11861_s7 + $0x1b80] sm:$0xff]  ;;  %1813 = vst [vmem:[%s11869_s8 + $0x6d8] sm:$0xff] %v1812_v27 }
  0xf1   : > { %v1816_v29 = vld [vmem:[%s11861_s7 + $0x1ba0] sm:$0xff]  ;;  %1815 = vst [vmem:[%s11869_s8 + $0x6e0] sm:$0xff] %v1814_v28 }
  0xf2   : > { %1817 = vst [vmem:[%s11869_s8 + $0x6e8] sm:$0xff] %v1816_v29  ;;  %v1818_v30 = vld [vmem:[%s11861_s7 + $0x1bc0] sm:$0xff] }
  0xf3   : > { %v1820_v31 = vld [vmem:[%s11861_s7 + $0x1be0] sm:$0xff]  ;;  %1819 = vst [vmem:[%s11869_s8 + $0x6f0] sm:$0xff] %v1818_v30 }
  0xf4   : > { %v1822_v32 = vld [vmem:[%s11861_s7 + $0x1c00] sm:$0xff]  ;;  %1821 = vst [vmem:[%s11869_s8 + $0x6f8] sm:$0xff] %v1820_v31 }
  0xf5   : > { %1823 = vst [vmem:[%s11869_s8 + $0x700] sm:$0xff] %v1822_v32  ;;  %v1824_v33 = vld [vmem:[%s11861_s7 + $0x1c20] sm:$0xff] }
  0xf6   : > { %v1826_v34 = vld [vmem:[%s11861_s7 + $0x1c40] sm:$0xff]  ;;  %1825 = vst [vmem:[%s11869_s8 + $0x708] sm:$0xff] %v1824_v33 }
  0xf7   : > { %v1828_v35 = vld [vmem:[%s11861_s7 + $0x1c60] sm:$0xff]  ;;  %1827 = vst [vmem:[%s11869_s8 + $0x710] sm:$0xff] %v1826_v34 }
  0xf8   : > { %1829 = vst [vmem:[%s11869_s8 + $0x718] sm:$0xff] %v1828_v35  ;;  %v1830_v36 = vld [vmem:[%s11861_s7 + $0x1c80] sm:$0xff] }
  0xf9   : > { %v1832_v37 = vld [vmem:[%s11861_s7 + $0x1ca0] sm:$0xff]  ;;  %1831 = vst [vmem:[%s11869_s8 + $0x720] sm:$0xff] %v1830_v36 }
  0xfa   : > { %v1834_v38 = vld [vmem:[%s11861_s7 + $0x1cc0] sm:$0xff]  ;;  %1833 = vst [vmem:[%s11869_s8 + $0x728] sm:$0xff] %v1832_v37 }
  0xfb   : > { %1835 = vst [vmem:[%s11869_s8 + $0x730] sm:$0xff] %v1834_v38  ;;  %v1836_v39 = vld [vmem:[%s11861_s7 + $0x1ce0] sm:$0xff] }
  0xfc   : > { %v1838_v40 = vld [vmem:[%s11861_s7 + $0x1d00] sm:$0xff]  ;;  %1837 = vst [vmem:[%s11869_s8 + $0x738] sm:$0xff] %v1836_v39 }
  0xfd   : > { %v1840_v41 = vld [vmem:[%s11861_s7 + $0x1d20] sm:$0xff]  ;;  %1839 = vst [vmem:[%s11869_s8 + $0x740] sm:$0xff] %v1838_v40 }
  0xfe   : > { %1841 = vst [vmem:[%s11869_s8 + $0x748] sm:$0xff] %v1840_v41  ;;  %v1842_v42 = vld [vmem:[%s11861_s7 + $0x1d40] sm:$0xff] }
  0xff   : > { %v1844_v43 = vld [vmem:[%s11861_s7 + $0x1d60] sm:$0xff]  ;;  %1843 = vst [vmem:[%s11869_s8 + $0x750] sm:$0xff] %v1842_v42 }
 0x100   : > { %v1846_v44 = vld [vmem:[%s11861_s7 + $0x1d80] sm:$0xff]  ;;  %1845 = vst [vmem:[%s11869_s8 + $0x758] sm:$0xff] %v1844_v43 }
 0x101   : > { %1847 = vst [vmem:[%s11869_s8 + $0x760] sm:$0xff] %v1846_v44  ;;  %v1848_v45 = vld [vmem:[%s11861_s7 + $0x1da0] sm:$0xff] }
 0x102   : > { %v1850_v46 = vld [vmem:[%s11861_s7 + $0x1dc0] sm:$0xff]  ;;  %1849 = vst [vmem:[%s11869_s8 + $0x768] sm:$0xff] %v1848_v45 }
 0x103   : > { %v1852_v47 = vld [vmem:[%s11861_s7 + $0x1de0] sm:$0xff]  ;;  %1851 = vst [vmem:[%s11869_s8 + $0x770] sm:$0xff] %v1850_v46 }
 0x104   : > { %1853 = vst [vmem:[%s11869_s8 + $0x778] sm:$0xff] %v1852_v47  ;;  %v1854_v48 = vld [vmem:[%s11861_s7 + $0x1e00] sm:$0xff] }
 0x105   : > { %v1856_v49 = vld [vmem:[%s11861_s7 + $0x1e20] sm:$0xff]  ;;  %1855 = vst [vmem:[%s11869_s8 + $0x780] sm:$0xff] %v1854_v48 }
 0x106   : > { %v1858_v50 = vld [vmem:[%s11861_s7 + $0x1e40] sm:$0xff]  ;;  %1857 = vst [vmem:[%s11869_s8 + $0x788] sm:$0xff] %v1856_v49 }
 0x107   : > { %1859 = vst [vmem:[%s11869_s8 + $0x790] sm:$0xff] %v1858_v50  ;;  %v1860_v51 = vld [vmem:[%s11861_s7 + $0x1e60] sm:$0xff] }
 0x108   : > { %v1862_v52 = vld [vmem:[%s11861_s7 + $0x1e80] sm:$0xff]  ;;  %1861 = vst [vmem:[%s11869_s8 + $0x798] sm:$0xff] %v1860_v51 }
 0x109   : > { %v1864_v53 = vld [vmem:[%s11861_s7 + $0x1ea0] sm:$0xff]  ;;  %1863 = vst [vmem:[%s11869_s8 + $0x7a0] sm:$0xff] %v1862_v52 }
 0x10a   : > { %1865 = vst [vmem:[%s11869_s8 + $0x7a8] sm:$0xff] %v1864_v53  ;;  %v1866_v54 = vld [vmem:[%s11861_s7 + $0x1ec0] sm:$0xff] }
 0x10b   : > { %v1868_v55 = vld [vmem:[%s11861_s7 + $0x1ee0] sm:$0xff]  ;;  %1867 = vst [vmem:[%s11869_s8 + $0x7b0] sm:$0xff] %v1866_v54 }
 0x10c   : > { %v1870_v56 = vld [vmem:[%s11861_s7 + $0x1f00] sm:$0xff]  ;;  %1869 = vst [vmem:[%s11869_s8 + $0x7b8] sm:$0xff] %v1868_v55 }
 0x10d   : > { %1871 = vst [vmem:[%s11869_s8 + $0x7c0] sm:$0xff] %v1870_v56  ;;  %v1872_v57 = vld [vmem:[%s11861_s7 + $0x1f20] sm:$0xff] }
 0x10e   : > { %v1874_v58 = vld [vmem:[%s11861_s7 + $0x1f40] sm:$0xff]  ;;  %1873 = vst [vmem:[%s11869_s8 + $0x7c8] sm:$0xff] %v1872_v57 }
 0x10f   : > { %v1876_v59 = vld [vmem:[%s11861_s7 + $0x1f60] sm:$0xff]  ;;  %1875 = vst [vmem:[%s11869_s8 + $0x7d0] sm:$0xff] %v1874_v58 }
 0x110   : > { %1877 = vst [vmem:[%s11869_s8 + $0x7d8] sm:$0xff] %v1876_v59  ;;  %v1878_v60 = vld [vmem:[%s11861_s7 + $0x1f80] sm:$0xff] }
 0x111   : > { %v1880_v61 = vld [vmem:[%s11861_s7 + $0x1fa0] sm:$0xff]  ;;  %1879 = vst [vmem:[%s11869_s8 + $0x7e0] sm:$0xff] %v1878_v60 }
 0x112   : > { %v1882_v62 = vld [vmem:[%s11861_s7 + $0x1fc0] sm:$0xff]  ;;  %1881 = vst [vmem:[%s11869_s8 + $0x7e8] sm:$0xff] %v1880_v61 }
 0x113   : > { %1883 = vst [vmem:[%s11869_s8 + $0x7f0] sm:$0xff] %v1882_v62  ;;  %v1884_v63 = vld [vmem:[%s11861_s7 + $0x1fe0] sm:$0xff] }
 0x114   : > { %v1886_v0 = vld [vmem:[%s11861_s7 + $0x2000] sm:$0xff]  ;;  %1885 = vst [vmem:[%s11869_s8 + $0x7f8] sm:$0xff] %v1884_v63 }
 0x115   : > { %v1888_v1 = vld [vmem:[%s11861_s7 + $0x2020] sm:$0xff]  ;;  %1887 = vst [vmem:[%s11869_s8 + $0x800] sm:$0xff] %v1886_v0 }
 0x116   : > { %1889 = vst [vmem:[%s11869_s8 + $0x808] sm:$0xff] %v1888_v1  ;;  %v1890_v2 = vld [vmem:[%s11861_s7 + $0x2040] sm:$0xff] }
 0x117   : > { %v1892_v3 = vld [vmem:[%s11861_s7 + $0x2060] sm:$0xff]  ;;  %1891 = vst [vmem:[%s11869_s8 + $0x810] sm:$0xff] %v1890_v2 }
 0x118   : > { %v1894_v4 = vld [vmem:[%s11861_s7 + $0x2080] sm:$0xff]  ;;  %1893 = vst [vmem:[%s11869_s8 + $0x818] sm:$0xff] %v1892_v3 }
 0x119   : > { %1895 = vst [vmem:[%s11869_s8 + $0x820] sm:$0xff] %v1894_v4  ;;  %v1896_v5 = vld [vmem:[%s11861_s7 + $0x20a0] sm:$0xff] }
 0x11a   : > { %v1898_v6 = vld [vmem:[%s11861_s7 + $0x20c0] sm:$0xff]  ;;  %1897 = vst [vmem:[%s11869_s8 + $0x828] sm:$0xff] %v1896_v5 }
 0x11b   : > { %v1900_v7 = vld [vmem:[%s11861_s7 + $0x20e0] sm:$0xff]  ;;  %1899 = vst [vmem:[%s11869_s8 + $0x830] sm:$0xff] %v1898_v6 }
 0x11c   : > { %1901 = vst [vmem:[%s11869_s8 + $0x838] sm:$0xff] %v1900_v7  ;;  %v1902_v8 = vld [vmem:[%s11861_s7 + $0x2100] sm:$0xff] }
 0x11d   : > { %v1904_v9 = vld [vmem:[%s11861_s7 + $0x2120] sm:$0xff]  ;;  %1903 = vst [vmem:[%s11869_s8 + $0x840] sm:$0xff] %v1902_v8 }
 0x11e   : > { %v1906_v10 = vld [vmem:[%s11861_s7 + $0x2140] sm:$0xff]  ;;  %1905 = vst [vmem:[%s11869_s8 + $0x848] sm:$0xff] %v1904_v9 }
 0x11f   : > { %1907 = vst [vmem:[%s11869_s8 + $0x850] sm:$0xff] %v1906_v10  ;;  %v1908_v11 = vld [vmem:[%s11861_s7 + $0x2160] sm:$0xff] }
 0x120   : > { %v1910_v12 = vld [vmem:[%s11861_s7 + $0x2180] sm:$0xff]  ;;  %1909 = vst [vmem:[%s11869_s8 + $0x858] sm:$0xff] %v1908_v11 }
 0x121   : > { %v1912_v13 = vld [vmem:[%s11861_s7 + $0x21a0] sm:$0xff]  ;;  %1911 = vst [vmem:[%s11869_s8 + $0x860] sm:$0xff] %v1910_v12 }
 0x122   : > { %1913 = vst [vmem:[%s11869_s8 + $0x868] sm:$0xff] %v1912_v13  ;;  %v1914_v14 = vld [vmem:[%s11861_s7 + $0x21c0] sm:$0xff] }
 0x123   : > { %v1916_v15 = vld [vmem:[%s11861_s7 + $0x21e0] sm:$0xff]  ;;  %1915 = vst [vmem:[%s11869_s8 + $0x870] sm:$0xff] %v1914_v14 }
 0x124   : > { %v1918_v16 = vld [vmem:[%s11861_s7 + $0x2200] sm:$0xff]  ;;  %1917 = vst [vmem:[%s11869_s8 + $0x878] sm:$0xff] %v1916_v15 }
 0x125   : > { %1919 = vst [vmem:[%s11869_s8 + $0x880] sm:$0xff] %v1918_v16  ;;  %v1920_v17 = vld [vmem:[%s11861_s7 + $0x2220] sm:$0xff] }
 0x126   : > { %v1922_v18 = vld [vmem:[%s11861_s7 + $0x2240] sm:$0xff]  ;;  %1921 = vst [vmem:[%s11869_s8 + $0x888] sm:$0xff] %v1920_v17 }
 0x127   : > { %v1924_v19 = vld [vmem:[%s11861_s7 + $0x2260] sm:$0xff]  ;;  %1923 = vst [vmem:[%s11869_s8 + $0x890] sm:$0xff] %v1922_v18 }
 0x128   : > { %1925 = vst [vmem:[%s11869_s8 + $0x898] sm:$0xff] %v1924_v19  ;;  %v1926_v20 = vld [vmem:[%s11861_s7 + $0x2280] sm:$0xff] }
 0x129   : > { %v1928_v21 = vld [vmem:[%s11861_s7 + $0x22a0] sm:$0xff]  ;;  %1927 = vst [vmem:[%s11869_s8 + $0x8a0] sm:$0xff] %v1926_v20 }
 0x12a   : > { %v1930_v22 = vld [vmem:[%s11861_s7 + $0x22c0] sm:$0xff]  ;;  %1929 = vst [vmem:[%s11869_s8 + $0x8a8] sm:$0xff] %v1928_v21 }
 0x12b   : > { %1931 = vst [vmem:[%s11869_s8 + $0x8b0] sm:$0xff] %v1930_v22  ;;  %v1932_v23 = vld [vmem:[%s11861_s7 + $0x22e0] sm:$0xff] }
 0x12c   : > { %v1934_v24 = vld [vmem:[%s11861_s7 + $0x2300] sm:$0xff]  ;;  %1933 = vst [vmem:[%s11869_s8 + $0x8b8] sm:$0xff] %v1932_v23 }
 0x12d   : > { %v1936_v25 = vld [vmem:[%s11861_s7 + $0x2320] sm:$0xff]  ;;  %1935 = vst [vmem:[%s11869_s8 + $0x8c0] sm:$0xff] %v1934_v24 }
 0x12e   : > { %1937 = vst [vmem:[%s11869_s8 + $0x8c8] sm:$0xff] %v1936_v25  ;;  %v1938_v26 = vld [vmem:[%s11861_s7 + $0x2340] sm:$0xff] }
 0x12f   : > { %v1940_v27 = vld [vmem:[%s11861_s7 + $0x2360] sm:$0xff]  ;;  %1939 = vst [vmem:[%s11869_s8 + $0x8d0] sm:$0xff] %v1938_v26 }
 0x130   : > { %v1942_v28 = vld [vmem:[%s11861_s7 + $0x2380] sm:$0xff]  ;;  %1941 = vst [vmem:[%s11869_s8 + $0x8d8] sm:$0xff] %v1940_v27 }
 0x131   : > { %1943 = vst [vmem:[%s11869_s8 + $0x8e0] sm:$0xff] %v1942_v28  ;;  %v1944_v29 = vld [vmem:[%s11861_s7 + $0x23a0] sm:$0xff] }
 0x132   : > { %v1946_v30 = vld [vmem:[%s11861_s7 + $0x23c0] sm:$0xff]  ;;  %1945 = vst [vmem:[%s11869_s8 + $0x8e8] sm:$0xff] %v1944_v29 }
 0x133   : > { %v1948_v31 = vld [vmem:[%s11861_s7 + $0x23e0] sm:$0xff]  ;;  %1947 = vst [vmem:[%s11869_s8 + $0x8f0] sm:$0xff] %v1946_v30 }
 0x134   : > { %1949 = vst [vmem:[%s11869_s8 + $0x8f8] sm:$0xff] %v1948_v31  ;;  %v1950_v32 = vld [vmem:[%s11861_s7 + $0x2400] sm:$0xff] }
 0x135   : > { %v1952_v33 = vld [vmem:[%s11861_s7 + $0x2420] sm:$0xff]  ;;  %1951 = vst [vmem:[%s11869_s8 + $0x900] sm:$0xff] %v1950_v32 }
 0x136   : > { %v1954_v34 = vld [vmem:[%s11861_s7 + $0x2440] sm:$0xff]  ;;  %1953 = vst [vmem:[%s11869_s8 + $0x908] sm:$0xff] %v1952_v33 }
 0x137   : > { %1955 = vst [vmem:[%s11869_s8 + $0x910] sm:$0xff] %v1954_v34  ;;  %v1956_v35 = vld [vmem:[%s11861_s7 + $0x2460] sm:$0xff] }
 0x138   : > { %v1958_v36 = vld [vmem:[%s11861_s7 + $0x2480] sm:$0xff]  ;;  %1957 = vst [vmem:[%s11869_s8 + $0x918] sm:$0xff] %v1956_v35 }
 0x139   : > { %v1960_v37 = vld [vmem:[%s11861_s7 + $0x24a0] sm:$0xff]  ;;  %1959 = vst [vmem:[%s11869_s8 + $0x920] sm:$0xff] %v1958_v36 }
 0x13a   : > { %1961 = vst [vmem:[%s11869_s8 + $0x928] sm:$0xff] %v1960_v37  ;;  %v1962_v38 = vld [vmem:[%s11861_s7 + $0x24c0] sm:$0xff] }
 0x13b   : > { %v1964_v39 = vld [vmem:[%s11861_s7 + $0x24e0] sm:$0xff]  ;;  %1963 = vst [vmem:[%s11869_s8 + $0x930] sm:$0xff] %v1962_v38 }
 0x13c   : > { %v1966_v40 = vld [vmem:[%s11861_s7 + $0x2500] sm:$0xff]  ;;  %1965 = vst [vmem:[%s11869_s8 + $0x938] sm:$0xff] %v1964_v39 }
 0x13d   : > { %1967 = vst [vmem:[%s11869_s8 + $0x940] sm:$0xff] %v1966_v40  ;;  %v1968_v41 = vld [vmem:[%s11861_s7 + $0x2520] sm:$0xff] }
 0x13e   : > { %v1970_v42 = vld [vmem:[%s11861_s7 + $0x2540] sm:$0xff]  ;;  %1969 = vst [vmem:[%s11869_s8 + $0x948] sm:$0xff] %v1968_v41 }
 0x13f   : > { %v1972_v43 = vld [vmem:[%s11861_s7 + $0x2560] sm:$0xff]  ;;  %1971 = vst [vmem:[%s11869_s8 + $0x950] sm:$0xff] %v1970_v42 }
 0x140   : > { %1973 = vst [vmem:[%s11869_s8 + $0x958] sm:$0xff] %v1972_v43  ;;  %v1974_v44 = vld [vmem:[%s11861_s7 + $0x2580] sm:$0xff] }
 0x141   : > { %v1976_v45 = vld [vmem:[%s11861_s7 + $0x25a0] sm:$0xff]  ;;  %1975 = vst [vmem:[%s11869_s8 + $0x960] sm:$0xff] %v1974_v44 }
 0x142   : > { %v1978_v46 = vld [vmem:[%s11861_s7 + $0x25c0] sm:$0xff]  ;;  %1977 = vst [vmem:[%s11869_s8 + $0x968] sm:$0xff] %v1976_v45 }
 0x143   : > { %1979 = vst [vmem:[%s11869_s8 + $0x970] sm:$0xff] %v1978_v46  ;;  %v1980_v47 = vld [vmem:[%s11861_s7 + $0x25e0] sm:$0xff] }
 0x144   : > { %v1982_v48 = vld [vmem:[%s11861_s7 + $0x2600] sm:$0xff]  ;;  %1981 = vst [vmem:[%s11869_s8 + $0x978] sm:$0xff] %v1980_v47 }
 0x145   : > { %v1984_v49 = vld [vmem:[%s11861_s7 + $0x2620] sm:$0xff]  ;;  %1983 = vst [vmem:[%s11869_s8 + $0x980] sm:$0xff] %v1982_v48 }
 0x146   : > { %1985 = vst [vmem:[%s11869_s8 + $0x988] sm:$0xff] %v1984_v49  ;;  %v1986_v50 = vld [vmem:[%s11861_s7 + $0x2640] sm:$0xff] }
 0x147   : > { %v1988_v51 = vld [vmem:[%s11861_s7 + $0x2660] sm:$0xff]  ;;  %1987 = vst [vmem:[%s11869_s8 + $0x990] sm:$0xff] %v1986_v50 }
 0x148   : > { %v1990_v52 = vld [vmem:[%s11861_s7 + $0x2680] sm:$0xff]  ;;  %1989 = vst [vmem:[%s11869_s8 + $0x998] sm:$0xff] %v1988_v51 }
 0x149   : > { %1991 = vst [vmem:[%s11869_s8 + $0x9a0] sm:$0xff] %v1990_v52  ;;  %v1992_v53 = vld [vmem:[%s11861_s7 + $0x26a0] sm:$0xff] }
 0x14a   : > { %v1994_v54 = vld [vmem:[%s11861_s7 + $0x26c0] sm:$0xff]  ;;  %1993 = vst [vmem:[%s11869_s8 + $0x9a8] sm:$0xff] %v1992_v53 }
 0x14b   : > { %v1996_v55 = vld [vmem:[%s11861_s7 + $0x26e0] sm:$0xff]  ;;  %1995 = vst [vmem:[%s11869_s8 + $0x9b0] sm:$0xff] %v1994_v54 }
 0x14c   : > { %1997 = vst [vmem:[%s11869_s8 + $0x9b8] sm:$0xff] %v1996_v55  ;;  %v1998_v56 = vld [vmem:[%s11861_s7 + $0x2700] sm:$0xff] }
 0x14d   : > { %v2000_v57 = vld [vmem:[%s11861_s7 + $0x2720] sm:$0xff]  ;;  %1999 = vst [vmem:[%s11869_s8 + $0x9c0] sm:$0xff] %v1998_v56 }
 0x14e   : > { %v2002_v58 = vld [vmem:[%s11861_s7 + $0x2740] sm:$0xff]  ;;  %2001 = vst [vmem:[%s11869_s8 + $0x9c8] sm:$0xff] %v2000_v57 }
 0x14f   : > { %2003 = vst [vmem:[%s11869_s8 + $0x9d0] sm:$0xff] %v2002_v58  ;;  %v2004_v59 = vld [vmem:[%s11861_s7 + $0x2760] sm:$0xff] }
 0x150   : > { %v2006_v60 = vld [vmem:[%s11861_s7 + $0x2780] sm:$0xff]  ;;  %2005 = vst [vmem:[%s11869_s8 + $0x9d8] sm:$0xff] %v2004_v59 }
 0x151   : > { %v2008_v61 = vld [vmem:[%s11861_s7 + $0x27a0] sm:$0xff]  ;;  %2007 = vst [vmem:[%s11869_s8 + $0x9e0] sm:$0xff] %v2006_v60 }
 0x152   : > { %2009 = vst [vmem:[%s11869_s8 + $0x9e8] sm:$0xff] %v2008_v61  ;;  %v2010_v62 = vld [vmem:[%s11861_s7 + $0x27c0] sm:$0xff] }
 0x153   : > { %v2012_v63 = vld [vmem:[%s11861_s7 + $0x27e0] sm:$0xff]  ;;  %2011 = vst [vmem:[%s11869_s8 + $0x9f0] sm:$0xff] %v2010_v62 }
 0x154   : > { %v2014_v0 = vld [vmem:[%s11861_s7 + $0x2800] sm:$0xff]  ;;  %2013 = vst [vmem:[%s11869_s8 + $0x9f8] sm:$0xff] %v2012_v63 }
 0x155   : > { %2015 = vst [vmem:[%s11869_s8 + $0xa00] sm:$0xff] %v2014_v0  ;;  %v2016_v1 = vld [vmem:[%s11861_s7 + $0x2820] sm:$0xff] }
 0x156   : > { %v2018_v2 = vld [vmem:[%s11861_s7 + $0x2840] sm:$0xff]  ;;  %2017 = vst [vmem:[%s11869_s8 + $0xa08] sm:$0xff] %v2016_v1 }
 0x157   : > { %v2020_v3 = vld [vmem:[%s11861_s7 + $0x2860] sm:$0xff]  ;;  %2019 = vst [vmem:[%s11869_s8 + $0xa10] sm:$0xff] %v2018_v2 }
 0x158   : > { %2021 = vst [vmem:[%s11869_s8 + $0xa18] sm:$0xff] %v2020_v3  ;;  %v2022_v4 = vld [vmem:[%s11861_s7 + $0x2880] sm:$0xff] }
 0x159   : > { %v2024_v5 = vld [vmem:[%s11861_s7 + $0x28a0] sm:$0xff]  ;;  %2023 = vst [vmem:[%s11869_s8 + $0xa20] sm:$0xff] %v2022_v4 }
 0x15a   : > { %v2026_v6 = vld [vmem:[%s11861_s7 + $0x28c0] sm:$0xff]  ;;  %2025 = vst [vmem:[%s11869_s8 + $0xa28] sm:$0xff] %v2024_v5 }
 0x15b   : > { %2027 = vst [vmem:[%s11869_s8 + $0xa30] sm:$0xff] %v2026_v6  ;;  %v2028_v7 = vld [vmem:[%s11861_s7 + $0x28e0] sm:$0xff] }
 0x15c   : > { %v2030_v8 = vld [vmem:[%s11861_s7 + $0x2900] sm:$0xff]  ;;  %2029 = vst [vmem:[%s11869_s8 + $0xa38] sm:$0xff] %v2028_v7 }
 0x15d   : > { %v2032_v9 = vld [vmem:[%s11861_s7 + $0x2920] sm:$0xff]  ;;  %2031 = vst [vmem:[%s11869_s8 + $0xa40] sm:$0xff] %v2030_v8 }
 0x15e   : > { %2033 = vst [vmem:[%s11869_s8 + $0xa48] sm:$0xff] %v2032_v9  ;;  %v2034_v10 = vld [vmem:[%s11861_s7 + $0x2940] sm:$0xff] }
 0x15f   : > { %v2036_v11 = vld [vmem:[%s11861_s7 + $0x2960] sm:$0xff]  ;;  %2035 = vst [vmem:[%s11869_s8 + $0xa50] sm:$0xff] %v2034_v10 }
 0x160   : > { %v2038_v12 = vld [vmem:[%s11861_s7 + $0x2980] sm:$0xff]  ;;  %2037 = vst [vmem:[%s11869_s8 + $0xa58] sm:$0xff] %v2036_v11 }
 0x161   : > { %2039 = vst [vmem:[%s11869_s8 + $0xa60] sm:$0xff] %v2038_v12  ;;  %v2040_v13 = vld [vmem:[%s11861_s7 + $0x29a0] sm:$0xff] }
 0x162   : > { %v2042_v14 = vld [vmem:[%s11861_s7 + $0x29c0] sm:$0xff]  ;;  %2041 = vst [vmem:[%s11869_s8 + $0xa68] sm:$0xff] %v2040_v13 }
 0x163   : > { %v2044_v15 = vld [vmem:[%s11861_s7 + $0x29e0] sm:$0xff]  ;;  %2043 = vst [vmem:[%s11869_s8 + $0xa70] sm:$0xff] %v2042_v14 }
 0x164   : > { %2045 = vst [vmem:[%s11869_s8 + $0xa78] sm:$0xff] %v2044_v15  ;;  %v2046_v16 = vld [vmem:[%s11861_s7 + $0x2a00] sm:$0xff] }
 0x165   : > { %v2048_v17 = vld [vmem:[%s11861_s7 + $0x2a20] sm:$0xff]  ;;  %2047 = vst [vmem:[%s11869_s8 + $0xa80] sm:$0xff] %v2046_v16 }
 0x166   : > { %v2050_v18 = vld [vmem:[%s11861_s7 + $0x2a40] sm:$0xff]  ;;  %2049 = vst [vmem:[%s11869_s8 + $0xa88] sm:$0xff] %v2048_v17 }
 0x167   : > { %2051 = vst [vmem:[%s11869_s8 + $0xa90] sm:$0xff] %v2050_v18  ;;  %v2052_v19 = vld [vmem:[%s11861_s7 + $0x2a60] sm:$0xff] }
 0x168   : > { %v2054_v20 = vld [vmem:[%s11861_s7 + $0x2a80] sm:$0xff]  ;;  %2053 = vst [vmem:[%s11869_s8 + $0xa98] sm:$0xff] %v2052_v19 }
 0x169   : > { %v2056_v21 = vld [vmem:[%s11861_s7 + $0x2aa0] sm:$0xff]  ;;  %2055 = vst [vmem:[%s11869_s8 + $0xaa0] sm:$0xff] %v2054_v20 }
 0x16a   : > { %2057 = vst [vmem:[%s11869_s8 + $0xaa8] sm:$0xff] %v2056_v21  ;;  %v2058_v22 = vld [vmem:[%s11861_s7 + $0x2ac0] sm:$0xff] }
 0x16b   : > { %v2060_v23 = vld [vmem:[%s11861_s7 + $0x2ae0] sm:$0xff]  ;;  %2059 = vst [vmem:[%s11869_s8 + $0xab0] sm:$0xff] %v2058_v22 }
 0x16c   : > { %v2062_v24 = vld [vmem:[%s11861_s7 + $0x2b00] sm:$0xff]  ;;  %2061 = vst [vmem:[%s11869_s8 + $0xab8] sm:$0xff] %v2060_v23 }
 0x16d   : > { %2063 = vst [vmem:[%s11869_s8 + $0xac0] sm:$0xff] %v2062_v24  ;;  %v2064_v25 = vld [vmem:[%s11861_s7 + $0x2b20] sm:$0xff] }
 0x16e   : > { %v2066_v26 = vld [vmem:[%s11861_s7 + $0x2b40] sm:$0xff]  ;;  %2065 = vst [vmem:[%s11869_s8 + $0xac8] sm:$0xff] %v2064_v25 }
 0x16f   : > { %v2068_v27 = vld [vmem:[%s11861_s7 + $0x2b60] sm:$0xff]  ;;  %2067 = vst [vmem:[%s11869_s8 + $0xad0] sm:$0xff] %v2066_v26 }
 0x170   : > { %2069 = vst [vmem:[%s11869_s8 + $0xad8] sm:$0xff] %v2068_v27  ;;  %v2070_v28 = vld [vmem:[%s11861_s7 + $0x2b80] sm:$0xff] }
 0x171   : > { %v2072_v29 = vld [vmem:[%s11861_s7 + $0x2ba0] sm:$0xff]  ;;  %2071 = vst [vmem:[%s11869_s8 + $0xae0] sm:$0xff] %v2070_v28 }
 0x172   : > { %v2074_v30 = vld [vmem:[%s11861_s7 + $0x2bc0] sm:$0xff]  ;;  %2073 = vst [vmem:[%s11869_s8 + $0xae8] sm:$0xff] %v2072_v29 }
 0x173   : > { %2075 = vst [vmem:[%s11869_s8 + $0xaf0] sm:$0xff] %v2074_v30  ;;  %v2076_v31 = vld [vmem:[%s11861_s7 + $0x2be0] sm:$0xff] }
 0x174   : > { %v2078_v32 = vld [vmem:[%s11861_s7 + $0x2c00] sm:$0xff]  ;;  %2077 = vst [vmem:[%s11869_s8 + $0xaf8] sm:$0xff] %v2076_v31 }
 0x175   : > { %v2080_v33 = vld [vmem:[%s11861_s7 + $0x2c20] sm:$0xff]  ;;  %2079 = vst [vmem:[%s11869_s8 + $0xb00] sm:$0xff] %v2078_v32 }
 0x176   : > { %2081 = vst [vmem:[%s11869_s8 + $0xb08] sm:$0xff] %v2080_v33  ;;  %v2082_v34 = vld [vmem:[%s11861_s7 + $0x2c40] sm:$0xff] }
 0x177   : > { %v2084_v35 = vld [vmem:[%s11861_s7 + $0x2c60] sm:$0xff]  ;;  %2083 = vst [vmem:[%s11869_s8 + $0xb10] sm:$0xff] %v2082_v34 }
 0x178   : > { %v2086_v36 = vld [vmem:[%s11861_s7 + $0x2c80] sm:$0xff]  ;;  %2085 = vst [vmem:[%s11869_s8 + $0xb18] sm:$0xff] %v2084_v35 }
 0x179   : > { %2087 = vst [vmem:[%s11869_s8 + $0xb20] sm:$0xff] %v2086_v36  ;;  %v2088_v37 = vld [vmem:[%s11861_s7 + $0x2ca0] sm:$0xff] }
 0x17a   : > { %v2090_v38 = vld [vmem:[%s11861_s7 + $0x2cc0] sm:$0xff]  ;;  %2089 = vst [vmem:[%s11869_s8 + $0xb28] sm:$0xff] %v2088_v37 }
 0x17b   : > { %v2092_v39 = vld [vmem:[%s11861_s7 + $0x2ce0] sm:$0xff]  ;;  %2091 = vst [vmem:[%s11869_s8 + $0xb30] sm:$0xff] %v2090_v38 }
 0x17c   : > { %2093 = vst [vmem:[%s11869_s8 + $0xb38] sm:$0xff] %v2092_v39  ;;  %v2094_v40 = vld [vmem:[%s11861_s7 + $0x2d00] sm:$0xff] }
 0x17d   : > { %v2096_v41 = vld [vmem:[%s11861_s7 + $0x2d20] sm:$0xff]  ;;  %2095 = vst [vmem:[%s11869_s8 + $0xb40] sm:$0xff] %v2094_v40 }
 0x17e   : > { %v2098_v42 = vld [vmem:[%s11861_s7 + $0x2d40] sm:$0xff]  ;;  %2097 = vst [vmem:[%s11869_s8 + $0xb48] sm:$0xff] %v2096_v41 }
 0x17f   : > { %2099 = vst [vmem:[%s11869_s8 + $0xb50] sm:$0xff] %v2098_v42  ;;  %v2100_v43 = vld [vmem:[%s11861_s7 + $0x2d60] sm:$0xff] }
 0x180   : > { %v2102_v44 = vld [vmem:[%s11861_s7 + $0x2d80] sm:$0xff]  ;;  %2101 = vst [vmem:[%s11869_s8 + $0xb58] sm:$0xff] %v2100_v43 }
 0x181   : > { %v2104_v45 = vld [vmem:[%s11861_s7 + $0x2da0] sm:$0xff]  ;;  %2103 = vst [vmem:[%s11869_s8 + $0xb60] sm:$0xff] %v2102_v44 }
 0x182   : > { %2105 = vst [vmem:[%s11869_s8 + $0xb68] sm:$0xff] %v2104_v45  ;;  %v2106_v46 = vld [vmem:[%s11861_s7 + $0x2dc0] sm:$0xff] }
 0x183   : > { %v2108_v47 = vld [vmem:[%s11861_s7 + $0x2de0] sm:$0xff]  ;;  %2107 = vst [vmem:[%s11869_s8 + $0xb70] sm:$0xff] %v2106_v46 }
 0x184   : > { %v2110_v48 = vld [vmem:[%s11861_s7 + $0x2e00] sm:$0xff]  ;;  %2109 = vst [vmem:[%s11869_s8 + $0xb78] sm:$0xff] %v2108_v47 }
 0x185   : > { %2111 = vst [vmem:[%s11869_s8 + $0xb80] sm:$0xff] %v2110_v48  ;;  %v2112_v49 = vld [vmem:[%s11861_s7 + $0x2e20] sm:$0xff] }
 0x186   : > { %v2114_v50 = vld [vmem:[%s11861_s7 + $0x2e40] sm:$0xff]  ;;  %2113 = vst [vmem:[%s11869_s8 + $0xb88] sm:$0xff] %v2112_v49 }
 0x187   : > { %v2116_v51 = vld [vmem:[%s11861_s7 + $0x2e60] sm:$0xff]  ;;  %2115 = vst [vmem:[%s11869_s8 + $0xb90] sm:$0xff] %v2114_v50 }
 0x188   : > { %2117 = vst [vmem:[%s11869_s8 + $0xb98] sm:$0xff] %v2116_v51  ;;  %v2118_v52 = vld [vmem:[%s11861_s7 + $0x2e80] sm:$0xff] }
 0x189   : > { %v2120_v53 = vld [vmem:[%s11861_s7 + $0x2ea0] sm:$0xff]  ;;  %2119 = vst [vmem:[%s11869_s8 + $0xba0] sm:$0xff] %v2118_v52 }
 0x18a   : > { %v2122_v54 = vld [vmem:[%s11861_s7 + $0x2ec0] sm:$0xff]  ;;  %2121 = vst [vmem:[%s11869_s8 + $0xba8] sm:$0xff] %v2120_v53 }
 0x18b   : > { %2123 = vst [vmem:[%s11869_s8 + $0xbb0] sm:$0xff] %v2122_v54  ;;  %v2124_v55 = vld [vmem:[%s11861_s7 + $0x2ee0] sm:$0xff] }
 0x18c   : > { %v2126_v56 = vld [vmem:[%s11861_s7 + $0x2f00] sm:$0xff]  ;;  %2125 = vst [vmem:[%s11869_s8 + $0xbb8] sm:$0xff] %v2124_v55 }
 0x18d   : > { %v2128_v57 = vld [vmem:[%s11861_s7 + $0x2f20] sm:$0xff]  ;;  %2127 = vst [vmem:[%s11869_s8 + $0xbc0] sm:$0xff] %v2126_v56 }
 0x18e   : > { %2129 = vst [vmem:[%s11869_s8 + $0xbc8] sm:$0xff] %v2128_v57  ;;  %v2130_v58 = vld [vmem:[%s11861_s7 + $0x2f40] sm:$0xff] }
 0x18f   : > { %v2132_v59 = vld [vmem:[%s11861_s7 + $0x2f60] sm:$0xff]  ;;  %2131 = vst [vmem:[%s11869_s8 + $0xbd0] sm:$0xff] %v2130_v58 }
 0x190   : > { %v2134_v60 = vld [vmem:[%s11861_s7 + $0x2f80] sm:$0xff]  ;;  %2133 = vst [vmem:[%s11869_s8 + $0xbd8] sm:$0xff] %v2132_v59 }
 0x191   : > { %2135 = vst [vmem:[%s11869_s8 + $0xbe0] sm:$0xff] %v2134_v60  ;;  %v2136_v61 = vld [vmem:[%s11861_s7 + $0x2fa0] sm:$0xff] }
 0x192   : > { %v2138_v62 = vld [vmem:[%s11861_s7 + $0x2fc0] sm:$0xff]  ;;  %2137 = vst [vmem:[%s11869_s8 + $0xbe8] sm:$0xff] %v2136_v61 }
 0x193   : > { %v2140_v63 = vld [vmem:[%s11861_s7 + $0x2fe0] sm:$0xff]  ;;  %2139 = vst [vmem:[%s11869_s8 + $0xbf0] sm:$0xff] %v2138_v62 }
 0x194   : > { %2141 = vst [vmem:[%s11869_s8 + $0xbf8] sm:$0xff] %v2140_v63  ;;  %v2142_v0 = vld [vmem:[%s11861_s7 + $0x3000] sm:$0xff] }
 0x195   : > { %v2144_v1 = vld [vmem:[%s11861_s7 + $0x3020] sm:$0xff]  ;;  %2143 = vst [vmem:[%s11869_s8 + $0xc00] sm:$0xff] %v2142_v0 }
 0x196   : > { %v2146_v2 = vld [vmem:[%s11861_s7 + $0x3040] sm:$0xff]  ;;  %2145 = vst [vmem:[%s11869_s8 + $0xc08] sm:$0xff] %v2144_v1 }
 0x197   : > { %2147 = vst [vmem:[%s11869_s8 + $0xc10] sm:$0xff] %v2146_v2  ;;  %v2148_v3 = vld [vmem:[%s11861_s7 + $0x3060] sm:$0xff] }
 0x198   : > { %v2150_v4 = vld [vmem:[%s11861_s7 + $0x3080] sm:$0xff]  ;;  %2149 = vst [vmem:[%s11869_s8 + $0xc18] sm:$0xff] %v2148_v3 }
 0x199   : > { %v2152_v5 = vld [vmem:[%s11861_s7 + $0x30a0] sm:$0xff]  ;;  %2151 = vst [vmem:[%s11869_s8 + $0xc20] sm:$0xff] %v2150_v4 }
 0x19a   : > { %2153 = vst [vmem:[%s11869_s8 + $0xc28] sm:$0xff] %v2152_v5  ;;  %v2154_v6 = vld [vmem:[%s11861_s7 + $0x30c0] sm:$0xff] }
 0x19b   : > { %v2156_v7 = vld [vmem:[%s11861_s7 + $0x30e0] sm:$0xff]  ;;  %2155 = vst [vmem:[%s11869_s8 + $0xc30] sm:$0xff] %v2154_v6 }
 0x19c   : > { %v2158_v8 = vld [vmem:[%s11861_s7 + $0x3100] sm:$0xff]  ;;  %2157 = vst [vmem:[%s11869_s8 + $0xc38] sm:$0xff] %v2156_v7 }
 0x19d   : > { %2159 = vst [vmem:[%s11869_s8 + $0xc40] sm:$0xff] %v2158_v8  ;;  %v2160_v9 = vld [vmem:[%s11861_s7 + $0x3120] sm:$0xff] }
 0x19e   : > { %v2162_v10 = vld [vmem:[%s11861_s7 + $0x3140] sm:$0xff]  ;;  %2161 = vst [vmem:[%s11869_s8 + $0xc48] sm:$0xff] %v2160_v9 }
 0x19f   : > { %v2164_v11 = vld [vmem:[%s11861_s7 + $0x3160] sm:$0xff]  ;;  %2163 = vst [vmem:[%s11869_s8 + $0xc50] sm:$0xff] %v2162_v10 }
 0x1a0   : > { %2165 = vst [vmem:[%s11869_s8 + $0xc58] sm:$0xff] %v2164_v11  ;;  %v2166_v12 = vld [vmem:[%s11861_s7 + $0x3180] sm:$0xff] }
 0x1a1   : > { %v2168_v13 = vld [vmem:[%s11861_s7 + $0x31a0] sm:$0xff]  ;;  %2167 = vst [vmem:[%s11869_s8 + $0xc60] sm:$0xff] %v2166_v12 }
 0x1a2   : > { %v2170_v14 = vld [vmem:[%s11861_s7 + $0x31c0] sm:$0xff]  ;;  %2169 = vst [vmem:[%s11869_s8 + $0xc68] sm:$0xff] %v2168_v13 }
 0x1a3   : > { %2171 = vst [vmem:[%s11869_s8 + $0xc70] sm:$0xff] %v2170_v14  ;;  %v2172_v15 = vld [vmem:[%s11861_s7 + $0x31e0] sm:$0xff] }
 0x1a4   : > { %v2174_v16 = vld [vmem:[%s11861_s7 + $0x3200] sm:$0xff]  ;;  %2173 = vst [vmem:[%s11869_s8 + $0xc78] sm:$0xff] %v2172_v15 }
 0x1a5   : > { %v2176_v17 = vld [vmem:[%s11861_s7 + $0x3220] sm:$0xff]  ;;  %2175 = vst [vmem:[%s11869_s8 + $0xc80] sm:$0xff] %v2174_v16 }
 0x1a6   : > { %2177 = vst [vmem:[%s11869_s8 + $0xc88] sm:$0xff] %v2176_v17  ;;  %v2178_v18 = vld [vmem:[%s11861_s7 + $0x3240] sm:$0xff] }
 0x1a7   : > { %v2180_v19 = vld [vmem:[%s11861_s7 + $0x3260] sm:$0xff]  ;;  %2179 = vst [vmem:[%s11869_s8 + $0xc90] sm:$0xff] %v2178_v18 }
 0x1a8   : > { %v2182_v20 = vld [vmem:[%s11861_s7 + $0x3280] sm:$0xff]  ;;  %2181 = vst [vmem:[%s11869_s8 + $0xc98] sm:$0xff] %v2180_v19 }
 0x1a9   : > { %2183 = vst [vmem:[%s11869_s8 + $0xca0] sm:$0xff] %v2182_v20  ;;  %v2184_v21 = vld [vmem:[%s11861_s7 + $0x32a0] sm:$0xff] }
 0x1aa   : > { %v2186_v22 = vld [vmem:[%s11861_s7 + $0x32c0] sm:$0xff]  ;;  %2185 = vst [vmem:[%s11869_s8 + $0xca8] sm:$0xff] %v2184_v21 }
 0x1ab   : > { %v2188_v23 = vld [vmem:[%s11861_s7 + $0x32e0] sm:$0xff]  ;;  %2187 = vst [vmem:[%s11869_s8 + $0xcb0] sm:$0xff] %v2186_v22 }
 0x1ac   : > { %2189 = vst [vmem:[%s11869_s8 + $0xcb8] sm:$0xff] %v2188_v23  ;;  %v2190_v24 = vld [vmem:[%s11861_s7 + $0x3300] sm:$0xff] }
 0x1ad   : > { %v2192_v25 = vld [vmem:[%s11861_s7 + $0x3320] sm:$0xff]  ;;  %2191 = vst [vmem:[%s11869_s8 + $0xcc0] sm:$0xff] %v2190_v24 }
 0x1ae   : > { %v2194_v26 = vld [vmem:[%s11861_s7 + $0x3340] sm:$0xff]  ;;  %2193 = vst [vmem:[%s11869_s8 + $0xcc8] sm:$0xff] %v2192_v25 }
 0x1af   : > { %2195 = vst [vmem:[%s11869_s8 + $0xcd0] sm:$0xff] %v2194_v26  ;;  %v2196_v27 = vld [vmem:[%s11861_s7 + $0x3360] sm:$0xff] }
 0x1b0   : > { %v2198_v28 = vld [vmem:[%s11861_s7 + $0x3380] sm:$0xff]  ;;  %2197 = vst [vmem:[%s11869_s8 + $0xcd8] sm:$0xff] %v2196_v27 }
 0x1b1   : > { %v2200_v29 = vld [vmem:[%s11861_s7 + $0x33a0] sm:$0xff]  ;;  %2199 = vst [vmem:[%s11869_s8 + $0xce0] sm:$0xff] %v2198_v28 }
 0x1b2   : > { %2201 = vst [vmem:[%s11869_s8 + $0xce8] sm:$0xff] %v2200_v29  ;;  %v2202_v30 = vld [vmem:[%s11861_s7 + $0x33c0] sm:$0xff] }
 0x1b3   : > { %v2204_v31 = vld [vmem:[%s11861_s7 + $0x33e0] sm:$0xff]  ;;  %2203 = vst [vmem:[%s11869_s8 + $0xcf0] sm:$0xff] %v2202_v30 }
 0x1b4   : > { %v2206_v32 = vld [vmem:[%s11861_s7 + $0x3400] sm:$0xff]  ;;  %2205 = vst [vmem:[%s11869_s8 + $0xcf8] sm:$0xff] %v2204_v31 }
 0x1b5   : > { %2207 = vst [vmem:[%s11869_s8 + $0xd00] sm:$0xff] %v2206_v32  ;;  %v2208_v33 = vld [vmem:[%s11861_s7 + $0x3420] sm:$0xff] }
 0x1b6   : > { %v2210_v34 = vld [vmem:[%s11861_s7 + $0x3440] sm:$0xff]  ;;  %2209 = vst [vmem:[%s11869_s8 + $0xd08] sm:$0xff] %v2208_v33 }
 0x1b7   : > { %v2212_v35 = vld [vmem:[%s11861_s7 + $0x3460] sm:$0xff]  ;;  %2211 = vst [vmem:[%s11869_s8 + $0xd10] sm:$0xff] %v2210_v34 }
 0x1b8   : > { %2213 = vst [vmem:[%s11869_s8 + $0xd18] sm:$0xff] %v2212_v35  ;;  %v2214_v36 = vld [vmem:[%s11861_s7 + $0x3480] sm:$0xff] }
 0x1b9   : > { %v2216_v37 = vld [vmem:[%s11861_s7 + $0x34a0] sm:$0xff]  ;;  %2215 = vst [vmem:[%s11869_s8 + $0xd20] sm:$0xff] %v2214_v36 }
 0x1ba   : > { %v2218_v38 = vld [vmem:[%s11861_s7 + $0x34c0] sm:$0xff]  ;;  %2217 = vst [vmem:[%s11869_s8 + $0xd28] sm:$0xff] %v2216_v37 }
 0x1bb   : > { %2219 = vst [vmem:[%s11869_s8 + $0xd30] sm:$0xff] %v2218_v38  ;;  %v2220_v39 = vld [vmem:[%s11861_s7 + $0x34e0] sm:$0xff] }
 0x1bc   : > { %v2222_v40 = vld [vmem:[%s11861_s7 + $0x3500] sm:$0xff]  ;;  %2221 = vst [vmem:[%s11869_s8 + $0xd38] sm:$0xff] %v2220_v39 }
 0x1bd   : > { %v2224_v41 = vld [vmem:[%s11861_s7 + $0x3520] sm:$0xff]  ;;  %2223 = vst [vmem:[%s11869_s8 + $0xd40] sm:$0xff] %v2222_v40 }
 0x1be   : > { %2225 = vst [vmem:[%s11869_s8 + $0xd48] sm:$0xff] %v2224_v41  ;;  %v2226_v42 = vld [vmem:[%s11861_s7 + $0x3540] sm:$0xff] }
 0x1bf   : > { %v2228_v43 = vld [vmem:[%s11861_s7 + $0x3560] sm:$0xff]  ;;  %2227 = vst [vmem:[%s11869_s8 + $0xd50] sm:$0xff] %v2226_v42 }
 0x1c0   : > { %v2230_v44 = vld [vmem:[%s11861_s7 + $0x3580] sm:$0xff]  ;;  %2229 = vst [vmem:[%s11869_s8 + $0xd58] sm:$0xff] %v2228_v43 }
 0x1c1   : > { %2231 = vst [vmem:[%s11869_s8 + $0xd60] sm:$0xff] %v2230_v44  ;;  %v2232_v45 = vld [vmem:[%s11861_s7 + $0x35a0] sm:$0xff] }
 0x1c2   : > { %v2234_v46 = vld [vmem:[%s11861_s7 + $0x35c0] sm:$0xff]  ;;  %2233 = vst [vmem:[%s11869_s8 + $0xd68] sm:$0xff] %v2232_v45 }
 0x1c3   : > { %v2236_v47 = vld [vmem:[%s11861_s7 + $0x35e0] sm:$0xff]  ;;  %2235 = vst [vmem:[%s11869_s8 + $0xd70] sm:$0xff] %v2234_v46 }
 0x1c4   : > { %2237 = vst [vmem:[%s11869_s8 + $0xd78] sm:$0xff] %v2236_v47  ;;  %v2238_v48 = vld [vmem:[%s11861_s7 + $0x3600] sm:$0xff] }
 0x1c5   : > { %v2240_v49 = vld [vmem:[%s11861_s7 + $0x3620] sm:$0xff]  ;;  %2239 = vst [vmem:[%s11869_s8 + $0xd80] sm:$0xff] %v2238_v48 }
 0x1c6   : > { %v2242_v50 = vld [vmem:[%s11861_s7 + $0x3640] sm:$0xff]  ;;  %2241 = vst [vmem:[%s11869_s8 + $0xd88] sm:$0xff] %v2240_v49 }
 0x1c7   : > { %2243 = vst [vmem:[%s11869_s8 + $0xd90] sm:$0xff] %v2242_v50  ;;  %v2244_v51 = vld [vmem:[%s11861_s7 + $0x3660] sm:$0xff] }
 0x1c8   : > { %v2246_v52 = vld [vmem:[%s11861_s7 + $0x3680] sm:$0xff]  ;;  %2245 = vst [vmem:[%s11869_s8 + $0xd98] sm:$0xff] %v2244_v51 }
 0x1c9   : > { %v2248_v53 = vld [vmem:[%s11861_s7 + $0x36a0] sm:$0xff]  ;;  %2247 = vst [vmem:[%s11869_s8 + $0xda0] sm:$0xff] %v2246_v52 }
 0x1ca   : > { %2249 = vst [vmem:[%s11869_s8 + $0xda8] sm:$0xff] %v2248_v53  ;;  %v2250_v54 = vld [vmem:[%s11861_s7 + $0x36c0] sm:$0xff] }
 0x1cb   : > { %v2252_v55 = vld [vmem:[%s11861_s7 + $0x36e0] sm:$0xff]  ;;  %2251 = vst [vmem:[%s11869_s8 + $0xdb0] sm:$0xff] %v2250_v54 }
 0x1cc   : > { %v2254_v56 = vld [vmem:[%s11861_s7 + $0x3700] sm:$0xff]  ;;  %2253 = vst [vmem:[%s11869_s8 + $0xdb8] sm:$0xff] %v2252_v55 }
 0x1cd   : > { %2255 = vst [vmem:[%s11869_s8 + $0xdc0] sm:$0xff] %v2254_v56  ;;  %v2256_v57 = vld [vmem:[%s11861_s7 + $0x3720] sm:$0xff] }
 0x1ce   : > { %v2258_v58 = vld [vmem:[%s11861_s7 + $0x3740] sm:$0xff]  ;;  %2257 = vst [vmem:[%s11869_s8 + $0xdc8] sm:$0xff] %v2256_v57 }
 0x1cf   : > { %v2260_v59 = vld [vmem:[%s11861_s7 + $0x3760] sm:$0xff]  ;;  %2259 = vst [vmem:[%s11869_s8 + $0xdd0] sm:$0xff] %v2258_v58 }
 0x1d0   : > { %2261 = vst [vmem:[%s11869_s8 + $0xdd8] sm:$0xff] %v2260_v59  ;;  %v2262_v60 = vld [vmem:[%s11861_s7 + $0x3780] sm:$0xff] }
 0x1d1   : > { %v2264_v61 = vld [vmem:[%s11861_s7 + $0x37a0] sm:$0xff]  ;;  %2263 = vst [vmem:[%s11869_s8 + $0xde0] sm:$0xff] %v2262_v60 }
 0x1d2   : > { %v2266_v62 = vld [vmem:[%s11861_s7 + $0x37c0] sm:$0xff]  ;;  %2265 = vst [vmem:[%s11869_s8 + $0xde8] sm:$0xff] %v2264_v61 }
 0x1d3   : > { %2267 = vst [vmem:[%s11869_s8 + $0xdf0] sm:$0xff] %v2266_v62  ;;  %v2268_v63 = vld [vmem:[%s11861_s7 + $0x37e0] sm:$0xff] }
 0x1d4   : > { %v2270_v0 = vld [vmem:[%s11861_s7 + $0x3800] sm:$0xff]  ;;  %2269 = vst [vmem:[%s11869_s8 + $0xdf8] sm:$0xff] %v2268_v63 }
 0x1d5   : > { %v2272_v1 = vld [vmem:[%s11861_s7 + $0x3820] sm:$0xff]  ;;  %2271 = vst [vmem:[%s11869_s8 + $0xe00] sm:$0xff] %v2270_v0 }
 0x1d6   : > { %2273 = vst [vmem:[%s11869_s8 + $0xe08] sm:$0xff] %v2272_v1  ;;  %v2274_v2 = vld [vmem:[%s11861_s7 + $0x3840] sm:$0xff] }
 0x1d7   : > { %v2276_v3 = vld [vmem:[%s11861_s7 + $0x3860] sm:$0xff]  ;;  %2275 = vst [vmem:[%s11869_s8 + $0xe10] sm:$0xff] %v2274_v2 }
 0x1d8   : > { %v2278_v4 = vld [vmem:[%s11861_s7 + $0x3880] sm:$0xff]  ;;  %2277 = vst [vmem:[%s11869_s8 + $0xe18] sm:$0xff] %v2276_v3 }
 0x1d9   : > { %2279 = vst [vmem:[%s11869_s8 + $0xe20] sm:$0xff] %v2278_v4  ;;  %v2280_v5 = vld [vmem:[%s11861_s7 + $0x38a0] sm:$0xff] }
 0x1da   : > { %v2282_v6 = vld [vmem:[%s11861_s7 + $0x38c0] sm:$0xff]  ;;  %2281 = vst [vmem:[%s11869_s8 + $0xe28] sm:$0xff] %v2280_v5 }
 0x1db   : > { %v2284_v7 = vld [vmem:[%s11861_s7 + $0x38e0] sm:$0xff]  ;;  %2283 = vst [vmem:[%s11869_s8 + $0xe30] sm:$0xff] %v2282_v6 }
 0x1dc   : > { %2285 = vst [vmem:[%s11869_s8 + $0xe38] sm:$0xff] %v2284_v7  ;;  %v2286_v8 = vld [vmem:[%s11861_s7 + $0x3900] sm:$0xff] }
 0x1dd   : > { %v2288_v9 = vld [vmem:[%s11861_s7 + $0x3920] sm:$0xff]  ;;  %2287 = vst [vmem:[%s11869_s8 + $0xe40] sm:$0xff] %v2286_v8 }
 0x1de   : > { %v2290_v10 = vld [vmem:[%s11861_s7 + $0x3940] sm:$0xff]  ;;  %2289 = vst [vmem:[%s11869_s8 + $0xe48] sm:$0xff] %v2288_v9 }
 0x1df   : > { %2291 = vst [vmem:[%s11869_s8 + $0xe50] sm:$0xff] %v2290_v10  ;;  %v2292_v11 = vld [vmem:[%s11861_s7 + $0x3960] sm:$0xff] }
 0x1e0   : > { %v2294_v12 = vld [vmem:[%s11861_s7 + $0x3980] sm:$0xff]  ;;  %2293 = vst [vmem:[%s11869_s8 + $0xe58] sm:$0xff] %v2292_v11 }
 0x1e1   : > { %v2296_v13 = vld [vmem:[%s11861_s7 + $0x39a0] sm:$0xff]  ;;  %2295 = vst [vmem:[%s11869_s8 + $0xe60] sm:$0xff] %v2294_v12 }
 0x1e2   : > { %2297 = vst [vmem:[%s11869_s8 + $0xe68] sm:$0xff] %v2296_v13  ;;  %v2298_v14 = vld [vmem:[%s11861_s7 + $0x39c0] sm:$0xff] }
 0x1e3   : > { %v2300_v15 = vld [vmem:[%s11861_s7 + $0x39e0] sm:$0xff]  ;;  %2299 = vst [vmem:[%s11869_s8 + $0xe70] sm:$0xff] %v2298_v14 }
 0x1e4   : > { %v2302_v16 = vld [vmem:[%s11861_s7 + $0x3a00] sm:$0xff]  ;;  %2301 = vst [vmem:[%s11869_s8 + $0xe78] sm:$0xff] %v2300_v15 }
 0x1e5   : > { %2303 = vst [vmem:[%s11869_s8 + $0xe80] sm:$0xff] %v2302_v16  ;;  %v2304_v17 = vld [vmem:[%s11861_s7 + $0x3a20] sm:$0xff] }
 0x1e6   : > { %v2306_v18 = vld [vmem:[%s11861_s7 + $0x3a40] sm:$0xff]  ;;  %2305 = vst [vmem:[%s11869_s8 + $0xe88] sm:$0xff] %v2304_v17 }
 0x1e7   : > { %v2308_v19 = vld [vmem:[%s11861_s7 + $0x3a60] sm:$0xff]  ;;  %2307 = vst [vmem:[%s11869_s8 + $0xe90] sm:$0xff] %v2306_v18 }
 0x1e8   : > { %2309 = vst [vmem:[%s11869_s8 + $0xe98] sm:$0xff] %v2308_v19  ;;  %v2310_v20 = vld [vmem:[%s11861_s7 + $0x3a80] sm:$0xff] }
 0x1e9   : > { %v2312_v21 = vld [vmem:[%s11861_s7 + $0x3aa0] sm:$0xff]  ;;  %2311 = vst [vmem:[%s11869_s8 + $0xea0] sm:$0xff] %v2310_v20 }
 0x1ea   : > { %v2314_v22 = vld [vmem:[%s11861_s7 + $0x3ac0] sm:$0xff]  ;;  %2313 = vst [vmem:[%s11869_s8 + $0xea8] sm:$0xff] %v2312_v21 }
 0x1eb   : > { %2315 = vst [vmem:[%s11869_s8 + $0xeb0] sm:$0xff] %v2314_v22  ;;  %v2316_v23 = vld [vmem:[%s11861_s7 + $0x3ae0] sm:$0xff] }
 0x1ec   : > { %v2318_v24 = vld [vmem:[%s11861_s7 + $0x3b00] sm:$0xff]  ;;  %2317 = vst [vmem:[%s11869_s8 + $0xeb8] sm:$0xff] %v2316_v23 }
 0x1ed   : > { %v2320_v25 = vld [vmem:[%s11861_s7 + $0x3b20] sm:$0xff]  ;;  %2319 = vst [vmem:[%s11869_s8 + $0xec0] sm:$0xff] %v2318_v24 }
 0x1ee   : > { %2321 = vst [vmem:[%s11869_s8 + $0xec8] sm:$0xff] %v2320_v25  ;;  %v2322_v26 = vld [vmem:[%s11861_s7 + $0x3b40] sm:$0xff] }
 0x1ef   : > { %v2324_v27 = vld [vmem:[%s11861_s7 + $0x3b60] sm:$0xff]  ;;  %2323 = vst [vmem:[%s11869_s8 + $0xed0] sm:$0xff] %v2322_v26 }
 0x1f0   : > { %v2326_v28 = vld [vmem:[%s11861_s7 + $0x3b80] sm:$0xff]  ;;  %2325 = vst [vmem:[%s11869_s8 + $0xed8] sm:$0xff] %v2324_v27 }
 0x1f1   : > { %2327 = vst [vmem:[%s11869_s8 + $0xee0] sm:$0xff] %v2326_v28  ;;  %v2328_v29 = vld [vmem:[%s11861_s7 + $0x3ba0] sm:$0xff] }
 0x1f2   : > { %v2330_v30 = vld [vmem:[%s11861_s7 + $0x3bc0] sm:$0xff]  ;;  %2329 = vst [vmem:[%s11869_s8 + $0xee8] sm:$0xff] %v2328_v29 }
 0x1f3   : > { %v2332_v31 = vld [vmem:[%s11861_s7 + $0x3be0] sm:$0xff]  ;;  %2331 = vst [vmem:[%s11869_s8 + $0xef0] sm:$0xff] %v2330_v30 }
 0x1f4   : > { %2333 = vst [vmem:[%s11869_s8 + $0xef8] sm:$0xff] %v2332_v31  ;;  %v2334_v32 = vld [vmem:[%s11861_s7 + $0x3c00] sm:$0xff] }
 0x1f5   : > { %v2336_v33 = vld [vmem:[%s11861_s7 + $0x3c20] sm:$0xff]  ;;  %2335 = vst [vmem:[%s11869_s8 + $0xf00] sm:$0xff] %v2334_v32 }
 0x1f6   : > { %v2338_v34 = vld [vmem:[%s11861_s7 + $0x3c40] sm:$0xff]  ;;  %2337 = vst [vmem:[%s11869_s8 + $0xf08] sm:$0xff] %v2336_v33 }
 0x1f7   : > { %2339 = vst [vmem:[%s11869_s8 + $0xf10] sm:$0xff] %v2338_v34  ;;  %v2340_v35 = vld [vmem:[%s11861_s7 + $0x3c60] sm:$0xff] }
 0x1f8   : > { %v2342_v36 = vld [vmem:[%s11861_s7 + $0x3c80] sm:$0xff]  ;;  %2341 = vst [vmem:[%s11869_s8 + $0xf18] sm:$0xff] %v2340_v35 }
 0x1f9   : > { %v2344_v37 = vld [vmem:[%s11861_s7 + $0x3ca0] sm:$0xff]  ;;  %2343 = vst [vmem:[%s11869_s8 + $0xf20] sm:$0xff] %v2342_v36 }
 0x1fa   : > { %2345 = vst [vmem:[%s11869_s8 + $0xf28] sm:$0xff] %v2344_v37  ;;  %v2346_v38 = vld [vmem:[%s11861_s7 + $0x3cc0] sm:$0xff] }
 0x1fb   : > { %v2348_v39 = vld [vmem:[%s11861_s7 + $0x3ce0] sm:$0xff]  ;;  %2347 = vst [vmem:[%s11869_s8 + $0xf30] sm:$0xff] %v2346_v38 }
 0x1fc   : > { %v2350_v40 = vld [vmem:[%s11861_s7 + $0x3d00] sm:$0xff]  ;;  %2349 = vst [vmem:[%s11869_s8 + $0xf38] sm:$0xff] %v2348_v39 }
 0x1fd   : > { %2351 = vst [vmem:[%s11869_s8 + $0xf40] sm:$0xff] %v2350_v40  ;;  %v2352_v41 = vld [vmem:[%s11861_s7 + $0x3d20] sm:$0xff] }
 0x1fe   : > { %v2354_v42 = vld [vmem:[%s11861_s7 + $0x3d40] sm:$0xff]  ;;  %2353 = vst [vmem:[%s11869_s8 + $0xf48] sm:$0xff] %v2352_v41 }
 0x1ff   : > { %v2356_v43 = vld [vmem:[%s11861_s7 + $0x3d60] sm:$0xff]  ;;  %2355 = vst [vmem:[%s11869_s8 + $0xf50] sm:$0xff] %v2354_v42 }
 0x200   : > { %2357 = vst [vmem:[%s11869_s8 + $0xf58] sm:$0xff] %v2356_v43  ;;  %v2358_v44 = vld [vmem:[%s11861_s7 + $0x3d80] sm:$0xff] }
 0x201   : > { %v2360_v45 = vld [vmem:[%s11861_s7 + $0x3da0] sm:$0xff]  ;;  %2359 = vst [vmem:[%s11869_s8 + $0xf60] sm:$0xff] %v2358_v44 }
 0x202   : > { %v2362_v46 = vld [vmem:[%s11861_s7 + $0x3dc0] sm:$0xff]  ;;  %2361 = vst [vmem:[%s11869_s8 + $0xf68] sm:$0xff] %v2360_v45 }
 0x203   : > { %2363 = vst [vmem:[%s11869_s8 + $0xf70] sm:$0xff] %v2362_v46  ;;  %v2364_v47 = vld [vmem:[%s11861_s7 + $0x3de0] sm:$0xff] }
 0x204   : > { %v2366_v48 = vld [vmem:[%s11861_s7 + $0x3e00] sm:$0xff]  ;;  %2365 = vst [vmem:[%s11869_s8 + $0xf78] sm:$0xff] %v2364_v47 }
 0x205   : > { %v2368_v49 = vld [vmem:[%s11861_s7 + $0x3e20] sm:$0xff]  ;;  %2367 = vst [vmem:[%s11869_s8 + $0xf80] sm:$0xff] %v2366_v48 }
 0x206   : > { %2369 = vst [vmem:[%s11869_s8 + $0xf88] sm:$0xff] %v2368_v49  ;;  %v2370_v50 = vld [vmem:[%s11861_s7 + $0x3e40] sm:$0xff] }
 0x207   : > { %v2372_v51 = vld [vmem:[%s11861_s7 + $0x3e60] sm:$0xff]  ;;  %2371 = vst [vmem:[%s11869_s8 + $0xf90] sm:$0xff] %v2370_v50 }
 0x208   : > { %v2374_v52 = vld [vmem:[%s11861_s7 + $0x3e80] sm:$0xff]  ;;  %2373 = vst [vmem:[%s11869_s8 + $0xf98] sm:$0xff] %v2372_v51 }
 0x209   : > { %2375 = vst [vmem:[%s11869_s8 + $0xfa0] sm:$0xff] %v2374_v52  ;;  %v2376_v53 = vld [vmem:[%s11861_s7 + $0x3ea0] sm:$0xff] }
 0x20a   : > { %v2378_v54 = vld [vmem:[%s11861_s7 + $0x3ec0] sm:$0xff]  ;;  %2377 = vst [vmem:[%s11869_s8 + $0xfa8] sm:$0xff] %v2376_v53 }
 0x20b   : > { %v2380_v55 = vld [vmem:[%s11861_s7 + $0x3ee0] sm:$0xff]  ;;  %2379 = vst [vmem:[%s11869_s8 + $0xfb0] sm:$0xff] %v2378_v54 }
 0x20c   : > { %2381 = vst [vmem:[%s11869_s8 + $0xfb8] sm:$0xff] %v2380_v55  ;;  %v2382_v56 = vld [vmem:[%s11861_s7 + $0x3f00] sm:$0xff] }
 0x20d   : > { %v2384_v57 = vld [vmem:[%s11861_s7 + $0x3f20] sm:$0xff]  ;;  %2383 = vst [vmem:[%s11869_s8 + $0xfc0] sm:$0xff] %v2382_v56 }
 0x20e   : > { %v2386_v58 = vld [vmem:[%s11861_s7 + $0x3f40] sm:$0xff]  ;;  %2385 = vst [vmem:[%s11869_s8 + $0xfc8] sm:$0xff] %v2384_v57 }
 0x20f   : > { %2387 = vst [vmem:[%s11869_s8 + $0xfd0] sm:$0xff] %v2386_v58  ;;  %v2388_v59 = vld [vmem:[%s11861_s7 + $0x3f60] sm:$0xff] }
 0x210   : > { %v2390_v60 = vld [vmem:[%s11861_s7 + $0x3f80] sm:$0xff]  ;;  %2389 = vst [vmem:[%s11869_s8 + $0xfd8] sm:$0xff] %v2388_v59 }
 0x211   : > { %v2392_v61 = vld [vmem:[%s11861_s7 + $0x3fa0] sm:$0xff]  ;;  %2391 = vst [vmem:[%s11869_s8 + $0xfe0] sm:$0xff] %v2390_v60 }
 0x212   : > { %2393 = vst [vmem:[%s11869_s8 + $0xfe8] sm:$0xff] %v2392_v61  ;;  %v2394_v62 = vld [vmem:[%s11861_s7 + $0x3fc0] sm:$0xff] }
 0x213   : > { %v2396_v63 = vld [vmem:[%s11861_s7 + $0x3fe0] sm:$0xff]  ;;  %2395 = vst [vmem:[%s11869_s8 + $0xff0] sm:$0xff] %v2394_v62 }
 0x214   : > { %v2398_v0 = vld [vmem:[%s11861_s7 + $0x4000] sm:$0xff]  ;;  %2397 = vst [vmem:[%s11869_s8 + $0xff8] sm:$0xff] %v2396_v63 }
 0x215   : > { %2399 = vst [vmem:[%s11869_s8 + $0x1000] sm:$0xff] %v2398_v0  ;;  %v2400_v1 = vld [vmem:[%s11861_s7 + $0x4020] sm:$0xff] }
 0x216   : > { %v2402_v2 = vld [vmem:[%s11861_s7 + $0x4040] sm:$0xff]  ;;  %2401 = vst [vmem:[%s11869_s8 + $0x1008] sm:$0xff] %v2400_v1 }
 0x217   : > { %v2404_v3 = vld [vmem:[%s11861_s7 + $0x4060] sm:$0xff]  ;;  %2403 = vst [vmem:[%s11869_s8 + $0x1010] sm:$0xff] %v2402_v2 }
 0x218   : > { %2405 = vst [vmem:[%s11869_s8 + $0x1018] sm:$0xff] %v2404_v3  ;;  %v2406_v4 = vld [vmem:[%s11861_s7 + $0x4080] sm:$0xff] }
 0x219   : > { %v2408_v5 = vld [vmem:[%s11861_s7 + $0x40a0] sm:$0xff]  ;;  %2407 = vst [vmem:[%s11869_s8 + $0x1020] sm:$0xff] %v2406_v4 }
 0x21a   : > { %v2410_v6 = vld [vmem:[%s11861_s7 + $0x40c0] sm:$0xff]  ;;  %2409 = vst [vmem:[%s11869_s8 + $0x1028] sm:$0xff] %v2408_v5 }
 0x21b   : > { %2411 = vst [vmem:[%s11869_s8 + $0x1030] sm:$0xff] %v2410_v6  ;;  %v2412_v7 = vld [vmem:[%s11861_s7 + $0x40e0] sm:$0xff] }
 0x21c   : > { %v2414_v8 = vld [vmem:[%s11861_s7 + $0x4100] sm:$0xff]  ;;  %2413 = vst [vmem:[%s11869_s8 + $0x1038] sm:$0xff] %v2412_v7 }
 0x21d   : > { %v2416_v9 = vld [vmem:[%s11861_s7 + $0x4120] sm:$0xff]  ;;  %2415 = vst [vmem:[%s11869_s8 + $0x1040] sm:$0xff] %v2414_v8 }
 0x21e   : > { %2417 = vst [vmem:[%s11869_s8 + $0x1048] sm:$0xff] %v2416_v9  ;;  %v2418_v10 = vld [vmem:[%s11861_s7 + $0x4140] sm:$0xff] }
 0x21f   : > { %v2420_v11 = vld [vmem:[%s11861_s7 + $0x4160] sm:$0xff]  ;;  %2419 = vst [vmem:[%s11869_s8 + $0x1050] sm:$0xff] %v2418_v10 }
 0x220   : > { %v2422_v12 = vld [vmem:[%s11861_s7 + $0x4180] sm:$0xff]  ;;  %2421 = vst [vmem:[%s11869_s8 + $0x1058] sm:$0xff] %v2420_v11 }
 0x221   : > { %2423 = vst [vmem:[%s11869_s8 + $0x1060] sm:$0xff] %v2422_v12  ;;  %v2424_v13 = vld [vmem:[%s11861_s7 + $0x41a0] sm:$0xff] }
 0x222   : > { %v2426_v14 = vld [vmem:[%s11861_s7 + $0x41c0] sm:$0xff]  ;;  %2425 = vst [vmem:[%s11869_s8 + $0x1068] sm:$0xff] %v2424_v13 }
 0x223   : > { %v2428_v15 = vld [vmem:[%s11861_s7 + $0x41e0] sm:$0xff]  ;;  %2427 = vst [vmem:[%s11869_s8 + $0x1070] sm:$0xff] %v2426_v14 }
 0x224   : > { %2429 = vst [vmem:[%s11869_s8 + $0x1078] sm:$0xff] %v2428_v15  ;;  %v2430_v16 = vld [vmem:[%s11861_s7 + $0x4200] sm:$0xff] }
 0x225   : > { %v2432_v17 = vld [vmem:[%s11861_s7 + $0x4220] sm:$0xff]  ;;  %2431 = vst [vmem:[%s11869_s8 + $0x1080] sm:$0xff] %v2430_v16 }
 0x226   : > { %v2434_v18 = vld [vmem:[%s11861_s7 + $0x4240] sm:$0xff]  ;;  %2433 = vst [vmem:[%s11869_s8 + $0x1088] sm:$0xff] %v2432_v17 }
 0x227   : > { %2435 = vst [vmem:[%s11869_s8 + $0x1090] sm:$0xff] %v2434_v18  ;;  %v2436_v19 = vld [vmem:[%s11861_s7 + $0x4260] sm:$0xff] }
 0x228   : > { %v2438_v20 = vld [vmem:[%s11861_s7 + $0x4280] sm:$0xff]  ;;  %2437 = vst [vmem:[%s11869_s8 + $0x1098] sm:$0xff] %v2436_v19 }
 0x229   : > { %v2440_v21 = vld [vmem:[%s11861_s7 + $0x42a0] sm:$0xff]  ;;  %2439 = vst [vmem:[%s11869_s8 + $0x10a0] sm:$0xff] %v2438_v20 }
 0x22a   : > { %2441 = vst [vmem:[%s11869_s8 + $0x10a8] sm:$0xff] %v2440_v21  ;;  %v2442_v22 = vld [vmem:[%s11861_s7 + $0x42c0] sm:$0xff] }
 0x22b   : > { %v2444_v23 = vld [vmem:[%s11861_s7 + $0x42e0] sm:$0xff]  ;;  %2443 = vst [vmem:[%s11869_s8 + $0x10b0] sm:$0xff] %v2442_v22 }
 0x22c   : > { %v2446_v24 = vld [vmem:[%s11861_s7 + $0x4300] sm:$0xff]  ;;  %2445 = vst [vmem:[%s11869_s8 + $0x10b8] sm:$0xff] %v2444_v23 }
 0x22d   : > { %2447 = vst [vmem:[%s11869_s8 + $0x10c0] sm:$0xff] %v2446_v24  ;;  %v2448_v25 = vld [vmem:[%s11861_s7 + $0x4320] sm:$0xff] }
 0x22e   : > { %v2450_v26 = vld [vmem:[%s11861_s7 + $0x4340] sm:$0xff]  ;;  %2449 = vst [vmem:[%s11869_s8 + $0x10c8] sm:$0xff] %v2448_v25 }
 0x22f   : > { %v2452_v27 = vld [vmem:[%s11861_s7 + $0x4360] sm:$0xff]  ;;  %2451 = vst [vmem:[%s11869_s8 + $0x10d0] sm:$0xff] %v2450_v26 }
 0x230   : > { %2453 = vst [vmem:[%s11869_s8 + $0x10d8] sm:$0xff] %v2452_v27  ;;  %v2454_v28 = vld [vmem:[%s11861_s7 + $0x4380] sm:$0xff] }
 0x231   : > { %v2456_v29 = vld [vmem:[%s11861_s7 + $0x43a0] sm:$0xff]  ;;  %2455 = vst [vmem:[%s11869_s8 + $0x10e0] sm:$0xff] %v2454_v28 }
 0x232   : > { %v2458_v30 = vld [vmem:[%s11861_s7 + $0x43c0] sm:$0xff]  ;;  %2457 = vst [vmem:[%s11869_s8 + $0x10e8] sm:$0xff] %v2456_v29 }
 0x233   : > { %2459 = vst [vmem:[%s11869_s8 + $0x10f0] sm:$0xff] %v2458_v30  ;;  %v2460_v31 = vld [vmem:[%s11861_s7 + $0x43e0] sm:$0xff] }
 0x234   : > { %v2462_v32 = vld [vmem:[%s11861_s7 + $0x4400] sm:$0xff]  ;;  %2461 = vst [vmem:[%s11869_s8 + $0x10f8] sm:$0xff] %v2460_v31 }
 0x235   : > { %v2464_v33 = vld [vmem:[%s11861_s7 + $0x4420] sm:$0xff]  ;;  %2463 = vst [vmem:[%s11869_s8 + $0x1100] sm:$0xff] %v2462_v32 }
 0x236   : > { %2465 = vst [vmem:[%s11869_s8 + $0x1108] sm:$0xff] %v2464_v33  ;;  %v2466_v34 = vld [vmem:[%s11861_s7 + $0x4440] sm:$0xff] }
 0x237   : > { %v2468_v35 = vld [vmem:[%s11861_s7 + $0x4460] sm:$0xff]  ;;  %2467 = vst [vmem:[%s11869_s8 + $0x1110] sm:$0xff] %v2466_v34 }
 0x238   : > { %v2470_v36 = vld [vmem:[%s11861_s7 + $0x4480] sm:$0xff]  ;;  %2469 = vst [vmem:[%s11869_s8 + $0x1118] sm:$0xff] %v2468_v35 }
 0x239   : > { %2471 = vst [vmem:[%s11869_s8 + $0x1120] sm:$0xff] %v2470_v36  ;;  %v2472_v37 = vld [vmem:[%s11861_s7 + $0x44a0] sm:$0xff] }
 0x23a   : > { %v2474_v38 = vld [vmem:[%s11861_s7 + $0x44c0] sm:$0xff]  ;;  %2473 = vst [vmem:[%s11869_s8 + $0x1128] sm:$0xff] %v2472_v37 }
 0x23b   : > { %v2476_v39 = vld [vmem:[%s11861_s7 + $0x44e0] sm:$0xff]  ;;  %2475 = vst [vmem:[%s11869_s8 + $0x1130] sm:$0xff] %v2474_v38 }
 0x23c   : > { %2477 = vst [vmem:[%s11869_s8 + $0x1138] sm:$0xff] %v2476_v39  ;;  %v2478_v40 = vld [vmem:[%s11861_s7 + $0x4500] sm:$0xff] }
 0x23d   : > { %v2480_v41 = vld [vmem:[%s11861_s7 + $0x4520] sm:$0xff]  ;;  %2479 = vst [vmem:[%s11869_s8 + $0x1140] sm:$0xff] %v2478_v40 }
 0x23e   : > { %v2482_v42 = vld [vmem:[%s11861_s7 + $0x4540] sm:$0xff]  ;;  %2481 = vst [vmem:[%s11869_s8 + $0x1148] sm:$0xff] %v2480_v41 }
 0x23f   : > { %2483 = vst [vmem:[%s11869_s8 + $0x1150] sm:$0xff] %v2482_v42  ;;  %v2484_v43 = vld [vmem:[%s11861_s7 + $0x4560] sm:$0xff] }
 0x240   : > { %v2486_v44 = vld [vmem:[%s11861_s7 + $0x4580] sm:$0xff]  ;;  %2485 = vst [vmem:[%s11869_s8 + $0x1158] sm:$0xff] %v2484_v43 }
 0x241   : > { %v2488_v45 = vld [vmem:[%s11861_s7 + $0x45a0] sm:$0xff]  ;;  %2487 = vst [vmem:[%s11869_s8 + $0x1160] sm:$0xff] %v2486_v44 }
 0x242   : > { %2489 = vst [vmem:[%s11869_s8 + $0x1168] sm:$0xff] %v2488_v45  ;;  %v2490_v46 = vld [vmem:[%s11861_s7 + $0x45c0] sm:$0xff] }
 0x243   : > { %v2492_v47 = vld [vmem:[%s11861_s7 + $0x45e0] sm:$0xff]  ;;  %2491 = vst [vmem:[%s11869_s8 + $0x1170] sm:$0xff] %v2490_v46 }
 0x244   : > { %v2494_v48 = vld [vmem:[%s11861_s7 + $0x4600] sm:$0xff]  ;;  %2493 = vst [vmem:[%s11869_s8 + $0x1178] sm:$0xff] %v2492_v47 }
 0x245   : > { %2495 = vst [vmem:[%s11869_s8 + $0x1180] sm:$0xff] %v2494_v48  ;;  %v2496_v49 = vld [vmem:[%s11861_s7 + $0x4620] sm:$0xff] }
 0x246   : > { %v2498_v50 = vld [vmem:[%s11861_s7 + $0x4640] sm:$0xff]  ;;  %2497 = vst [vmem:[%s11869_s8 + $0x1188] sm:$0xff] %v2496_v49 }
 0x247   : > { %v2500_v51 = vld [vmem:[%s11861_s7 + $0x4660] sm:$0xff]  ;;  %2499 = vst [vmem:[%s11869_s8 + $0x1190] sm:$0xff] %v2498_v50 }
 0x248   : > { %2501 = vst [vmem:[%s11869_s8 + $0x1198] sm:$0xff] %v2500_v51  ;;  %v2502_v52 = vld [vmem:[%s11861_s7 + $0x4680] sm:$0xff] }
 0x249   : > { %v2504_v53 = vld [vmem:[%s11861_s7 + $0x46a0] sm:$0xff]  ;;  %2503 = vst [vmem:[%s11869_s8 + $0x11a0] sm:$0xff] %v2502_v52 }
 0x24a   : > { %v2506_v54 = vld [vmem:[%s11861_s7 + $0x46c0] sm:$0xff]  ;;  %2505 = vst [vmem:[%s11869_s8 + $0x11a8] sm:$0xff] %v2504_v53 }
 0x24b   : > { %2507 = vst [vmem:[%s11869_s8 + $0x11b0] sm:$0xff] %v2506_v54  ;;  %v2508_v55 = vld [vmem:[%s11861_s7 + $0x46e0] sm:$0xff] }
 0x24c   : > { %v2510_v56 = vld [vmem:[%s11861_s7 + $0x4700] sm:$0xff]  ;;  %2509 = vst [vmem:[%s11869_s8 + $0x11b8] sm:$0xff] %v2508_v55 }
 0x24d   : > { %v2512_v57 = vld [vmem:[%s11861_s7 + $0x4720] sm:$0xff]  ;;  %2511 = vst [vmem:[%s11869_s8 + $0x11c0] sm:$0xff] %v2510_v56 }
 0x24e   : > { %2513 = vst [vmem:[%s11869_s8 + $0x11c8] sm:$0xff] %v2512_v57  ;;  %v2514_v58 = vld [vmem:[%s11861_s7 + $0x4740] sm:$0xff] }
 0x24f   : > { %v2516_v59 = vld [vmem:[%s11861_s7 + $0x4760] sm:$0xff]  ;;  %2515 = vst [vmem:[%s11869_s8 + $0x11d0] sm:$0xff] %v2514_v58 }
 0x250   : > { %v2518_v60 = vld [vmem:[%s11861_s7 + $0x4780] sm:$0xff]  ;;  %2517 = vst [vmem:[%s11869_s8 + $0x11d8] sm:$0xff] %v2516_v59 }
 0x251   : > { %2519 = vst [vmem:[%s11869_s8 + $0x11e0] sm:$0xff] %v2518_v60  ;;  %v2520_v61 = vld [vmem:[%s11861_s7 + $0x47a0] sm:$0xff] }
 0x252   : > { %v2522_v62 = vld [vmem:[%s11861_s7 + $0x47c0] sm:$0xff]  ;;  %2521 = vst [vmem:[%s11869_s8 + $0x11e8] sm:$0xff] %v2520_v61 }
 0x253   : > { %v2524_v63 = vld [vmem:[%s11861_s7 + $0x47e0] sm:$0xff]  ;;  %2523 = vst [vmem:[%s11869_s8 + $0x11f0] sm:$0xff] %v2522_v62 }
 0x254   : > { %2525 = vst [vmem:[%s11869_s8 + $0x11f8] sm:$0xff] %v2524_v63 }
 0x255 PF: > { %p9981_p7 = scmp.ge.s32.totalorder %s11787_s20, 1  ;;  %p4894_p8 = scmp.lt.s32.totalorder %s11787_s20, 5 }
 0x257   : > { %p4895_p9 = pnand %p9981_p7, %p4894_p8 }
 0x258   : > { %s4901_s9 = sand.u32 (!%p4895_p9), 1, %s11779_s18   ;;  %v10905_v0 = vld [vmem:[%s13845_s0 + $0x4] ss:$144 sps:$4 sm:$0xff] (!%p4895_p9)   ;;  %v10911_v1 = vld [vmem:[%s13845_s0 + $0x4c] ss:$144 sps:$4 sm:$0xff] (!%p4895_p9)  }
 0x259   : > { %4898 = sbr.rel (%p4895_p9) target bundleno = 1470 (0x5be), region = 88  ;;  %8816 = vmatprep.mubr.bf16.mxu1 (!%p4895_p9), %v10905_v0  ;;  %9275 = vmatprep.mubr.bf16.mxu0 (!%p4895_p9), %v10911_v1 }
 0x25a   : > { %s10780_s10 = smul.u32 (!%p4895_p9), 4608, %s4901_s9 }
 0x25b   : > { %s10781_s8 = smul.u32 (!%p4895_p9), 48, %s4901_s9 }
 0x25c   : > { %s13028_s15 = scalar_lea.vmem (!%p4895_p9), [#allocation2], %s10780_s10 }
 0x25d   : > { %v10807_v2 = vld [vmem:[%s13028_s15 + $0x4] ss:$8 sps:$4 sm:$0xff] (!%p4895_p9)   ;;  %v10811_v4 = vld [vmem:[%s13028_s15] ss:$8 sps:$4 sm:$0xff] (!%p4895_p9)   ;;  %v10813_v6 = vld [vmem:[%s13028_s15 + $0x14] ss:$8 sps:$4 sm:$0xff] (!%p4895_p9)  }
 0x25e   : > { %v10809_v3 = vld [vmem:[%s13028_s15 + $0x904] ss:$8 sps:$4 sm:$0xff] (!%p4895_p9)   ;;  %8784 = vmatprep.subr.bf16.mxu1 (!%p4895_p9), %v10807_v2  ;;  %v10812_v5 = vld [vmem:[%s13028_s15 + $0x900] ss:$8 sps:$4 sm:$0xff] (!%p4895_p9)   ;;  %v10815_v7 = vld [vmem:[%s13028_s15 + $0x914] ss:$8 sps:$4 sm:$0xff] (!%p4895_p9)  }
 0x25f   : > { %9243 = vmatprep.subr.bf16.mxu0 (!%p4895_p9), %v10809_v3  ;;  %8785 = vmatpush1.bf16.msra.mxu1 (!%p4895_p9), %v10811_v4  ;;  %v10817_v8 = vld [vmem:[%s13028_s15 + $0x10] ss:$8 sps:$4 sm:$0xff] (!%p4895_p9)   ;;  %v10819_v10 = vld [vmem:[%s13028_s15 + $0x24] ss:$8 sps:$4 sm:$0xff] (!%p4895_p9)   ;;  %v10823_v12 = vld [vmem:[%s13028_s15 + $0x20] ss:$8 sps:$4 sm:$0xff] (!%p4895_p9)  }
 0x260   : > { %9244 = vmatpush1.bf16.msra.mxu0 %v10812_v5  ;;  %8786 = vmatprep.subr.bf16.mxu1 %v10813_v6  ;;  %v10818_v9 = vld [vmem:[%s13028_s15 + $0x910] ss:$8 sps:$4 sm:$0xff]   ;;  %v10821_v11 = vld [vmem:[%s13028_s15 + $0x924] ss:$8 sps:$4 sm:$0xff]   ;;  %v10824_v13 = vld [vmem:[%s13028_s15 + $0x920] ss:$8 sps:$4 sm:$0xff]  }
 0x261   : > { %9245 = vmatprep.subr.bf16.mxu0 %v10815_v7  ;;  %v10825_v14 = vld [vmem:[%s13028_s15 + $0x34] ss:$8 sps:$4 sm:$0xff]   ;;  %v10829_v16 = vld [vmem:[%s13028_s15 + $0x30] ss:$8 sps:$4 sm:$0xff]   ;;  %v10831_v18 = vld [vmem:[%s13028_s15 + $0x44] ss:$8 sps:$4 sm:$0xff]  }
 0x262   : > { %v10827_v15 = vld [vmem:[%s13028_s15 + $0x934] ss:$8 sps:$4 sm:$0xff]   ;;  %v10830_v17 = vld [vmem:[%s13028_s15 + $0x930] ss:$8 sps:$4 sm:$0xff]   ;;  %v10833_v19 = vld [vmem:[%s13028_s15 + $0x944] ss:$8 sps:$4 sm:$0xff]  }
 0x263   : > { %8787 = vmatpush1.bf16.msra.mxu1 %v10817_v8  ;;  %v10835_v20 = vld [vmem:[%s13028_s15 + $0x40] ss:$8 sps:$4 sm:$0xff]   ;;  %v10837_v22 = vld [vmem:[%s13028_s15 + $0x54] ss:$8 sps:$4 sm:$0xff]   ;;  %v10841_v24 = vld [vmem:[%s13028_s15 + $0x50] ss:$8 sps:$4 sm:$0xff]  }
 0x264   : > { %9246 = vmatpush1.bf16.msra.mxu0 %v10818_v9  ;;  %8788 = vmatprep.subr.bf16.mxu1 %v10819_v10  ;;  %v10836_v21 = vld [vmem:[%s13028_s15 + $0x940] ss:$8 sps:$4 sm:$0xff]   ;;  %v10839_v23 = vld [vmem:[%s13028_s15 + $0x954] ss:$8 sps:$4 sm:$0xff]   ;;  %v10842_v25 = vld [vmem:[%s13028_s15 + $0x950] ss:$8 sps:$4 sm:$0xff]  }
 0x265   : > { %9247 = vmatprep.subr.bf16.mxu0 %v10821_v11  ;;  %v10843_v26 = vld [vmem:[%s13028_s15 + $0x64] ss:$8 sps:$4 sm:$0xff]   ;;  %v10847_v28 = vld [vmem:[%s13028_s15 + $0x60] ss:$8 sps:$4 sm:$0xff]   ;;  %v10849_v30 = vld [vmem:[%s13028_s15 + $0x74] ss:$8 sps:$4 sm:$0xff]  }
 0x266   : > { %v10845_v27 = vld [vmem:[%s13028_s15 + $0x964] ss:$8 sps:$4 sm:$0xff]   ;;  %v10848_v29 = vld [vmem:[%s13028_s15 + $0x960] ss:$8 sps:$4 sm:$0xff]   ;;  %v10851_v31 = vld [vmem:[%s13028_s15 + $0x974] ss:$8 sps:$4 sm:$0xff]  }
 0x267   : > { %8789 = vmatpush1.bf16.msra.mxu1 %v10823_v12  ;;  %v10853_v32 = vld [vmem:[%s13028_s15 + $0x70] ss:$8 sps:$4 sm:$0xff]   ;;  %v10855_v34 = vld [vmem:[%s13028_s15 + $0x84] ss:$8 sps:$4 sm:$0xff]   ;;  %v10859_v36 = vld [vmem:[%s13028_s15 + $0x80] ss:$8 sps:$4 sm:$0xff]  }
 0x268   : > { %9248 = vmatpush1.bf16.msra.mxu0 %v10824_v13  ;;  %8790 = vmatprep.subr.bf16.mxu1 %v10825_v14  ;;  %v10854_v33 = vld [vmem:[%s13028_s15 + $0x970] ss:$8 sps:$4 sm:$0xff]   ;;  %v10857_v35 = vld [vmem:[%s13028_s15 + $0x984] ss:$8 sps:$4 sm:$0xff]   ;;  %v10860_v37 = vld [vmem:[%s13028_s15 + $0x980] ss:$8 sps:$4 sm:$0xff]  }
 0x269   : > { %9249 = vmatprep.subr.bf16.mxu0 %v10827_v15  ;;  %v10861_v38 = vld [vmem:[%s13028_s15 + $0x94] ss:$8 sps:$4 sm:$0xff]   ;;  %v10865_v40 = vld [vmem:[%s13028_s15 + $0x90] ss:$8 sps:$4 sm:$0xff]   ;;  %v10867_v42 = vld [vmem:[%s13028_s15 + $0xa4] ss:$8 sps:$4 sm:$0xff]  }
 0x26a   : > { %v10863_v39 = vld [vmem:[%s13028_s15 + $0x994] ss:$8 sps:$4 sm:$0xff]   ;;  %v10866_v41 = vld [vmem:[%s13028_s15 + $0x990] ss:$8 sps:$4 sm:$0xff]   ;;  %v10869_v43 = vld [vmem:[%s13028_s15 + $0x9a4] ss:$8 sps:$4 sm:$0xff]  }
 0x26b   : > { %8791 = vmatpush1.bf16.msra.mxu1 %v10829_v16  ;;  %v10871_v44 = vld [vmem:[%s13028_s15 + $0xa0] ss:$8 sps:$4 sm:$0xff]   ;;  %v10873_v46 = vld [vmem:[%s13028_s15 + $0xb4] ss:$8 sps:$4 sm:$0xff]   ;;  %v10877_v48 = vld [vmem:[%s13028_s15 + $0xb0] ss:$8 sps:$4 sm:$0xff]  }
 0x26c   : > { %9250 = vmatpush1.bf16.msra.mxu0 %v10830_v17  ;;  %8792 = vmatprep.subr.bf16.mxu1 %v10831_v18  ;;  %v10872_v45 = vld [vmem:[%s13028_s15 + $0x9a0] ss:$8 sps:$4 sm:$0xff]   ;;  %v10875_v47 = vld [vmem:[%s13028_s15 + $0x9b4] ss:$8 sps:$4 sm:$0xff]   ;;  %v10878_v49 = vld [vmem:[%s13028_s15 + $0x9b0] ss:$8 sps:$4 sm:$0xff]  }
 0x26d   : > { %9251 = vmatprep.subr.bf16.mxu0 %v10833_v19  ;;  %v10879_v50 = vld [vmem:[%s13028_s15 + $0xc4] ss:$8 sps:$4 sm:$0xff]   ;;  %v10883_v52 = vld [vmem:[%s13028_s15 + $0xc0] ss:$8 sps:$4 sm:$0xff]   ;;  %v10885_v54 = vld [vmem:[%s13028_s15 + $0xd4] ss:$8 sps:$4 sm:$0xff]  }
 0x26e   : > { %v10881_v51 = vld [vmem:[%s13028_s15 + $0x9c4] ss:$8 sps:$4 sm:$0xff]   ;;  %v10884_v53 = vld [vmem:[%s13028_s15 + $0x9c0] ss:$8 sps:$4 sm:$0xff]   ;;  %v10887_v55 = vld [vmem:[%s13028_s15 + $0x9d4] ss:$8 sps:$4 sm:$0xff]  }
 0x26f   : > { %8793 = vmatpush1.bf16.msra.mxu1 %v10835_v20  ;;  %v10889_v56 = vld [vmem:[%s13028_s15 + $0xd0] ss:$8 sps:$4 sm:$0xff]   ;;  %v10891_v58 = vld [vmem:[%s13028_s15 + $0xe4] ss:$8 sps:$4 sm:$0xff]   ;;  %v10895_v60 = vld [vmem:[%s13028_s15 + $0xe0] ss:$8 sps:$4 sm:$0xff]  }
 0x270   : > { %9252 = vmatpush1.bf16.msra.mxu0 %v10836_v21  ;;  %8794 = vmatprep.subr.bf16.mxu1 %v10837_v22  ;;  %v10890_v57 = vld [vmem:[%s13028_s15 + $0x9d0] ss:$8 sps:$4 sm:$0xff]   ;;  %v10893_v59 = vld [vmem:[%s13028_s15 + $0x9e4] ss:$8 sps:$4 sm:$0xff]   ;;  %v10896_v61 = vld [vmem:[%s13028_s15 + $0x9e0] ss:$8 sps:$4 sm:$0xff]  }
 0x271   : > { %9253 = vmatprep.subr.bf16.mxu0 %v10839_v23  ;;  %v10897_v62 = vld [vmem:[%s13028_s15 + $0xf4] ss:$8 sps:$4 sm:$0xff]   ;;  %v10901_v0 = vld [vmem:[%s13028_s15 + $0xf0] ss:$8 sps:$4 sm:$0xff]   ;;  %v10908_v2 = vld [vmem:[%s13028_s15 + $0x104] ss:$8 sps:$4 sm:$0xff]  }
 0x272   : > { %v10899_v63 = vld [vmem:[%s13028_s15 + $0x9f4] ss:$8 sps:$4 sm:$0xff]   ;;  %v10902_v1 = vld [vmem:[%s13028_s15 + $0x9f0] ss:$8 sps:$4 sm:$0xff]   ;;  %v10914_v5 = vld [vmem:[%s13028_s15 + $0xa04] ss:$8 sps:$4 sm:$0xff]  }
 0x273   : > { %8795 = vmatpush1.bf16.msra.mxu1 %v10841_v24  ;;  %v10903_v3 = vld [vmem:[%s13845_s0] ss:$144 sps:$4 sm:$0xff]   ;;  %v10909_v4 = vld [vmem:[%s13845_s0 + $0x48] ss:$144 sps:$4 sm:$0xff]   ;;  %v10917_v10 = vld [vmem:[%s13028_s15 + $0x114] ss:$8 sps:$4 sm:$0xff]  }
 0x274   : > { %9254 = vmatpush1.bf16.msra.mxu0 %v10842_v25  ;;  %8796 = vmatprep.subr.bf16.mxu1 %v10843_v26  ;;  %v4992_v6 = vld [vmem:[%s13845_s0 + $0x120] sm:$0xff]  ;;  %v5001_v7 = vld [vmem:[%s13845_s0 + $0x168] sm:$0xff]  ;;  %v10920_v11 = vld [vmem:[%s13028_s15 + $0xa14] ss:$8 sps:$4 sm:$0xff]   ;;  %s4938_s18 = scalar_lea.vmem [#allocation3], %s10781_s8  ;;  %s10638_s9 = sshll.u32 (%p11851_p5), %s11836_s21, 4 }
 0x275   : > { %9255 = vmatprep.subr.bf16.mxu0 %v10845_v27  ;;  %v10906_v8 = vld [vmem:[%s13028_s15 + $0x100] ss:$8 sps:$4 sm:$0xff]   ;;  %v10022_v12 = vcombine.high %v4992_v6, %v4992_v6  ;;  %v10040_v13 = vcombine.high %v5001_v7, %v5001_v7  ;;  %v10915_v14 = vld [vmem:[%s13028_s15 + $0x110] ss:$8 sps:$4 sm:$0xff]   ;;  %v10923_v16 = vld [vmem:[%s13028_s15 + $0x124] ss:$8 sps:$4 sm:$0xff]   ;;  %v10021_v20 = vcombine.low %v4992_v6, %v4992_v6  ;;  %v10039_v21 = vcombine.low %v5001_v7, %v5001_v7  ;;  %s9855_s12 = scalar_lea.vmem (%p11851_p5), %s13850_s5, %s10638_s9 }
 0x276   : > { %v10912_v9 = vld [vmem:[%s13028_s15 + $0xa00] ss:$8 sps:$4 sm:$0xff]   ;;  %v10918_v15 = vld [vmem:[%s13028_s15 + $0xa10] ss:$8 sps:$4 sm:$0xff]   ;;  %v10926_v17 = vld [vmem:[%s13028_s15 + $0xa24] ss:$8 sps:$4 sm:$0xff]  }
 0x277   : > { %8797 = vmatpush1.bf16.msra.mxu1 %v10847_v28  ;;  %v10921_v18 = vld [vmem:[%s13028_s15 + $0x120] ss:$8 sps:$4 sm:$0xff]   ;;  %v10929_v22 = vld [vmem:[%s13028_s15 + $0x134] ss:$8 sps:$4 sm:$0xff]   ;;  %v10927_v24 = vld [vmem:[%s13028_s15 + $0x130] ss:$8 sps:$4 sm:$0xff]  }
 0x278   : > { %9256 = vmatpush1.bf16.msra.mxu0 %v10848_v29  ;;  %8798 = vmatprep.subr.bf16.mxu1 %v10849_v30  ;;  %v10924_v19 = vld [vmem:[%s13028_s15 + $0xa20] ss:$8 sps:$4 sm:$0xff]   ;;  %v10932_v23 = vld [vmem:[%s13028_s15 + $0xa34] ss:$8 sps:$4 sm:$0xff]   ;;  %v10930_v25 = vld [vmem:[%s13028_s15 + $0xa30] ss:$8 sps:$4 sm:$0xff]  }
 0x279   : > { %9257 = vmatprep.subr.bf16.mxu0 %v10851_v31  ;;  %v10935_v26 = vld [vmem:[%s13028_s15 + $0x144] ss:$8 sps:$4 sm:$0xff]   ;;  %v10933_v28 = vld [vmem:[%s13028_s15 + $0x140] ss:$8 sps:$4 sm:$0xff]   ;;  %v10941_v30 = vld [vmem:[%s13028_s15 + $0x154] ss:$8 sps:$4 sm:$0xff]  }
 0x27a   : > { %v10938_v27 = vld [vmem:[%s13028_s15 + $0xa44] ss:$8 sps:$4 sm:$0xff]   ;;  %v10936_v29 = vld [vmem:[%s13028_s15 + $0xa40] ss:$8 sps:$4 sm:$0xff]   ;;  %v10944_v31 = vld [vmem:[%s13028_s15 + $0xa54] ss:$8 sps:$4 sm:$0xff]  }
 0x27b   : > { %8799 = vmatpush1.bf16.msra.mxu1 %v10853_v32  ;;  %v10939_v32 = vld [vmem:[%s13028_s15 + $0x150] ss:$8 sps:$4 sm:$0xff]   ;;  %v10994_v6 = vld [vmem:[%s13028_s15 + $0x1e0] ss:$8 sps:$4 sm:$0xff]  }
 0x27c   : > { %9258 = vmatpush1.bf16.msra.mxu0 %v10854_v33  ;;  %8800 = vmatprep.subr.bf16.mxu1 %v10855_v34  ;;  %v10942_v33 = vld [vmem:[%s13028_s15 + $0xa50] ss:$8 sps:$4 sm:$0xff]   ;;  %v10947_v34 = vld [vmem:[%s13028_s15 + $0x164] ss:$8 sps:$4 sm:$0xff]   ;;  %v10998_v7 = vld [vmem:[%s13028_s15 + $0xae0] ss:$8 sps:$4 sm:$0xff]  }
 0x27d   : > { %9259 = vmatprep.subr.bf16.mxu0 %v10857_v35  ;;  %v10950_v35 = vld [vmem:[%s13028_s15 + $0xa64] ss:$8 sps:$4 sm:$0xff]  }
 0x27f   : > { %8801 = vmatpush1.bf16.msra.mxu1 %v10859_v36  ;;  %v11011_v36 = vld [vmem:[%s13845_s0 + $0xc] ss:$144 sps:$4 sm:$0xff]  }
 0x280   : > { %9260 = vmatpush1.bf16.msra.mxu0 %v10860_v37  ;;  %8802 = vmatprep.subr.bf16.mxu1 %v10861_v38  ;;  %v10945_v37 = vld [vmem:[%s13028_s15 + $0x160] ss:$8 sps:$4 sm:$0xff]  }
 0x281   : > { %9261 = vmatprep.subr.bf16.mxu0 %v10863_v39  ;;  %v10948_v38 = vld [vmem:[%s13028_s15 + $0xa60] ss:$8 sps:$4 sm:$0xff]   ;;  %v11017_v39 = vld [vmem:[%s13845_s0 + $0x54] ss:$144 sps:$4 sm:$0xff]  }
 0x283   : > { %8803 = vmatpush1.bf16.msra.mxu1 %v10865_v40  ;;  %v10953_v40 = vld [vmem:[%s13028_s15 + $0x174] ss:$8 sps:$4 sm:$0xff]  }
 0x284   : > { %9262 = vmatpush1.bf16.msra.mxu0 %v10866_v41  ;;  %8804 = vmatprep.subr.bf16.mxu1 %v10867_v42  ;;  %v10956_v41 = vld [vmem:[%s13028_s15 + $0xa74] ss:$8 sps:$4 sm:$0xff]   ;;  %v10951_v42 = vld [vmem:[%s13028_s15 + $0x170] ss:$8 sps:$4 sm:$0xff]  }
 0x285   : > { %9263 = vmatprep.subr.bf16.mxu0 %v10869_v43  ;;  %v10954_v43 = vld [vmem:[%s13028_s15 + $0xa70] ss:$8 sps:$4 sm:$0xff]  }
 0x287   : > { %8805 = vmatpush1.bf16.msra.mxu1 %v10871_v44  ;;  %v10959_v44 = vld [vmem:[%s13028_s15 + $0x184] ss:$8 sps:$4 sm:$0xff]  }
 0x288   : > { %9264 = vmatpush1.bf16.msra.mxu0 %v10872_v45  ;;  %8806 = vmatprep.subr.bf16.mxu1 %v10873_v46  ;;  %v10962_v45 = vld [vmem:[%s13028_s15 + $0xa84] ss:$8 sps:$4 sm:$0xff]   ;;  %v10957_v46 = vld [vmem:[%s13028_s15 + $0x180] ss:$8 sps:$4 sm:$0xff]  }
 0x289   : > { %9265 = vmatprep.subr.bf16.mxu0 %v10875_v47  ;;  %v10960_v47 = vld [vmem:[%s13028_s15 + $0xa80] ss:$8 sps:$4 sm:$0xff]  }
 0x28b   : > { %8807 = vmatpush1.bf16.msra.mxu1 %v10877_v48  ;;  %v10965_v48 = vld [vmem:[%s13028_s15 + $0x194] ss:$8 sps:$4 sm:$0xff]  }
 0x28c   : > { %9266 = vmatpush1.bf16.msra.mxu0 %v10878_v49  ;;  %8808 = vmatprep.subr.bf16.mxu1 %v10879_v50  ;;  %v10968_v49 = vld [vmem:[%s13028_s15 + $0xa94] ss:$8 sps:$4 sm:$0xff]   ;;  %v10963_v50 = vld [vmem:[%s13028_s15 + $0x190] ss:$8 sps:$4 sm:$0xff]  }
 0x28d   : > { %9267 = vmatprep.subr.bf16.mxu0 %v10881_v51  ;;  %v10966_v51 = vld [vmem:[%s13028_s15 + $0xa90] ss:$8 sps:$4 sm:$0xff]  }
 0x28f   : > { %8809 = vmatpush1.bf16.msra.mxu1 %v10883_v52  ;;  %v10971_v52 = vld [vmem:[%s13028_s15 + $0x1a4] ss:$8 sps:$4 sm:$0xff]  }
 0x290   : > { %9268 = vmatpush1.bf16.msra.mxu0 %v10884_v53  ;;  %8810 = vmatprep.subr.bf16.mxu1 %v10885_v54  ;;  %v10974_v53 = vld [vmem:[%s13028_s15 + $0xaa4] ss:$8 sps:$4 sm:$0xff]   ;;  %v10969_v54 = vld [vmem:[%s13028_s15 + $0x1a0] ss:$8 sps:$4 sm:$0xff]  }
 0x291   : > { %9269 = vmatprep.subr.bf16.mxu0 %v10887_v55  ;;  %v10972_v55 = vld [vmem:[%s13028_s15 + $0xaa0] ss:$8 sps:$4 sm:$0xff]  }
 0x293   : > { %8811 = vmatpush1.bf16.msra.mxu1 %v10889_v56  ;;  %v10977_v56 = vld [vmem:[%s13028_s15 + $0x1b4] ss:$8 sps:$4 sm:$0xff]  }
 0x294   : > { %9270 = vmatpush1.bf16.msra.mxu0 %v10890_v57  ;;  %8812 = vmatprep.subr.bf16.mxu1 %v10891_v58  ;;  %v10980_v57 = vld [vmem:[%s13028_s15 + $0xab4] ss:$8 sps:$4 sm:$0xff]   ;;  %v10975_v58 = vld [vmem:[%s13028_s15 + $0x1b0] ss:$8 sps:$4 sm:$0xff]  }
 0x295   : > { %9271 = vmatprep.subr.bf16.mxu0 %v10893_v59  ;;  %v10978_v59 = vld [vmem:[%s13028_s15 + $0xab0] ss:$8 sps:$4 sm:$0xff]  }
 0x297   : > { %8813 = vmatpush1.bf16.msra.mxu1 %v10895_v60  ;;  %v10983_v60 = vld [vmem:[%s13028_s15 + $0x1c4] ss:$8 sps:$4 sm:$0xff]  }
 0x298   : > { %9272 = vmatpush1.bf16.msra.mxu0 %v10896_v61  ;;  %8814 = vmatprep.subr.bf16.mxu1 %v10897_v62  ;;  %v10986_v61 = vld [vmem:[%s13028_s15 + $0xac4] ss:$8 sps:$4 sm:$0xff]   ;;  %v10981_v62 = vld [vmem:[%s13028_s15 + $0x1c0] ss:$8 sps:$4 sm:$0xff]  }
 0x299   : > { %9273 = vmatprep.subr.bf16.mxu0 %v10899_v63  ;;  %v10984_v63 = vld [vmem:[%s13028_s15 + $0xac0] ss:$8 sps:$4 sm:$0xff]  }
 0x29b   : > { %8815 = vmatpush1.bf16.msra.mxu1 %v10901_v0  ;;  %v10989_v0 = vld [vmem:[%s13028_s15 + $0x1d4] ss:$8 sps:$4 sm:$0xff]  }
 0x29c   : > { %9274 = vmatpush1.bf16.msra.mxu0 %v10902_v1  ;;  %8835 = vmatprep.subr.bf16.mxu1 %v10908_v2  ;;  %v10992_v1 = vld [vmem:[%s13028_s15 + $0xad4] ss:$8 sps:$4 sm:$0xff]   ;;  %v10987_v2 = vld [vmem:[%s13028_s15 + $0x1d0] ss:$8 sps:$4 sm:$0xff]  }
 0x29d   : > { %9294 = vmatprep.subr.bf16.mxu0 %v10914_v5  ;;  %v11000_v5 = vld [vmem:[%s13028_s15 + $0xae4] ss:$8 sps:$4 sm:$0xff]  }
 0x29e   : > { %8817 = vmatmul.mubr.bf16.vlgmr.msra.gmra.mrb[0].mxu1 %v10903_v3  ;;  %v10990_v3 = vld [vmem:[%s13028_s15 + $0xad0] ss:$8 sps:$4 sm:$0xff]  }
 0x29f   : > { %9276 = vmatmul.mubr.bf16.vlgmr.msra.gmra.mrb[0].mxu0 %v10909_v4  ;;  %8836 = vmatpush1.bf16.msra.mxu1 %v10906_v8  ;;  %v10996_v4 = vld [vmem:[%s13028_s15 + $0x1e4] ss:$8 sps:$4 sm:$0xff]   ;;  %v11005_v8 = vld [vmem:[%s13028_s15 + $0x1f4] ss:$8 sps:$4 sm:$0xff]  }
 0x2a0   : > { %9295 = vmatpush1.bf16.msra.mxu0 %v10912_v9  ;;  %8837 = vmatprep.subr.bf16.mxu1 %v10917_v10  ;;  %v11008_v9 = vld [vmem:[%s13028_s15 + $0xaf4] ss:$8 sps:$4 sm:$0xff]   ;;  %v11003_v10 = vld [vmem:[%s13028_s15 + $0x1f0] ss:$8 sps:$4 sm:$0xff]  }
 0x2a1   : > { %9296 = vmatprep.subr.bf16.mxu0 %v10920_v11  ;;  %8826 = vmatprep.mubr.bf16.mxu1 %v10022_v12  ;;  %v11006_v11 = vld [vmem:[%s13028_s15 + $0xaf0] ss:$8 sps:$4 sm:$0xff]   ;;  %v11014_v12 = vld [vmem:[%s13028_s15 + $0x204] ss:$8 sps:$4 sm:$0xff]  }
 0x2a2   : > { %9285 = vmatprep.mubr.bf16.mxu0 %v10040_v13  ;;  %v11009_v13 = vld [vmem:[%s13845_s0 + $0x8] ss:$144 sps:$4 sm:$0xff]  }
 0x2a3   : > { %8838 = vmatpush1.bf16.msra.mxu1 %v10915_v14  ;;  %v11020_v14 = vld [vmem:[%s13028_s15 + $0xb04] ss:$8 sps:$4 sm:$0xff]  }
 0x2a4   : > { %9297 = vmatpush1.bf16.msra.mxu0 %v10918_v15  ;;  %8839 = vmatprep.subr.bf16.mxu1 %v10923_v16  ;;  %v11012_v15 = vld [vmem:[%s13028_s15 + $0x200] ss:$8 sps:$4 sm:$0xff]  }
 0x2a5   : > { %9298 = vmatprep.subr.bf16.mxu0 %v10926_v17  ;;  %v11015_v16 = vld [vmem:[%s13845_s0 + $0x50] ss:$144 sps:$4 sm:$0xff]  }
 0x2a6   : > { %8827 = vmatmul.mubr.bf16.gmra.mrb[4].mxu1 %v10021_v20  ;;  %v11018_v17 = vld [vmem:[%s13028_s15 + $0xb00] ss:$8 sps:$4 sm:$0xff]   ;;  %v11023_v20 = vld [vmem:[%s13028_s15 + $0x214] ss:$8 sps:$4 sm:$0xff]  }
 0x2a7   : > { %9286 = vmatmul.mubr.bf16.gmra.mrb[4].mxu0 %v10039_v21  ;;  %8840 = vmatpush1.bf16.msra.mxu1 %v10921_v18  ;;  %v4993_v18 = vld [vmem:[%s13845_s0 + $0x128] sm:$0xff]  ;;  %v11026_v21 = vld [vmem:[%s13028_s15 + $0xb14] ss:$8 sps:$4 sm:$0xff]  }
 0x2a8   : > { %9299 = vmatpush1.bf16.msra.mxu0 %v10924_v19  ;;  %8841 = vmatprep.subr.bf16.mxu1 %v10929_v22  ;;  %v5002_v19 = vld [vmem:[%s13845_s0 + $0x170] sm:$0xff]  ;;  %v10024_v22 = vcombine.high %v4993_v18, %v4993_v18 }
 0x2a9   : > { %9300 = vmatprep.subr.bf16.mxu0 %v10932_v23  ;;  %8867 = vmatprep.mubr.bf16.mxu1 %v11011_v36  ;;  %v10042_v23 = vcombine.high %v5002_v19, %v5002_v19  ;;  %v11033_v36 = vld [vmem:[%s13028_s15 + $0x230] ss:$8 sps:$4 sm:$0xff]  }
 0x2aa   : > { %9326 = vmatprep.mubr.bf16.mxu0 %v11017_v39  ;;  %v11044_v39 = vld [vmem:[%s13028_s15 + $0xb44] ss:$8 sps:$4 sm:$0xff]  }
 0x2ab   : > { %8842 = vmatpush1.bf16.msra.mxu1 %v10927_v24  ;;  %v11021_v24 = vld [vmem:[%s13028_s15 + $0x210] ss:$8 sps:$4 sm:$0xff]  }
 0x2ac   : > { %9301 = vmatpush1.bf16.msra.mxu0 %v10930_v25  ;;  %8843 = vmatprep.subr.bf16.mxu1 %v10935_v26  ;;  %v11024_v25 = vld [vmem:[%s13028_s15 + $0xb10] ss:$8 sps:$4 sm:$0xff]   ;;  %v11029_v26 = vld [vmem:[%s13028_s15 + $0x224] ss:$8 sps:$4 sm:$0xff]  }
 0x2ad   : > { %9302 = vmatprep.subr.bf16.mxu0 %v10938_v27  ;;  %v11032_v27 = vld [vmem:[%s13028_s15 + $0xb24] ss:$8 sps:$4 sm:$0xff]  }
 0x2af   : > { %8844 = vmatpush1.bf16.msra.mxu1 %v10933_v28  ;;  %v11027_v28 = vld [vmem:[%s13028_s15 + $0x220] ss:$8 sps:$4 sm:$0xff]  }
 0x2b0   : > { %9303 = vmatpush1.bf16.msra.mxu0 %v10936_v29  ;;  %8845 = vmatprep.subr.bf16.mxu1 %v10941_v30  ;;  %v11030_v29 = vld [vmem:[%s13028_s15 + $0xb20] ss:$8 sps:$4 sm:$0xff]   ;;  %v10023_v30 = vcombine.low %v4993_v18, %v4993_v18  ;;  %v11111_v18 = vld [vmem:[%s13028_s15 + $0x2f4] ss:$8 sps:$4 sm:$0xff]  }
 0x2b1   : > { %9304 = vmatprep.subr.bf16.mxu0 %v10944_v31  ;;  %v10041_v31 = vcombine.low %v5002_v19, %v5002_v19  ;;  %v11114_v19 = vld [vmem:[%s13028_s15 + $0xbf4] ss:$8 sps:$4 sm:$0xff]  }
 0x2b3   : > { %8846 = vmatpush1.bf16.msra.mxu1 %v10939_v32  ;;  %v11035_v32 = vld [vmem:[%s13028_s15 + $0x234] ss:$8 sps:$4 sm:$0xff]  }
 0x2b4   : > { %9305 = vmatpush1.bf16.msra.mxu0 %v10942_v33  ;;  %8847 = vmatprep.subr.bf16.mxu1 %v10947_v34  ;;  %v11038_v33 = vld [vmem:[%s13028_s15 + $0xb34] ss:$8 sps:$4 sm:$0xff]  }
 0x2b5   : > { %9306 = vmatprep.subr.bf16.mxu0 %v10950_v35  ;;  %v11117_v34 = vld [vmem:[%s13845_s0 + $0x14] ss:$144 sps:$4 sm:$0xff]   ;;  %v11123_v35 = vld [vmem:[%s13845_s0 + $0x5c] ss:$144 sps:$4 sm:$0xff]  }
 0x2b7   : > { %8848 = vmatpush1.bf16.msra.mxu1 %v10945_v37  ;;  %v11036_v37 = vld [vmem:[%s13028_s15 + $0xb30] ss:$8 sps:$4 sm:$0xff]  }
 0x2b8   : > { %9307 = vmatpush1.bf16.msra.mxu0 %v10948_v38  ;;  %8849 = vmatprep.subr.bf16.mxu1 %v10953_v40  ;;  %v11041_v38 = vld [vmem:[%s13028_s15 + $0x244] ss:$8 sps:$4 sm:$0xff]   ;;  %v11039_v40 = vld [vmem:[%s13028_s15 + $0x240] ss:$8 sps:$4 sm:$0xff]  }
 0x2b9   : > { %9308 = vmatprep.subr.bf16.mxu0 %v10956_v41  ;;  %v11042_v41 = vld [vmem:[%s13028_s15 + $0xb40] ss:$8 sps:$4 sm:$0xff]  }
 0x2bb   : > { %8850 = vmatpush1.bf16.msra.mxu1 %v10951_v42  ;;  %v11047_v42 = vld [vmem:[%s13028_s15 + $0x254] ss:$8 sps:$4 sm:$0xff]  }
 0x2bc   : > { %9309 = vmatpush1.bf16.msra.mxu0 %v10954_v43  ;;  %8851 = vmatprep.subr.bf16.mxu1 %v10959_v44  ;;  %v11050_v43 = vld [vmem:[%s13028_s15 + $0xb54] ss:$8 sps:$4 sm:$0xff]   ;;  %v11045_v44 = vld [vmem:[%s13028_s15 + $0x250] ss:$8 sps:$4 sm:$0xff]  }
 0x2bd   : > { %9310 = vmatprep.subr.bf16.mxu0 %v10962_v45  ;;  %v11048_v45 = vld [vmem:[%s13028_s15 + $0xb50] ss:$8 sps:$4 sm:$0xff]  }
 0x2bf   : > { %8852 = vmatpush1.bf16.msra.mxu1 %v10957_v46  ;;  %v11053_v46 = vld [vmem:[%s13028_s15 + $0x264] ss:$8 sps:$4 sm:$0xff]  }
 0x2c0   : > { %9311 = vmatpush1.bf16.msra.mxu0 %v10960_v47  ;;  %8853 = vmatprep.subr.bf16.mxu1 %v10965_v48  ;;  %v11056_v47 = vld [vmem:[%s13028_s15 + $0xb64] ss:$8 sps:$4 sm:$0xff]   ;;  %v11051_v48 = vld [vmem:[%s13028_s15 + $0x260] ss:$8 sps:$4 sm:$0xff]  }
 0x2c1   : > { %9312 = vmatprep.subr.bf16.mxu0 %v10968_v49  ;;  %v11054_v49 = vld [vmem:[%s13028_s15 + $0xb60] ss:$8 sps:$4 sm:$0xff]  }
 0x2c3   : > { %8854 = vmatpush1.bf16.msra.mxu1 %v10963_v50  ;;  %v11059_v50 = vld [vmem:[%s13028_s15 + $0x274] ss:$8 sps:$4 sm:$0xff]  }
 0x2c4   : > { %9313 = vmatpush1.bf16.msra.mxu0 %v10966_v51  ;;  %8855 = vmatprep.subr.bf16.mxu1 %v10971_v52  ;;  %v11062_v51 = vld [vmem:[%s13028_s15 + $0xb74] ss:$8 sps:$4 sm:$0xff]   ;;  %v11057_v52 = vld [vmem:[%s13028_s15 + $0x270] ss:$8 sps:$4 sm:$0xff]  }
 0x2c5   : > { %9314 = vmatprep.subr.bf16.mxu0 %v10974_v53  ;;  %v11060_v53 = vld [vmem:[%s13028_s15 + $0xb70] ss:$8 sps:$4 sm:$0xff]  }
 0x2c7   : > { %8856 = vmatpush1.bf16.msra.mxu1 %v10969_v54  ;;  %v11065_v54 = vld [vmem:[%s13028_s15 + $0x284] ss:$8 sps:$4 sm:$0xff]  }
 0x2c8   : > { %9315 = vmatpush1.bf16.msra.mxu0 %v10972_v55  ;;  %8857 = vmatprep.subr.bf16.mxu1 %v10977_v56  ;;  %v11068_v55 = vld [vmem:[%s13028_s15 + $0xb84] ss:$8 sps:$4 sm:$0xff]   ;;  %v11063_v56 = vld [vmem:[%s13028_s15 + $0x280] ss:$8 sps:$4 sm:$0xff]  }
 0x2c9   : > { %9316 = vmatprep.subr.bf16.mxu0 %v10980_v57  ;;  %v11066_v57 = vld [vmem:[%s13028_s15 + $0xb80] ss:$8 sps:$4 sm:$0xff]  }
 0x2cb   : > { %8858 = vmatpush1.bf16.msra.mxu1 %v10975_v58  ;;  %v11071_v58 = vld [vmem:[%s13028_s15 + $0x294] ss:$8 sps:$4 sm:$0xff]  }
 0x2cc   : > { %9317 = vmatpush1.bf16.msra.mxu0 %v10978_v59  ;;  %8859 = vmatprep.subr.bf16.mxu1 %v10983_v60  ;;  %v11074_v59 = vld [vmem:[%s13028_s15 + $0xb94] ss:$8 sps:$4 sm:$0xff]   ;;  %v11069_v60 = vld [vmem:[%s13028_s15 + $0x290] ss:$8 sps:$4 sm:$0xff]  }
 0x2cd   : > { %9318 = vmatprep.subr.bf16.mxu0 %v10986_v61  ;;  %v11072_v61 = vld [vmem:[%s13028_s15 + $0xb90] ss:$8 sps:$4 sm:$0xff]  }
 0x2cf   : > { %8860 = vmatpush1.bf16.msra.mxu1 %v10981_v62  ;;  %v11077_v62 = vld [vmem:[%s13028_s15 + $0x2a4] ss:$8 sps:$4 sm:$0xff]  }
 0x2d0   : > { %9319 = vmatpush1.bf16.msra.mxu0 %v10984_v63  ;;  %8861 = vmatprep.subr.bf16.mxu1 %v10989_v0  ;;  %v11080_v63 = vld [vmem:[%s13028_s15 + $0xba4] ss:$8 sps:$4 sm:$0xff]   ;;  %v11075_v0 = vld [vmem:[%s13028_s15 + $0x2a0] ss:$8 sps:$4 sm:$0xff]  }
 0x2d1   : > { %9320 = vmatprep.subr.bf16.mxu0 %v10992_v1  ;;  %v11078_v1 = vld [vmem:[%s13028_s15 + $0xba0] ss:$8 sps:$4 sm:$0xff]  }
 0x2d3   : > { %8862 = vmatpush1.bf16.msra.mxu1 %v10987_v2  ;;  %v11083_v2 = vld [vmem:[%s13028_s15 + $0x2b4] ss:$8 sps:$4 sm:$0xff]  }
 0x2d4   : > { %9321 = vmatpush1.bf16.msra.mxu0 %v10990_v3  ;;  %8863 = vmatprep.subr.bf16.mxu1 %v10996_v4  ;;  %v11086_v3 = vld [vmem:[%s13028_s15 + $0xbb4] ss:$8 sps:$4 sm:$0xff]   ;;  %v11081_v4 = vld [vmem:[%s13028_s15 + $0x2b0] ss:$8 sps:$4 sm:$0xff]  }
 0x2d5   : > { %9322 = vmatprep.subr.bf16.mxu0 %v11000_v5  ;;  %v11084_v5 = vld [vmem:[%s13028_s15 + $0xbb0] ss:$8 sps:$4 sm:$0xff]  }
 0x2d7   : > { %8864 = vmatpush1.bf16.msra.mxu1 %v10994_v6  ;;  %v11089_v6 = vld [vmem:[%s13028_s15 + $0x2c4] ss:$8 sps:$4 sm:$0xff]  }
 0x2d8   : > { %9323 = vmatpush1.bf16.msra.mxu0 %v10998_v7  ;;  %8865 = vmatprep.subr.bf16.mxu1 %v11005_v8  ;;  %v11092_v7 = vld [vmem:[%s13028_s15 + $0xbc4] ss:$8 sps:$4 sm:$0xff]   ;;  %v11087_v8 = vld [vmem:[%s13028_s15 + $0x2c0] ss:$8 sps:$4 sm:$0xff]  }
 0x2d9   : > { %9324 = vmatprep.subr.bf16.mxu0 %v11008_v9  ;;  %v11090_v9 = vld [vmem:[%s13028_s15 + $0xbc0] ss:$8 sps:$4 sm:$0xff]  }
 0x2db   : > { %8866 = vmatpush1.bf16.msra.mxu1 %v11003_v10  ;;  %v11095_v10 = vld [vmem:[%s13028_s15 + $0x2d4] ss:$8 sps:$4 sm:$0xff]  }
 0x2dc   : > { %9325 = vmatpush1.bf16.msra.mxu0 %v11006_v11  ;;  %8886 = vmatprep.subr.bf16.mxu1 %v11014_v12  ;;  %v11098_v11 = vld [vmem:[%s13028_s15 + $0xbd4] ss:$8 sps:$4 sm:$0xff]   ;;  %v11093_v12 = vld [vmem:[%s13028_s15 + $0x2d0] ss:$8 sps:$4 sm:$0xff]  }
 0x2dd   : > { %9345 = vmatprep.subr.bf16.mxu0 %v11020_v14  ;;  %v11102_v14 = vld [vmem:[%s13028_s15 + $0x2e4] ss:$8 sps:$4 sm:$0xff]  }
 0x2de   : > { %8868 = vmatmul.mubr.bf16.vlgmr.msra.gmra.mrb[0].mxu1 %v11009_v13  ;;  %v11096_v13 = vld [vmem:[%s13028_s15 + $0xbd0] ss:$8 sps:$4 sm:$0xff]  }
 0x2df   : > { %9327 = vmatmul.mubr.bf16.vlgmr.msra.gmra.mrb[0].mxu0 %v11015_v16  ;;  %8887 = vmatpush1.bf16.msra.mxu1 %v11012_v15  ;;  %v11106_v15 = vld [vmem:[%s13028_s15 + $0xbe4] ss:$8 sps:$4 sm:$0xff]   ;;  %v11100_v16 = vld [vmem:[%s13028_s15 + $0x2e0] ss:$8 sps:$4 sm:$0xff]  }
 0x2e0   : > { %9346 = vmatpush1.bf16.msra.mxu0 %v11018_v17  ;;  %8888 = vmatprep.subr.bf16.mxu1 %v11023_v20  ;;  %v11104_v17 = vld [vmem:[%s13028_s15 + $0xbe0] ss:$8 sps:$4 sm:$0xff]   ;;  %v11109_v20 = vld [vmem:[%s13028_s15 + $0x2f0] ss:$8 sps:$4 sm:$0xff]  }
 0x2e1   : > { %9347 = vmatprep.subr.bf16.mxu0 %v11026_v21  ;;  %8877 = vmatprep.mubr.bf16.mxu1 %v10024_v22  ;;  %v11112_v21 = vld [vmem:[%s13028_s15 + $0xbf0] ss:$8 sps:$4 sm:$0xff]   ;;  %v11120_v22 = vld [vmem:[%s13028_s15 + $0x304] ss:$8 sps:$4 sm:$0xff]  }
 0x2e2   : > { %9336 = vmatprep.mubr.bf16.mxu0 %v10042_v23  ;;  %v11115_v23 = vld [vmem:[%s13845_s0 + $0x10] ss:$144 sps:$4 sm:$0xff]  }
 0x2e3   : > { %8889 = vmatpush1.bf16.msra.mxu1 %v11021_v24  ;;  %v11121_v24 = vld [vmem:[%s13845_s0 + $0x58] ss:$144 sps:$4 sm:$0xff]  }
 0x2e4   : > { %9348 = vmatpush1.bf16.msra.mxu0 %v11024_v25  ;;  %8890 = vmatprep.subr.bf16.mxu1 %v11029_v26  ;;  %v11126_v25 = vld [vmem:[%s13028_s15 + $0xc04] ss:$8 sps:$4 sm:$0xff]   ;;  %v4994_v26 = vld [vmem:[%s13845_s0 + $0x130] sm:$0xff] }
 0x2e5   : > { %9349 = vmatprep.subr.bf16.mxu0 %v11032_v27  ;;  %v5003_v27 = vld [vmem:[%s13845_s0 + $0x178] sm:$0xff] }
 0x2e6   : > { %8878 = vmatmul.mubr.bf16.gmra.mrb[4].mxu1 %v10023_v30  ;;  %v11129_v30 = vld [vmem:[%s13028_s15 + $0x314] ss:$8 sps:$4 sm:$0xff]  }
 0x2e7   : > { %9337 = vmatmul.mubr.bf16.gmra.mrb[4].mxu0 %v10041_v31  ;;  %8891 = vmatpush1.bf16.msra.mxu1 %v11027_v28  ;;  %v11118_v28 = vld [vmem:[%s13028_s15 + $0x300] ss:$8 sps:$4 sm:$0xff]   ;;  %v11132_v31 = vld [vmem:[%s13028_s15 + $0xc14] ss:$8 sps:$4 sm:$0xff]  }
 0x2e8   : > { %9350 = vmatpush1.bf16.msra.mxu0 %v11030_v29  ;;  %8892 = vmatprep.subr.bf16.mxu1 %v11035_v32  ;;  %v11124_v29 = vld [vmem:[%s13028_s15 + $0xc00] ss:$8 sps:$4 sm:$0xff]   ;;  %v10026_v32 = vcombine.high %v4994_v26, %v4994_v26 }
 0x2e9   : > { %9351 = vmatprep.subr.bf16.mxu0 %v11038_v33  ;;  %8918 = vmatprep.mubr.bf16.mxu1 %v11117_v34  ;;  %v10044_v33 = vcombine.high %v5003_v27, %v5003_v27  ;;  %v11127_v34 = vld [vmem:[%s13028_s15 + $0x310] ss:$8 sps:$4 sm:$0xff]  }
 0x2ea   : > { %9377 = vmatprep.mubr.bf16.mxu0 %v11123_v35  ;;  %v11130_v35 = vld [vmem:[%s13028_s15 + $0xc10] ss:$8 sps:$4 sm:$0xff]  }
 0x2eb   : > { %8893 = vmatpush1.bf16.msra.mxu1 %v11033_v36  ;;  %v11135_v36 = vld [vmem:[%s13028_s15 + $0x324] ss:$8 sps:$4 sm:$0xff]  }
 0x2ec   : > { %9352 = vmatpush1.bf16.msra.mxu0 %v11036_v37  ;;  %8894 = vmatprep.subr.bf16.mxu1 %v11041_v38  ;;  %v11138_v37 = vld [vmem:[%s13028_s15 + $0xc24] ss:$8 sps:$4 sm:$0xff]   ;;  %v11133_v38 = vld [vmem:[%s13028_s15 + $0x320] ss:$8 sps:$4 sm:$0xff]  }
 0x2ed   : > { %9353 = vmatprep.subr.bf16.mxu0 %v11044_v39  ;;  %v10025_v39 = vcombine.low %v4994_v26, %v4994_v26  ;;  %v11206_v26 = vld [vmem:[%s13028_s15 + $0x3e0] ss:$8 sps:$4 sm:$0xff]  }
 0x2ef   : > { %8895 = vmatpush1.bf16.msra.mxu1 %v11039_v40  ;;  %v10043_v40 = vcombine.low %v5003_v27, %v5003_v27  ;;  %v11210_v27 = vld [vmem:[%s13028_s15 + $0xce0] ss:$8 sps:$4 sm:$0xff]  }
 0x2f0   : > { %9354 = vmatpush1.bf16.msra.mxu0 %v11042_v41  ;;  %8896 = vmatprep.subr.bf16.mxu1 %v11047_v42  ;;  %v11136_v41 = vld [vmem:[%s13028_s15 + $0xc20] ss:$8 sps:$4 sm:$0xff]   ;;  %v11141_v42 = vld [vmem:[%s13028_s15 + $0x334] ss:$8 sps:$4 sm:$0xff]  }
 0x2f1   : > { %9355 = vmatprep.subr.bf16.mxu0 %v11050_v43  ;;  %v11144_v43 = vld [vmem:[%s13028_s15 + $0xc34] ss:$8 sps:$4 sm:$0xff]  }
 0x2f3   : > { %8897 = vmatpush1.bf16.msra.mxu1 %v11045_v44  ;;  %v11223_v44 = vld [vmem:[%s13845_s0 + $0x1c] ss:$144 sps:$4 sm:$0xff]  }
 0x2f4   : > { %9356 = vmatpush1.bf16.msra.mxu0 %v11048_v45  ;;  %8898 = vmatprep.subr.bf16.mxu1 %v11053_v46  ;;  %v11229_v45 = vld [vmem:[%s13845_s0 + $0x64] ss:$144 sps:$4 sm:$0xff]   ;;  %v11139_v46 = vld [vmem:[%s13028_s15 + $0x330] ss:$8 sps:$4 sm:$0xff]  }
 0x2f5   : > { %9357 = vmatprep.subr.bf16.mxu0 %v11056_v47  ;;  %v11142_v47 = vld [vmem:[%s13028_s15 + $0xc30] ss:$8 sps:$4 sm:$0xff]  }
 0x2f7   : > { %8899 = vmatpush1.bf16.msra.mxu1 %v11051_v48  ;;  %v11147_v48 = vld [vmem:[%s13028_s15 + $0x344] ss:$8 sps:$4 sm:$0xff]  }
 0x2f8   : > { %9358 = vmatpush1.bf16.msra.mxu0 %v11054_v49  ;;  %8900 = vmatprep.subr.bf16.mxu1 %v11059_v50  ;;  %v11150_v49 = vld [vmem:[%s13028_s15 + $0xc44] ss:$8 sps:$4 sm:$0xff]   ;;  %v11145_v50 = vld [vmem:[%s13028_s15 + $0x340] ss:$8 sps:$4 sm:$0xff]  }
 0x2f9   : > { %9359 = vmatprep.subr.bf16.mxu0 %v11062_v51  ;;  %v11148_v51 = vld [vmem:[%s13028_s15 + $0xc40] ss:$8 sps:$4 sm:$0xff]  }
 0x2fb   : > { %8901 = vmatpush1.bf16.msra.mxu1 %v11057_v52  ;;  %v11153_v52 = vld [vmem:[%s13028_s15 + $0x354] ss:$8 sps:$4 sm:$0xff]  }
 0x2fc   : > { %9360 = vmatpush1.bf16.msra.mxu0 %v11060_v53  ;;  %8902 = vmatprep.subr.bf16.mxu1 %v11065_v54  ;;  %v11156_v53 = vld [vmem:[%s13028_s15 + $0xc54] ss:$8 sps:$4 sm:$0xff]   ;;  %v11151_v54 = vld [vmem:[%s13028_s15 + $0x350] ss:$8 sps:$4 sm:$0xff]  }
 0x2fd   : > { %9361 = vmatprep.subr.bf16.mxu0 %v11068_v55  ;;  %v11154_v55 = vld [vmem:[%s13028_s15 + $0xc50] ss:$8 sps:$4 sm:$0xff]  }
 0x2ff   : > { %8903 = vmatpush1.bf16.msra.mxu1 %v11063_v56  ;;  %v11159_v56 = vld [vmem:[%s13028_s15 + $0x364] ss:$8 sps:$4 sm:$0xff]  }
 0x300   : > { %9362 = vmatpush1.bf16.msra.mxu0 %v11066_v57  ;;  %8904 = vmatprep.subr.bf16.mxu1 %v11071_v58  ;;  %v11162_v57 = vld [vmem:[%s13028_s15 + $0xc64] ss:$8 sps:$4 sm:$0xff]   ;;  %v11157_v58 = vld [vmem:[%s13028_s15 + $0x360] ss:$8 sps:$4 sm:$0xff]  }
 0x301   : > { %9363 = vmatprep.subr.bf16.mxu0 %v11074_v59  ;;  %v11160_v59 = vld [vmem:[%s13028_s15 + $0xc60] ss:$8 sps:$4 sm:$0xff]  }
 0x303   : > { %8905 = vmatpush1.bf16.msra.mxu1 %v11069_v60  ;;  %v11165_v60 = vld [vmem:[%s13028_s15 + $0x374] ss:$8 sps:$4 sm:$0xff]  }
 0x304   : > { %9364 = vmatpush1.bf16.msra.mxu0 %v11072_v61  ;;  %8906 = vmatprep.subr.bf16.mxu1 %v11077_v62  ;;  %v11168_v61 = vld [vmem:[%s13028_s15 + $0xc74] ss:$8 sps:$4 sm:$0xff]   ;;  %v11163_v62 = vld [vmem:[%s13028_s15 + $0x370] ss:$8 sps:$4 sm:$0xff]  }
 0x305   : > { %9365 = vmatprep.subr.bf16.mxu0 %v11080_v63  ;;  %v11166_v63 = vld [vmem:[%s13028_s15 + $0xc70] ss:$8 sps:$4 sm:$0xff]  }
 0x307   : > { %8907 = vmatpush1.bf16.msra.mxu1 %v11075_v0  ;;  %v11171_v0 = vld [vmem:[%s13028_s15 + $0x384] ss:$8 sps:$4 sm:$0xff]  }
 0x308   : > { %9366 = vmatpush1.bf16.msra.mxu0 %v11078_v1  ;;  %8908 = vmatprep.subr.bf16.mxu1 %v11083_v2  ;;  %v11174_v1 = vld [vmem:[%s13028_s15 + $0xc84] ss:$8 sps:$4 sm:$0xff]   ;;  %v11169_v2 = vld [vmem:[%s13028_s15 + $0x380] ss:$8 sps:$4 sm:$0xff]  }
 0x309   : > { %9367 = vmatprep.subr.bf16.mxu0 %v11086_v3  ;;  %v11172_v3 = vld [vmem:[%s13028_s15 + $0xc80] ss:$8 sps:$4 sm:$0xff]  }
 0x30b   : > { %8909 = vmatpush1.bf16.msra.mxu1 %v11081_v4  ;;  %v11177_v4 = vld [vmem:[%s13028_s15 + $0x394] ss:$8 sps:$4 sm:$0xff]  }
 0x30c   : > { %9368 = vmatpush1.bf16.msra.mxu0 %v11084_v5  ;;  %8910 = vmatprep.subr.bf16.mxu1 %v11089_v6  ;;  %v11180_v5 = vld [vmem:[%s13028_s15 + $0xc94] ss:$8 sps:$4 sm:$0xff]   ;;  %v11175_v6 = vld [vmem:[%s13028_s15 + $0x390] ss:$8 sps:$4 sm:$0xff]  }
 0x30d   : > { %9369 = vmatprep.subr.bf16.mxu0 %v11092_v7  ;;  %v11178_v7 = vld [vmem:[%s13028_s15 + $0xc90] ss:$8 sps:$4 sm:$0xff]  }
 0x30f   : > { %8911 = vmatpush1.bf16.msra.mxu1 %v11087_v8  ;;  %v11183_v8 = vld [vmem:[%s13028_s15 + $0x3a4] ss:$8 sps:$4 sm:$0xff]  }
 0x310   : > { %9370 = vmatpush1.bf16.msra.mxu0 %v11090_v9  ;;  %8912 = vmatprep.subr.bf16.mxu1 %v11095_v10  ;;  %v11186_v9 = vld [vmem:[%s13028_s15 + $0xca4] ss:$8 sps:$4 sm:$0xff]   ;;  %v11181_v10 = vld [vmem:[%s13028_s15 + $0x3a0] ss:$8 sps:$4 sm:$0xff]  }
 0x311   : > { %9371 = vmatprep.subr.bf16.mxu0 %v11098_v11  ;;  %v11184_v11 = vld [vmem:[%s13028_s15 + $0xca0] ss:$8 sps:$4 sm:$0xff]  }
 0x313   : > { %8913 = vmatpush1.bf16.msra.mxu1 %v11093_v12  ;;  %v11189_v12 = vld [vmem:[%s13028_s15 + $0x3b4] ss:$8 sps:$4 sm:$0xff]  }
 0x314   : > { %9372 = vmatpush1.bf16.msra.mxu0 %v11096_v13  ;;  %8914 = vmatprep.subr.bf16.mxu1 %v11102_v14  ;;  %v11192_v13 = vld [vmem:[%s13028_s15 + $0xcb4] ss:$8 sps:$4 sm:$0xff]   ;;  %v11187_v14 = vld [vmem:[%s13028_s15 + $0x3b0] ss:$8 sps:$4 sm:$0xff]  }
 0x315   : > { %9373 = vmatprep.subr.bf16.mxu0 %v11106_v15  ;;  %v11190_v15 = vld [vmem:[%s13028_s15 + $0xcb0] ss:$8 sps:$4 sm:$0xff]  }
 0x317   : > { %8915 = vmatpush1.bf16.msra.mxu1 %v11100_v16  ;;  %v11195_v16 = vld [vmem:[%s13028_s15 + $0x3c4] ss:$8 sps:$4 sm:$0xff]  }
 0x318   : > { %9374 = vmatpush1.bf16.msra.mxu0 %v11104_v17  ;;  %8916 = vmatprep.subr.bf16.mxu1 %v11111_v18  ;;  %v11198_v17 = vld [vmem:[%s13028_s15 + $0xcc4] ss:$8 sps:$4 sm:$0xff]   ;;  %v11193_v18 = vld [vmem:[%s13028_s15 + $0x3c0] ss:$8 sps:$4 sm:$0xff]  }
 0x319   : > { %9375 = vmatprep.subr.bf16.mxu0 %v11114_v19  ;;  %v11196_v19 = vld [vmem:[%s13028_s15 + $0xcc0] ss:$8 sps:$4 sm:$0xff]  }
 0x31b   : > { %8917 = vmatpush1.bf16.msra.mxu1 %v11109_v20  ;;  %v11201_v20 = vld [vmem:[%s13028_s15 + $0x3d4] ss:$8 sps:$4 sm:$0xff]  }
 0x31c   : > { %9376 = vmatpush1.bf16.msra.mxu0 %v11112_v21  ;;  %8937 = vmatprep.subr.bf16.mxu1 %v11120_v22  ;;  %v11204_v21 = vld [vmem:[%s13028_s15 + $0xcd4] ss:$8 sps:$4 sm:$0xff]   ;;  %v11199_v22 = vld [vmem:[%s13028_s15 + $0x3d0] ss:$8 sps:$4 sm:$0xff]  }
 0x31d   : > { %9396 = vmatprep.subr.bf16.mxu0 %v11126_v25  ;;  %v11212_v25 = vld [vmem:[%s13028_s15 + $0xce4] ss:$8 sps:$4 sm:$0xff]  }
 0x31e   : > { %8919 = vmatmul.mubr.bf16.vlgmr.msra.gmra.mrb[0].mxu1 %v11115_v23  ;;  %v11202_v23 = vld [vmem:[%s13028_s15 + $0xcd0] ss:$8 sps:$4 sm:$0xff]  }
 0x31f   : > { %9378 = vmatmul.mubr.bf16.vlgmr.msra.gmra.mrb[0].mxu0 %v11121_v24  ;;  %8938 = vmatpush1.bf16.msra.mxu1 %v11118_v28  ;;  %v11208_v24 = vld [vmem:[%s13028_s15 + $0x3e4] ss:$8 sps:$4 sm:$0xff]   ;;  %v11217_v28 = vld [vmem:[%s13028_s15 + $0x3f4] ss:$8 sps:$4 sm:$0xff]  }
 0x320   : > { %9397 = vmatpush1.bf16.msra.mxu0 %v11124_v29  ;;  %8939 = vmatprep.subr.bf16.mxu1 %v11129_v30  ;;  %v11220_v29 = vld [vmem:[%s13028_s15 + $0xcf4] ss:$8 sps:$4 sm:$0xff]   ;;  %v11215_v30 = vld [vmem:[%s13028_s15 + $0x3f0] ss:$8 sps:$4 sm:$0xff]  }
 0x321   : > { %9398 = vmatprep.subr.bf16.mxu0 %v11132_v31  ;;  %8928 = vmatprep.mubr.bf16.mxu1 %v10026_v32  ;;  %v11218_v31 = vld [vmem:[%s13028_s15 + $0xcf0] ss:$8 sps:$4 sm:$0xff]   ;;  %v11226_v32 = vld [vmem:[%s13028_s15 + $0x404] ss:$8 sps:$4 sm:$0xff]  }
 0x322   : > { %9387 = vmatprep.mubr.bf16.mxu0 %v10044_v33  ;;  %v11221_v33 = vld [vmem:[%s13845_s0 + $0x18] ss:$144 sps:$4 sm:$0xff]  }
 0x323   : > { %8940 = vmatpush1.bf16.msra.mxu1 %v11127_v34  ;;  %v11232_v34 = vld [vmem:[%s13028_s15 + $0xd04] ss:$8 sps:$4 sm:$0xff]  }
 0x324   : > { %9399 = vmatpush1.bf16.msra.mxu0 %v11130_v35  ;;  %8941 = vmatprep.subr.bf16.mxu1 %v11135_v36  ;;  %v11224_v35 = vld [vmem:[%s13028_s15 + $0x400] ss:$8 sps:$4 sm:$0xff]  }
 0x325   : > { %9400 = vmatprep.subr.bf16.mxu0 %v11138_v37  ;;  %v11227_v36 = vld [vmem:[%s13845_s0 + $0x60] ss:$144 sps:$4 sm:$0xff]  }
 0x326   : > { %8929 = vmatmul.mubr.bf16.gmra.mrb[4].mxu1 %v10025_v39  ;;  %v11230_v37 = vld [vmem:[%s13028_s15 + $0xd00] ss:$8 sps:$4 sm:$0xff]  }
 0x327   : > { %9388 = vmatmul.mubr.bf16.gmra.mrb[4].mxu0 %v10043_v40  ;;  %8942 = vmatpush1.bf16.msra.mxu1 %v11133_v38  ;;  %v4995_v38 = vld [vmem:[%s13845_s0 + $0x138] sm:$0xff]  ;;  %v5004_v39 = vld [vmem:[%s13845_s0 + $0x180] sm:$0xff] }
 0x328   : > { %9401 = vmatpush1.bf16.msra.mxu0 %v11136_v41  ;;  %8943 = vmatprep.subr.bf16.mxu1 %v11141_v42  ;;  %v11235_v40 = vld [vmem:[%s13028_s15 + $0x414] ss:$8 sps:$4 sm:$0xff]   ;;  %v10028_v42 = vcombine.high %v4995_v38, %v4995_v38 }
 0x329   : > { %9402 = vmatprep.subr.bf16.mxu0 %v11144_v43  ;;  %8969 = vmatprep.mubr.bf16.mxu1 %v11223_v44  ;;  %v11238_v41 = vld [vmem:[%s13028_s15 + $0xd14] ss:$8 sps:$4 sm:$0xff]   ;;  %v10046_v43 = vcombine.high %v5004_v39, %v5004_v39  ;;  %v11233_v44 = vld [vmem:[%s13028_s15 + $0x410] ss:$8 sps:$4 sm:$0xff]  }
 0x32a   : > { %9428 = vmatprep.mubr.bf16.mxu0 %v11229_v45  ;;  %v11236_v45 = vld [vmem:[%s13028_s15 + $0xd10] ss:$8 sps:$4 sm:$0xff]  }
 0x32b   : > { %8944 = vmatpush1.bf16.msra.mxu1 %v11139_v46  ;;  %v11241_v46 = vld [vmem:[%s13028_s15 + $0x424] ss:$8 sps:$4 sm:$0xff]  }
 0x32c   : > { %9403 = vmatpush1.bf16.msra.mxu0 %v11142_v47  ;;  %8945 = vmatprep.subr.bf16.mxu1 %v11147_v48  ;;  %v11244_v47 = vld [vmem:[%s13028_s15 + $0xd24] ss:$8 sps:$4 sm:$0xff]   ;;  %v11239_v48 = vld [vmem:[%s13028_s15 + $0x420] ss:$8 sps:$4 sm:$0xff]  }
 0x32d   : > { %9404 = vmatprep.subr.bf16.mxu0 %v11150_v49  ;;  %v10027_v49 = vcombine.low %v4995_v38, %v4995_v38  ;;  %v11323_v38 = vld [vmem:[%s13028_s15 + $0x4f4] ss:$8 sps:$4 sm:$0xff]  }
 0x32f   : > { %8946 = vmatpush1.bf16.msra.mxu1 %v11145_v50  ;;  %v10045_v50 = vcombine.low %v5004_v39, %v5004_v39  ;;  %v11326_v39 = vld [vmem:[%s13028_s15 + $0xdf4] ss:$8 sps:$4 sm:$0xff]  }
 0x330   : > { %9405 = vmatpush1.bf16.msra.mxu0 %v11148_v51  ;;  %8947 = vmatprep.subr.bf16.mxu1 %v11153_v52  ;;  %v11242_v51 = vld [vmem:[%s13028_s15 + $0xd20] ss:$8 sps:$4 sm:$0xff]   ;;  %v11247_v52 = vld [vmem:[%s13028_s15 + $0x434] ss:$8 sps:$4 sm:$0xff]  }
 0x331   : > { %9406 = vmatprep.subr.bf16.mxu0 %v11156_v53  ;;  %v11250_v53 = vld [vmem:[%s13028_s15 + $0xd34] ss:$8 sps:$4 sm:$0xff]  }
 0x333   : > { %8948 = vmatpush1.bf16.msra.mxu1 %v11151_v54  ;;  %v11329_v54 = vld [vmem:[%s13845_s0 + $0x24] ss:$144 sps:$4 sm:$0xff]  }
 0x334   : > { %9407 = vmatpush1.bf16.msra.mxu0 %v11154_v55  ;;  %8949 = vmatprep.subr.bf16.mxu1 %v11159_v56  ;;  %v11335_v55 = vld [vmem:[%s13845_s0 + $0x6c] ss:$144 sps:$4 sm:$0xff]   ;;  %v11245_v56 = vld [vmem:[%s13028_s15 + $0x430] ss:$8 sps:$4 sm:$0xff]  }
 0x335   : > { %9408 = vmatprep.subr.bf16.mxu0 %v11162_v57  ;;  %v11248_v57 = vld [vmem:[%s13028_s15 + $0xd30] ss:$8 sps:$4 sm:$0xff]  }
 0x337   : > { %8950 = vmatpush1.bf16.msra.mxu1 %v11157_v58  ;;  %v11253_v58 = vld [vmem:[%s13028_s15 + $0x444] ss:$8 sps:$4 sm:$0xff]  }
 0x338   : > { %9409 = vmatpush1.bf16.msra.mxu0 %v11160_v59  ;;  %8951 = vmatprep.subr.bf16.mxu1 %v11165_v60  ;;  %v11256_v59 = vld [vmem:[%s13028_s15 + $0xd44] ss:$8 sps:$4 sm:$0xff]   ;;  %v11251_v60 = vld [vmem:[%s13028_s15 + $0x440] ss:$8 sps:$4 sm:$0xff]  }
 0x339   : > { %9410 = vmatprep.subr.bf16.mxu0 %v11168_v61  ;;  %v11254_v61 = vld [vmem:[%s13028_s15 + $0xd40] ss:$8 sps:$4 sm:$0xff]  }
 0x33b   : > { %8952 = vmatpush1.bf16.msra.mxu1 %v11163_v62  ;;  %v11259_v62 = vld [vmem:[%s13028_s15 + $0x454] ss:$8 sps:$4 sm:$0xff]  }
 0x33c   : > { %9411 = vmatpush1.bf16.msra.mxu0 %v11166_v63  ;;  %8953 = vmatprep.subr.bf16.mxu1 %v11171_v0  ;;  %v11262_v63 = vld [vmem:[%s13028_s15 + $0xd54] ss:$8 sps:$4 sm:$0xff]   ;;  %v11257_v0 = vld [vmem:[%s13028_s15 + $0x450] ss:$8 sps:$4 sm:$0xff]  }
 0x33d   : > { %9412 = vmatprep.subr.bf16.mxu0 %v11174_v1  ;;  %v11260_v1 = vld [vmem:[%s13028_s15 + $0xd50] ss:$8 sps:$4 sm:$0xff]  }
 0x33f   : > { %8954 = vmatpush1.bf16.msra.mxu1 %v11169_v2  ;;  %v11265_v2 = vld [vmem:[%s13028_s15 + $0x464] ss:$8 sps:$4 sm:$0xff]  }
 0x340   : > { %9413 = vmatpush1.bf16.msra.mxu0 %v11172_v3  ;;  %8955 = vmatprep.subr.bf16.mxu1 %v11177_v4  ;;  %v11268_v3 = vld [vmem:[%s13028_s15 + $0xd64] ss:$8 sps:$4 sm:$0xff]   ;;  %v11263_v4 = vld [vmem:[%s13028_s15 + $0x460] ss:$8 sps:$4 sm:$0xff]  }
 0x341   : > { %9414 = vmatprep.subr.bf16.mxu0 %v11180_v5  ;;  %v11266_v5 = vld [vmem:[%s13028_s15 + $0xd60] ss:$8 sps:$4 sm:$0xff]  }
 0x343   : > { %8956 = vmatpush1.bf16.msra.mxu1 %v11175_v6  ;;  %v11271_v6 = vld [vmem:[%s13028_s15 + $0x474] ss:$8 sps:$4 sm:$0xff]  }
 0x344   : > { %9415 = vmatpush1.bf16.msra.mxu0 %v11178_v7  ;;  %8957 = vmatprep.subr.bf16.mxu1 %v11183_v8  ;;  %v11274_v7 = vld [vmem:[%s13028_s15 + $0xd74] ss:$8 sps:$4 sm:$0xff]   ;;  %v11269_v8 = vld [vmem:[%s13028_s15 + $0x470] ss:$8 sps:$4 sm:$0xff]  }
 0x345   : > { %9416 = vmatprep.subr.bf16.mxu0 %v11186_v9  ;;  %v11272_v9 = vld [vmem:[%s13028_s15 + $0xd70] ss:$8 sps:$4 sm:$0xff]  }
 0x347   : > { %8958 = vmatpush1.bf16.msra.mxu1 %v11181_v10  ;;  %v11277_v10 = vld [vmem:[%s13028_s15 + $0x484] ss:$8 sps:$4 sm:$0xff]  }
 0x348   : > { %9417 = vmatpush1.bf16.msra.mxu0 %v11184_v11  ;;  %8959 = vmatprep.subr.bf16.mxu1 %v11189_v12  ;;  %v11280_v11 = vld [vmem:[%s13028_s15 + $0xd84] ss:$8 sps:$4 sm:$0xff]   ;;  %v11275_v12 = vld [vmem:[%s13028_s15 + $0x480] ss:$8 sps:$4 sm:$0xff]  }
 0x349   : > { %9418 = vmatprep.subr.bf16.mxu0 %v11192_v13  ;;  %v11278_v13 = vld [vmem:[%s13028_s15 + $0xd80] ss:$8 sps:$4 sm:$0xff]  }
 0x34b   : > { %8960 = vmatpush1.bf16.msra.mxu1 %v11187_v14  ;;  %v11283_v14 = vld [vmem:[%s13028_s15 + $0x494] ss:$8 sps:$4 sm:$0xff]  }
 0x34c   : > { %9419 = vmatpush1.bf16.msra.mxu0 %v11190_v15  ;;  %8961 = vmatprep.subr.bf16.mxu1 %v11195_v16  ;;  %v11286_v15 = vld [vmem:[%s13028_s15 + $0xd94] ss:$8 sps:$4 sm:$0xff]   ;;  %v11281_v16 = vld [vmem:[%s13028_s15 + $0x490] ss:$8 sps:$4 sm:$0xff]  }
 0x34d   : > { %9420 = vmatprep.subr.bf16.mxu0 %v11198_v17  ;;  %v11284_v17 = vld [vmem:[%s13028_s15 + $0xd90] ss:$8 sps:$4 sm:$0xff]  }
 0x34f   : > { %8962 = vmatpush1.bf16.msra.mxu1 %v11193_v18  ;;  %v11289_v18 = vld [vmem:[%s13028_s15 + $0x4a4] ss:$8 sps:$4 sm:$0xff]  }
 0x350   : > { %9421 = vmatpush1.bf16.msra.mxu0 %v11196_v19  ;;  %8963 = vmatprep.subr.bf16.mxu1 %v11201_v20  ;;  %v11292_v19 = vld [vmem:[%s13028_s15 + $0xda4] ss:$8 sps:$4 sm:$0xff]   ;;  %v11287_v20 = vld [vmem:[%s13028_s15 + $0x4a0] ss:$8 sps:$4 sm:$0xff]  }
 0x351   : > { %9422 = vmatprep.subr.bf16.mxu0 %v11204_v21  ;;  %v11290_v21 = vld [vmem:[%s13028_s15 + $0xda0] ss:$8 sps:$4 sm:$0xff]  }
 0x353   : > { %8964 = vmatpush1.bf16.msra.mxu1 %v11199_v22  ;;  %v11295_v22 = vld [vmem:[%s13028_s15 + $0x4b4] ss:$8 sps:$4 sm:$0xff]  }
 0x354   : > { %9423 = vmatpush1.bf16.msra.mxu0 %v11202_v23  ;;  %8965 = vmatprep.subr.bf16.mxu1 %v11208_v24  ;;  %v11298_v23 = vld [vmem:[%s13028_s15 + $0xdb4] ss:$8 sps:$4 sm:$0xff]   ;;  %v11293_v24 = vld [vmem:[%s13028_s15 + $0x4b0] ss:$8 sps:$4 sm:$0xff]  }
 0x355   : > { %9424 = vmatprep.subr.bf16.mxu0 %v11212_v25  ;;  %v11296_v25 = vld [vmem:[%s13028_s15 + $0xdb0] ss:$8 sps:$4 sm:$0xff]  }
 0x357   : > { %8966 = vmatpush1.bf16.msra.mxu1 %v11206_v26  ;;  %v11301_v26 = vld [vmem:[%s13028_s15 + $0x4c4] ss:$8 sps:$4 sm:$0xff]  }
 0x358   : > { %9425 = vmatpush1.bf16.msra.mxu0 %v11210_v27  ;;  %8967 = vmatprep.subr.bf16.mxu1 %v11217_v28  ;;  %v11304_v27 = vld [vmem:[%s13028_s15 + $0xdc4] ss:$8 sps:$4 sm:$0xff]   ;;  %v11299_v28 = vld [vmem:[%s13028_s15 + $0x4c0] ss:$8 sps:$4 sm:$0xff]  }
 0x359   : > { %9426 = vmatprep.subr.bf16.mxu0 %v11220_v29  ;;  %v11302_v29 = vld [vmem:[%s13028_s15 + $0xdc0] ss:$8 sps:$4 sm:$0xff]  }
 0x35b   : > { %8968 = vmatpush1.bf16.msra.mxu1 %v11215_v30  ;;  %v11307_v30 = vld [vmem:[%s13028_s15 + $0x4d4] ss:$8 sps:$4 sm:$0xff]  }
 0x35c   : > { %9427 = vmatpush1.bf16.msra.mxu0 %v11218_v31  ;;  %8988 = vmatprep.subr.bf16.mxu1 %v11226_v32  ;;  %v11310_v31 = vld [vmem:[%s13028_s15 + $0xdd4] ss:$8 sps:$4 sm:$0xff]   ;;  %v11305_v32 = vld [vmem:[%s13028_s15 + $0x4d0] ss:$8 sps:$4 sm:$0xff]  }
 0x35d   : > { %9447 = vmatprep.subr.bf16.mxu0 %v11232_v34  ;;  %v11314_v34 = vld [vmem:[%s13028_s15 + $0x4e4] ss:$8 sps:$4 sm:$0xff]  }
 0x35e   : > { %8970 = vmatmul.mubr.bf16.vlgmr.msra.gmra.mrb[0].mxu1 %v11221_v33  ;;  %v11308_v33 = vld [vmem:[%s13028_s15 + $0xdd0] ss:$8 sps:$4 sm:$0xff]  }
 0x35f   : > { %9429 = vmatmul.mubr.bf16.vlgmr.msra.gmra.mrb[0].mxu0 %v11227_v36  ;;  %8989 = vmatpush1.bf16.msra.mxu1 %v11224_v35  ;;  %v11318_v35 = vld [vmem:[%s13028_s15 + $0xde4] ss:$8 sps:$4 sm:$0xff]   ;;  %v11312_v36 = vld [vmem:[%s13028_s15 + $0x4e0] ss:$8 sps:$4 sm:$0xff]  }
 0x360   : > { %9448 = vmatpush1.bf16.msra.mxu0 %v11230_v37  ;;  %8990 = vmatprep.subr.bf16.mxu1 %v11235_v40  ;;  %v11316_v37 = vld [vmem:[%s13028_s15 + $0xde0] ss:$8 sps:$4 sm:$0xff]   ;;  %v11321_v40 = vld [vmem:[%s13028_s15 + $0x4f0] ss:$8 sps:$4 sm:$0xff]  }
 0x361   : > { %9449 = vmatprep.subr.bf16.mxu0 %v11238_v41  ;;  %8979 = vmatprep.mubr.bf16.mxu1 %v10028_v42  ;;  %v11324_v41 = vld [vmem:[%s13028_s15 + $0xdf0] ss:$8 sps:$4 sm:$0xff]   ;;  %v11332_v42 = vld [vmem:[%s13028_s15 + $0x504] ss:$8 sps:$4 sm:$0xff]  }
 0x362   : > { %9438 = vmatprep.mubr.bf16.mxu0 %v10046_v43  ;;  %v11338_v43 = vld [vmem:[%s13028_s15 + $0xe04] ss:$8 sps:$4 sm:$0xff]  }
 0x363   : > { %8991 = vmatpush1.bf16.msra.mxu1 %v11233_v44  ;;  %v11327_v44 = vld [vmem:[%s13845_s0 + $0x20] ss:$144 sps:$4 sm:$0xff]  }
 0x364   : > { %9450 = vmatpush1.bf16.msra.mxu0 %v11236_v45  ;;  %8992 = vmatprep.subr.bf16.mxu1 %v11241_v46  ;;  %v11333_v45 = vld [vmem:[%s13845_s0 + $0x68] ss:$144 sps:$4 sm:$0xff]   ;;  %v4996_v46 = vld [vmem:[%s13845_s0 + $0x140] sm:$0xff] }
 0x365   : > { %9451 = vmatprep.subr.bf16.mxu0 %v11244_v47  ;;  %v5005_v47 = vld [vmem:[%s13845_s0 + $0x188] sm:$0xff] }
 0x366   : > { %8980 = vmatmul.mubr.bf16.gmra.mrb[4].mxu1 %v10027_v49  ;;  %v11336_v49 = vld [vmem:[%s13028_s15 + $0xe00] ss:$8 sps:$4 sm:$0xff]  }
 0x367   : > { %9439 = vmatmul.mubr.bf16.gmra.mrb[4].mxu0 %v10045_v50  ;;  %8993 = vmatpush1.bf16.msra.mxu1 %v11239_v48  ;;  %v11330_v48 = vld [vmem:[%s13028_s15 + $0x500] ss:$8 sps:$4 sm:$0xff]   ;;  %v11341_v50 = vld [vmem:[%s13028_s15 + $0x514] ss:$8 sps:$4 sm:$0xff]  }
 0x368   : > { %9452 = vmatpush1.bf16.msra.mxu0 %v11242_v51  ;;  %8994 = vmatprep.subr.bf16.mxu1 %v11247_v52  ;;  %v11344_v51 = vld [vmem:[%s13028_s15 + $0xe14] ss:$8 sps:$4 sm:$0xff]   ;;  %v10030_v52 = vcombine.high %v4996_v46, %v4996_v46 }
 0x369   : > { %9453 = vmatprep.subr.bf16.mxu0 %v11250_v53  ;;  %9020 = vmatprep.mubr.bf16.mxu1 %v11329_v54  ;;  %v10048_v53 = vcombine.high %v5005_v47, %v5005_v47  ;;  %v11339_v54 = vld [vmem:[%s13028_s15 + $0x510] ss:$8 sps:$4 sm:$0xff]  }
 0x36a   : > { %9479 = vmatprep.mubr.bf16.mxu0 %v11335_v55  ;;  %v11342_v55 = vld [vmem:[%s13028_s15 + $0xe10] ss:$8 sps:$4 sm:$0xff]  }
 0x36b   : > { %8995 = vmatpush1.bf16.msra.mxu1 %v11245_v56  ;;  %v11347_v56 = vld [vmem:[%s13028_s15 + $0x524] ss:$8 sps:$4 sm:$0xff]  }
 0x36c   : > { %9454 = vmatpush1.bf16.msra.mxu0 %v11248_v57  ;;  %8996 = vmatprep.subr.bf16.mxu1 %v11253_v58  ;;  %v11350_v57 = vld [vmem:[%s13028_s15 + $0xe24] ss:$8 sps:$4 sm:$0xff]   ;;  %v11345_v58 = vld [vmem:[%s13028_s15 + $0x520] ss:$8 sps:$4 sm:$0xff]  }
 0x36d   : > { %9455 = vmatprep.subr.bf16.mxu0 %v11256_v59  ;;  %v11348_v59 = vld [vmem:[%s13028_s15 + $0xe20] ss:$8 sps:$4 sm:$0xff]  }
 0x36f   : > { %8997 = vmatpush1.bf16.msra.mxu1 %v11251_v60  ;;  %v10029_v60 = vcombine.low %v4996_v46, %v4996_v46  ;;  %v11418_v46 = vld [vmem:[%s13028_s15 + $0x5e0] ss:$8 sps:$4 sm:$0xff]  }
 0x370   : > { %9456 = vmatpush1.bf16.msra.mxu0 %v11254_v61  ;;  %8998 = vmatprep.subr.bf16.mxu1 %v11259_v62  ;;  %v10047_v61 = vcombine.low %v5005_v47, %v5005_v47  ;;  %v11353_v62 = vld [vmem:[%s13028_s15 + $0x534] ss:$8 sps:$4 sm:$0xff]   ;;  %v11422_v47 = vld [vmem:[%s13028_s15 + $0xee0] ss:$8 sps:$4 sm:$0xff]  }
 0x371   : > { %9457 = vmatprep.subr.bf16.mxu0 %v11262_v63  ;;  %v11356_v63 = vld [vmem:[%s13028_s15 + $0xe34] ss:$8 sps:$4 sm:$0xff]  }
 0x373   : > { %8999 = vmatpush1.bf16.msra.mxu1 %v11257_v0  ;;  %v11435_v0 = vld [vmem:[%s13845_s0 + $0x2c] ss:$144 sps:$4 sm:$0xff]  }
 0x374   : > { %9458 = vmatpush1.bf16.msra.mxu0 %v11260_v1  ;;  %9000 = vmatprep.subr.bf16.mxu1 %v11265_v2  ;;  %v11441_v1 = vld [vmem:[%s13845_s0 + $0x74] ss:$144 sps:$4 sm:$0xff]   ;;  %v11351_v2 = vld [vmem:[%s13028_s15 + $0x530] ss:$8 sps:$4 sm:$0xff]  }
 0x375   : > { %9459 = vmatprep.subr.bf16.mxu0 %v11268_v3  ;;  %v11354_v3 = vld [vmem:[%s13028_s15 + $0xe30] ss:$8 sps:$4 sm:$0xff]  }
 0x377   : > { %9001 = vmatpush1.bf16.msra.mxu1 %v11263_v4  ;;  %v11359_v4 = vld [vmem:[%s13028_s15 + $0x544] ss:$8 sps:$4 sm:$0xff]  }
 0x378   : > { %9460 = vmatpush1.bf16.msra.mxu0 %v11266_v5  ;;  %9002 = vmatprep.subr.bf16.mxu1 %v11271_v6  ;;  %v11362_v5 = vld [vmem:[%s13028_s15 + $0xe44] ss:$8 sps:$4 sm:$0xff]   ;;  %v11357_v6 = vld [vmem:[%s13028_s15 + $0x540] ss:$8 sps:$4 sm:$0xff]  }
 0x379   : > { %9461 = vmatprep.subr.bf16.mxu0 %v11274_v7  ;;  %v11360_v7 = vld [vmem:[%s13028_s15 + $0xe40] ss:$8 sps:$4 sm:$0xff]  }
 0x37b   : > { %9003 = vmatpush1.bf16.msra.mxu1 %v11269_v8  ;;  %v11365_v8 = vld [vmem:[%s13028_s15 + $0x554] ss:$8 sps:$4 sm:$0xff]  }
 0x37c   : > { %9462 = vmatpush1.bf16.msra.mxu0 %v11272_v9  ;;  %9004 = vmatprep.subr.bf16.mxu1 %v11277_v10  ;;  %v11368_v9 = vld [vmem:[%s13028_s15 + $0xe54] ss:$8 sps:$4 sm:$0xff]   ;;  %v11363_v10 = vld [vmem:[%s13028_s15 + $0x550] ss:$8 sps:$4 sm:$0xff]  }
 0x37d   : > { %9463 = vmatprep.subr.bf16.mxu0 %v11280_v11  ;;  %v11366_v11 = vld [vmem:[%s13028_s15 + $0xe50] ss:$8 sps:$4 sm:$0xff]  }
 0x37f   : > { %9005 = vmatpush1.bf16.msra.mxu1 %v11275_v12  ;;  %v11371_v12 = vld [vmem:[%s13028_s15 + $0x564] ss:$8 sps:$4 sm:$0xff]  }
 0x380   : > { %9464 = vmatpush1.bf16.msra.mxu0 %v11278_v13  ;;  %9006 = vmatprep.subr.bf16.mxu1 %v11283_v14  ;;  %v11374_v13 = vld [vmem:[%s13028_s15 + $0xe64] ss:$8 sps:$4 sm:$0xff]   ;;  %v11369_v14 = vld [vmem:[%s13028_s15 + $0x560] ss:$8 sps:$4 sm:$0xff]  }
 0x381   : > { %9465 = vmatprep.subr.bf16.mxu0 %v11286_v15  ;;  %v11372_v15 = vld [vmem:[%s13028_s15 + $0xe60] ss:$8 sps:$4 sm:$0xff]  }
 0x383   : > { %9007 = vmatpush1.bf16.msra.mxu1 %v11281_v16  ;;  %v11377_v16 = vld [vmem:[%s13028_s15 + $0x574] ss:$8 sps:$4 sm:$0xff]  }
 0x384   : > { %9466 = vmatpush1.bf16.msra.mxu0 %v11284_v17  ;;  %9008 = vmatprep.subr.bf16.mxu1 %v11289_v18  ;;  %v11380_v17 = vld [vmem:[%s13028_s15 + $0xe74] ss:$8 sps:$4 sm:$0xff]   ;;  %v11375_v18 = vld [vmem:[%s13028_s15 + $0x570] ss:$8 sps:$4 sm:$0xff]  }
 0x385   : > { %9467 = vmatprep.subr.bf16.mxu0 %v11292_v19  ;;  %v11378_v19 = vld [vmem:[%s13028_s15 + $0xe70] ss:$8 sps:$4 sm:$0xff]  }
 0x387   : > { %9009 = vmatpush1.bf16.msra.mxu1 %v11287_v20  ;;  %v11383_v20 = vld [vmem:[%s13028_s15 + $0x584] ss:$8 sps:$4 sm:$0xff]  }
 0x388   : > { %9468 = vmatpush1.bf16.msra.mxu0 %v11290_v21  ;;  %9010 = vmatprep.subr.bf16.mxu1 %v11295_v22  ;;  %v11386_v21 = vld [vmem:[%s13028_s15 + $0xe84] ss:$8 sps:$4 sm:$0xff]   ;;  %v11381_v22 = vld [vmem:[%s13028_s15 + $0x580] ss:$8 sps:$4 sm:$0xff]  }
 0x389   : > { %9469 = vmatprep.subr.bf16.mxu0 %v11298_v23  ;;  %v11384_v23 = vld [vmem:[%s13028_s15 + $0xe80] ss:$8 sps:$4 sm:$0xff]  }
 0x38b   : > { %9011 = vmatpush1.bf16.msra.mxu1 %v11293_v24  ;;  %v11389_v24 = vld [vmem:[%s13028_s15 + $0x594] ss:$8 sps:$4 sm:$0xff]  }
 0x38c   : > { %9470 = vmatpush1.bf16.msra.mxu0 %v11296_v25  ;;  %9012 = vmatprep.subr.bf16.mxu1 %v11301_v26  ;;  %v11392_v25 = vld [vmem:[%s13028_s15 + $0xe94] ss:$8 sps:$4 sm:$0xff]   ;;  %v11387_v26 = vld [vmem:[%s13028_s15 + $0x590] ss:$8 sps:$4 sm:$0xff]  }
 0x38d   : > { %9471 = vmatprep.subr.bf16.mxu0 %v11304_v27  ;;  %v11390_v27 = vld [vmem:[%s13028_s15 + $0xe90] ss:$8 sps:$4 sm:$0xff]  }
 0x38f   : > { %9013 = vmatpush1.bf16.msra.mxu1 %v11299_v28  ;;  %v11395_v28 = vld [vmem:[%s13028_s15 + $0x5a4] ss:$8 sps:$4 sm:$0xff]  }
 0x390   : > { %9472 = vmatpush1.bf16.msra.mxu0 %v11302_v29  ;;  %9014 = vmatprep.subr.bf16.mxu1 %v11307_v30  ;;  %v11398_v29 = vld [vmem:[%s13028_s15 + $0xea4] ss:$8 sps:$4 sm:$0xff]   ;;  %v11393_v30 = vld [vmem:[%s13028_s15 + $0x5a0] ss:$8 sps:$4 sm:$0xff]  }
 0x391   : > { %9473 = vmatprep.subr.bf16.mxu0 %v11310_v31  ;;  %v11396_v31 = vld [vmem:[%s13028_s15 + $0xea0] ss:$8 sps:$4 sm:$0xff]  }
 0x393   : > { %9015 = vmatpush1.bf16.msra.mxu1 %v11305_v32  ;;  %v11401_v32 = vld [vmem:[%s13028_s15 + $0x5b4] ss:$8 sps:$4 sm:$0xff]  }
 0x394   : > { %9474 = vmatpush1.bf16.msra.mxu0 %v11308_v33  ;;  %9016 = vmatprep.subr.bf16.mxu1 %v11314_v34  ;;  %v11404_v33 = vld [vmem:[%s13028_s15 + $0xeb4] ss:$8 sps:$4 sm:$0xff]   ;;  %v11399_v34 = vld [vmem:[%s13028_s15 + $0x5b0] ss:$8 sps:$4 sm:$0xff]  }
 0x395   : > { %9475 = vmatprep.subr.bf16.mxu0 %v11318_v35  ;;  %v11402_v35 = vld [vmem:[%s13028_s15 + $0xeb0] ss:$8 sps:$4 sm:$0xff]  }
 0x397   : > { %9017 = vmatpush1.bf16.msra.mxu1 %v11312_v36  ;;  %v11407_v36 = vld [vmem:[%s13028_s15 + $0x5c4] ss:$8 sps:$4 sm:$0xff]  }
 0x398   : > { %9476 = vmatpush1.bf16.msra.mxu0 %v11316_v37  ;;  %9018 = vmatprep.subr.bf16.mxu1 %v11323_v38  ;;  %v11410_v37 = vld [vmem:[%s13028_s15 + $0xec4] ss:$8 sps:$4 sm:$0xff]   ;;  %v11405_v38 = vld [vmem:[%s13028_s15 + $0x5c0] ss:$8 sps:$4 sm:$0xff]  }
 0x399   : > { %9477 = vmatprep.subr.bf16.mxu0 %v11326_v39  ;;  %v11408_v39 = vld [vmem:[%s13028_s15 + $0xec0] ss:$8 sps:$4 sm:$0xff]  }
 0x39b   : > { %9019 = vmatpush1.bf16.msra.mxu1 %v11321_v40  ;;  %v11413_v40 = vld [vmem:[%s13028_s15 + $0x5d4] ss:$8 sps:$4 sm:$0xff]  }
 0x39c   : > { %9478 = vmatpush1.bf16.msra.mxu0 %v11324_v41  ;;  %9039 = vmatprep.subr.bf16.mxu1 %v11332_v42  ;;  %v11416_v41 = vld [vmem:[%s13028_s15 + $0xed4] ss:$8 sps:$4 sm:$0xff]   ;;  %v11411_v42 = vld [vmem:[%s13028_s15 + $0x5d0] ss:$8 sps:$4 sm:$0xff]  }
 0x39d   : > { %9498 = vmatprep.subr.bf16.mxu0 %v11338_v43  ;;  %v11414_v43 = vld [vmem:[%s13028_s15 + $0xed0] ss:$8 sps:$4 sm:$0xff]  }
 0x39e   : > { %9021 = vmatmul.mubr.bf16.vlgmr.msra.gmra.mrb[0].mxu1 %v11327_v44  ;;  %v11420_v44 = vld [vmem:[%s13028_s15 + $0x5e4] ss:$8 sps:$4 sm:$0xff]  }
 0x39f   : > { %9480 = vmatmul.mubr.bf16.vlgmr.msra.gmra.mrb[0].mxu0 %v11333_v45  ;;  %9040 = vmatpush1.bf16.msra.mxu1 %v11330_v48  ;;  %v11424_v45 = vld [vmem:[%s13028_s15 + $0xee4] ss:$8 sps:$4 sm:$0xff]   ;;  %v11429_v48 = vld [vmem:[%s13028_s15 + $0x5f4] ss:$8 sps:$4 sm:$0xff]  }
 0x3a0   : > { %9499 = vmatpush1.bf16.msra.mxu0 %v11336_v49  ;;  %9041 = vmatprep.subr.bf16.mxu1 %v11341_v50  ;;  %v11432_v49 = vld [vmem:[%s13028_s15 + $0xef4] ss:$8 sps:$4 sm:$0xff]   ;;  %v11427_v50 = vld [vmem:[%s13028_s15 + $0x5f0] ss:$8 sps:$4 sm:$0xff]  }
 0x3a1   : > { %9500 = vmatprep.subr.bf16.mxu0 %v11344_v51  ;;  %9030 = vmatprep.mubr.bf16.mxu1 %v10030_v52  ;;  %v11430_v51 = vld [vmem:[%s13028_s15 + $0xef0] ss:$8 sps:$4 sm:$0xff]   ;;  %v11438_v52 = vld [vmem:[%s13028_s15 + $0x604] ss:$8 sps:$4 sm:$0xff]  }
 0x3a2   : > { %9489 = vmatprep.mubr.bf16.mxu0 %v10048_v53  ;;  %v11444_v53 = vld [vmem:[%s13028_s15 + $0xf04] ss:$8 sps:$4 sm:$0xff]  }
 0x3a3   : > { %9042 = vmatpush1.bf16.msra.mxu1 %v11339_v54  ;;  %v11433_v54 = vld [vmem:[%s13845_s0 + $0x28] ss:$144 sps:$4 sm:$0xff]  }
 0x3a4   : > { %9501 = vmatpush1.bf16.msra.mxu0 %v11342_v55  ;;  %9043 = vmatprep.subr.bf16.mxu1 %v11347_v56  ;;  %v11439_v55 = vld [vmem:[%s13845_s0 + $0x70] ss:$144 sps:$4 sm:$0xff]   ;;  %v4997_v56 = vld [vmem:[%s13845_s0 + $0x148] sm:$0xff] }
 0x3a5   : > { %9502 = vmatprep.subr.bf16.mxu0 %v11350_v57  ;;  %v5006_v57 = vld [vmem:[%s13845_s0 + $0x190] sm:$0xff] }
 0x3a6   : > { %9031 = vmatmul.mubr.bf16.gmra.mrb[4].mxu1 %v10029_v60  ;;  %v11447_v60 = vld [vmem:[%s13028_s15 + $0x614] ss:$8 sps:$4 sm:$0xff]  }
 0x3a7   : > { %9490 = vmatmul.mubr.bf16.gmra.mrb[4].mxu0 %v10047_v61  ;;  %9044 = vmatpush1.bf16.msra.mxu1 %v11345_v58  ;;  %v11436_v58 = vld [vmem:[%s13028_s15 + $0x600] ss:$8 sps:$4 sm:$0xff]   ;;  %v11450_v61 = vld [vmem:[%s13028_s15 + $0xf14] ss:$8 sps:$4 sm:$0xff]  }
 0x3a8   : > { %9503 = vmatpush1.bf16.msra.mxu0 %v11348_v59  ;;  %9045 = vmatprep.subr.bf16.mxu1 %v11353_v62  ;;  %v11442_v59 = vld [vmem:[%s13028_s15 + $0xf00] ss:$8 sps:$4 sm:$0xff]   ;;  %v10032_v62 = vcombine.high %v4997_v56, %v4997_v56 }
 0x3a9   : > { %9504 = vmatprep.subr.bf16.mxu0 %v11356_v63  ;;  %9071 = vmatprep.mubr.bf16.mxu1 %v11435_v0  ;;  %v10050_v63 = vcombine.high %v5006_v57, %v5006_v57  ;;  %v11445_v0 = vld [vmem:[%s13028_s15 + $0x610] ss:$8 sps:$4 sm:$0xff]  }
 0x3aa   : > { %9530 = vmatprep.mubr.bf16.mxu0 %v11441_v1  ;;  %v11448_v1 = vld [vmem:[%s13028_s15 + $0xf10] ss:$8 sps:$4 sm:$0xff]  }
 0x3ab   : > { %9046 = vmatpush1.bf16.msra.mxu1 %v11351_v2  ;;  %v11453_v2 = vld [vmem:[%s13028_s15 + $0x624] ss:$8 sps:$4 sm:$0xff]  }
 0x3ac   : > { %9505 = vmatpush1.bf16.msra.mxu0 %v11354_v3  ;;  %9047 = vmatprep.subr.bf16.mxu1 %v11359_v4  ;;  %v11456_v3 = vld [vmem:[%s13028_s15 + $0xf24] ss:$8 sps:$4 sm:$0xff]   ;;  %v10031_v4 = vcombine.low %v4997_v56, %v4997_v56  ;;  %v11524_v56 = vld [vmem:[%s13028_s15 + $0x6e0] ss:$8 sps:$4 sm:$0xff]  }
 0x3ad   : > { %9506 = vmatprep.subr.bf16.mxu0 %v11362_v5  ;;  %v10049_v5 = vcombine.low %v5006_v57, %v5006_v57  ;;  %v11528_v57 = vld [vmem:[%s13028_s15 + $0xfe0] ss:$8 sps:$4 sm:$0xff]  }
 0x3af   : > { %9048 = vmatpush1.bf16.msra.mxu1 %v11357_v6  ;;  %v11451_v6 = vld [vmem:[%s13028_s15 + $0x620] ss:$8 sps:$4 sm:$0xff]  }
 0x3b0   : > { %9507 = vmatpush1.bf16.msra.mxu0 %v11360_v7  ;;  %9049 = vmatprep.subr.bf16.mxu1 %v11365_v8  ;;  %v11454_v7 = vld [vmem:[%s13028_s15 + $0xf20] ss:$8 sps:$4 sm:$0xff]   ;;  %v11459_v8 = vld [vmem:[%s13028_s15 + $0x634] ss:$8 sps:$4 sm:$0xff]  }
 0x3b1   : > { %9508 = vmatprep.subr.bf16.mxu0 %v11368_v9  ;;  %v11462_v9 = vld [vmem:[%s13028_s15 + $0xf34] ss:$8 sps:$4 sm:$0xff]  }
 0x3b3   : > { %9050 = vmatpush1.bf16.msra.mxu1 %v11363_v10  ;;  %v11541_v10 = vld [vmem:[%s13845_s0 + $0x34] ss:$144 sps:$4 sm:$0xff]  }
 0x3b4   : > { %9509 = vmatpush1.bf16.msra.mxu0 %v11366_v11  ;;  %9051 = vmatprep.subr.bf16.mxu1 %v11371_v12  ;;  %v11547_v11 = vld [vmem:[%s13845_s0 + $0x7c] ss:$144 sps:$4 sm:$0xff]   ;;  %v11457_v12 = vld [vmem:[%s13028_s15 + $0x630] ss:$8 sps:$4 sm:$0xff]  }
 0x3b5   : > { %9510 = vmatprep.subr.bf16.mxu0 %v11374_v13  ;;  %v11460_v13 = vld [vmem:[%s13028_s15 + $0xf30] ss:$8 sps:$4 sm:$0xff]  }
 0x3b7   : > { %9052 = vmatpush1.bf16.msra.mxu1 %v11369_v14  ;;  %v11465_v14 = vld [vmem:[%s13028_s15 + $0x644] ss:$8 sps:$4 sm:$0xff]  }
 0x3b8   : > { %9511 = vmatpush1.bf16.msra.mxu0 %v11372_v15  ;;  %9053 = vmatprep.subr.bf16.mxu1 %v11377_v16  ;;  %v11468_v15 = vld [vmem:[%s13028_s15 + $0xf44] ss:$8 sps:$4 sm:$0xff]   ;;  %v11463_v16 = vld [vmem:[%s13028_s15 + $0x640] ss:$8 sps:$4 sm:$0xff]  }
 0x3b9   : > { %9512 = vmatprep.subr.bf16.mxu0 %v11380_v17  ;;  %v11466_v17 = vld [vmem:[%s13028_s15 + $0xf40] ss:$8 sps:$4 sm:$0xff]  }
 0x3bb   : > { %9054 = vmatpush1.bf16.msra.mxu1 %v11375_v18  ;;  %v11471_v18 = vld [vmem:[%s13028_s15 + $0x654] ss:$8 sps:$4 sm:$0xff]  }
 0x3bc   : > { %9513 = vmatpush1.bf16.msra.mxu0 %v11378_v19  ;;  %9055 = vmatprep.subr.bf16.mxu1 %v11383_v20  ;;  %v11474_v19 = vld [vmem:[%s13028_s15 + $0xf54] ss:$8 sps:$4 sm:$0xff]   ;;  %v11469_v20 = vld [vmem:[%s13028_s15 + $0x650] ss:$8 sps:$4 sm:$0xff]  }
 0x3bd   : > { %9514 = vmatprep.subr.bf16.mxu0 %v11386_v21  ;;  %v11472_v21 = vld [vmem:[%s13028_s15 + $0xf50] ss:$8 sps:$4 sm:$0xff]  }
 0x3bf   : > { %9056 = vmatpush1.bf16.msra.mxu1 %v11381_v22  ;;  %v11477_v22 = vld [vmem:[%s13028_s15 + $0x664] ss:$8 sps:$4 sm:$0xff]  }
 0x3c0   : > { %9515 = vmatpush1.bf16.msra.mxu0 %v11384_v23  ;;  %9057 = vmatprep.subr.bf16.mxu1 %v11389_v24  ;;  %v11480_v23 = vld [vmem:[%s13028_s15 + $0xf64] ss:$8 sps:$4 sm:$0xff]   ;;  %v11475_v24 = vld [vmem:[%s13028_s15 + $0x660] ss:$8 sps:$4 sm:$0xff]  }
 0x3c1   : > { %9516 = vmatprep.subr.bf16.mxu0 %v11392_v25  ;;  %v11478_v25 = vld [vmem:[%s13028_s15 + $0xf60] ss:$8 sps:$4 sm:$0xff]  }
 0x3c3   : > { %9058 = vmatpush1.bf16.msra.mxu1 %v11387_v26  ;;  %v11483_v26 = vld [vmem:[%s13028_s15 + $0x674] ss:$8 sps:$4 sm:$0xff]  }
 0x3c4   : > { %9517 = vmatpush1.bf16.msra.mxu0 %v11390_v27  ;;  %9059 = vmatprep.subr.bf16.mxu1 %v11395_v28  ;;  %v11486_v27 = vld [vmem:[%s13028_s15 + $0xf74] ss:$8 sps:$4 sm:$0xff]   ;;  %v11481_v28 = vld [vmem:[%s13028_s15 + $0x670] ss:$8 sps:$4 sm:$0xff]  }
 0x3c5   : > { %9518 = vmatprep.subr.bf16.mxu0 %v11398_v29  ;;  %v11484_v29 = vld [vmem:[%s13028_s15 + $0xf70] ss:$8 sps:$4 sm:$0xff]  }
 0x3c7   : > { %9060 = vmatpush1.bf16.msra.mxu1 %v11393_v30  ;;  %v11489_v30 = vld [vmem:[%s13028_s15 + $0x684] ss:$8 sps:$4 sm:$0xff]  }
 0x3c8   : > { %9519 = vmatpush1.bf16.msra.mxu0 %v11396_v31  ;;  %9061 = vmatprep.subr.bf16.mxu1 %v11401_v32  ;;  %v11492_v31 = vld [vmem:[%s13028_s15 + $0xf84] ss:$8 sps:$4 sm:$0xff]   ;;  %v11487_v32 = vld [vmem:[%s13028_s15 + $0x680] ss:$8 sps:$4 sm:$0xff]  }
 0x3c9   : > { %9520 = vmatprep.subr.bf16.mxu0 %v11404_v33  ;;  %v11490_v33 = vld [vmem:[%s13028_s15 + $0xf80] ss:$8 sps:$4 sm:$0xff]  }
 0x3cb   : > { %9062 = vmatpush1.bf16.msra.mxu1 %v11399_v34  ;;  %v11495_v34 = vld [vmem:[%s13028_s15 + $0x694] ss:$8 sps:$4 sm:$0xff]  }
 0x3cc   : > { %9521 = vmatpush1.bf16.msra.mxu0 %v11402_v35  ;;  %9063 = vmatprep.subr.bf16.mxu1 %v11407_v36  ;;  %v11498_v35 = vld [vmem:[%s13028_s15 + $0xf94] ss:$8 sps:$4 sm:$0xff]   ;;  %v11493_v36 = vld [vmem:[%s13028_s15 + $0x690] ss:$8 sps:$4 sm:$0xff]  }
 0x3cd   : > { %9522 = vmatprep.subr.bf16.mxu0 %v11410_v37  ;;  %v11496_v37 = vld [vmem:[%s13028_s15 + $0xf90] ss:$8 sps:$4 sm:$0xff]  }
 0x3cf   : > { %9064 = vmatpush1.bf16.msra.mxu1 %v11405_v38  ;;  %v11501_v38 = vld [vmem:[%s13028_s15 + $0x6a4] ss:$8 sps:$4 sm:$0xff]  }
 0x3d0   : > { %9523 = vmatpush1.bf16.msra.mxu0 %v11408_v39  ;;  %9065 = vmatprep.subr.bf16.mxu1 %v11413_v40  ;;  %v11504_v39 = vld [vmem:[%s13028_s15 + $0xfa4] ss:$8 sps:$4 sm:$0xff]   ;;  %v11499_v40 = vld [vmem:[%s13028_s15 + $0x6a0] ss:$8 sps:$4 sm:$0xff]  }
 0x3d1   : > { %9524 = vmatprep.subr.bf16.mxu0 %v11416_v41  ;;  %v11502_v41 = vld [vmem:[%s13028_s15 + $0xfa0] ss:$8 sps:$4 sm:$0xff]  }
 0x3d3   : > { %9066 = vmatpush1.bf16.msra.mxu1 %v11411_v42  ;;  %v11507_v42 = vld [vmem:[%s13028_s15 + $0x6b4] ss:$8 sps:$4 sm:$0xff]  }
 0x3d4   : > { %9525 = vmatpush1.bf16.msra.mxu0 %v11414_v43  ;;  %9067 = vmatprep.subr.bf16.mxu1 %v11420_v44  ;;  %v11510_v43 = vld [vmem:[%s13028_s15 + $0xfb4] ss:$8 sps:$4 sm:$0xff]   ;;  %v11505_v44 = vld [vmem:[%s13028_s15 + $0x6b0] ss:$8 sps:$4 sm:$0xff]  }
 0x3d5   : > { %9526 = vmatprep.subr.bf16.mxu0 %v11424_v45  ;;  %v11508_v45 = vld [vmem:[%s13028_s15 + $0xfb0] ss:$8 sps:$4 sm:$0xff]  }
 0x3d7   : > { %9068 = vmatpush1.bf16.msra.mxu1 %v11418_v46  ;;  %v11513_v46 = vld [vmem:[%s13028_s15 + $0x6c4] ss:$8 sps:$4 sm:$0xff]  }
 0x3d8   : > { %9527 = vmatpush1.bf16.msra.mxu0 %v11422_v47  ;;  %9069 = vmatprep.subr.bf16.mxu1 %v11429_v48  ;;  %v11516_v47 = vld [vmem:[%s13028_s15 + $0xfc4] ss:$8 sps:$4 sm:$0xff]   ;;  %v11511_v48 = vld [vmem:[%s13028_s15 + $0x6c0] ss:$8 sps:$4 sm:$0xff]  }
 0x3d9   : > { %9528 = vmatprep.subr.bf16.mxu0 %v11432_v49  ;;  %v11514_v49 = vld [vmem:[%s13028_s15 + $0xfc0] ss:$8 sps:$4 sm:$0xff]  }
 0x3db   : > { %9070 = vmatpush1.bf16.msra.mxu1 %v11427_v50  ;;  %v11519_v50 = vld [vmem:[%s13028_s15 + $0x6d4] ss:$8 sps:$4 sm:$0xff]  }
 0x3dc   : > { %9529 = vmatpush1.bf16.msra.mxu0 %v11430_v51  ;;  %9090 = vmatprep.subr.bf16.mxu1 %v11438_v52  ;;  %v11522_v51 = vld [vmem:[%s13028_s15 + $0xfd4] ss:$8 sps:$4 sm:$0xff]   ;;  %v11517_v52 = vld [vmem:[%s13028_s15 + $0x6d0] ss:$8 sps:$4 sm:$0xff]  }
 0x3dd   : > { %9549 = vmatprep.subr.bf16.mxu0 %v11444_v53  ;;  %v11520_v53 = vld [vmem:[%s13028_s15 + $0xfd0] ss:$8 sps:$4 sm:$0xff]  }
 0x3de   : > { %9072 = vmatmul.mubr.bf16.vlgmr.msra.gmra.mrb[0].mxu1 %v11433_v54  ;;  %v11526_v54 = vld [vmem:[%s13028_s15 + $0x6e4] ss:$8 sps:$4 sm:$0xff]  }
 0x3df   : > { %9531 = vmatmul.mubr.bf16.vlgmr.msra.gmra.mrb[0].mxu0 %v11439_v55  ;;  %9091 = vmatpush1.bf16.msra.mxu1 %v11436_v58  ;;  %v11530_v55 = vld [vmem:[%s13028_s15 + $0xfe4] ss:$8 sps:$4 sm:$0xff]   ;;  %v11535_v58 = vld [vmem:[%s13028_s15 + $0x6f4] ss:$8 sps:$4 sm:$0xff]  }
 0x3e0   : > { %9550 = vmatpush1.bf16.msra.mxu0 %v11442_v59  ;;  %9092 = vmatprep.subr.bf16.mxu1 %v11447_v60  ;;  %v11538_v59 = vld [vmem:[%s13028_s15 + $0xff4] ss:$8 sps:$4 sm:$0xff]   ;;  %v11533_v60 = vld [vmem:[%s13028_s15 + $0x6f0] ss:$8 sps:$4 sm:$0xff]  }
 0x3e1   : > { %9551 = vmatprep.subr.bf16.mxu0 %v11450_v61  ;;  %9081 = vmatprep.mubr.bf16.mxu1 %v10032_v62  ;;  %v11536_v61 = vld [vmem:[%s13028_s15 + $0xff0] ss:$8 sps:$4 sm:$0xff]   ;;  %v11544_v62 = vld [vmem:[%s13028_s15 + $0x704] ss:$8 sps:$4 sm:$0xff]  }
 0x3e2   : > { %9540 = vmatprep.mubr.bf16.mxu0 %v10050_v63  ;;  %v11550_v63 = vld [vmem:[%s13028_s15 + $0x1004] ss:$8 sps:$4 sm:$0xff]  }
 0x3e3   : > { %9093 = vmatpush1.bf16.msra.mxu1 %v11445_v0  ;;  %v11539_v0 = vld [vmem:[%s13845_s0 + $0x30] ss:$144 sps:$4 sm:$0xff]  }
 0x3e4   : > { %9552 = vmatpush1.bf16.msra.mxu0 %v11448_v1  ;;  %9094 = vmatprep.subr.bf16.mxu1 %v11453_v2  ;;  %v11545_v1 = vld [vmem:[%s13845_s0 + $0x78] ss:$144 sps:$4 sm:$0xff]   ;;  %v4998_v2 = vld [vmem:[%s13845_s0 + $0x150] sm:$0xff] }
 0x3e5   : > { %9553 = vmatprep.subr.bf16.mxu0 %v11456_v3  ;;  %v5007_v3 = vld [vmem:[%s13845_s0 + $0x198] sm:$0xff] }
 0x3e6   : > { %9082 = vmatmul.mubr.bf16.gmra.mrb[4].mxu1 %v10031_v4  ;;  %v11542_v4 = vld [vmem:[%s13028_s15 + $0x700] ss:$8 sps:$4 sm:$0xff]  }
 0x3e7   : > { %9541 = vmatmul.mubr.bf16.gmra.mrb[4].mxu0 %v10049_v5  ;;  %9095 = vmatpush1.bf16.msra.mxu1 %v11451_v6  ;;  %v11548_v5 = vld [vmem:[%s13028_s15 + $0x1000] ss:$8 sps:$4 sm:$0xff]   ;;  %v11553_v6 = vld [vmem:[%s13028_s15 + $0x714] ss:$8 sps:$4 sm:$0xff]  }
 0x3e8   : > { %9554 = vmatpush1.bf16.msra.mxu0 %v11454_v7  ;;  %9096 = vmatprep.subr.bf16.mxu1 %v11459_v8  ;;  %v11556_v7 = vld [vmem:[%s13028_s15 + $0x1014] ss:$8 sps:$4 sm:$0xff]   ;;  %v10034_v8 = vcombine.high %v4998_v2, %v4998_v2 }
 0x3e9   : > { %9555 = vmatprep.subr.bf16.mxu0 %v11462_v9  ;;  %9122 = vmatprep.mubr.bf16.mxu1 %v11541_v10  ;;  %v10052_v9 = vcombine.high %v5007_v3, %v5007_v3  ;;  %v11551_v10 = vld [vmem:[%s13028_s15 + $0x710] ss:$8 sps:$4 sm:$0xff]  }
 0x3ea   : > { %9581 = vmatprep.mubr.bf16.mxu0 %v11547_v11  ;;  %v11554_v11 = vld [vmem:[%s13028_s15 + $0x1010] ss:$8 sps:$4 sm:$0xff]  }
 0x3eb   : > { %9097 = vmatpush1.bf16.msra.mxu1 %v11457_v12  ;;  %v11559_v12 = vld [vmem:[%s13028_s15 + $0x724] ss:$8 sps:$4 sm:$0xff]  }
 0x3ec   : > { %9556 = vmatpush1.bf16.msra.mxu0 %v11460_v13  ;;  %9098 = vmatprep.subr.bf16.mxu1 %v11465_v14  ;;  %v11562_v13 = vld [vmem:[%s13028_s15 + $0x1024] ss:$8 sps:$4 sm:$0xff]   ;;  %v10033_v14 = vcombine.low %v4998_v2, %v4998_v2  ;;  %v11630_v2 = vld [vmem:[%s13028_s15 + $0x7e0] ss:$8 sps:$4 sm:$0xff]  }
 0x3ed   : > { %9557 = vmatprep.subr.bf16.mxu0 %v11468_v15  ;;  %v10051_v15 = vcombine.low %v5007_v3, %v5007_v3  ;;  %v11634_v3 = vld [vmem:[%s13028_s15 + $0x10e0] ss:$8 sps:$4 sm:$0xff]  }
 0x3ef   : > { %9099 = vmatpush1.bf16.msra.mxu1 %v11463_v16  ;;  %v11557_v16 = vld [vmem:[%s13028_s15 + $0x720] ss:$8 sps:$4 sm:$0xff]  }
 0x3f0   : > { %9558 = vmatpush1.bf16.msra.mxu0 %v11466_v17  ;;  %9100 = vmatprep.subr.bf16.mxu1 %v11471_v18  ;;  %v11560_v17 = vld [vmem:[%s13028_s15 + $0x1020] ss:$8 sps:$4 sm:$0xff]   ;;  %v11565_v18 = vld [vmem:[%s13028_s15 + $0x734] ss:$8 sps:$4 sm:$0xff]  }
 0x3f1   : > { %9559 = vmatprep.subr.bf16.mxu0 %v11474_v19  ;;  %v11568_v19 = vld [vmem:[%s13028_s15 + $0x1034] ss:$8 sps:$4 sm:$0xff]  }
 0x3f3   : > { %9101 = vmatpush1.bf16.msra.mxu1 %v11469_v20  ;;  %v11647_v20 = vld [vmem:[%s13845_s0 + $0x3c] ss:$144 sps:$4 sm:$0xff]  }
 0x3f4   : > { %9560 = vmatpush1.bf16.msra.mxu0 %v11472_v21  ;;  %9102 = vmatprep.subr.bf16.mxu1 %v11477_v22  ;;  %v11653_v21 = vld [vmem:[%s13845_s0 + $0x84] ss:$144 sps:$4 sm:$0xff]   ;;  %v11563_v22 = vld [vmem:[%s13028_s15 + $0x730] ss:$8 sps:$4 sm:$0xff]  }
 0x3f5   : > { %9561 = vmatprep.subr.bf16.mxu0 %v11480_v23  ;;  %v11566_v23 = vld [vmem:[%s13028_s15 + $0x1030] ss:$8 sps:$4 sm:$0xff]  }
 0x3f7   : > { %9103 = vmatpush1.bf16.msra.mxu1 %v11475_v24  ;;  %v11571_v24 = vld [vmem:[%s13028_s15 + $0x744] ss:$8 sps:$4 sm:$0xff]  }
 0x3f8   : > { %9562 = vmatpush1.bf16.msra.mxu0 %v11478_v25  ;;  %9104 = vmatprep.subr.bf16.mxu1 %v11483_v26  ;;  %v11574_v25 = vld [vmem:[%s13028_s15 + $0x1044] ss:$8 sps:$4 sm:$0xff]   ;;  %v11569_v26 = vld [vmem:[%s13028_s15 + $0x740] ss:$8 sps:$4 sm:$0xff]  }
 0x3f9   : > { %9563 = vmatprep.subr.bf16.mxu0 %v11486_v27  ;;  %v11572_v27 = vld [vmem:[%s13028_s15 + $0x1040] ss:$8 sps:$4 sm:$0xff]  }
 0x3fb   : > { %9105 = vmatpush1.bf16.msra.mxu1 %v11481_v28  ;;  %v11577_v28 = vld [vmem:[%s13028_s15 + $0x754] ss:$8 sps:$4 sm:$0xff]  }
 0x3fc   : > { %9564 = vmatpush1.bf16.msra.mxu0 %v11484_v29  ;;  %9106 = vmatprep.subr.bf16.mxu1 %v11489_v30  ;;  %v11580_v29 = vld [vmem:[%s13028_s15 + $0x1054] ss:$8 sps:$4 sm:$0xff]   ;;  %v11575_v30 = vld [vmem:[%s13028_s15 + $0x750] ss:$8 sps:$4 sm:$0xff]  }
 0x3fd   : > { %9565 = vmatprep.subr.bf16.mxu0 %v11492_v31  ;;  %v11578_v31 = vld [vmem:[%s13028_s15 + $0x1050] ss:$8 sps:$4 sm:$0xff]  }
 0x3ff   : > { %9107 = vmatpush1.bf16.msra.mxu1 %v11487_v32  ;;  %v11583_v32 = vld [vmem:[%s13028_s15 + $0x764] ss:$8 sps:$4 sm:$0xff]  }
 0x400   : > { %9566 = vmatpush1.bf16.msra.mxu0 %v11490_v33  ;;  %9108 = vmatprep.subr.bf16.mxu1 %v11495_v34  ;;  %v11586_v33 = vld [vmem:[%s13028_s15 + $0x1064] ss:$8 sps:$4 sm:$0xff]   ;;  %v11581_v34 = vld [vmem:[%s13028_s15 + $0x760] ss:$8 sps:$4 sm:$0xff]  }
 0x401   : > { %9567 = vmatprep.subr.bf16.mxu0 %v11498_v35  ;;  %v11584_v35 = vld [vmem:[%s13028_s15 + $0x1060] ss:$8 sps:$4 sm:$0xff]  }
 0x403   : > { %9109 = vmatpush1.bf16.msra.mxu1 %v11493_v36  ;;  %v11589_v36 = vld [vmem:[%s13028_s15 + $0x774] ss:$8 sps:$4 sm:$0xff]  }
 0x404   : > { %9568 = vmatpush1.bf16.msra.mxu0 %v11496_v37  ;;  %9110 = vmatprep.subr.bf16.mxu1 %v11501_v38  ;;  %v11592_v37 = vld [vmem:[%s13028_s15 + $0x1074] ss:$8 sps:$4 sm:$0xff]   ;;  %v11587_v38 = vld [vmem:[%s13028_s15 + $0x770] ss:$8 sps:$4 sm:$0xff]  }
 0x405   : > { %9569 = vmatprep.subr.bf16.mxu0 %v11504_v39  ;;  %v11590_v39 = vld [vmem:[%s13028_s15 + $0x1070] ss:$8 sps:$4 sm:$0xff]  }
 0x407   : > { %9111 = vmatpush1.bf16.msra.mxu1 %v11499_v40  ;;  %v11595_v40 = vld [vmem:[%s13028_s15 + $0x784] ss:$8 sps:$4 sm:$0xff]  }
 0x408   : > { %9570 = vmatpush1.bf16.msra.mxu0 %v11502_v41  ;;  %9112 = vmatprep.subr.bf16.mxu1 %v11507_v42  ;;  %v11598_v41 = vld [vmem:[%s13028_s15 + $0x1084] ss:$8 sps:$4 sm:$0xff]   ;;  %v11593_v42 = vld [vmem:[%s13028_s15 + $0x780] ss:$8 sps:$4 sm:$0xff]  }
 0x409   : > { %9571 = vmatprep.subr.bf16.mxu0 %v11510_v43  ;;  %v11596_v43 = vld [vmem:[%s13028_s15 + $0x1080] ss:$8 sps:$4 sm:$0xff]  }
 0x40b   : > { %9113 = vmatpush1.bf16.msra.mxu1 %v11505_v44  ;;  %v11601_v44 = vld [vmem:[%s13028_s15 + $0x794] ss:$8 sps:$4 sm:$0xff]  }
 0x40c   : > { %9572 = vmatpush1.bf16.msra.mxu0 %v11508_v45  ;;  %9114 = vmatprep.subr.bf16.mxu1 %v11513_v46  ;;  %v11604_v45 = vld [vmem:[%s13028_s15 + $0x1094] ss:$8 sps:$4 sm:$0xff]   ;;  %v11599_v46 = vld [vmem:[%s13028_s15 + $0x790] ss:$8 sps:$4 sm:$0xff]  }
 0x40d   : > { %9573 = vmatprep.subr.bf16.mxu0 %v11516_v47  ;;  %v11602_v47 = vld [vmem:[%s13028_s15 + $0x1090] ss:$8 sps:$4 sm:$0xff]  }
 0x40f   : > { %9115 = vmatpush1.bf16.msra.mxu1 %v11511_v48  ;;  %v11607_v48 = vld [vmem:[%s13028_s15 + $0x7a4] ss:$8 sps:$4 sm:$0xff]  }
 0x410   : > { %9574 = vmatpush1.bf16.msra.mxu0 %v11514_v49  ;;  %9116 = vmatprep.subr.bf16.mxu1 %v11519_v50  ;;  %v11610_v49 = vld [vmem:[%s13028_s15 + $0x10a4] ss:$8 sps:$4 sm:$0xff]   ;;  %v11605_v50 = vld [vmem:[%s13028_s15 + $0x7a0] ss:$8 sps:$4 sm:$0xff]  }
 0x411   : > { %9575 = vmatprep.subr.bf16.mxu0 %v11522_v51  ;;  %v11608_v51 = vld [vmem:[%s13028_s15 + $0x10a0] ss:$8 sps:$4 sm:$0xff]  }
 0x413   : > { %9117 = vmatpush1.bf16.msra.mxu1 %v11517_v52  ;;  %v11613_v52 = vld [vmem:[%s13028_s15 + $0x7b4] ss:$8 sps:$4 sm:$0xff]  }
 0x414   : > { %9576 = vmatpush1.bf16.msra.mxu0 %v11520_v53  ;;  %9118 = vmatprep.subr.bf16.mxu1 %v11526_v54  ;;  %v11616_v53 = vld [vmem:[%s13028_s15 + $0x10b4] ss:$8 sps:$4 sm:$0xff]   ;;  %v11611_v54 = vld [vmem:[%s13028_s15 + $0x7b0] ss:$8 sps:$4 sm:$0xff]  }
 0x415   : > { %9577 = vmatprep.subr.bf16.mxu0 %v11530_v55  ;;  %v11614_v55 = vld [vmem:[%s13028_s15 + $0x10b0] ss:$8 sps:$4 sm:$0xff]  }
 0x417   : > { %9119 = vmatpush1.bf16.msra.mxu1 %v11524_v56  ;;  %v11619_v56 = vld [vmem:[%s13028_s15 + $0x7c4] ss:$8 sps:$4 sm:$0xff]  }
 0x418   : > { %9578 = vmatpush1.bf16.msra.mxu0 %v11528_v57  ;;  %9120 = vmatprep.subr.bf16.mxu1 %v11535_v58  ;;  %v11622_v57 = vld [vmem:[%s13028_s15 + $0x10c4] ss:$8 sps:$4 sm:$0xff]   ;;  %v11617_v58 = vld [vmem:[%s13028_s15 + $0x7c0] ss:$8 sps:$4 sm:$0xff]  }
 0x419   : > { %9579 = vmatprep.subr.bf16.mxu0 %v11538_v59  ;;  %v11620_v59 = vld [vmem:[%s13028_s15 + $0x10c0] ss:$8 sps:$4 sm:$0xff]  }
 0x41b   : > { %9121 = vmatpush1.bf16.msra.mxu1 %v11533_v60  ;;  %v11625_v60 = vld [vmem:[%s13028_s15 + $0x7d4] ss:$8 sps:$4 sm:$0xff]  }
 0x41c   : > { %9580 = vmatpush1.bf16.msra.mxu0 %v11536_v61  ;;  %9141 = vmatprep.subr.bf16.mxu1 %v11544_v62  ;;  %v11628_v61 = vld [vmem:[%s13028_s15 + $0x10d4] ss:$8 sps:$4 sm:$0xff]   ;;  %v11623_v62 = vld [vmem:[%s13028_s15 + $0x7d0] ss:$8 sps:$4 sm:$0xff]  }
 0x41d   : > { %9600 = vmatprep.subr.bf16.mxu0 %v11550_v63  ;;  %v11626_v63 = vld [vmem:[%s13028_s15 + $0x10d0] ss:$8 sps:$4 sm:$0xff]  }
 0x41e   : > { %9123 = vmatmul.mubr.bf16.vlgmr.msra.gmra.mrb[0].mxu1 %v11539_v0  ;;  %v11632_v0 = vld [vmem:[%s13028_s15 + $0x7e4] ss:$8 sps:$4 sm:$0xff]  }
 0x41f   : > { %9582 = vmatmul.mubr.bf16.vlgmr.msra.gmra.mrb[0].mxu0 %v11545_v1  ;;  %9142 = vmatpush1.bf16.msra.mxu1 %v11542_v4  ;;  %v11636_v1 = vld [vmem:[%s13028_s15 + $0x10e4] ss:$8 sps:$4 sm:$0xff]   ;;  %v11641_v4 = vld [vmem:[%s13028_s15 + $0x7f4] ss:$8 sps:$4 sm:$0xff]  }
 0x420   : > { %9601 = vmatpush1.bf16.msra.mxu0 %v11548_v5  ;;  %9143 = vmatprep.subr.bf16.mxu1 %v11553_v6  ;;  %v11644_v5 = vld [vmem:[%s13028_s15 + $0x10f4] ss:$8 sps:$4 sm:$0xff]   ;;  %v11639_v6 = vld [vmem:[%s13028_s15 + $0x7f0] ss:$8 sps:$4 sm:$0xff]  }
 0x421   : > { %9602 = vmatprep.subr.bf16.mxu0 %v11556_v7  ;;  %9132 = vmatprep.mubr.bf16.mxu1 %v10034_v8  ;;  %v11642_v7 = vld [vmem:[%s13028_s15 + $0x10f0] ss:$8 sps:$4 sm:$0xff]   ;;  %v11650_v8 = vld [vmem:[%s13028_s15 + $0x804] ss:$8 sps:$4 sm:$0xff]  }
 0x422   : > { %9591 = vmatprep.mubr.bf16.mxu0 %v10052_v9  ;;  %v11656_v9 = vld [vmem:[%s13028_s15 + $0x1104] ss:$8 sps:$4 sm:$0xff]  }
 0x423   : > { %9144 = vmatpush1.bf16.msra.mxu1 %v11551_v10  ;;  %v11645_v10 = vld [vmem:[%s13845_s0 + $0x38] ss:$144 sps:$4 sm:$0xff]  }
 0x424   : > { %9603 = vmatpush1.bf16.msra.mxu0 %v11554_v11  ;;  %9145 = vmatprep.subr.bf16.mxu1 %v11559_v12  ;;  %v11651_v11 = vld [vmem:[%s13845_s0 + $0x80] ss:$144 sps:$4 sm:$0xff]   ;;  %v4999_v12 = vld [vmem:[%s13845_s0 + $0x158] sm:$0xff] }
 0x425   : > { %9604 = vmatprep.subr.bf16.mxu0 %v11562_v13  ;;  %v5008_v13 = vld [vmem:[%s13845_s0 + $0x1a0] sm:$0xff] }
 0x426   : > { %9133 = vmatmul.mubr.bf16.gmra.mrb[4].mxu1 %v10033_v14  ;;  %v11648_v14 = vld [vmem:[%s13028_s15 + $0x800] ss:$8 sps:$4 sm:$0xff]  }
 0x427   : > { %9592 = vmatmul.mubr.bf16.gmra.mrb[4].mxu0 %v10051_v15  ;;  %9146 = vmatpush1.bf16.msra.mxu1 %v11557_v16  ;;  %v11654_v15 = vld [vmem:[%s13028_s15 + $0x1100] ss:$8 sps:$4 sm:$0xff]   ;;  %v11659_v16 = vld [vmem:[%s13028_s15 + $0x814] ss:$8 sps:$4 sm:$0xff]  }
 0x428   : > { %9605 = vmatpush1.bf16.msra.mxu0 %v11560_v17  ;;  %9147 = vmatprep.subr.bf16.mxu1 %v11565_v18  ;;  %v11662_v17 = vld [vmem:[%s13028_s15 + $0x1114] ss:$8 sps:$4 sm:$0xff]   ;;  %v10036_v18 = vcombine.high %v4999_v12, %v4999_v12 }
 0x429   : > { %9606 = vmatprep.subr.bf16.mxu0 %v11568_v19  ;;  %9173 = vmatprep.mubr.bf16.mxu1 %v11647_v20  ;;  %v10054_v19 = vcombine.high %v5008_v13, %v5008_v13  ;;  %v11657_v20 = vld [vmem:[%s13028_s15 + $0x810] ss:$8 sps:$4 sm:$0xff]  }
 0x42a   : > { %9632 = vmatprep.mubr.bf16.mxu0 %v11653_v21  ;;  %v11660_v21 = vld [vmem:[%s13028_s15 + $0x1110] ss:$8 sps:$4 sm:$0xff]  }
 0x42b   : > { %9148 = vmatpush1.bf16.msra.mxu1 %v11563_v22  ;;  %v11665_v22 = vld [vmem:[%s13028_s15 + $0x824] ss:$8 sps:$4 sm:$0xff]  }
 0x42c   : > { %9607 = vmatpush1.bf16.msra.mxu0 %v11566_v23  ;;  %9149 = vmatprep.subr.bf16.mxu1 %v11571_v24  ;;  %v11668_v23 = vld [vmem:[%s13028_s15 + $0x1124] ss:$8 sps:$4 sm:$0xff]   ;;  %v10035_v24 = vcombine.low %v4999_v12, %v4999_v12  ;;  %v11738_v12 = vld [vmem:[%s13028_s15 + $0x8e0] ss:$8 sps:$4 sm:$0xff]  }
 0x42d   : > { %9608 = vmatprep.subr.bf16.mxu0 %v11574_v25  ;;  %v10053_v25 = vcombine.low %v5008_v13, %v5008_v13  ;;  %v11742_v13 = vld [vmem:[%s13028_s15 + $0x11e0] ss:$8 sps:$4 sm:$0xff]  }
 0x42f   : > { %9150 = vmatpush1.bf16.msra.mxu1 %v11569_v26  ;;  %v11663_v26 = vld [vmem:[%s13028_s15 + $0x820] ss:$8 sps:$4 sm:$0xff]  }
 0x430   : > { %9609 = vmatpush1.bf16.msra.mxu0 %v11572_v27  ;;  %9151 = vmatprep.subr.bf16.mxu1 %v11577_v28  ;;  %v11666_v27 = vld [vmem:[%s13028_s15 + $0x1120] ss:$8 sps:$4 sm:$0xff]   ;;  %v11671_v28 = vld [vmem:[%s13028_s15 + $0x834] ss:$8 sps:$4 sm:$0xff]  }
 0x431   : > { %9610 = vmatprep.subr.bf16.mxu0 %v11580_v29  ;;  %v11674_v29 = vld [vmem:[%s13028_s15 + $0x1134] ss:$8 sps:$4 sm:$0xff]  }
 0x433   : > { %9152 = vmatpush1.bf16.msra.mxu1 %v11575_v30  ;;  %v11753_v30 = vld [vmem:[%s13845_s0 + $0x44] ss:$144 sps:$4 sm:$0xff]  }
 0x434   : > { %9611 = vmatpush1.bf16.msra.mxu0 %v11578_v31  ;;  %9153 = vmatprep.subr.bf16.mxu1 %v11583_v32  ;;  %v11756_v31 = vld [vmem:[%s13845_s0 + $0x8c] ss:$144 sps:$4 sm:$0xff]   ;;  %v11669_v32 = vld [vmem:[%s13028_s15 + $0x830] ss:$8 sps:$4 sm:$0xff]  }
 0x435   : > { %9612 = vmatprep.subr.bf16.mxu0 %v11586_v33  ;;  %v11672_v33 = vld [vmem:[%s13028_s15 + $0x1130] ss:$8 sps:$4 sm:$0xff]  }
 0x437   : > { %9154 = vmatpush1.bf16.msra.mxu1 %v11581_v34  ;;  %v11677_v34 = vld [vmem:[%s13028_s15 + $0x844] ss:$8 sps:$4 sm:$0xff]  }
 0x438   : > { %9613 = vmatpush1.bf16.msra.mxu0 %v11584_v35  ;;  %9155 = vmatprep.subr.bf16.mxu1 %v11589_v36  ;;  %v11680_v35 = vld [vmem:[%s13028_s15 + $0x1144] ss:$8 sps:$4 sm:$0xff]   ;;  %v11675_v36 = vld [vmem:[%s13028_s15 + $0x840] ss:$8 sps:$4 sm:$0xff]  }
 0x439   : > { %9614 = vmatprep.subr.bf16.mxu0 %v11592_v37  ;;  %v11678_v37 = vld [vmem:[%s13028_s15 + $0x1140] ss:$8 sps:$4 sm:$0xff]  }
 0x43b   : > { %9156 = vmatpush1.bf16.msra.mxu1 %v11587_v38  ;;  %v11683_v38 = vld [vmem:[%s13028_s15 + $0x854] ss:$8 sps:$4 sm:$0xff]  }
 0x43c   : > { %9615 = vmatpush1.bf16.msra.mxu0 %v11590_v39  ;;  %9157 = vmatprep.subr.bf16.mxu1 %v11595_v40  ;;  %v11686_v39 = vld [vmem:[%s13028_s15 + $0x1154] ss:$8 sps:$4 sm:$0xff]   ;;  %v11681_v40 = vld [vmem:[%s13028_s15 + $0x850] ss:$8 sps:$4 sm:$0xff]  }
 0x43d   : > { %9616 = vmatprep.subr.bf16.mxu0 %v11598_v41  ;;  %v11684_v41 = vld [vmem:[%s13028_s15 + $0x1150] ss:$8 sps:$4 sm:$0xff]  }
 0x43f   : > { %9158 = vmatpush1.bf16.msra.mxu1 %v11593_v42  ;;  %v11689_v42 = vld [vmem:[%s13028_s15 + $0x864] ss:$8 sps:$4 sm:$0xff]  }
 0x440   : > { %9617 = vmatpush1.bf16.msra.mxu0 %v11596_v43  ;;  %9159 = vmatprep.subr.bf16.mxu1 %v11601_v44  ;;  %v11692_v43 = vld [vmem:[%s13028_s15 + $0x1164] ss:$8 sps:$4 sm:$0xff]   ;;  %v11687_v44 = vld [vmem:[%s13028_s15 + $0x860] ss:$8 sps:$4 sm:$0xff]  }
 0x441   : > { %9618 = vmatprep.subr.bf16.mxu0 %v11604_v45  ;;  %v11690_v45 = vld [vmem:[%s13028_s15 + $0x1160] ss:$8 sps:$4 sm:$0xff]  }
 0x443   : > { %9160 = vmatpush1.bf16.msra.mxu1 %v11599_v46  ;;  %v11695_v46 = vld [vmem:[%s13028_s15 + $0x874] ss:$8 sps:$4 sm:$0xff]  }
 0x444   : > { %9619 = vmatpush1.bf16.msra.mxu0 %v11602_v47  ;;  %9161 = vmatprep.subr.bf16.mxu1 %v11607_v48  ;;  %v11698_v47 = vld [vmem:[%s13028_s15 + $0x1174] ss:$8 sps:$4 sm:$0xff]   ;;  %v11693_v48 = vld [vmem:[%s13028_s15 + $0x870] ss:$8 sps:$4 sm:$0xff]  }
 0x445   : > { %9620 = vmatprep.subr.bf16.mxu0 %v11610_v49  ;;  %v11696_v49 = vld [vmem:[%s13028_s15 + $0x1170] ss:$8 sps:$4 sm:$0xff]  }
 0x447   : > { %9162 = vmatpush1.bf16.msra.mxu1 %v11605_v50  ;;  %v11701_v50 = vld [vmem:[%s13028_s15 + $0x884] ss:$8 sps:$4 sm:$0xff]  }
 0x448   : > { %9621 = vmatpush1.bf16.msra.mxu0 %v11608_v51  ;;  %9163 = vmatprep.subr.bf16.mxu1 %v11613_v52  ;;  %v11704_v51 = vld [vmem:[%s13028_s15 + $0x1184] ss:$8 sps:$4 sm:$0xff]   ;;  %v11699_v52 = vld [vmem:[%s13028_s15 + $0x880] ss:$8 sps:$4 sm:$0xff]  }
 0x449   : > { %9622 = vmatprep.subr.bf16.mxu0 %v11616_v53  ;;  %v11702_v53 = vld [vmem:[%s13028_s15 + $0x1180] ss:$8 sps:$4 sm:$0xff]  }
 0x44b   : > { %9164 = vmatpush1.bf16.msra.mxu1 %v11611_v54  ;;  %v11707_v54 = vld [vmem:[%s13028_s15 + $0x894] ss:$8 sps:$4 sm:$0xff]  }
 0x44c   : > { %9623 = vmatpush1.bf16.msra.mxu0 %v11614_v55  ;;  %9165 = vmatprep.subr.bf16.mxu1 %v11619_v56  ;;  %v11710_v55 = vld [vmem:[%s13028_s15 + $0x1194] ss:$8 sps:$4 sm:$0xff]   ;;  %v11705_v56 = vld [vmem:[%s13028_s15 + $0x890] ss:$8 sps:$4 sm:$0xff]  }
 0x44d   : > { %9624 = vmatprep.subr.bf16.mxu0 %v11622_v57  ;;  %v11708_v57 = vld [vmem:[%s13028_s15 + $0x1190] ss:$8 sps:$4 sm:$0xff]  }
 0x44f   : > { %9166 = vmatpush1.bf16.msra.mxu1 %v11617_v58  ;;  %v11713_v58 = vld [vmem:[%s13028_s15 + $0x8a4] ss:$8 sps:$4 sm:$0xff]  }
 0x450   : > { %9625 = vmatpush1.bf16.msra.mxu0 %v11620_v59  ;;  %9167 = vmatprep.subr.bf16.mxu1 %v11625_v60  ;;  %v11716_v59 = vld [vmem:[%s13028_s15 + $0x11a4] ss:$8 sps:$4 sm:$0xff]   ;;  %v11711_v60 = vld [vmem:[%s13028_s15 + $0x8a0] ss:$8 sps:$4 sm:$0xff]  }
 0x451   : > { %9626 = vmatprep.subr.bf16.mxu0 %v11628_v61  ;;  %v11714_v61 = vld [vmem:[%s13028_s15 + $0x11a0] ss:$8 sps:$4 sm:$0xff]  }
 0x453   : > { %9168 = vmatpush1.bf16.msra.mxu1 %v11623_v62  ;;  %v11719_v62 = vld [vmem:[%s13028_s15 + $0x8b4] ss:$8 sps:$4 sm:$0xff]  }
 0x454   : > { %9627 = vmatpush1.bf16.msra.mxu0 %v11626_v63  ;;  %9169 = vmatprep.subr.bf16.mxu1 %v11632_v0  ;;  %v11722_v63 = vld [vmem:[%s13028_s15 + $0x11b4] ss:$8 sps:$4 sm:$0xff]   ;;  %v11717_v0 = vld [vmem:[%s13028_s15 + $0x8b0] ss:$8 sps:$4 sm:$0xff]  }
 0x455   : > { %9628 = vmatprep.subr.bf16.mxu0 %v11636_v1  ;;  %v11720_v1 = vld [vmem:[%s13028_s15 + $0x11b0] ss:$8 sps:$4 sm:$0xff]  }
 0x457   : > { %9170 = vmatpush1.bf16.msra.mxu1 %v11630_v2  ;;  %v11725_v2 = vld [vmem:[%s13028_s15 + $0x8c4] ss:$8 sps:$4 sm:$0xff]  }
 0x458   : > { %9629 = vmatpush1.bf16.msra.mxu0 %v11634_v3  ;;  %9171 = vmatprep.subr.bf16.mxu1 %v11641_v4  ;;  %v11728_v3 = vld [vmem:[%s13028_s15 + $0x11c4] ss:$8 sps:$4 sm:$0xff]   ;;  %v11723_v4 = vld [vmem:[%s13028_s15 + $0x8c0] ss:$8 sps:$4 sm:$0xff]  }
 0x459   : > { %9630 = vmatprep.subr.bf16.mxu0 %v11644_v5  ;;  %v11726_v5 = vld [vmem:[%s13028_s15 + $0x11c0] ss:$8 sps:$4 sm:$0xff]  }
 0x45b   : > { %9172 = vmatpush1.bf16.msra.mxu1 %v11639_v6  ;;  %v11731_v6 = vld [vmem:[%s13028_s15 + $0x8d4] ss:$8 sps:$4 sm:$0xff]  }
 0x45c   : > { %9631 = vmatpush1.bf16.msra.mxu0 %v11642_v7  ;;  %9192 = vmatprep.subr.bf16.mxu1 %v11650_v8  ;;  %v11734_v7 = vld [vmem:[%s13028_s15 + $0x11d4] ss:$8 sps:$4 sm:$0xff]   ;;  %v11729_v8 = vld [vmem:[%s13028_s15 + $0x8d0] ss:$8 sps:$4 sm:$0xff]  }
 0x45d   : > { %9651 = vmatprep.subr.bf16.mxu0 %v11656_v9  ;;  %v11732_v9 = vld [vmem:[%s13028_s15 + $0x11d0] ss:$8 sps:$4 sm:$0xff]  }
 0x45e   : > { %9174 = vmatmul.mubr.bf16.vlgmr.msra.gmra.mrb[0].mxu1 %v11645_v10  ;;  %v11740_v10 = vld [vmem:[%s13028_s15 + $0x8e4] ss:$8 sps:$4 sm:$0xff]  }
 0x45f   : > { %9633 = vmatmul.mubr.bf16.vlgmr.msra.gmra.mrb[0].mxu0 %v11651_v11  ;;  %9193 = vmatpush1.bf16.msra.mxu1 %v11648_v14  ;;  %v11744_v11 = vld [vmem:[%s13028_s15 + $0x11e4] ss:$8 sps:$4 sm:$0xff]   ;;  %v11747_v14 = vld [vmem:[%s13028_s15 + $0x8f4] ss:$8 sps:$4 sm:$0xff]  }
 0x460   : > { %9652 = vmatpush1.bf16.msra.mxu0 %v11654_v15  ;;  %9194 = vmatprep.subr.bf16.mxu1 %v11659_v16  ;;  %v11750_v15 = vld [vmem:[%s13028_s15 + $0x11f4] ss:$8 sps:$4 sm:$0xff]   ;;  %v11745_v16 = vld [vmem:[%s13028_s15 + $0x8f0] ss:$8 sps:$4 sm:$0xff]  }
 0x461   : > { %9653 = vmatprep.subr.bf16.mxu0 %v11662_v17  ;;  %9183 = vmatprep.mubr.bf16.mxu1 %v10036_v18  ;;  %v11748_v17 = vld [vmem:[%s13028_s15 + $0x11f0] ss:$8 sps:$4 sm:$0xff]   ;;  %v5000_v18 = vld [vmem:[%s13845_s0 + $0x160] sm:$0xff]  ;;  %s9982_s15 = sshll.u32 %s11836_s21, 1 }
 0x462   : > { %9642 = vmatprep.mubr.bf16.mxu0 %v10054_v19  ;;  %v5009_v19 = vld [vmem:[%s13845_s0 + $0x1a8] sm:$0xff]  ;;  %p4941_p10 = scmp.lt.s32.totalorder %s9982_s15, 7 }
 0x463   : > { %9195 = vmatpush1.bf16.msra.mxu1 %v11657_v20  ;;  %v11751_v20 = vld [vmem:[%s13845_s0 + $0x40] ss:$144 sps:$4 sm:$0xff]  }
 0x464   : > { %9654 = vmatpush1.bf16.msra.mxu0 %v11660_v21  ;;  %9196 = vmatprep.subr.bf16.mxu1 %v11665_v22  ;;  %v11754_v21 = vld [vmem:[%s13845_s0 + $0x88] ss:$144 sps:$4 sm:$0xff]   ;;  %v10038_v22 = vcombine.high %v5000_v18, %v5000_v18  ;;  %s13856_s15 = smov (!%p4941_p10, %s9982_s15), 7 }
 0x465   : > { %9655 = vmatprep.subr.bf16.mxu0 %v11668_v23  ;;  %v10056_v23 = vcombine.high %v5009_v19, %v5009_v19  ;;  %s4943_s24 = scalar_lea.vmem %s13847_s2, %s13856_s15  ;;  %s4948_s29 = scalar_lea.vmem %s13848_s3, %s13856_s15 }
 0x466   : > { %9184 = vmatmul.mubr.bf16.gmra.mrb[4].mxu1 %v10035_v24  ;;  %v10037_v24 = vcombine.low %v5000_v18, %v5000_v18  ;;  %s4953_s7 = scalar_lea.vmem %s13849_s4, %s13856_s15 }
 0x467   : > { %9643 = vmatmul.mubr.bf16.gmra.mrb[4].mxu0 %v10053_v25  ;;  %9197 = vmatpush1.bf16.msra.mxu1 %v11663_v26  ;;  %v10055_v25 = vcombine.low %v5009_v19, %v5009_v19  ;;  %v5588_v26 = vlaneseq }
 0x468   : > { %9656 = vmatpush1.bf16.msra.mxu0 %v11666_v27  ;;  %9198 = vmatprep.subr.bf16.mxu1 %v11671_v28 }
 0x469   : > { %9657 = vmatprep.subr.bf16.mxu0 %v11674_v29  ;;  %9224 = vmatprep.mubr.bf16.mxu1 %v11753_v30  ;;  %v13765_v27 = vshrl.u32 %v5588_v26, 7  ;;  %v5586_v29 = vld [vmem:[%s4943_s24] sm:$0x3] }
 0x46a   : > { %9683 = vmatprep.mubr.bf16.mxu0 %v11756_v31 }
 0x46b   : > { %9199 = vmatpush1.bf16.msra.mxu1 %v11669_v32  ;;  %v13772_v28 = vsub.s32 0, %v13765_v27  ;;  %v13775_v30 = vsub.s32 1, %v13765_v27 }
 0x46c   : > { %9658 = vmatpush1.bf16.msra.mxu0 %v11672_v33  ;;  %9200 = vmatprep.subr.bf16.mxu1 %v11677_v34 }
 0x46d   : > { %9659 = vmatprep.subr.bf16.mxu0 %v11680_v35  ;;  %v5591_v31 = vrot.slane %v5586_v29, %v13772_v28  ;;  %v5595_v32 = vrot.slane %v5586_v29, %v13775_v30 }
 0x46f   : > { %9201 = vmatpush1.bf16.msra.mxu1 %v11675_v36 }
 0x470   : > { %9660 = vmatpush1.bf16.msra.mxu0 %v11678_v37  ;;  %9202 = vmatprep.subr.bf16.mxu1 %v11683_v38 }
 0x471   : > { %9661 = vmatprep.subr.bf16.mxu0 %v11686_v39 }
 0x473   : > { %9203 = vmatpush1.bf16.msra.mxu1 %v11681_v40 }
 0x474   : > { %9662 = vmatpush1.bf16.msra.mxu0 %v11684_v41  ;;  %9204 = vmatprep.subr.bf16.mxu1 %v11689_v42 }
 0x475   : > { %9663 = vmatprep.subr.bf16.mxu0 %v11692_v43 }
 0x477   : > { %9205 = vmatpush1.bf16.msra.mxu1 %v11687_v44 }
 0x478   : > { %9664 = vmatpush1.bf16.msra.mxu0 %v11690_v45  ;;  %9206 = vmatprep.subr.bf16.mxu1 %v11695_v46 }
 0x479   : > { %9665 = vmatprep.subr.bf16.mxu0 %v11698_v47 }
 0x47b   : > { %9207 = vmatpush1.bf16.msra.mxu1 %v11693_v48 }
 0x47c   : > { %9666 = vmatpush1.bf16.msra.mxu0 %v11696_v49  ;;  %9208 = vmatprep.subr.bf16.mxu1 %v11701_v50 }
 0x47d   : > { %9667 = vmatprep.subr.bf16.mxu0 %v11704_v51 }
 0x47f   : > { %9209 = vmatpush1.bf16.msra.mxu1 %v11699_v52 }
 0x480   : > { %9668 = vmatpush1.bf16.msra.mxu0 %v11702_v53  ;;  %9210 = vmatprep.subr.bf16.mxu1 %v11707_v54 }
 0x481   : > { %9669 = vmatprep.subr.bf16.mxu0 %v11710_v55  ;;  %v9711_v55 = vadd.s32 16, %v13765_v27 }
 0x483   : > { %9211 = vmatpush1.bf16.msra.mxu1 %v11705_v56  ;;  %vm9714_vm0 = vcmp.lt.s32.totalorder %v9711_v55, 18 }
 0x484   : > { %9670 = vmatpush1.bf16.msra.mxu0 %v11708_v57  ;;  %9212 = vmatprep.subr.bf16.mxu1 %v11713_v58 }
 0x485   : > { %9671 = vmatprep.subr.bf16.mxu0 %v11716_v59 }
 0x487   : > { %9213 = vmatpush1.bf16.msra.mxu1 %v11711_v60 }
 0x488   : > { %9672 = vmatpush1.bf16.msra.mxu0 %v11714_v61  ;;  %9214 = vmatprep.subr.bf16.mxu1 %v11719_v62 }
 0x489   : > { %9673 = vmatprep.subr.bf16.mxu0 %v11722_v63 }
 0x48b   : > { %9215 = vmatpush1.bf16.msra.mxu1 %v11717_v0 }
 0x48c   : > { %9674 = vmatpush1.bf16.msra.mxu0 %v11720_v1  ;;  %9216 = vmatprep.subr.bf16.mxu1 %v11725_v2 }
 0x48d   : > { %9675 = vmatprep.subr.bf16.mxu0 %v11728_v3 }
 0x48f   : > { %9217 = vmatpush1.bf16.msra.mxu1 %v11723_v4 }
 0x490   : > { %9676 = vmatpush1.bf16.msra.mxu0 %v11726_v5  ;;  %9218 = vmatprep.subr.bf16.mxu1 %v11731_v6 }
 0x491   : > { %9677 = vmatprep.subr.bf16.mxu0 %v11734_v7 }
 0x493   : > { %9219 = vmatpush1.bf16.msra.mxu1 %v11729_v8 }
 0x494   : > { %9678 = vmatpush1.bf16.msra.mxu0 %v11732_v9  ;;  %9220 = vmatprep.subr.bf16.mxu1 %v11740_v10 }
 0x495   : > { %9679 = vmatprep.subr.bf16.mxu0 %v11744_v11 }
 0x497   : > { %9221 = vmatpush1.bf16.msra.mxu1 %v11738_v12 }
 0x498   : > { %9680 = vmatpush1.bf16.msra.mxu0 %v11742_v13  ;;  %9222 = vmatprep.subr.bf16.mxu1 %v11747_v14 }
 0x499   : > { %9681 = vmatprep.subr.bf16.mxu0 %v11750_v15 }
 0x49b   : > { %9223 = vmatpush1.bf16.msra.mxu1 %v11745_v16 }
 0x49c   : > { %9682 = vmatpush1.bf16.msra.mxu0 %v11748_v17 }
 0x49e   : > { %9225 = vmatmul.mubr.bf16.vlgmr.msra.gmra.mrb[0].mxu1 %v11751_v20 }
 0x49f   : > { %9684 = vmatmul.mubr.bf16.vlgmr.msra.gmra.mrb[0].mxu0 %v11754_v21  ;;  %9234 = vmatprep.mubr.bf16.mxu1 %v10038_v22 }
 0x4a0   : > { %9693 = vmatprep.mubr.bf16.mxu0 %v10056_v23 }
 0x4a6   : > { %9235 = vmatmul.mubr.bf16.gmra.mrb[4].mxu1 %v10037_v24 }
 0x4a7   : > { %9694 = vmatmul.mubr.bf16.gmra.mrb[4].mxu0 %v10055_v25 }
 0x571   : > { %v9226_v33 = vpop.f32.mrb[0].mxu1 }
 0x572   : > { %v9685_v34 = vpop.f32.mrb[0].mxu0  ;;  %v10639_v35 = vadd.f32 %v9226_v33, %v5591_v31  ;;  %v9228_v36 = vpop.f32.mrb[1].mxu1 }
 0x573   : > { %v9687_v37 = vpop.f32.mrb[1].mxu0  ;;  %v10641_v38 = vadd.f32 %v9228_v36, %v5595_v32  ;;  %v9230_v39 = vpop.f32.mrb[2].mxu1 }
 0x574   : > { %v9689_v40 = vpop.f32.mrb[2].mxu0  ;;  %v10640_v41 = vadd.f32 %v10639_v35, %v9685_v34  ;;  %v10643_v42 = vadd.f32 %v9230_v39, %v5591_v31  ;;  %v9232_v43 = vpop.f32.mrb[3].mxu1 }
 0x575   : > { %v9691_v44 = vpop.f32.mrb[3].mxu0  ;;  %v10642_v45 = vadd.f32 %v10641_v38, %v9687_v37  ;;  %v10645_v46 = vadd.f32 %v9232_v43, %v5595_v32 }
 0x576   : > { %v13779_v47 = vmax.f32 %v10640_v41, 0.0  ;;  %v10644_v48 = vadd.f32 %v10643_v42, %v9689_v40 }
 0x577   : > { %v13781_v49 = vmax.f32 %v10642_v45, 0.0  ;;  %v10646_v50 = vadd.f32 %v10645_v46, %v9691_v44 }
 0x578   : > { %v13783_v51 = vmax.f32 %v10644_v48, 0.0  ;;  %v9743_v56 = vmul.f32 %v13779_v47, %v13779_v47 }
 0x579   : > { %v13785_v52 = vmax.f32 %v10646_v50, 0.0  ;;  %v9236_v53 = vpop.f32.mrb[4].mxu1  ;;  %v9744_v62 = vmul.f32 %v13781_v49, %v13781_v49 }
 0x57a   : > { %v9695_v54 = vpop.f32.mrb[4].mxu0  ;;  %v9727_v57 = vadd.f32 %v13783_v51, %v13779_v47  ;;  %v9745_v58 = vmul.f32 %v13783_v51, %v13783_v51  ;;  %v10647_v59 = vadd.f32 %v9236_v53, %v5591_v31  ;;  %v9238_v60 = vpop.f32.mrb[5].mxu1 }
 0x57b   : > { %v9697_v61 = vpop.f32.mrb[5].mxu0  ;;  %v9735_v63 = vadd.f32 %v13785_v52, %v13781_v49  ;;  %v9746_v0 = vmul.f32 %v13785_v52, %v13785_v52  ;;  %v10649_v1 = vadd.f32 %v9238_v60, %v5595_v32  ;;  %v9240_v2 = vpop.f32.mrb[6].mxu1 }
 0x57c   : > { %v9699_v3 = vpop.f32.mrb[6].mxu0  ;;  %v9749_v4 = vadd.f32 %v9745_v58, %v9743_v56  ;;  %v10648_v5 = vadd.f32 %v10647_v59, %v9695_v54  ;;  %v9241_v6 = vpop.f32.mrb[7].mxu1 }
 0x57d   : > { %v9700_v7 = vpop.f32.mrb[7].mxu0  ;;  %v9757_v8 = vadd.f32 %v9746_v0, %v9744_v62  ;;  %v10650_v9 = vadd.f32 %v10649_v1, %v9697_v61 }
 0x57e   : > { %v13800_v10 = vmax.f32 %v10648_v5, 0.0 }
 0x57f   : > { %v13802_v11 = vmax.f32 %v10650_v9, 0.0  ;;  %v9775_v9 = vld [vmem:[%s4948_s29] sm:$0x3] }
 0x580   : > { %v9725_v12 = vsel %vm9714_vm0, %v13800_v10, 0.0 }
 0x581   : > { %v9728_v13 = vadd.f32 %v9727_v57, %v9725_v12  ;;  %v9747_v14 = vmul.f32 %v9725_v12, %v13800_v10  ;;  %v9726_v15 = vsel %vm9714_vm0, %v13802_v11, 0.0 }
 0x582   : > { %v9736_v16 = vadd.f32 %v9735_v63, %v9726_v15  ;;  %v9748_v17 = vmul.f32 %v9726_v15, %v13802_v11 }
 0x583   : > { %v9729_v18 = vrot.slane %v9728_v13, 4  ;;  %v9750_v19 = vadd.f32 %v9749_v4, %v9747_v14 }
 0x584   : > { %v9737_v20 = vrot.slane %v9736_v16, 4  ;;  %v9758_v21 = vadd.f32 %v9757_v8, %v9748_v17 }
 0x585   : > { %v9730_v22 = vadd.f32 %v9729_v18, %v9728_v13  ;;  %v9751_v23 = vrot.slane %v9750_v19, 4 }
 0x586   : > { %v9738_v24 = vadd.f32 %v9737_v20, %v9736_v16  ;;  %v9759_v25 = vrot.slane %v9758_v21, 4 }
 0x587   : > { %v9731_v26 = vrot.slane %v9730_v22, 2  ;;  %v9752_v29 = vadd.f32 %v9751_v23, %v9750_v19 }
 0x588   : > { %v9739_v31 = vrot.slane %v9738_v24, 2  ;;  %v9760_v32 = vadd.f32 %v9759_v25, %v9758_v21 }
 0x589   : > { %v9732_v33 = vadd.f32 %v9731_v26, %v9730_v22  ;;  %v9753_v34 = vrot.slane %v9752_v29, 2 }
 0x58a   : > { %v9740_v35 = vadd.f32 %v9739_v31, %v9738_v24  ;;  %v9761_v36 = vrot.slane %v9760_v32, 2 }
 0x58b   : > { %v9733_v37 = vrot.slane %v9732_v33, 1  ;;  %v9754_v38 = vadd.f32 %v9753_v34, %v9752_v29 }
 0x58c   : > { %v9741_v39 = vrot.slane %v9740_v35, 1  ;;  %v9762_v40 = vadd.f32 %v9761_v36, %v9760_v32 }
 0x58d   : > { %v9734_v41 = vadd.f32 %v9733_v37, %v9732_v33  ;;  %v9755_v42 = vrot.slane %v9754_v38, 1 }
 0x58e   : > { %v9742_v43 = vadd.f32 %v9741_v39, %v9740_v35  ;;  %v9763_v44 = vrot.slane %v9762_v40, 1 }
 0x58f   : > { %v9756_v45 = vadd.f32 %v9755_v42, %v9754_v38  ;;  %v9765_v46 = vmul.f32 0.055555556, %v9734_v41 }
 0x590   : > { %v9764_v48 = vadd.f32 %v9763_v44, %v9762_v40  ;;  %v9766_v50 = vmul.f32 0.055555556, %v9742_v43 }
 0x591   : > { %v9767_v53 = vmul.f32 0.055555556, %v9756_v45  ;;  %v9769_v54 = vmul.f32 %v9765_v46, %v9765_v46  ;;  %v9799_v55 = vsub.f32 %v13779_v47, %v9765_v46  ;;  %v9801_v56 = vsub.f32 %v13783_v51, %v9765_v46 }
 0x592   : > { %v9803_v57 = vsub.f32 %v13800_v10, %v9765_v46  ;;  %v9768_v58 = vmul.f32 0.055555556, %v9764_v48  ;;  %v9770_v59 = vmul.f32 %v9766_v50, %v9766_v50  ;;  %v9800_v60 = vsub.f32 %v13781_v49, %v9766_v50 }
 0x593   : > { %v9771_v61 = vsub.f32 %v9767_v53, %v9769_v54  ;;  %v9802_v62 = vsub.f32 %v13785_v52, %v9766_v50  ;;  %v9804_v63 = vsub.f32 %v13802_v11, %v9766_v50  ;;  %v11789_v51 = vmov 1966171168   ;;  %v9822_v11 = vld [vmem:[%s4953_s7] sm:$0x3] }
 0x594   : > { %v9772_v0 = vsub.f32 %v9768_v58, %v9770_v59  ;;  %v9784_v4 = vunpack.c.l.s4 %v11789_v51  ;;  %v9827_v13 = vrot.slane %v9822_v11, %v13772_v28  ;;  %v9831_v15 = vrot.slane %v9822_v11, %v13775_v30 }
 0x595   : > { %v9773_v1 = vmax.f32 %v9771_v61, 0.0 }
 0x596   : > { %v9774_v2 = vmax.f32 %v9772_v0, 0.0  ;;  %v9785_v5 = vunpack.c.0.s8 %v9784_v4 }
 0x597   : > { %v9776_v3 = vadd.f32 1e-05, %v9773_v1 }
 0x598   : > { %v9777_v47 = vadd.f32 1e-05, %v9774_v2  ;;  %v9788_v49 = vsub.s32 %v9785_v5, %v13765_v27 }
 0x599   : > { %11761 = vrsqrt.f32 %v9776_v3 }
 0x59a   : > { %11763 = vrsqrt.f32 %v9777_v47 }
 0x5a3   : > { %v11762_v6 = vpop.eup %11761 }
 0x5a4   : > { %v11764_v7 = vpop.eup %11763 }
 0x5a5   : > { %v9782_v52 = vcombine.low %v11762_v6, %v11764_v7 }
 0x5a7   : > { %v9789_v8 = vrot.slane %v9782_v52, %v9788_v49 }
 0x5a9   : > { %v9796_v10 = vrot.slane %v9789_v8, %v9788_v49 }
 0x5ab   : > { %v9798_v12 = vmul.f32 %v9796_v10, %v9775_v9 }
 0x5ad   : > { %v9809_v27 = vrot.slane %v9798_v12, %v13772_v28  ;;  %v9813_v14 = vrot.slane %v9798_v12, %v13775_v30 }
 0x5af   : > { %v9816_v16 = vmul.f32 %v9809_v27, %v9799_v55  ;;  %v9817_v17 = vmul.f32 %v9813_v14, %v9800_v60  ;;  %v9818_v18 = vmul.f32 %v9809_v27, %v9801_v56  ;;  %v9819_v19 = vmul.f32 %v9813_v14, %v9802_v62  ;;  %9852 = sbr.rel (!%p11851_p5) target bundleno = 1470 (0x5be), region = 96 }
 0x5b0   : > { %v9820_v20 = vmul.f32 %v9809_v27, %v9803_v57  ;;  %v9821_v21 = vmul.f32 %v9813_v14, %v9804_v63 }
 0x5b1   : > { %v9834_v22 = vadd.f32 %v9827_v13, %v9816_v16  ;;  %v9835_v23 = vadd.f32 %v9831_v15, %v9817_v17  ;;  %v9836_v24 = vadd.f32 %v9827_v13, %v9818_v18  ;;  %v9837_v25 = vadd.f32 %v9831_v15, %v9819_v19 }
 0x5b2   : > { %v9838_v26 = vadd.f32 %v9827_v13, %v9820_v20  ;;  %v9839_v29 = vadd.f32 %v9831_v15, %v9821_v21 }
 0x5b3   : > { %9840 = vst [vmem:[%s4938_s18] sm:$0xff] %v9834_v22  ;;  %9841 = vst [vmem:[%s4938_s18 + $0x8] sm:$0xff] %v9835_v23 }
 0x5b4   : > { %9842 = vst [vmem:[%s4938_s18 + $0x10] sm:$0xff] %v9836_v24  ;;  %9843 = vst [vmem:[%s4938_s18 + $0x18] sm:$0xff] %v9837_v25 }
 0x5b5   : > { %9844 = vst [vmem:[%s4938_s18 + $0x20] sm:$0xff] %v9838_v26  ;;  %9845 = vst [vmem:[%s4938_s18 + $0x28] sm:$0xff] %v9839_v29 }
 0x5ba   : > { %v9868_v28 = vld [vmem:[%s4938_s18] sm:$0xff]  ;;  %v9870_v30 = vld [vmem:[%s4938_s18 + $0x8] sm:$0xff] }
 0x5bb   : > { %v9872_v31 = vld [vmem:[%s4938_s18 + $0x10] sm:$0xff]  ;;  %v9874_v32 = vld [vmem:[%s4938_s18 + $0x18] sm:$0xff]  ;;  %9869 = vst [vmem:[%s9855_s12] sm:$0xff] %v9868_v28  ;;  %9871 = vst [vmem:[%s9855_s12 + $0x8] sm:$0xff] %v9870_v30 }
 0x5bc   : > { %v9876_v33 = vld [vmem:[%s4938_s18 + $0x20] sm:$0xff]  ;;  %v9878_v34 = vld [vmem:[%s4938_s18 + $0x28] sm:$0xff]  ;;  %9873 = vst [vmem:[%s9855_s12 + $0x40] sm:$0xff] %v9872_v31  ;;  %9875 = vst [vmem:[%s9855_s12 + $0x48] sm:$0xff] %v9874_v32 }
 0x5bd   : > { %9877 = vst [vmem:[%s9855_s12 + $0x80] sm:$0xff] %v9876_v33  ;;  %9879 = vst [vmem:[%s9855_s12 + $0x88] sm:$0xff] %v9878_v34 }
 0x5be PF: > { %p12_p11 = scmp.ge.s32.totalorder %s11839_s22, 6   ;;  %s13852_s18 = smov %s11783_s19 }
 0x5bf   : > { %s13853_s19 = smov %s11849_s25  ;;  %s13854_s20 = smov %s11839_s22 }
 0x5c0   :  { %14 = sbr.rel (!%p12_p11) target bundleno = 2 (0x2), region = 165 }

// kernel: cnn_bn_forward.7
= control target key start
LH: loop header
LB: loop body
LE: loop exit
PB: predicated region body
PF: predicated region fallthrough
CT: control target
= control target key end

     0   :  { %vm48_vm0 = vcmask 1040384   ;;  %vm377_vm1 = vcmask 1041409   ;;  %s1551_s0 = inlined_call_operand.vmem [shape: f32[2,9,1024], index: 0, kind: input, shape index: {}]   ;;  %s1552_s1 = inlined_call_operand.vmem [shape: bf16[1024,128], index: 1, kind: input, shape index: {}]   ;;  %s1553_s2 = inlined_call_operand.vmem [shape: f32[1,128], index: 2, kind: input, shape index: {}]   ;;  %s1554_s3 = inlined_call_operand.hbm [shape: f32[2,128], index: 3, kind: output, shape index: {}]  }
   0x1   :  { %v1115_v0 = vld [vmem:[%s1552_s1 + $0x40] sm:$0xff]   ;;  %v1119_v4 = vld [vmem:[%s1552_s1 + $0x48] sm:$0xff]   ;;  %v1123_v8 = vld [vmem:[%s1552_s1 + $0x50] sm:$0xff]  }
   0x2   :  { %v1116_v1 = vld [vmem:[%s1552_s1 + $0xc0] sm:$0xff]   ;;  %1026 = vmatprep.subr.bf16.mxu0 %v1115_v0  ;;  %v1120_v5 = vld [vmem:[%s1552_s1 + $0xc8] sm:$0xff]   ;;  %v1124_v9 = vld [vmem:[%s1552_s1 + $0xd0] sm:$0xff]  }
   0x3   :  { %v1117_v2 = vld [vmem:[%s1552_s1] sm:$0xff]   ;;  %1048 = vmatprep.subr.bf16.mxu1 %v1116_v1  ;;  %v1121_v6 = vld [vmem:[%s1552_s1 + $0x8] sm:$0xff]   ;;  %v1125_v10 = vld [vmem:[%s1552_s1 + $0x10] sm:$0xff]  }
   0x4   :  { %v1118_v3 = vld [vmem:[%s1552_s1 + $0x80] sm:$0xff]   ;;  %1027 = vmatpush3.bf16.msra.mxu0 %v1117_v2  ;;  %v1122_v7 = vld [vmem:[%s1552_s1 + $0x88] sm:$0xff]   ;;  %v1126_v11 = vld [vmem:[%s1552_s1 + $0x90] sm:$0xff]  }
   0x5   :  { %1049 = vmatpush3.bf16.msra.mxu1 %v1118_v3  ;;  %1028 = vmatprep.subr.bf16.mxu0 %v1119_v4  ;;  %v1127_v12 = vld [vmem:[%s1552_s1 + $0x58] sm:$0xff]   ;;  %v1131_v16 = vld [vmem:[%s1552_s1 + $0x60] sm:$0xff]   ;;  %v1135_v20 = vld [vmem:[%s1552_s1 + $0x68] sm:$0xff]  }
   0x6   :  { %1050 = vmatprep.subr.bf16.mxu1 %v1120_v5  ;;  %v1128_v13 = vld [vmem:[%s1552_s1 + $0xd8] sm:$0xff]   ;;  %v1132_v17 = vld [vmem:[%s1552_s1 + $0xe0] sm:$0xff]   ;;  %v1136_v21 = vld [vmem:[%s1552_s1 + $0xe8] sm:$0xff]  }
   0x7   :  { %v1129_v14 = vld [vmem:[%s1552_s1 + $0x18] sm:$0xff]   ;;  %v1133_v18 = vld [vmem:[%s1552_s1 + $0x20] sm:$0xff]   ;;  %v1137_v22 = vld [vmem:[%s1552_s1 + $0x28] sm:$0xff]  }
   0x8   :  { %1029 = vmatpush3.bf16.msra.mxu0 %v1121_v6  ;;  %v1130_v15 = vld [vmem:[%s1552_s1 + $0x98] sm:$0xff]   ;;  %v1134_v19 = vld [vmem:[%s1552_s1 + $0xa0] sm:$0xff]   ;;  %v1138_v23 = vld [vmem:[%s1552_s1 + $0xa8] sm:$0xff]  }
   0x9   :  { %1051 = vmatpush3.bf16.msra.mxu1 %v1122_v7  ;;  %1030 = vmatprep.subr.bf16.mxu0 %v1123_v8  ;;  %v1139_v24 = vld [vmem:[%s1552_s1 + $0x70] sm:$0xff]   ;;  %v1143_v28 = vld [vmem:[%s1552_s1 + $0x78] sm:$0xff]   ;;  %v17_v32 = vld [vmem:[%s1551_s0 + $0x8] sm:$0xff] }
   0xa   :  { %1052 = vmatprep.subr.bf16.mxu1 %v1124_v9  ;;  %v1140_v25 = vld [vmem:[%s1552_s1 + $0xf0] sm:$0xff]   ;;  %v1144_v29 = vld [vmem:[%s1552_s1 + $0xf8] sm:$0xff]   ;;  %v25_v33 = vld [vmem:[%s1551_s0 + $0x48] sm:$0x1] }
   0xb   :  { %v1141_v26 = vld [vmem:[%s1552_s1 + $0x30] sm:$0xff]   ;;  %v1145_v30 = vld [vmem:[%s1552_s1 + $0x38] sm:$0xff]   ;;  %v33_v34 = vld [vmem:[%s1551_s0 + $0x88] sm:$0xff]  ;;  %v57_v36 = vsel %vm48_vm0, %v25_v33, 0.0 }
   0xc   :  { %1031 = vmatpush3.bf16.msra.mxu0 %v1125_v10  ;;  %v1142_v27 = vld [vmem:[%s1552_s1 + $0xb0] sm:$0xff]   ;;  %v1146_v31 = vld [vmem:[%s1552_s1 + $0xb8] sm:$0xff]   ;;  %v41_v35 = vld [vmem:[%s1551_s0 + $0xc8] sm:$0x1]  ;;  %v58_v39 = vadd.f32 %v57_v36, %v17_v32 }
   0xd   :  { %1053 = vmatpush3.bf16.msra.mxu1 %v1126_v11  ;;  %1032 = vmatprep.subr.bf16.mxu0 %v1127_v12  ;;  %v19_v37 = vld [vmem:[%s1551_s0 + $0x18] sm:$0xff]  ;;  %v121_v40 = vsel %vm48_vm0, %v41_v35, 0.0  ;;  %v16_v44 = vld [vmem:[%s1551_s0] sm:$0xff]  ;;  %v18_v55 = vld [vmem:[%s1551_s0 + $0x10] sm:$0xff] }
   0xe   :  { %1054 = vmatprep.subr.bf16.mxu1 %v1128_v13  ;;  %v27_v38 = vld [vmem:[%s1551_s0 + $0x58] sm:$0x1]  ;;  %v122_v45 = vadd.f32 %v121_v40, %v33_v34  ;;  %v24_v48 = vld [vmem:[%s1551_s0 + $0x40] sm:$0x1]  ;;  %v59_v51 = vrot.slane %v58_v39, 4  ;;  %v34_v61 = vld [vmem:[%s1551_s0 + $0x90] sm:$0xff] }
   0xf   :  { %v35_v41 = vld [vmem:[%s1551_s0 + $0x98] sm:$0xff]  ;;  %v73_v43 = vsel %vm48_vm0, %v27_v38, 0.0  ;;  %v32_v49 = vld [vmem:[%s1551_s0 + $0x80] sm:$0xff]  ;;  %v49_v53 = vsel %vm48_vm0, %v24_v48, 0.0  ;;  %v26_v56 = vld [vmem:[%s1551_s0 + $0x50] sm:$0x1] }
  0x10   :  { %1033 = vmatpush3.bf16.msra.mxu0 %v1129_v14  ;;  %v43_v42 = vld [vmem:[%s1551_s0 + $0xd8] sm:$0x1]  ;;  %v74_v46 = vadd.f32 %v73_v43, %v19_v37  ;;  %v40_v50 = vld [vmem:[%s1551_s0 + $0xc0] sm:$0x1]  ;;  %v123_v57 = vrot.slane %v122_v45, 4  ;;  %v50_v59 = vadd.f32 %v49_v53, %v16_v44  ;;  %v60_v0 = vadd.f32 %v59_v51, %v58_v39 }
  0x11   :  { %1055 = vmatpush3.bf16.msra.mxu1 %v1130_v15  ;;  %1034 = vmatprep.subr.bf16.mxu0 %v1131_v16  ;;  %v137_v47 = vsel %vm48_vm0, %v43_v42, 0.0  ;;  %v113_v54 = vsel %vm48_vm0, %v40_v50, 0.0  ;;  %v42_v62 = vld [vmem:[%s1551_s0 + $0xd0] sm:$0x1]  ;;  %v1147_v63 = vld [vmem:[%s1552_s1 + $0x140] sm:$0xff]   ;;  %v65_v2 = vsel %vm48_vm0, %v26_v56, 0.0 }
  0x12   :  { %1056 = vmatprep.subr.bf16.mxu1 %v1132_v17  ;;  %v138_v52 = vadd.f32 %v137_v47, %v35_v41  ;;  %v75_v58 = vrot.slane %v74_v46, 4  ;;  %v114_v60 = vadd.f32 %v113_v54, %v32_v49  ;;  %v129_v3 = vsel %vm48_vm0, %v42_v62, 0.0  ;;  %v1148_v4 = vld [vmem:[%s1552_s1 + $0x1c0] sm:$0xff]  }
  0x13   :  { %v124_v5 = vadd.f32 %v123_v57, %v122_v45  ;;  %v51_v7 = vrot.slane %v50_v59, 4  ;;  %v61_v9 = vrot.slane %v60_v0, 2  ;;  %v66_v11 = vadd.f32 %v65_v2, %v18_v55 }
  0x14   :  { %1035 = vmatpush3.bf16.msra.mxu0 %v1133_v18  ;;  %v139_v1 = vrot.slane %v138_v52, 4  ;;  %v76_v6 = vadd.f32 %v75_v58, %v74_v46  ;;  %v115_v8 = vrot.slane %v114_v60, 4  ;;  %v130_v12 = vadd.f32 %v129_v3, %v34_v61 }
  0x15   :  { %1057 = vmatpush3.bf16.msra.mxu1 %v1134_v19  ;;  %1036 = vmatprep.subr.bf16.mxu0 %v1135_v20  ;;  %v125_v13 = vrot.slane %v124_v5, 2  ;;  %v52_v15 = vadd.f32 %v51_v7, %v50_v59  ;;  %v62_v17 = vadd.f32 %v61_v9, %v60_v0  ;;  %v67_v19 = vrot.slane %v66_v11, 4 }
  0x16   :  { %1058 = vmatprep.subr.bf16.mxu1 %v1136_v21  ;;  %v140_v10 = vadd.f32 %v139_v1, %v138_v52  ;;  %v77_v14 = vrot.slane %v76_v6, 2  ;;  %v116_v16 = vadd.f32 %v115_v8, %v114_v60  ;;  %v131_v20 = vrot.slane %v130_v12, 4 }
  0x17   :  { %v126_v21 = vadd.f32 %v125_v13, %v124_v5  ;;  %v1149_v13 = vld [vmem:[%s1552_s1 + $0x100] sm:$0xff]  }
  0x18   :  { %1037 = vmatpush3.bf16.msra.mxu0 %v1137_v22  ;;  %v141_v18 = vrot.slane %v140_v10, 2  ;;  %v78_v22 = vadd.f32 %v77_v14, %v76_v6 }
  0x19   :  { %1059 = vmatpush3.bf16.msra.mxu1 %v1138_v23  ;;  %1038 = vmatprep.subr.bf16.mxu0 %v1139_v24  ;;  %v53_v23 = vrot.slane %v52_v15, 2  ;;  %v117_v24 = vrot.slane %v116_v16, 2 }
  0x1a   :  { %1060 = vmatprep.subr.bf16.mxu1 %v1140_v25  ;;  %v63_v25 = vrot.slane %v62_v17, 1 }
  0x1b   :  { %v118_v32 = vadd.f32 %v117_v24, %v116_v16  ;;  %v1154_v24 = vld [vmem:[%s1552_s1 + $0x188] sm:$0xff]  }
  0x1c   :  { %1039 = vmatpush3.bf16.msra.mxu0 %v1141_v26  ;;  %v142_v26 = vadd.f32 %v141_v18, %v140_v10  ;;  %v64_v33 = vadd.f32 %v63_v25, %v62_v17  ;;  %v1151_v17 = vld [vmem:[%s1552_s1 + $0x148] sm:$0xff]   ;;  %v1150_v18 = vld [vmem:[%s1552_s1 + $0x180] sm:$0xff]   ;;  %v1156_v25 = vld [vmem:[%s1552_s1 + $0x1d0] sm:$0xff]  }
  0x1d   :  { %1061 = vmatpush3.bf16.msra.mxu1 %v1142_v27  ;;  %1040 = vmatprep.subr.bf16.mxu0 %v1143_v28  ;;  %v68_v27 = vadd.f32 %v67_v19, %v66_v11  ;;  %v132_v28 = vadd.f32 %v131_v20, %v130_v12  ;;  %v119_v40 = vrot.slane %v118_v32, 1  ;;  %v1152_v20 = vld [vmem:[%s1552_s1 + $0x1c8] sm:$0xff]  }
  0x1e   :  { %1062 = vmatprep.subr.bf16.mxu1 %v1144_v29  ;;  %v127_v29 = vrot.slane %v126_v21, 1  ;;  %v143_v34 = vrot.slane %v142_v26, 1  ;;  %v179_v41 = vmul.f32 0.11111111, %v64_v33  ;;  %v1164_v33 = vld [vmem:[%s1552_s1 + $0x1e0] sm:$0xff]  }
  0x1f   :  { %v69_v35 = vrot.slane %v68_v27, 2  ;;  %v133_v36 = vrot.slane %v132_v28, 2  ;;  %v120_v48 = vadd.f32 %v119_v40, %v118_v32  ;;  %v1162_v32 = vld [vmem:[%s1552_s1 + $0x198] sm:$0xff]   ;;  %v29_v40 = vld [vmem:[%s1551_s0 + $0x68] sm:$0x1] }
  0x20   :  { %1041 = vmatpush3.bf16.msra.mxu0 %v1145_v30  ;;  %v79_v30 = vrot.slane %v78_v22, 1  ;;  %v128_v37 = vadd.f32 %v127_v29, %v126_v21  ;;  %v144_v42 = vadd.f32 %v143_v34, %v142_v26  ;;  %v195_v49 = vpack.c.bf16 %v179_v41, %v179_v41  ;;  %v1157_v26 = vld [vmem:[%s1552_s1 + $0x110] sm:$0xff]   ;;  %v1160_v29 = vld [vmem:[%s1552_s1 + $0x1d8] sm:$0xff]   ;;  %v1165_v34 = vld [vmem:[%s1552_s1 + $0x120] sm:$0xff]  }
  0x21   :  { %1063 = vmatpush3.bf16.msra.mxu1 %v1146_v31  ;;  %1070 = vmatprep.subr.bf16.mxu0 %v1147_v63  ;;  %v54_v31 = vadd.f32 %v53_v23, %v52_v15  ;;  %v70_v43 = vadd.f32 %v69_v35, %v68_v27  ;;  %v134_v44 = vadd.f32 %v133_v36, %v132_v28  ;;  %v186_v56 = vmul.f32 0.11111111, %v120_v48  ;;  %v1155_v23 = vld [vmem:[%s1552_s1 + $0x150] sm:$0xff]   ;;  %v1159_v27 = vld [vmem:[%s1552_s1 + $0x158] sm:$0xff]   ;;  %v1166_v35 = vld [vmem:[%s1552_s1 + $0x1a0] sm:$0xff]  }
  0x22   :  { %1092 = vmatprep.subr.bf16.mxu1 %v1148_v4  ;;  %v80_v38 = vadd.f32 %v79_v30, %v78_v22  ;;  %v187_v45 = vmul.f32 0.11111111, %v128_v37  ;;  %v189_v50 = vmul.f32 0.11111111, %v144_v42  ;;  %v362_v57 = vunpack.c.l.b16 %v195_v49  ;;  %v1153_v22 = vld [vmem:[%s1552_s1 + $0x108] sm:$0xff]   ;;  %v1158_v28 = vld [vmem:[%s1552_s1 + $0x190] sm:$0xff]  }
  0x23   :  { %v55_v39 = vrot.slane %v54_v31, 1  ;;  %v71_v51 = vrot.slane %v70_v43, 1  ;;  %v135_v52 = vrot.slane %v134_v44, 1  ;;  %v202_v0 = vpack.c.bf16 %v186_v56, %v186_v56  ;;  %v1161_v30 = vld [vmem:[%s1552_s1 + $0x118] sm:$0xff]   ;;  %v1167_v36 = vld [vmem:[%s1552_s1 + $0x168] sm:$0xff]  }
  0x24   :  { %v181_v46 = vmul.f32 0.11111111, %v80_v38  ;;  %v203_v53 = vpack.c.bf16 %v187_v45, %v187_v45  ;;  %v205_v58 = vpack.c.bf16 %v189_v50, %v189_v50  ;;  %v21_v37 = vld [vmem:[%s1551_s0 + $0x28] sm:$0xff]  ;;  %v23_v45 = vld [vmem:[%s1551_s0 + $0x38] sm:$0xff] }
  0x25   :  { %v56_v47 = vadd.f32 %v55_v39, %v54_v31  ;;  %v72_v59 = vadd.f32 %v71_v51, %v70_v43  ;;  %v136_v60 = vadd.f32 %v135_v52, %v134_v44  ;;  %v369_v6 = vunpack.c.l.b16 %v202_v0  ;;  %v1163_v31 = vld [vmem:[%s1552_s1 + $0x160] sm:$0xff]   ;;  %v1168_v38 = vld [vmem:[%s1552_s1 + $0x1e8] sm:$0xff]   ;;  %v47_v50 = vld [vmem:[%s1551_s0 + $0xf8] sm:$0x1] }
  0x26   :  { %v197_v54 = vpack.c.bf16 %v181_v46, %v181_v46  ;;  %v370_v61 = vunpack.c.l.b16 %v203_v53  ;;  %v372_v1 = vunpack.c.l.b16 %v205_v58  ;;  %v1169_v39 = vld [vmem:[%s1552_s1 + $0x128] sm:$0xff]   ;;  %v89_v43 = vsel %vm48_vm0, %v29_v40, 0.0  ;;  %v31_v46 = vld [vmem:[%s1551_s0 + $0x78] sm:$0x1]  ;;  %v20_v52 = vld [vmem:[%s1551_s0 + $0x20] sm:$0xff] }
  0x27   :  { %v178_v55 = vmul.f32 0.11111111, %v56_v47  ;;  %v180_v2 = vmul.f32 0.11111111, %v72_v59  ;;  %v188_v3 = vmul.f32 0.11111111, %v136_v60  ;;  %v90_v48 = vadd.f32 %v89_v43, %v21_v37 }
  0x28   :  { %v364_v62 = vunpack.c.l.b16 %v197_v54  ;;  %v379_v4 = vsel %vm377_vm1, %v370_v61, %v362_v57  ;;  %v37_v41 = vld [vmem:[%s1551_s0 + $0xa8] sm:$0xff]  ;;  %v39_v47 = vld [vmem:[%s1551_s0 + $0xb8] sm:$0xff]  ;;  %v105_v51 = vsel %vm48_vm0, %v31_v46, 0.0  ;;  %v28_v53 = vld [vmem:[%s1551_s0 + $0x60] sm:$0x1]  ;;  %v169_v57 = vsel %vm48_vm0, %v47_v50, 0.0 }
  0x29   :  { %v194_v63 = vpack.c.bf16 %v178_v55, %v178_v55  ;;  %v387_v7 = vpack.c.b16 %v379_v4, %v379_v4  ;;  %v196_v9 = vpack.c.bf16 %v180_v2, %v180_v2  ;;  %v204_v10 = vpack.c.bf16 %v188_v3, %v188_v3  ;;  %v45_v42 = vld [vmem:[%s1551_s0 + $0xe8] sm:$0x1]  ;;  %v1171_v55 = vld [vmem:[%s1552_s1 + $0x170] sm:$0xff]   ;;  %v44_v58 = vld [vmem:[%s1551_s0 + $0xe0] sm:$0x1] }
  0x2a   :  { %v381_v8 = vsel %vm377_vm1, %v372_v1, %v364_v62  ;;  %v153_v44 = vsel %vm48_vm0, %v45_v42, 0.0  ;;  %v1170_v54 = vld [vmem:[%s1552_s1 + $0x1a8] sm:$0xff]   ;;  %v106_v56 = vadd.f32 %v105_v51, %v23_v45  ;;  %v81_v59 = vsel %vm48_vm0, %v28_v53, 0.0  ;;  %v22_v1 = vld [vmem:[%s1551_s0 + $0x30] sm:$0xff] }
  0x2b   :  { %v361_v5 = vunpack.c.l.b16 %v194_v63  ;;  %v389_v11 = vpack.c.b16 %v381_v8, %v381_v8  ;;  %818 = vmatprep.mubr.bf16.mxu0 %v387_v7  ;;  %v363_v15 = vunpack.c.l.b16 %v196_v9  ;;  %v371_v16 = vunpack.c.l.b16 %v204_v10  ;;  %v36_v63 = vld [vmem:[%s1551_s0 + $0xa0] sm:$0xff]  ;;  %v30_v2 = vld [vmem:[%s1551_s0 + $0x70] sm:$0x1] }
  0x2c   :  { %v154_v49 = vadd.f32 %v153_v44, %v37_v41  ;;  %v91_v60 = vrot.slane %v90_v48, 4  ;;  %v170_v62 = vadd.f32 %v169_v57, %v39_v47  ;;  %v82_v0 = vadd.f32 %v81_v59, %v20_v52  ;;  %v1172_v3 = vld [vmem:[%s1552_s1 + $0x1f0] sm:$0xff]  }
  0x2d   :  { %v378_v12 = vsel %vm377_vm1, %v369_v6, %v361_v5  ;;  %858 = vmatprep.mubr.bf16.mxu1 %v389_v11  ;;  %v380_v19 = vsel %vm377_vm1, %v371_v16, %v363_v15  ;;  %v107_v4 = vrot.slane %v106_v56, 4  ;;  %v145_v5 = vsel %vm48_vm0, %v44_v58, 0.0  ;;  %v46_v6 = vld [vmem:[%s1551_s0 + $0xf0] sm:$0x1] }
  0x2e   :  { %v386_v14 = vpack.c.b16 %v378_v12, %v378_v12  ;;  %v388_v21 = vpack.c.b16 %v380_v19, %v380_v19  ;;  %v155_v61 = vrot.slane %v154_v49, 4  ;;  %v97_v7 = vsel %vm48_vm0, %v30_v2, 0.0  ;;  %v1173_v8 = vld [vmem:[%s1552_s1 + $0x130] sm:$0xff]  }
  0x2f   :  { %v92_v9 = vadd.f32 %v91_v60, %v90_v48  ;;  %v171_v11 = vrot.slane %v170_v62, 4  ;;  %v83_v12 = vrot.slane %v82_v0, 4 }
  0x30   :  { %819 = vmatmul.mubr.bf16.vlgmr.msra.gmra.mrb[0].mxu0 %v386_v14  ;;  %859 = vmatmul.mubr.bf16.vlgmr.msra.gmra.mrb[0].mxu1 %v388_v21  ;;  %v156_v10 = vadd.f32 %v155_v61, %v154_v49 }
  0x31   :  { %1071 = vmatpush3.bf16.msra.mxu0 %v1149_v13  ;;  %1093 = vmatpush3.bf16.msra.mxu1 %v1150_v18  ;;  %v38_v13 = vld [vmem:[%s1551_s0 + $0xb0] sm:$0xff] }
  0x32   :  { %1072 = vmatprep.subr.bf16.mxu0 %v1151_v17  ;;  %1094 = vmatprep.subr.bf16.mxu1 %v1152_v20 }
  0x35   :  { %1073 = vmatpush3.bf16.msra.mxu0 %v1153_v22  ;;  %1095 = vmatpush3.bf16.msra.mxu1 %v1154_v24 }
  0x36   :  { %1074 = vmatprep.subr.bf16.mxu0 %v1155_v23  ;;  %1096 = vmatprep.subr.bf16.mxu1 %v1156_v25 }
  0x39   :  { %1075 = vmatpush3.bf16.msra.mxu0 %v1157_v26  ;;  %1097 = vmatpush3.bf16.msra.mxu1 %v1158_v28 }
  0x3a   :  { %1076 = vmatprep.subr.bf16.mxu0 %v1159_v27  ;;  %1098 = vmatprep.subr.bf16.mxu1 %v1160_v29 }
  0x3d   :  { %1077 = vmatpush3.bf16.msra.mxu0 %v1161_v30  ;;  %1099 = vmatpush3.bf16.msra.mxu1 %v1162_v32 }
  0x3e   :  { %1078 = vmatprep.subr.bf16.mxu0 %v1163_v31  ;;  %1100 = vmatprep.subr.bf16.mxu1 %v1164_v33 }
  0x41   :  { %1079 = vmatpush3.bf16.msra.mxu0 %v1165_v34  ;;  %1101 = vmatpush3.bf16.msra.mxu1 %v1166_v35 }
  0x42   :  { %1080 = vmatprep.subr.bf16.mxu0 %v1167_v36  ;;  %1102 = vmatprep.subr.bf16.mxu1 %v1168_v38 }
  0x45   :  { %1081 = vmatpush3.bf16.msra.mxu0 %v1169_v39 }
  0x46   :  { %8 = vsyncpa [#allocation3], 0  ;;  %1082 = vmatprep.subr.bf16.mxu0 %v1171_v55  ;;  %v1175_v14 = vld [vmem:[%s1552_s1 + $0x178] sm:$0xff]   ;;  %v108_v15 = vadd.f32 %v107_v4, %v106_v56  ;;  %v146_v16 = vadd.f32 %v145_v5, %v36_v63  ;;  %v98_v17 = vadd.f32 %v97_v7, %v22_v1  ;;  %v161_v18 = vsel %vm48_vm0, %v46_v6, 0.0  ;;  %1103 = vmatpush3.bf16.msra.mxu1 %v1170_v54  ;;  %v1174_v23 = vld [vmem:[%s1552_s1 + $0x1b0] sm:$0xff]   ;;  %s1203_s15 = smov [#allocation2]  }
  0x47   :  { %v93_v19 = vrot.slane %v92_v9, 2  ;;  %v157_v20 = vrot.slane %v156_v10, 2  ;;  %v172_v21 = vadd.f32 %v171_v11, %v170_v62  ;;  %v84_v22 = vadd.f32 %v83_v12, %v82_v0  ;;  %1104 = vmatprep.subr.bf16.mxu1 %v1172_v3  ;;  %v1176_v28 = vld [vmem:[%s1552_s1 + $0x1f8] sm:$0xff]  }
  0x48   :  { %v109_v24 = vrot.slane %v108_v15, 2  ;;  %v147_v25 = vrot.slane %v146_v16, 4  ;;  %v99_v26 = vrot.slane %v98_v17, 4  ;;  %v162_v27 = vadd.f32 %v161_v18, %v38_v13  ;;  %v1177_v29 = vld [vmem:[%s1552_s1 + $0x138] sm:$0xff]  }
  0x49   :  { %1083 = vmatpush3.bf16.msra.mxu0 %v1173_v8  ;;  %v94_v30 = vadd.f32 %v93_v19, %v92_v9  ;;  %v158_v31 = vadd.f32 %v157_v20, %v156_v10  ;;  %v173_v32 = vrot.slane %v172_v21, 2  ;;  %v85_v33 = vrot.slane %v84_v22, 2  ;;  %v1178_v42 = vld [vmem:[%s1552_s1 + $0x1b8] sm:$0xff]  }
  0x4a   :  { %1084 = vmatprep.subr.bf16.mxu0 %v1175_v14  ;;  %v110_v34 = vadd.f32 %v109_v24, %v108_v15  ;;  %v148_v35 = vadd.f32 %v147_v25, %v146_v16  ;;  %v100_v36 = vadd.f32 %v99_v26, %v98_v17  ;;  %v163_v37 = vrot.slane %v162_v27, 4  ;;  %1105 = vmatpush3.bf16.msra.mxu1 %v1174_v23 }
  0x4b   :  { %v95_v38 = vrot.slane %v94_v30, 1  ;;  %v159_v39 = vrot.slane %v158_v31, 1  ;;  %v174_v40 = vadd.f32 %v173_v32, %v172_v21  ;;  %v86_v41 = vadd.f32 %v85_v33, %v84_v22  ;;  %1106 = vmatprep.subr.bf16.mxu1 %v1176_v28  ;;  %v961_v33 = vld [vmem:[%s1553_s2] ss:$0 sm:$0xff]  ;;  %s953_s2 = sshll.u32 %s1203_s15, 4  ;;  %s954_s2 = int_to_ptr.vmem [resolvable:$true] %s953_s2 }
  0x4c   :  { %v111_v43 = vrot.slane %v110_v34, 1  ;;  %v149_v44 = vrot.slane %v148_v35, 2  ;;  %v101_v45 = vrot.slane %v100_v36, 2  ;;  %v164_v46 = vadd.f32 %v163_v37, %v162_v27  ;;  %s1179_s16 = scalar_lea.vmem %s954_s2, 32  ;;  %p1184_p1 = scmp.lt.s32.totalorder %s954_s2, %s954_s2 }
  0x4d   :  { %1085 = vmatpush3.bf16.msra.mxu0 %v1177_v29  ;;  %v96_v47 = vadd.f32 %v95_v38, %v94_v30  ;;  %v160_v48 = vadd.f32 %v159_v39, %v158_v31  ;;  %v175_v49 = vrot.slane %v174_v40, 1  ;;  %v87_v50 = vrot.slane %v86_v41, 1  ;;  %p1180_p0 = scmp.ne.s32.totalorder %s954_s2, %s1179_s16  ;;  %p1185_p2 = scmp.lt.s32.totalorder %s1179_s16, %s1179_s16 }
  0x4e   :  { %v112_v51 = vadd.f32 %v111_v43, %v110_v34  ;;  %v150_v52 = vadd.f32 %v149_v44, %v148_v35  ;;  %v102_v53 = vadd.f32 %v101_v45, %v100_v36  ;;  %v165_v54 = vrot.slane %v164_v46, 2  ;;  %1107 = vmatpush3.bf16.msra.mxu1 %v1178_v42 }
  0x4f   :  { %v183_v55 = vmul.f32 0.11111111, %v96_v47  ;;  %v191_v56 = vmul.f32 0.11111111, %v160_v48  ;;  %v176_v57 = vadd.f32 %v175_v49, %v174_v40  ;;  %v88_v58 = vadd.f32 %v87_v50, %v86_v41  ;;  %p1186_p3 = por %p1185_p2, %p1184_p1 }
  0x50   :  { %v185_v59 = vmul.f32 0.11111111, %v112_v51  ;;  %v151_v60 = vrot.slane %v150_v52, 1  ;;  %v103_v61 = vrot.slane %v102_v53, 1  ;;  %v166_v62 = vadd.f32 %v165_v54, %v164_v46 }
  0x51   :  { %v199_v63 = vpack.c.bf16 %v183_v55, %v183_v55  ;;  %v207_v0 = vpack.c.bf16 %v191_v56, %v191_v56  ;;  %v193_v1 = vmul.f32 0.11111111, %v176_v57  ;;  %v182_v2 = vmul.f32 0.11111111, %v88_v58  ;;  %p1187_p4 = pnand %p1186_p3, %p1180_p0 }
  0x52   :  { %v201_v3 = vpack.c.bf16 %v185_v59, %v185_v59  ;;  %v152_v4 = vadd.f32 %v151_v60, %v150_v52  ;;  %v104_v5 = vadd.f32 %v103_v61, %v102_v53  ;;  %v167_v6 = vrot.slane %v166_v62, 1 }
  0x53   :  { %v366_v7 = vunpack.c.l.b16 %v199_v63  ;;  %v374_v8 = vunpack.c.l.b16 %v207_v0  ;;  %v209_v9 = vpack.c.bf16 %v193_v1, %v193_v1  ;;  %v198_v10 = vpack.c.bf16 %v182_v2, %v182_v2 }
  0x54   :  { %v368_v11 = vunpack.c.l.b16 %v201_v3  ;;  %v190_v12 = vmul.f32 0.11111111, %v152_v4  ;;  %v168_v13 = vadd.f32 %v167_v6, %v166_v62  ;;  %v184_v14 = vmul.f32 0.11111111, %v104_v5 }
  0x55   :  { %v383_v15 = vsel %vm377_vm1, %v374_v8, %v366_v7  ;;  %v376_v16 = vunpack.c.l.b16 %v209_v9  ;;  %v365_v17 = vunpack.c.l.b16 %v198_v10 }
  0x56   :  { %v391_v18 = vpack.c.b16 %v383_v15, %v383_v15  ;;  %v206_v19 = vpack.c.bf16 %v190_v12, %v190_v12  ;;  %v192_v20 = vmul.f32 0.11111111, %v168_v13  ;;  %v200_v21 = vpack.c.bf16 %v184_v14, %v184_v14 }
  0x57   :  { %v385_v22 = vsel %vm377_vm1, %v376_v16, %v368_v11 }
  0x58   :  { %898 = vmatprep.mubr.bf16.mxu0 %v391_v18  ;;  %v393_v23 = vpack.c.b16 %v385_v22, %v385_v22  ;;  %v373_v24 = vunpack.c.l.b16 %v206_v19  ;;  %v208_v25 = vpack.c.bf16 %v192_v20, %v192_v20  ;;  %v367_v26 = vunpack.c.l.b16 %v200_v21 }
  0x5a   :  { %938 = vmatprep.mubr.bf16.mxu1 %v393_v23  ;;  %v382_v27 = vsel %vm377_vm1, %v373_v24, %v365_v17  ;;  %v375_v28 = vunpack.c.l.b16 %v208_v25 }
  0x5b   :  { %v390_v29 = vpack.c.b16 %v382_v27, %v382_v27 }
  0x5c   :  { %v384_v30 = vsel %vm377_vm1, %v375_v28, %v367_v26 }
  0x5d   :  { %899 = vmatmul.mubr.bf16.vlgmr.msra.gmra.mrb[4].mxu0 %v390_v29  ;;  %v392_v31 = vpack.c.b16 %v384_v30, %v384_v30 }
  0x5f   :  { %939 = vmatmul.mubr.bf16.vlgmr.msra.gmra.mrb[4].mxu1 %v392_v31 }
 0x103   :  { %v1042_v32 = vpop.f32.mrb[0].mxu0  ;;  %v1064_v37 = vpop.f32.mrb[0].mxu1 }
 0x104   :  { %v1043_v34 = vpop.f32.mrb[1].mxu0  ;;  %v1065_v40 = vpop.f32.mrb[1].mxu1 }
 0x105   :  { %v1044_v35 = vadd.f32 %v1043_v34, %v1042_v32  ;;  %v1045_v36 = vpop.f32.mrb[2].mxu0  ;;  %v1066_v41 = vadd.f32 %v1065_v40, %v1064_v37  ;;  %v1067_v42 = vpop.f32.mrb[2].mxu1 }
 0x106   :  { %v1046_v38 = vpop.f32.mrb[3].mxu0  ;;  %v1068_v43 = vpop.f32.mrb[3].mxu1 }
 0x107   :  { %v821_v39 = vadd.f32 %v1044_v35, %v961_v33 }
 0x109   :  { %v861_v44 = vadd.f32 %v1066_v41, %v821_v39 }
 0x130   :  { %v1086_v45 = vpop.f32.mrb[4].mxu0 }
 0x131   :  { %v1087_v46 = vpop.f32.mrb[5].mxu0 }
 0x132   :  { %v1108_v47 = vpop.f32.mrb[4].mxu1  ;;  %v1088_v48 = vadd.f32 %v1087_v46, %v1086_v45  ;;  %v1089_v49 = vpop.f32.mrb[6].mxu0 }
 0x133   :  { %v1109_v50 = vpop.f32.mrb[5].mxu1  ;;  %v1090_v51 = vpop.f32.mrb[7].mxu0 }
 0x134   :  { %v901_v52 = vadd.f32 %v1088_v48, %v861_v44  ;;  %v1110_v53 = vadd.f32 %v1109_v50, %v1108_v47  ;;  %v1111_v54 = vpop.f32.mrb[6].mxu1 }
 0x135   :  { %v1112_v55 = vpop.f32.mrb[7].mxu1 }
 0x136   :  { %v941_v56 = vadd.f32 %v1110_v53, %v901_v52 }
 0x138   :  { %946 = vst [vmem:[#allocation2] sm:$0x3] %v941_v56 }
 0x139   :  { %1190 = shalt.err (!%p1187_p4)
}
 0x13a   :  { %s1191_s19 = scalar_lea.hbm %s1554_s3, 32 }
 0x13b   :  { %p1192_p5 = scmp.ne.s32.totalorder %s1554_s3, %s1191_s19  ;;  %p1195_p6 = scmp.lt.u32.totalorder %s1191_s19, %s1554_s3 }
 0x13d   :  { %p1197_p7 = pnand %p1195_p6, %p1192_p5 }
 0x13f   :  { %1200 = shalt.err (!%p1197_p7)
}
 0x140   :  { %956 = dma.vmem_to_hbm [thread:$0]  %s954_s2, 32, %s1554_s3, [#allocation3]  }
 0x141   :  { %1201 = dma.done.wait [#allocation3], 32  }
 0x142   :  { %1202 = vsyncadd [#allocation3], 4294967264 }
 0x143   :  { %960 = vsyncpa [#allocation3], 1 }

</bundles_post_ra>
